<compile_context>
chip_gen: v7x
topology: tpu7x:2x2x1
jax: 0.10.0
libtpu: 0.0.40
codegen_flags: <defaults>
</compile_context>

<pallas_src>
import functools

import numpy as np

import jax
import jax.numpy as jnp
from jax import lax
from jax.experimental import pallas as pl
from jax.experimental.pallas import tpu as pltpu

BN_EPS = 1e-5
LEAKY_SLOPE = 0.2
KSIZE = 4                      # all convs are 4x4
KK = KSIZE * KSIZE             # 16 kernel positions


def _leaky(y):
    return jnp.maximum(y, LEAKY_SLOPE * y)


def _batchnorm(y, gamma, beta):
    # Training-mode BatchNorm: batch statistics, biased variance, all in f32.
    mu = jnp.mean(y, axis=0, keepdims=True)
    var = jnp.mean(jnp.square(y - mu), axis=0, keepdims=True)
    return (y - mu) * (lax.rsqrt(var + BN_EPS) * gamma) + beta


def _gathered_conv(x_bf16, g_ref, w_ref):
    """In-kernel convolution on a row-major activation matrix.

    x_bf16 : (M_in, C_in) activations, rows ordered (n, h, w).
    g_ref  : (KK*M_out, M_in) static 0/1 gather matrix, rows ordered
             (kernel position, n, oh, ow); all-zero rows encode zero padding.
    w_ref  : (KK, C_in, C_out) weights.
    Returns the (M_out, C_out) f32 pre-activation (no bias).
    """
    m_out = g_ref.shape[0] // KK
    cout = w_ref.shape[2]
    # One MXU matmul materializes all 16 receptive-field row blocks.
    q = jnp.dot(g_ref[...], x_bf16,
                preferred_element_type=jnp.float32).astype(jnp.bfloat16)
    y = jnp.zeros((m_out, cout), jnp.float32)
    for pos in range(KK):              # static unroll: 16 tiny MXU matmuls
        y = y + jnp.dot(q[pos * m_out:(pos + 1) * m_out, :], w_ref[pos],
                        preferred_element_type=jnp.float32)
    return y


def _disc_fused_kernel(p1_ref, w1_ref, b1_ref,
                       g2_ref, w2_ref, b2_ref, gm2_ref, bt2_ref,
                       g3_ref, w3_ref, b3_ref, gm3_ref, bt3_ref,
                       g4_ref, w4_ref, b4_ref, o_ref):
    bf16 = jnp.bfloat16

    # layer 1: conv1_1 (pre-built im2col patches) + bias + leaky ReLU
    y1 = jnp.dot(p1_ref[...], w1_ref[...], preferred_element_type=jnp.float32)
    x1 = _leaky(y1 + b1_ref[...]).astype(bf16)                  # (M1, C1)

    # layer 2: conv2 + BatchNorm + leaky ReLU (single pass, exact batch stats)
    y2 = _gathered_conv(x1, g2_ref, w2_ref) + b2_ref[...]
    x2 = _leaky(_batchnorm(y2, gm2_ref[...], bt2_ref[...])).astype(bf16)

    # layer 3: conv3 + BatchNorm + leaky ReLU
    y3 = _gathered_conv(x2, g3_ref, w3_ref) + b3_ref[...]
    x3 = _leaky(_batchnorm(y3, gm3_ref[...], bt3_ref[...])).astype(bf16)

    # layer 4: conv4 + exact sigmoid
    y4 = _gathered_conv(x3, g4_ref, w4_ref) + b4_ref[...]
    o_ref[...] = 1.0 / (1.0 + jnp.exp(-y4))


# ---------------------------------------------------------------------------
# Wrapper glue (trace-time only)
# ---------------------------------------------------------------------------
def _conv_gather_matrix(n, h, w, oh, ow, stride, pad):
    """Static 0/1 matrix G with
         G[pos*M_out + r_out, r_in] = 1
       iff output pixel r_out (rows ordered (batch, oh, ow)) reads input pixel
       r_in (columns ordered (batch, h, w)) at kernel position pos = ki*4+kj.
       Rows that fall into the spatial zero-padding stay all-zero."""
    m_in, m_out = n * h * w, n * oh * ow
    g = np.zeros((KK * m_out, m_in), dtype=np.float32)
    for ki in range(KSIZE):
        for kj in range(KSIZE):
            pos = ki * KSIZE + kj
            for b in range(n):
                for i in range(oh):
                    ih = i * stride + ki - pad
                    if ih < 0 or ih >= h:
                        continue
                    for j in range(ow):
                        iw = j * stride + kj - pad
                        if iw < 0 or iw >= w:
                            continue
                        g[pos * m_out + (b * oh + i) * ow + j,
                          (b * h + ih) * w + iw] = 1.0
    return g


def discriminator_forward(x_nchw, params):
    w1, b1 = params["conv1_1_w"], params["conv1_1_b"]
    w2, b2 = params["conv2_w"], params["conv2_b"]
    w3, b3 = params["conv3_w"], params["conv3_b"]
    w4, b4 = params["conv4_w"], params["conv4_b"]
    gm2, bt2 = params["conv2_bn_g"], params["conv2_bn_b"]
    gm3, bt3 = params["conv3_bn_g"], params["conv3_bn_b"]

    N, Cin, H, W = x_nchw.shape
    C1, C2, C3 = w1.shape[0], w2.shape[0], w3.shape[0]

    def out_hw(h, w, stride, pad):
        return ((h + 2 * pad - KSIZE) // stride + 1,
                (w + 2 * pad - KSIZE) // stride + 1)

    OH1, OW1 = out_hw(H, W, 2, 1)
    OH2, OW2 = out_hw(OH1, OW1, 2, 1)
    OH3, OW3 = out_hw(OH2, OW2, 2, 1)
    OH4, OW4 = out_hw(OH3, OW3, 1, 0)
    assert OH4 >= 1 and OW4 >= 1, "input too small for conv4 (needs >=4x4 map)"
    m1, m2, m3, m4 = N * OH1 * OW1, N * OH2 * OW2, N * OH3 * OW3, N * OH4 * OW4

    # Layer-1 im2col: ONE XLA op on the bf16-cast NHWC input.  Patch channels
    # are input-channel-major, i.e. ordered (cin, ki, kj).
    x = jnp.transpose(x_nchw, (0, 2, 3, 1)).astype(jnp.bfloat16)
    p1 = lax.conv_general_dilated_patches(
        x, filter_shape=(KSIZE, KSIZE), window_strides=(2, 2),
        padding=((1, 1), (1, 1)),
        dimension_numbers=("NHWC", "HWIO", "NHWC"))
    p1 = p1.reshape(m1, Cin * KK).astype(jnp.bfloat16)

    # Flattened weights.  w1m rows are (cin, ki, kj) to match p1; w2m/w3m/w4m
    # are (pos, cin, cout) to match the kernel's per-position indexing.
    w1m = jnp.transpose(w1, (1, 2, 3, 0)).reshape(Cin * KK, C1).astype(jnp.bfloat16)
    w2m = jnp.transpose(w2, (2, 3, 1, 0)).reshape(KK, C1, C2).astype(jnp.bfloat16)
    w3m = jnp.transpose(w3, (2, 3, 1, 0)).reshape(KK, C2, C3).astype(jnp.bfloat16)
    w4m = jnp.transpose(w4, (2, 3, 1, 0)).reshape(KK, C3, 1).astype(jnp.bfloat16)

    row = lambda v: jnp.asarray(v, jnp.float32).reshape(1, -1)
    b1m, b2m, b3m, b4m = row(b1), row(b2), row(b3), row(b4)
    gm2m, bt2m, gm3m, bt3m = row(gm2), row(bt2), row(gm3), row(bt3)

    # Static receptive-field gather matrices (trace-time numpy constants).
    g2 = jnp.asarray(_conv_gather_matrix(N, OH1, OW1, OH2, OW2, 2, 1), jnp.bfloat16)
    g3 = jnp.asarray(_conv_gather_matrix(N, OH2, OW2, OH3, OW3, 2, 1), jnp.bfloat16)
    g4 = jnp.asarray(_conv_gather_matrix(N, OH3, OW3, OH4, OW4, 1, 0), jnp.bfloat16)

    args = (p1, w1m, b1m, g2, w2m, b2m, gm2m, bt2m,
            g3, w3m, b3m, gm3m, bt3m, g4, w4m, b4m)

    def conv_flops(m_in, m_out, cin, cout):
        return 2 * KK * m_out * (m_in * cin + cin * cout)  # gather + weight mm

    flops = (2 * m1 * Cin * KK * C1
             + conv_flops(m1, m2, C1, C2)
             + conv_flops(m2, m3, C2, C3)
             + conv_flops(m3, m4, C3, 1))
    bytes_accessed = (sum(int(np.prod(a.shape)) * a.dtype.itemsize for a in args)
                      + m4 * 4)

    out = pl.pallas_call(
        _disc_fused_kernel,
        out_shape=jax.ShapeDtypeStruct((m4, 1), jnp.float32),
        compiler_params=pltpu.CompilerParams(
            vmem_limit_bytes=32 * 1024 * 1024),
        cost_estimate=pl.CostEstimate(
            flops=int(flops),
            transcendentals=int(m4 + C2 + C3),
            bytes_accessed=int(bytes_accessed)),
    )(*args)

    # (N*OH4*OW4, 1) rows ordered (n, oh, ow) -> NCHW
    return jnp.transpose(out.reshape(N, OH4, OW4, 1), (0, 3, 1, 2))


# ---------------------------------------------------------------------------
# Deterministic parameter init (mimics weight_init(mean=0, std=0.02); BN keeps
# default gamma=1, beta=0 as in the PyTorch module)
# ---------------------------------------------------------------------------
def init_params(key, d=16, channels=1):
    conv_shapes = {
        "conv1_1": (d // 2, channels, 4, 4),
        "conv2":   (d * 2, d // 2, 4, 4),
        "conv3":   (d * 4, d * 2, 4, 4),
        "conv4":   (1, d * 4, 4, 4),
    }
    params = {}
    for i, (name, shp) in enumerate(sorted(conv_shapes.items())):
        k = jax.random.fold_in(key, i)
        params[name + "_w"] = 0.02 * jax.random.normal(k, shp, dtype=jnp.float32)
        params[name + "_b"] = jnp.zeros((shp[0],), dtype=jnp.float32)
    params["conv2_bn_g"] = jnp.ones((d * 2,), jnp.float32)
    params["conv2_bn_b"] = jnp.zeros((d * 2,), jnp.float32)
    params["conv3_bn_g"] = jnp.ones((d * 4,), jnp.float32)
    params["conv3_bn_b"] = jnp.zeros((d * 4,), jnp.float32)
    return params


if __name__ == "__main__":
    key = jax.random.PRNGKey(0)
    d, channels, batch, hw = 16, 1, 2, 32      # 32x32 input -> 4x4 map at conv4

    params = init_params(jax.random.fold_in(key, 100), d=d, channels=channels)
    x = jax.random.normal(jax.random.fold_in(key, 200),
                          (batch, channels, hw, hw), dtype=jnp.float32)

    fwd = jax.jit(functools.partial(discriminator_forward, params=params))
    out = jax.block_until_ready(fwd(x))

    assert out.shape == (batch, 1, 1, 1), out.shape
    assert bool(jnp.all(jnp.isfinite(out)))
    assert bool(jnp.all((out >= 0.0) & (out <= 1.0)))
    print("KERNEL_OK")
</pallas_src>

<mosaic_0001>
module attributes {stable_mosaic.version = 11 : i64} {
  func.func @_disc_fused_kernel(%arg0: memref<512x16xbf16, #tpu.memory_space<vmem>>, %arg1: memref<16x8xbf16, #tpu.memory_space<vmem>>, %arg2: memref<1x8xf32, #tpu.memory_space<vmem>>, %arg3: memref<2048x512xbf16, #tpu.memory_space<vmem>>, %arg4: memref<16x8x32xbf16, #tpu.memory_space<vmem>>, %arg5: memref<1x32xf32, #tpu.memory_space<vmem>>, %arg6: memref<1x32xf32, #tpu.memory_space<vmem>>, %arg7: memref<1x32xf32, #tpu.memory_space<vmem>>, %arg8: memref<512x128xbf16, #tpu.memory_space<vmem>>, %arg9: memref<16x32x64xbf16, #tpu.memory_space<vmem>>, %arg10: memref<1x64xf32, #tpu.memory_space<vmem>>, %arg11: memref<1x64xf32, #tpu.memory_space<vmem>>, %arg12: memref<1x64xf32, #tpu.memory_space<vmem>>, %arg13: memref<32x32xbf16, #tpu.memory_space<vmem>>, %arg14: memref<16x64x1xbf16, #tpu.memory_space<vmem>>, %arg15: memref<1x1xf32, #tpu.memory_space<vmem>>, %arg16: memref<2x1xf32, #tpu.memory_space<vmem>>) attributes {dimension_semantics = [], scalar_prefetch = 0 : i64, scratch_operands = 0 : i64, tpu.core_type = #tpu.core_type<tc>} {
    %c0 = arith.constant 0 : index
    %c0_0 = arith.constant 0 : index
    %0 = vector.load %arg0[%c0, %c0_0] : memref<512x16xbf16, #tpu.memory_space<vmem>>, vector<512x16xbf16>
    %c0_1 = arith.constant 0 : index
    %c0_2 = arith.constant 0 : index
    %1 = vector.load %arg1[%c0_1, %c0_2] : memref<16x8xbf16, #tpu.memory_space<vmem>>, vector<16x8xbf16>
    %cst = arith.constant dense<0.000000e+00> : vector<512x8xf32>
    %2 = tpu.matmul %0, %1, %cst {dimension_numbers = #tpu.dot_dimension_numbers<[1], [0], [0], [1], [0, 0, 1, 1], [], []>} : vector<512x16xbf16>, vector<16x8xbf16>, vector<512x8xf32> -> vector<512x8xf32>
    %c0_3 = arith.constant 0 : index
    %c0_4 = arith.constant 0 : index
    %3 = vector.load %arg2[%c0_3, %c0_4] : memref<1x8xf32, #tpu.memory_space<vmem>>, vector<1x8xf32>
    %4 = vector.broadcast %3 : vector<1x8xf32> to vector<512x8xf32>
    %5 = arith.addf %2, %4 : vector<512x8xf32>
    %cst_5 = arith.constant 2.000000e-01 : f32
    %6 = vector.broadcast %cst_5 : f32 to vector<512x8xf32>
    %7 = arith.mulf %6, %5 : vector<512x8xf32>
    %8 = arith.maximumf %5, %7 : vector<512x8xf32>
    %9 = arith.truncf %8 : vector<512x8xf32> to vector<512x8xbf16>
    %c0_6 = arith.constant 0 : index
    %c0_7 = arith.constant 0 : index
    %10 = vector.load %arg3[%c0_6, %c0_7] : memref<2048x512xbf16, #tpu.memory_space<vmem>>, vector<2048x512xbf16>
    %cst_8 = arith.constant dense<0.000000e+00> : vector<2048x8xf32>
    %11 = tpu.matmul %10, %9, %cst_8 {dimension_numbers = #tpu.dot_dimension_numbers<[1], [0], [0], [1], [0, 0, 1, 1], [], []>} : vector<2048x512xbf16>, vector<512x8xbf16>, vector<2048x8xf32> -> vector<2048x8xf32>
    %12 = arith.truncf %11 : vector<2048x8xf32> to vector<2048x8xbf16>
    %cst_9 = arith.constant 0.000000e+00 : f32
    %13 = vector.broadcast %cst_9 : f32 to vector<128x32xf32>
    %14 = vector.extract_strided_slice %12 {offsets = [0, 0], sizes = [128, 8], strides = [1, 1]} : vector<2048x8xbf16> to vector<128x8xbf16>
    %c0_10 = arith.constant 0 : index
    %c0_11 = arith.constant 0 : index
    %c0_12 = arith.constant 0 : index
    %15 = vector.load %arg4[%c0_10, %c0_11, %c0_12] : memref<16x8x32xbf16, #tpu.memory_space<vmem>>, vector<1x8x32xbf16>
    %16 = vector.shape_cast %15 : vector<1x8x32xbf16> to vector<8x32xbf16>
    %cst_13 = arith.constant dense<0.000000e+00> : vector<128x32xf32>
    %17 = tpu.matmul %14, %16, %cst_13 {dimension_numbers = #tpu.dot_dimension_numbers<[1], [0], [0], [1], [0, 0, 1, 1], [], []>} : vector<128x8xbf16>, vector<8x32xbf16>, vector<128x32xf32> -> vector<128x32xf32>
    %18 = arith.addf %13, %17 : vector<128x32xf32>
    %19 = vector.extract_strided_slice %12 {offsets = [128, 0], sizes = [128, 8], strides = [1, 1]} : vector<2048x8xbf16> to vector<128x8xbf16>
    %c1 = arith.constant 1 : index
    %c0_14 = arith.constant 0 : index
    %c0_15 = arith.constant 0 : index
    %20 = vector.load %arg4[%c1, %c0_14, %c0_15] : memref<16x8x32xbf16, #tpu.memory_space<vmem>>, vector<1x8x32xbf16>
    %21 = vector.shape_cast %20 : vector<1x8x32xbf16> to vector<8x32xbf16>
    %cst_16 = arith.constant dense<0.000000e+00> : vector<128x32xf32>
    %22 = tpu.matmul %19, %21, %cst_16 {dimension_numbers = #tpu.dot_dimension_numbers<[1], [0], [0], [1], [0, 0, 1, 1], [], []>} : vector<128x8xbf16>, vector<8x32xbf16>, vector<128x32xf32> -> vector<128x32xf32>
    %23 = arith.addf %18, %22 : vector<128x32xf32>
    %24 = vector.extract_strided_slice %12 {offsets = [256, 0], sizes = [128, 8], strides = [1, 1]} : vector<2048x8xbf16> to vector<128x8xbf16>
    %c2 = arith.constant 2 : index
    %c0_17 = arith.constant 0 : index
    %c0_18 = arith.constant 0 : index
    %25 = vector.load %arg4[%c2, %c0_17, %c0_18] : memref<16x8x32xbf16, #tpu.memory_space<vmem>>, vector<1x8x32xbf16>
    %26 = vector.shape_cast %25 : vector<1x8x32xbf16> to vector<8x32xbf16>
    %cst_19 = arith.constant dense<0.000000e+00> : vector<128x32xf32>
    %27 = tpu.matmul %24, %26, %cst_19 {dimension_numbers = #tpu.dot_dimension_numbers<[1], [0], [0], [1], [0, 0, 1, 1], [], []>} : vector<128x8xbf16>, vector<8x32xbf16>, vector<128x32xf32> -> vector<128x32xf32>
    %28 = arith.addf %23, %27 : vector<128x32xf32>
    %29 = vector.extract_strided_slice %12 {offsets = [384, 0], sizes = [128, 8], strides = [1, 1]} : vector<2048x8xbf16> to vector<128x8xbf16>
    %c3 = arith.constant 3 : index
    %c0_20 = arith.constant 0 : index
    %c0_21 = arith.constant 0 : index
    %30 = vector.load %arg4[%c3, %c0_20, %c0_21] : memref<16x8x32xbf16, #tpu.memory_space<vmem>>, vector<1x8x32xbf16>
    %31 = vector.shape_cast %30 : vector<1x8x32xbf16> to vector<8x32xbf16>
    %cst_22 = arith.constant dense<0.000000e+00> : vector<128x32xf32>
    %32 = tpu.matmul %29, %31, %cst_22 {dimension_numbers = #tpu.dot_dimension_numbers<[1], [0], [0], [1], [0, 0, 1, 1], [], []>} : vector<128x8xbf16>, vector<8x32xbf16>, vector<128x32xf32> -> vector<128x32xf32>
    %33 = arith.addf %28, %32 : vector<128x32xf32>
    %34 = vector.extract_strided_slice %12 {offsets = [512, 0], sizes = [128, 8], strides = [1, 1]} : vector<2048x8xbf16> to vector<128x8xbf16>
    %c4 = arith.constant 4 : index
    %c0_23 = arith.constant 0 : index
    %c0_24 = arith.constant 0 : index
    %35 = vector.load %arg4[%c4, %c0_23, %c0_24] : memref<16x8x32xbf16, #tpu.memory_space<vmem>>, vector<1x8x32xbf16>
    %36 = vector.shape_cast %35 : vector<1x8x32xbf16> to vector<8x32xbf16>
    %cst_25 = arith.constant dense<0.000000e+00> : vector<128x32xf32>
    %37 = tpu.matmul %34, %36, %cst_25 {dimension_numbers = #tpu.dot_dimension_numbers<[1], [0], [0], [1], [0, 0, 1, 1], [], []>} : vector<128x8xbf16>, vector<8x32xbf16>, vector<128x32xf32> -> vector<128x32xf32>
    %38 = arith.addf %33, %37 : vector<128x32xf32>
    %39 = vector.extract_strided_slice %12 {offsets = [640, 0], sizes = [128, 8], strides = [1, 1]} : vector<2048x8xbf16> to vector<128x8xbf16>
    %c5 = arith.constant 5 : index
    %c0_26 = arith.constant 0 : index
    %c0_27 = arith.constant 0 : index
    %40 = vector.load %arg4[%c5, %c0_26, %c0_27] : memref<16x8x32xbf16, #tpu.memory_space<vmem>>, vector<1x8x32xbf16>
    %41 = vector.shape_cast %40 : vector<1x8x32xbf16> to vector<8x32xbf16>
    %cst_28 = arith.constant dense<0.000000e+00> : vector<128x32xf32>
    %42 = tpu.matmul %39, %41, %cst_28 {dimension_numbers = #tpu.dot_dimension_numbers<[1], [0], [0], [1], [0, 0, 1, 1], [], []>} : vector<128x8xbf16>, vector<8x32xbf16>, vector<128x32xf32> -> vector<128x32xf32>
    %43 = arith.addf %38, %42 : vector<128x32xf32>
    %44 = vector.extract_strided_slice %12 {offsets = [768, 0], sizes = [128, 8], strides = [1, 1]} : vector<2048x8xbf16> to vector<128x8xbf16>
    %c6 = arith.constant 6 : index
    %c0_29 = arith.constant 0 : index
    %c0_30 = arith.constant 0 : index
    %45 = vector.load %arg4[%c6, %c0_29, %c0_30] : memref<16x8x32xbf16, #tpu.memory_space<vmem>>, vector<1x8x32xbf16>
    %46 = vector.shape_cast %45 : vector<1x8x32xbf16> to vector<8x32xbf16>
    %cst_31 = arith.constant dense<0.000000e+00> : vector<128x32xf32>
    %47 = tpu.matmul %44, %46, %cst_31 {dimension_numbers = #tpu.dot_dimension_numbers<[1], [0], [0], [1], [0, 0, 1, 1], [], []>} : vector<128x8xbf16>, vector<8x32xbf16>, vector<128x32xf32> -> vector<128x32xf32>
    %48 = arith.addf %43, %47 : vector<128x32xf32>
    %49 = vector.extract_strided_slice %12 {offsets = [896, 0], sizes = [128, 8], strides = [1, 1]} : vector<2048x8xbf16> to vector<128x8xbf16>
    %c7 = arith.constant 7 : index
    %c0_32 = arith.constant 0 : index
    %c0_33 = arith.constant 0 : index
    %50 = vector.load %arg4[%c7, %c0_32, %c0_33] : memref<16x8x32xbf16, #tpu.memory_space<vmem>>, vector<1x8x32xbf16>
    %51 = vector.shape_cast %50 : vector<1x8x32xbf16> to vector<8x32xbf16>
    %cst_34 = arith.constant dense<0.000000e+00> : vector<128x32xf32>
    %52 = tpu.matmul %49, %51, %cst_34 {dimension_numbers = #tpu.dot_dimension_numbers<[1], [0], [0], [1], [0, 0, 1, 1], [], []>} : vector<128x8xbf16>, vector<8x32xbf16>, vector<128x32xf32> -> vector<128x32xf32>
    %53 = arith.addf %48, %52 : vector<128x32xf32>
    %54 = vector.extract_strided_slice %12 {offsets = [1024, 0], sizes = [128, 8], strides = [1, 1]} : vector<2048x8xbf16> to vector<128x8xbf16>
    %c8 = arith.constant 8 : index
    %c0_35 = arith.constant 0 : index
    %c0_36 = arith.constant 0 : index
    %55 = vector.load %arg4[%c8, %c0_35, %c0_36] : memref<16x8x32xbf16, #tpu.memory_space<vmem>>, vector<1x8x32xbf16>
    %56 = vector.shape_cast %55 : vector<1x8x32xbf16> to vector<8x32xbf16>
    %cst_37 = arith.constant dense<0.000000e+00> : vector<128x32xf32>
    %57 = tpu.matmul %54, %56, %cst_37 {dimension_numbers = #tpu.dot_dimension_numbers<[1], [0], [0], [1], [0, 0, 1, 1], [], []>} : vector<128x8xbf16>, vector<8x32xbf16>, vector<128x32xf32> -> vector<128x32xf32>
    %58 = arith.addf %53, %57 : vector<128x32xf32>
    %59 = vector.extract_strided_slice %12 {offsets = [1152, 0], sizes = [128, 8], strides = [1, 1]} : vector<2048x8xbf16> to vector<128x8xbf16>
    %c9 = arith.constant 9 : index
    %c0_38 = arith.constant 0 : index
    %c0_39 = arith.constant 0 : index
    %60 = vector.load %arg4[%c9, %c0_38, %c0_39] : memref<16x8x32xbf16, #tpu.memory_space<vmem>>, vector<1x8x32xbf16>
    %61 = vector.shape_cast %60 : vector<1x8x32xbf16> to vector<8x32xbf16>
    %cst_40 = arith.constant dense<0.000000e+00> : vector<128x32xf32>
    %62 = tpu.matmul %59, %61, %cst_40 {dimension_numbers = #tpu.dot_dimension_numbers<[1], [0], [0], [1], [0, 0, 1, 1], [], []>} : vector<128x8xbf16>, vector<8x32xbf16>, vector<128x32xf32> -> vector<128x32xf32>
    %63 = arith.addf %58, %62 : vector<128x32xf32>
    %64 = vector.extract_strided_slice %12 {offsets = [1280, 0], sizes = [128, 8], strides = [1, 1]} : vector<2048x8xbf16> to vector<128x8xbf16>
    %c10 = arith.constant 10 : index
    %c0_41 = arith.constant 0 : index
    %c0_42 = arith.constant 0 : index
    %65 = vector.load %arg4[%c10, %c0_41, %c0_42] : memref<16x8x32xbf16, #tpu.memory_space<vmem>>, vector<1x8x32xbf16>
    %66 = vector.shape_cast %65 : vector<1x8x32xbf16> to vector<8x32xbf16>
    %cst_43 = arith.constant dense<0.000000e+00> : vector<128x32xf32>
    %67 = tpu.matmul %64, %66, %cst_43 {dimension_numbers = #tpu.dot_dimension_numbers<[1], [0], [0], [1], [0, 0, 1, 1], [], []>} : vector<128x8xbf16>, vector<8x32xbf16>, vector<128x32xf32> -> vector<128x32xf32>
    %68 = arith.addf %63, %67 : vector<128x32xf32>
    %69 = vector.extract_strided_slice %12 {offsets = [1408, 0], sizes = [128, 8], strides = [1, 1]} : vector<2048x8xbf16> to vector<128x8xbf16>
    %c11 = arith.constant 11 : index
    %c0_44 = arith.constant 0 : index
    %c0_45 = arith.constant 0 : index
    %70 = vector.load %arg4[%c11, %c0_44, %c0_45] : memref<16x8x32xbf16, #tpu.memory_space<vmem>>, vector<1x8x32xbf16>
    %71 = vector.shape_cast %70 : vector<1x8x32xbf16> to vector<8x32xbf16>
    %cst_46 = arith.constant dense<0.000000e+00> : vector<128x32xf32>
    %72 = tpu.matmul %69, %71, %cst_46 {dimension_numbers = #tpu.dot_dimension_numbers<[1], [0], [0], [1], [0, 0, 1, 1], [], []>} : vector<128x8xbf16>, vector<8x32xbf16>, vector<128x32xf32> -> vector<128x32xf32>
    %73 = arith.addf %68, %72 : vector<128x32xf32>
    %74 = vector.extract_strided_slice %12 {offsets = [1536, 0], sizes = [128, 8], strides = [1, 1]} : vector<2048x8xbf16> to vector<128x8xbf16>
    %c12 = arith.constant 12 : index
    %c0_47 = arith.constant 0 : index
    %c0_48 = arith.constant 0 : index
    %75 = vector.load %arg4[%c12, %c0_47, %c0_48] : memref<16x8x32xbf16, #tpu.memory_space<vmem>>, vector<1x8x32xbf16>
    %76 = vector.shape_cast %75 : vector<1x8x32xbf16> to vector<8x32xbf16>
    %cst_49 = arith.constant dense<0.000000e+00> : vector<128x32xf32>
    %77 = tpu.matmul %74, %76, %cst_49 {dimension_numbers = #tpu.dot_dimension_numbers<[1], [0], [0], [1], [0, 0, 1, 1], [], []>} : vector<128x8xbf16>, vector<8x32xbf16>, vector<128x32xf32> -> vector<128x32xf32>
    %78 = arith.addf %73, %77 : vector<128x32xf32>
    %79 = vector.extract_strided_slice %12 {offsets = [1664, 0], sizes = [128, 8], strides = [1, 1]} : vector<2048x8xbf16> to vector<128x8xbf16>
    %c13 = arith.constant 13 : index
    %c0_50 = arith.constant 0 : index
    %c0_51 = arith.constant 0 : index
    %80 = vector.load %arg4[%c13, %c0_50, %c0_51] : memref<16x8x32xbf16, #tpu.memory_space<vmem>>, vector<1x8x32xbf16>
    %81 = vector.shape_cast %80 : vector<1x8x32xbf16> to vector<8x32xbf16>
    %cst_52 = arith.constant dense<0.000000e+00> : vector<128x32xf32>
    %82 = tpu.matmul %79, %81, %cst_52 {dimension_numbers = #tpu.dot_dimension_numbers<[1], [0], [0], [1], [0, 0, 1, 1], [], []>} : vector<128x8xbf16>, vector<8x32xbf16>, vector<128x32xf32> -> vector<128x32xf32>
    %83 = arith.addf %78, %82 : vector<128x32xf32>
    %84 = vector.extract_strided_slice %12 {offsets = [1792, 0], sizes = [128, 8], strides = [1, 1]} : vector<2048x8xbf16> to vector<128x8xbf16>
    %c14 = arith.constant 14 : index
    %c0_53 = arith.constant 0 : index
    %c0_54 = arith.constant 0 : index
    %85 = vector.load %arg4[%c14, %c0_53, %c0_54] : memref<16x8x32xbf16, #tpu.memory_space<vmem>>, vector<1x8x32xbf16>
    %86 = vector.shape_cast %85 : vector<1x8x32xbf16> to vector<8x32xbf16>
    %cst_55 = arith.constant dense<0.000000e+00> : vector<128x32xf32>
    %87 = tpu.matmul %84, %86, %cst_55 {dimension_numbers = #tpu.dot_dimension_numbers<[1], [0], [0], [1], [0, 0, 1, 1], [], []>} : vector<128x8xbf16>, vector<8x32xbf16>, vector<128x32xf32> -> vector<128x32xf32>
    %88 = arith.addf %83, %87 : vector<128x32xf32>
    %89 = vector.extract_strided_slice %12 {offsets = [1920, 0], sizes = [128, 8], strides = [1, 1]} : vector<2048x8xbf16> to vector<128x8xbf16>
    %c15 = arith.constant 15 : index
    %c0_56 = arith.constant 0 : index
    %c0_57 = arith.constant 0 : index
    %90 = vector.load %arg4[%c15, %c0_56, %c0_57] : memref<16x8x32xbf16, #tpu.memory_space<vmem>>, vector<1x8x32xbf16>
    %91 = vector.shape_cast %90 : vector<1x8x32xbf16> to vector<8x32xbf16>
    %cst_58 = arith.constant dense<0.000000e+00> : vector<128x32xf32>
    %92 = tpu.matmul %89, %91, %cst_58 {dimension_numbers = #tpu.dot_dimension_numbers<[1], [0], [0], [1], [0, 0, 1, 1], [], []>} : vector<128x8xbf16>, vector<8x32xbf16>, vector<128x32xf32> -> vector<128x32xf32>
    %93 = arith.addf %88, %92 : vector<128x32xf32>
    %c0_59 = arith.constant 0 : index
    %c0_60 = arith.constant 0 : index
    %94 = vector.load %arg5[%c0_59, %c0_60] : memref<1x32xf32, #tpu.memory_space<vmem>>, vector<1x32xf32>
    %95 = vector.broadcast %94 : vector<1x32xf32> to vector<128x32xf32>
    %96 = arith.addf %93, %95 : vector<128x32xf32>
    %c0_61 = arith.constant 0 : index
    %c0_62 = arith.constant 0 : index
    %97 = vector.load %arg6[%c0_61, %c0_62] : memref<1x32xf32, #tpu.memory_space<vmem>>, vector<1x32xf32>
    %c0_63 = arith.constant 0 : index
    %c0_64 = arith.constant 0 : index
    %98 = vector.load %arg7[%c0_63, %c0_64] : memref<1x32xf32, #tpu.memory_space<vmem>>, vector<1x32xf32>
    %cst_65 = arith.constant dense<0.000000e+00> : vector<32xf32>
    %99 = vector.multi_reduction <add>, %96, %cst_65 [0] : vector<128x32xf32> to vector<32xf32>
    %100 = vector.shape_cast %99 : vector<32xf32> to vector<1x32xf32>
    %cst_66 = arith.constant 1.280000e+02 : f32
    %101 = vector.broadcast %cst_66 : f32 to vector<1x32xf32>
    %102 = arith.divf %100, %101 : vector<1x32xf32>
    %103 = vector.broadcast %102 : vector<1x32xf32> to vector<128x32xf32>
    %104 = arith.subf %96, %103 : vector<128x32xf32>
    %105 = arith.mulf %104, %104 : vector<128x32xf32>
    %cst_67 = arith.constant dense<0.000000e+00> : vector<32xf32>
    %106 = vector.multi_reduction <add>, %105, %cst_67 [0] : vector<128x32xf32> to vector<32xf32>
    %107 = vector.shape_cast %106 : vector<32xf32> to vector<1x32xf32>
    %cst_68 = arith.constant 1.280000e+02 : f32
    %108 = vector.broadcast %cst_68 : f32 to vector<1x32xf32>
    %109 = arith.divf %107, %108 : vector<1x32xf32>
    %110 = vector.broadcast %102 : vector<1x32xf32> to vector<128x32xf32>
    %111 = arith.subf %96, %110 : vector<128x32xf32>
    %cst_69 = arith.constant 9.99999974E-6 : f32
    %112 = vector.broadcast %cst_69 : f32 to vector<1x32xf32>
    %113 = arith.addf %109, %112 : vector<1x32xf32>
    %114 = math.rsqrt %113 : vector<1x32xf32>
    %115 = arith.mulf %114, %97 : vector<1x32xf32>
    %116 = vector.broadcast %115 : vector<1x32xf32> to vector<128x32xf32>
    %117 = arith.mulf %111, %116 : vector<128x32xf32>
    %118 = vector.broadcast %98 : vector<1x32xf32> to vector<128x32xf32>
    %119 = arith.addf %117, %118 : vector<128x32xf32>
    %cst_70 = arith.constant 2.000000e-01 : f32
    %120 = vector.broadcast %cst_70 : f32 to vector<128x32xf32>
    %121 = arith.mulf %120, %119 : vector<128x32xf32>
    %122 = arith.maximumf %119, %121 : vector<128x32xf32>
    %123 = arith.truncf %122 : vector<128x32xf32> to vector<128x32xbf16>
    %c0_71 = arith.constant 0 : index
    %c0_72 = arith.constant 0 : index
    %124 = vector.load %arg8[%c0_71, %c0_72] : memref<512x128xbf16, #tpu.memory_space<vmem>>, vector<512x128xbf16>
    %cst_73 = arith.constant dense<0.000000e+00> : vector<512x32xf32>
    %125 = tpu.matmul %124, %123, %cst_73 {dimension_numbers = #tpu.dot_dimension_numbers<[1], [0], [0], [1], [0, 0, 1, 1], [], []>} : vector<512x128xbf16>, vector<128x32xbf16>, vector<512x32xf32> -> vector<512x32xf32>
    %126 = arith.truncf %125 : vector<512x32xf32> to vector<512x32xbf16>
    %cst_74 = arith.constant 0.000000e+00 : f32
    %127 = vector.broadcast %cst_74 : f32 to vector<32x64xf32>
    %128 = vector.extract_strided_slice %126 {offsets = [0, 0], sizes = [32, 32], strides = [1, 1]} : vector<512x32xbf16> to vector<32x32xbf16>
    %c0_75 = arith.constant 0 : index
    %c0_76 = arith.constant 0 : index
    %c0_77 = arith.constant 0 : index
    %129 = vector.load %arg9[%c0_75, %c0_76, %c0_77] : memref<16x32x64xbf16, #tpu.memory_space<vmem>>, vector<1x32x64xbf16>
    %130 = vector.shape_cast %129 : vector<1x32x64xbf16> to vector<32x64xbf16>
    %cst_78 = arith.constant dense<0.000000e+00> : vector<32x64xf32>
    %131 = tpu.matmul %128, %130, %cst_78 {dimension_numbers = #tpu.dot_dimension_numbers<[1], [0], [0], [1], [0, 0, 1, 1], [], []>} : vector<32x32xbf16>, vector<32x64xbf16>, vector<32x64xf32> -> vector<32x64xf32>
    %132 = arith.addf %127, %131 : vector<32x64xf32>
    %133 = vector.extract_strided_slice %126 {offsets = [32, 0], sizes = [32, 32], strides = [1, 1]} : vector<512x32xbf16> to vector<32x32xbf16>
    %c1_79 = arith.constant 1 : index
    %c0_80 = arith.constant 0 : index
    %c0_81 = arith.constant 0 : index
    %134 = vector.load %arg9[%c1_79, %c0_80, %c0_81] : memref<16x32x64xbf16, #tpu.memory_space<vmem>>, vector<1x32x64xbf16>
    %135 = vector.shape_cast %134 : vector<1x32x64xbf16> to vector<32x64xbf16>
    %cst_82 = arith.constant dense<0.000000e+00> : vector<32x64xf32>
    %136 = tpu.matmul %133, %135, %cst_82 {dimension_numbers = #tpu.dot_dimension_numbers<[1], [0], [0], [1], [0, 0, 1, 1], [], []>} : vector<32x32xbf16>, vector<32x64xbf16>, vector<32x64xf32> -> vector<32x64xf32>
    %137 = arith.addf %132, %136 : vector<32x64xf32>
    %138 = vector.extract_strided_slice %126 {offsets = [64, 0], sizes = [32, 32], strides = [1, 1]} : vector<512x32xbf16> to vector<32x32xbf16>
    %c2_83 = arith.constant 2 : index
    %c0_84 = arith.constant 0 : index
    %c0_85 = arith.constant 0 : index
    %139 = vector.load %arg9[%c2_83, %c0_84, %c0_85] : memref<16x32x64xbf16, #tpu.memory_space<vmem>>, vector<1x32x64xbf16>
    %140 = vector.shape_cast %139 : vector<1x32x64xbf16> to vector<32x64xbf16>
    %cst_86 = arith.constant dense<0.000000e+00> : vector<32x64xf32>
    %141 = tpu.matmul %138, %140, %cst_86 {dimension_numbers = #tpu.dot_dimension_numbers<[1], [0], [0], [1], [0, 0, 1, 1], [], []>} : vector<32x32xbf16>, vector<32x64xbf16>, vector<32x64xf32> -> vector<32x64xf32>
    %142 = arith.addf %137, %141 : vector<32x64xf32>
    %143 = vector.extract_strided_slice %126 {offsets = [96, 0], sizes = [32, 32], strides = [1, 1]} : vector<512x32xbf16> to vector<32x32xbf16>
    %c3_87 = arith.constant 3 : index
    %c0_88 = arith.constant 0 : index
    %c0_89 = arith.constant 0 : index
    %144 = vector.load %arg9[%c3_87, %c0_88, %c0_89] : memref<16x32x64xbf16, #tpu.memory_space<vmem>>, vector<1x32x64xbf16>
    %145 = vector.shape_cast %144 : vector<1x32x64xbf16> to vector<32x64xbf16>
    %cst_90 = arith.constant dense<0.000000e+00> : vector<32x64xf32>
    %146 = tpu.matmul %143, %145, %cst_90 {dimension_numbers = #tpu.dot_dimension_numbers<[1], [0], [0], [1], [0, 0, 1, 1], [], []>} : vector<32x32xbf16>, vector<32x64xbf16>, vector<32x64xf32> -> vector<32x64xf32>
    %147 = arith.addf %142, %146 : vector<32x64xf32>
    %148 = vector.extract_strided_slice %126 {offsets = [128, 0], sizes = [32, 32], strides = [1, 1]} : vector<512x32xbf16> to vector<32x32xbf16>
    %c4_91 = arith.constant 4 : index
    %c0_92 = arith.constant 0 : index
    %c0_93 = arith.constant 0 : index
    %149 = vector.load %arg9[%c4_91, %c0_92, %c0_93] : memref<16x32x64xbf16, #tpu.memory_space<vmem>>, vector<1x32x64xbf16>
    %150 = vector.shape_cast %149 : vector<1x32x64xbf16> to vector<32x64xbf16>
    %cst_94 = arith.constant dense<0.000000e+00> : vector<32x64xf32>
    %151 = tpu.matmul %148, %150, %cst_94 {dimension_numbers = #tpu.dot_dimension_numbers<[1], [0], [0], [1], [0, 0, 1, 1], [], []>} : vector<32x32xbf16>, vector<32x64xbf16>, vector<32x64xf32> -> vector<32x64xf32>
    %152 = arith.addf %147, %151 : vector<32x64xf32>
    %153 = vector.extract_strided_slice %126 {offsets = [160, 0], sizes = [32, 32], strides = [1, 1]} : vector<512x32xbf16> to vector<32x32xbf16>
    %c5_95 = arith.constant 5 : index
    %c0_96 = arith.constant 0 : index
    %c0_97 = arith.constant 0 : index
    %154 = vector.load %arg9[%c5_95, %c0_96, %c0_97] : memref<16x32x64xbf16, #tpu.memory_space<vmem>>, vector<1x32x64xbf16>
    %155 = vector.shape_cast %154 : vector<1x32x64xbf16> to vector<32x64xbf16>
    %cst_98 = arith.constant dense<0.000000e+00> : vector<32x64xf32>
    %156 = tpu.matmul %153, %155, %cst_98 {dimension_numbers = #tpu.dot_dimension_numbers<[1], [0], [0], [1], [0, 0, 1, 1], [], []>} : vector<32x32xbf16>, vector<32x64xbf16>, vector<32x64xf32> -> vector<32x64xf32>
    %157 = arith.addf %152, %156 : vector<32x64xf32>
    %158 = vector.extract_strided_slice %126 {offsets = [192, 0], sizes = [32, 32], strides = [1, 1]} : vector<512x32xbf16> to vector<32x32xbf16>
    %c6_99 = arith.constant 6 : index
    %c0_100 = arith.constant 0 : index
    %c0_101 = arith.constant 0 : index
    %159 = vector.load %arg9[%c6_99, %c0_100, %c0_101] : memref<16x32x64xbf16, #tpu.memory_space<vmem>>, vector<1x32x64xbf16>
    %160 = vector.shape_cast %159 : vector<1x32x64xbf16> to vector<32x64xbf16>
    %cst_102 = arith.constant dense<0.000000e+00> : vector<32x64xf32>
    %161 = tpu.matmul %158, %160, %cst_102 {dimension_numbers = #tpu.dot_dimension_numbers<[1], [0], [0], [1], [0, 0, 1, 1], [], []>} : vector<32x32xbf16>, vector<32x64xbf16>, vector<32x64xf32> -> vector<32x64xf32>
    %162 = arith.addf %157, %161 : vector<32x64xf32>
    %163 = vector.extract_strided_slice %126 {offsets = [224, 0], sizes = [32, 32], strides = [1, 1]} : vector<512x32xbf16> to vector<32x32xbf16>
    %c7_103 = arith.constant 7 : index
    %c0_104 = arith.constant 0 : index
    %c0_105 = arith.constant 0 : index
    %164 = vector.load %arg9[%c7_103, %c0_104, %c0_105] : memref<16x32x64xbf16, #tpu.memory_space<vmem>>, vector<1x32x64xbf16>
    %165 = vector.shape_cast %164 : vector<1x32x64xbf16> to vector<32x64xbf16>
    %cst_106 = arith.constant dense<0.000000e+00> : vector<32x64xf32>
    %166 = tpu.matmul %163, %165, %cst_106 {dimension_numbers = #tpu.dot_dimension_numbers<[1], [0], [0], [1], [0, 0, 1, 1], [], []>} : vector<32x32xbf16>, vector<32x64xbf16>, vector<32x64xf32> -> vector<32x64xf32>
    %167 = arith.addf %162, %166 : vector<32x64xf32>
    %168 = vector.extract_strided_slice %126 {offsets = [256, 0], sizes = [32, 32], strides = [1, 1]} : vector<512x32xbf16> to vector<32x32xbf16>
    %c8_107 = arith.constant 8 : index
    %c0_108 = arith.constant 0 : index
    %c0_109 = arith.constant 0 : index
    %169 = vector.load %arg9[%c8_107, %c0_108, %c0_109] : memref<16x32x64xbf16, #tpu.memory_space<vmem>>, vector<1x32x64xbf16>
    %170 = vector.shape_cast %169 : vector<1x32x64xbf16> to vector<32x64xbf16>
    %cst_110 = arith.constant dense<0.000000e+00> : vector<32x64xf32>
    %171 = tpu.matmul %168, %170, %cst_110 {dimension_numbers = #tpu.dot_dimension_numbers<[1], [0], [0], [1], [0, 0, 1, 1], [], []>} : vector<32x32xbf16>, vector<32x64xbf16>, vector<32x64xf32> -> vector<32x64xf32>
    %172 = arith.addf %167, %171 : vector<32x64xf32>
    %173 = vector.extract_strided_slice %126 {offsets = [288, 0], sizes = [32, 32], strides = [1, 1]} : vector<512x32xbf16> to vector<32x32xbf16>
    %c9_111 = arith.constant 9 : index
    %c0_112 = arith.constant 0 : index
    %c0_113 = arith.constant 0 : index
    %174 = vector.load %arg9[%c9_111, %c0_112, %c0_113] : memref<16x32x64xbf16, #tpu.memory_space<vmem>>, vector<1x32x64xbf16>
    %175 = vector.shape_cast %174 : vector<1x32x64xbf16> to vector<32x64xbf16>
    %cst_114 = arith.constant dense<0.000000e+00> : vector<32x64xf32>
    %176 = tpu.matmul %173, %175, %cst_114 {dimension_numbers = #tpu.dot_dimension_numbers<[1], [0], [0], [1], [0, 0, 1, 1], [], []>} : vector<32x32xbf16>, vector<32x64xbf16>, vector<32x64xf32> -> vector<32x64xf32>
    %177 = arith.addf %172, %176 : vector<32x64xf32>
    %178 = vector.extract_strided_slice %126 {offsets = [320, 0], sizes = [32, 32], strides = [1, 1]} : vector<512x32xbf16> to vector<32x32xbf16>
    %c10_115 = arith.constant 10 : index
    %c0_116 = arith.constant 0 : index
    %c0_117 = arith.constant 0 : index
    %179 = vector.load %arg9[%c10_115, %c0_116, %c0_117] : memref<16x32x64xbf16, #tpu.memory_space<vmem>>, vector<1x32x64xbf16>
    %180 = vector.shape_cast %179 : vector<1x32x64xbf16> to vector<32x64xbf16>
    %cst_118 = arith.constant dense<0.000000e+00> : vector<32x64xf32>
    %181 = tpu.matmul %178, %180, %cst_118 {dimension_numbers = #tpu.dot_dimension_numbers<[1], [0], [0], [1], [0, 0, 1, 1], [], []>} : vector<32x32xbf16>, vector<32x64xbf16>, vector<32x64xf32> -> vector<32x64xf32>
    %182 = arith.addf %177, %181 : vector<32x64xf32>
    %183 = vector.extract_strided_slice %126 {offsets = [352, 0], sizes = [32, 32], strides = [1, 1]} : vector<512x32xbf16> to vector<32x32xbf16>
    %c11_119 = arith.constant 11 : index
    %c0_120 = arith.constant 0 : index
    %c0_121 = arith.constant 0 : index
    %184 = vector.load %arg9[%c11_119, %c0_120, %c0_121] : memref<16x32x64xbf16, #tpu.memory_space<vmem>>, vector<1x32x64xbf16>
    %185 = vector.shape_cast %184 : vector<1x32x64xbf16> to vector<32x64xbf16>
    %cst_122 = arith.constant dense<0.000000e+00> : vector<32x64xf32>
    %186 = tpu.matmul %183, %185, %cst_122 {dimension_numbers = #tpu.dot_dimension_numbers<[1], [0], [0], [1], [0, 0, 1, 1], [], []>} : vector<32x32xbf16>, vector<32x64xbf16>, vector<32x64xf32> -> vector<32x64xf32>
    %187 = arith.addf %182, %186 : vector<32x64xf32>
    %188 = vector.extract_strided_slice %126 {offsets = [384, 0], sizes = [32, 32], strides = [1, 1]} : vector<512x32xbf16> to vector<32x32xbf16>
    %c12_123 = arith.constant 12 : index
    %c0_124 = arith.constant 0 : index
    %c0_125 = arith.constant 0 : index
    %189 = vector.load %arg9[%c12_123, %c0_124, %c0_125] : memref<16x32x64xbf16, #tpu.memory_space<vmem>>, vector<1x32x64xbf16>
    %190 = vector.shape_cast %189 : vector<1x32x64xbf16> to vector<32x64xbf16>
    %cst_126 = arith.constant dense<0.000000e+00> : vector<32x64xf32>
    %191 = tpu.matmul %188, %190, %cst_126 {dimension_numbers = #tpu.dot_dimension_numbers<[1], [0], [0], [1], [0, 0, 1, 1], [], []>} : vector<32x32xbf16>, vector<32x64xbf16>, vector<32x64xf32> -> vector<32x64xf32>
    %192 = arith.addf %187, %191 : vector<32x64xf32>
    %193 = vector.extract_strided_slice %126 {offsets = [416, 0], sizes = [32, 32], strides = [1, 1]} : vector<512x32xbf16> to vector<32x32xbf16>
    %c13_127 = arith.constant 13 : index
    %c0_128 = arith.constant 0 : index
    %c0_129 = arith.constant 0 : index
    %194 = vector.load %arg9[%c13_127, %c0_128, %c0_129] : memref<16x32x64xbf16, #tpu.memory_space<vmem>>, vector<1x32x64xbf16>
    %195 = vector.shape_cast %194 : vector<1x32x64xbf16> to vector<32x64xbf16>
    %cst_130 = arith.constant dense<0.000000e+00> : vector<32x64xf32>
    %196 = tpu.matmul %193, %195, %cst_130 {dimension_numbers = #tpu.dot_dimension_numbers<[1], [0], [0], [1], [0, 0, 1, 1], [], []>} : vector<32x32xbf16>, vector<32x64xbf16>, vector<32x64xf32> -> vector<32x64xf32>
    %197 = arith.addf %192, %196 : vector<32x64xf32>
    %198 = vector.extract_strided_slice %126 {offsets = [448, 0], sizes = [32, 32], strides = [1, 1]} : vector<512x32xbf16> to vector<32x32xbf16>
    %c14_131 = arith.constant 14 : index
    %c0_132 = arith.constant 0 : index
    %c0_133 = arith.constant 0 : index
    %199 = vector.load %arg9[%c14_131, %c0_132, %c0_133] : memref<16x32x64xbf16, #tpu.memory_space<vmem>>, vector<1x32x64xbf16>
    %200 = vector.shape_cast %199 : vector<1x32x64xbf16> to vector<32x64xbf16>
    %cst_134 = arith.constant dense<0.000000e+00> : vector<32x64xf32>
    %201 = tpu.matmul %198, %200, %cst_134 {dimension_numbers = #tpu.dot_dimension_numbers<[1], [0], [0], [1], [0, 0, 1, 1], [], []>} : vector<32x32xbf16>, vector<32x64xbf16>, vector<32x64xf32> -> vector<32x64xf32>
    %202 = arith.addf %197, %201 : vector<32x64xf32>
    %203 = vector.extract_strided_slice %126 {offsets = [480, 0], sizes = [32, 32], strides = [1, 1]} : vector<512x32xbf16> to vector<32x32xbf16>
    %c15_135 = arith.constant 15 : index
    %c0_136 = arith.constant 0 : index
    %c0_137 = arith.constant 0 : index
    %204 = vector.load %arg9[%c15_135, %c0_136, %c0_137] : memref<16x32x64xbf16, #tpu.memory_space<vmem>>, vector<1x32x64xbf16>
    %205 = vector.shape_cast %204 : vector<1x32x64xbf16> to vector<32x64xbf16>
    %cst_138 = arith.constant dense<0.000000e+00> : vector<32x64xf32>
    %206 = tpu.matmul %203, %205, %cst_138 {dimension_numbers = #tpu.dot_dimension_numbers<[1], [0], [0], [1], [0, 0, 1, 1], [], []>} : vector<32x32xbf16>, vector<32x64xbf16>, vector<32x64xf32> -> vector<32x64xf32>
    %207 = arith.addf %202, %206 : vector<32x64xf32>
    %c0_139 = arith.constant 0 : index
    %c0_140 = arith.constant 0 : index
    %208 = vector.load %arg10[%c0_139, %c0_140] : memref<1x64xf32, #tpu.memory_space<vmem>>, vector<1x64xf32>
    %209 = vector.broadcast %208 : vector<1x64xf32> to vector<32x64xf32>
    %210 = arith.addf %207, %209 : vector<32x64xf32>
    %c0_141 = arith.constant 0 : index
    %c0_142 = arith.constant 0 : index
    %211 = vector.load %arg11[%c0_141, %c0_142] : memref<1x64xf32, #tpu.memory_space<vmem>>, vector<1x64xf32>
    %c0_143 = arith.constant 0 : index
    %c0_144 = arith.constant 0 : index
    %212 = vector.load %arg12[%c0_143, %c0_144] : memref<1x64xf32, #tpu.memory_space<vmem>>, vector<1x64xf32>
    %cst_145 = arith.constant dense<0.000000e+00> : vector<64xf32>
    %213 = vector.multi_reduction <add>, %210, %cst_145 [0] : vector<32x64xf32> to vector<64xf32>
    %214 = vector.shape_cast %213 : vector<64xf32> to vector<1x64xf32>
    %cst_146 = arith.constant 3.200000e+01 : f32
    %215 = vector.broadcast %cst_146 : f32 to vector<1x64xf32>
    %216 = arith.divf %214, %215 : vector<1x64xf32>
    %217 = vector.broadcast %216 : vector<1x64xf32> to vector<32x64xf32>
    %218 = arith.subf %210, %217 : vector<32x64xf32>
    %219 = arith.mulf %218, %218 : vector<32x64xf32>
    %cst_147 = arith.constant dense<0.000000e+00> : vector<64xf32>
    %220 = vector.multi_reduction <add>, %219, %cst_147 [0] : vector<32x64xf32> to vector<64xf32>
    %221 = vector.shape_cast %220 : vector<64xf32> to vector<1x64xf32>
    %cst_148 = arith.constant 3.200000e+01 : f32
    %222 = vector.broadcast %cst_148 : f32 to vector<1x64xf32>
    %223 = arith.divf %221, %222 : vector<1x64xf32>
    %224 = vector.broadcast %216 : vector<1x64xf32> to vector<32x64xf32>
    %225 = arith.subf %210, %224 : vector<32x64xf32>
    %cst_149 = arith.constant 9.99999974E-6 : f32
    %226 = vector.broadcast %cst_149 : f32 to vector<1x64xf32>
    %227 = arith.addf %223, %226 : vector<1x64xf32>
    %228 = math.rsqrt %227 : vector<1x64xf32>
    %229 = arith.mulf %228, %211 : vector<1x64xf32>
    %230 = vector.broadcast %229 : vector<1x64xf32> to vector<32x64xf32>
    %231 = arith.mulf %225, %230 : vector<32x64xf32>
    %232 = vector.broadcast %212 : vector<1x64xf32> to vector<32x64xf32>
    %233 = arith.addf %231, %232 : vector<32x64xf32>
    %cst_150 = arith.constant 2.000000e-01 : f32
    %234 = vector.broadcast %cst_150 : f32 to vector<32x64xf32>
    %235 = arith.mulf %234, %233 : vector<32x64xf32>
    %236 = arith.maximumf %233, %235 : vector<32x64xf32>
    %237 = arith.truncf %236 : vector<32x64xf32> to vector<32x64xbf16>
    %c0_151 = arith.constant 0 : index
    %c0_152 = arith.constant 0 : index
    %238 = vector.load %arg13[%c0_151, %c0_152] : memref<32x32xbf16, #tpu.memory_space<vmem>>, vector<32x32xbf16>
    %cst_153 = arith.constant dense<0.000000e+00> : vector<32x64xf32>
    %239 = tpu.matmul %238, %237, %cst_153 {dimension_numbers = #tpu.dot_dimension_numbers<[1], [0], [0], [1], [0, 0, 1, 1], [], []>} : vector<32x32xbf16>, vector<32x64xbf16>, vector<32x64xf32> -> vector<32x64xf32>
    %240 = arith.truncf %239 : vector<32x64xf32> to vector<32x64xbf16>
    %cst_154 = arith.constant 0.000000e+00 : f32
    %241 = vector.broadcast %cst_154 : f32 to vector<2x1xf32>
    %242 = vector.extract_strided_slice %240 {offsets = [0, 0], sizes = [2, 64], strides = [1, 1]} : vector<32x64xbf16> to vector<2x64xbf16>
    %c0_155 = arith.constant 0 : index
    %c0_156 = arith.constant 0 : index
    %c0_157 = arith.constant 0 : index
    %243 = vector.load %arg14[%c0_155, %c0_156, %c0_157] : memref<16x64x1xbf16, #tpu.memory_space<vmem>>, vector<1x64x1xbf16>
    %244 = vector.shape_cast %243 : vector<1x64x1xbf16> to vector<64x1xbf16>
    %cst_158 = arith.constant dense<0.000000e+00> : vector<2x1xf32>
    %245 = tpu.matmul %242, %244, %cst_158 {dimension_numbers = #tpu.dot_dimension_numbers<[1], [0], [0], [1], [0, 0, 1, 1], [], []>} : vector<2x64xbf16>, vector<64x1xbf16>, vector<2x1xf32> -> vector<2x1xf32>
    %246 = arith.addf %241, %245 : vector<2x1xf32>
    %247 = vector.extract_strided_slice %240 {offsets = [2, 0], sizes = [2, 64], strides = [1, 1]} : vector<32x64xbf16> to vector<2x64xbf16>
    %c1_159 = arith.constant 1 : index
    %c0_160 = arith.constant 0 : index
    %c0_161 = arith.constant 0 : index
    %248 = vector.load %arg14[%c1_159, %c0_160, %c0_161] : memref<16x64x1xbf16, #tpu.memory_space<vmem>>, vector<1x64x1xbf16>
    %249 = vector.shape_cast %248 : vector<1x64x1xbf16> to vector<64x1xbf16>
    %cst_162 = arith.constant dense<0.000000e+00> : vector<2x1xf32>
    %250 = tpu.matmul %247, %249, %cst_162 {dimension_numbers = #tpu.dot_dimension_numbers<[1], [0], [0], [1], [0, 0, 1, 1], [], []>} : vector<2x64xbf16>, vector<64x1xbf16>, vector<2x1xf32> -> vector<2x1xf32>
    %251 = arith.addf %246, %250 : vector<2x1xf32>
    %252 = vector.extract_strided_slice %240 {offsets = [4, 0], sizes = [2, 64], strides = [1, 1]} : vector<32x64xbf16> to vector<2x64xbf16>
    %c2_163 = arith.constant 2 : index
    %c0_164 = arith.constant 0 : index
    %c0_165 = arith.constant 0 : index
    %253 = vector.load %arg14[%c2_163, %c0_164, %c0_165] : memref<16x64x1xbf16, #tpu.memory_space<vmem>>, vector<1x64x1xbf16>
    %254 = vector.shape_cast %253 : vector<1x64x1xbf16> to vector<64x1xbf16>
    %cst_166 = arith.constant dense<0.000000e+00> : vector<2x1xf32>
    %255 = tpu.matmul %252, %254, %cst_166 {dimension_numbers = #tpu.dot_dimension_numbers<[1], [0], [0], [1], [0, 0, 1, 1], [], []>} : vector<2x64xbf16>, vector<64x1xbf16>, vector<2x1xf32> -> vector<2x1xf32>
    %256 = arith.addf %251, %255 : vector<2x1xf32>
    %257 = vector.extract_strided_slice %240 {offsets = [6, 0], sizes = [2, 64], strides = [1, 1]} : vector<32x64xbf16> to vector<2x64xbf16>
    %c3_167 = arith.constant 3 : index
    %c0_168 = arith.constant 0 : index
    %c0_169 = arith.constant 0 : index
    %258 = vector.load %arg14[%c3_167, %c0_168, %c0_169] : memref<16x64x1xbf16, #tpu.memory_space<vmem>>, vector<1x64x1xbf16>
    %259 = vector.shape_cast %258 : vector<1x64x1xbf16> to vector<64x1xbf16>
    %cst_170 = arith.constant dense<0.000000e+00> : vector<2x1xf32>
    %260 = tpu.matmul %257, %259, %cst_170 {dimension_numbers = #tpu.dot_dimension_numbers<[1], [0], [0], [1], [0, 0, 1, 1], [], []>} : vector<2x64xbf16>, vector<64x1xbf16>, vector<2x1xf32> -> vector<2x1xf32>
    %261 = arith.addf %256, %260 : vector<2x1xf32>
    %262 = vector.extract_strided_slice %240 {offsets = [8, 0], sizes = [2, 64], strides = [1, 1]} : vector<32x64xbf16> to vector<2x64xbf16>
    %c4_171 = arith.constant 4 : index
    %c0_172 = arith.constant 0 : index
    %c0_173 = arith.constant 0 : index
    %263 = vector.load %arg14[%c4_171, %c0_172, %c0_173] : memref<16x64x1xbf16, #tpu.memory_space<vmem>>, vector<1x64x1xbf16>
    %264 = vector.shape_cast %263 : vector<1x64x1xbf16> to vector<64x1xbf16>
    %cst_174 = arith.constant dense<0.000000e+00> : vector<2x1xf32>
    %265 = tpu.matmul %262, %264, %cst_174 {dimension_numbers = #tpu.dot_dimension_numbers<[1], [0], [0], [1], [0, 0, 1, 1], [], []>} : vector<2x64xbf16>, vector<64x1xbf16>, vector<2x1xf32> -> vector<2x1xf32>
    %266 = arith.addf %261, %265 : vector<2x1xf32>
    %267 = vector.extract_strided_slice %240 {offsets = [10, 0], sizes = [2, 64], strides = [1, 1]} : vector<32x64xbf16> to vector<2x64xbf16>
    %c5_175 = arith.constant 5 : index
    %c0_176 = arith.constant 0 : index
    %c0_177 = arith.constant 0 : index
    %268 = vector.load %arg14[%c5_175, %c0_176, %c0_177] : memref<16x64x1xbf16, #tpu.memory_space<vmem>>, vector<1x64x1xbf16>
    %269 = vector.shape_cast %268 : vector<1x64x1xbf16> to vector<64x1xbf16>
    %cst_178 = arith.constant dense<0.000000e+00> : vector<2x1xf32>
    %270 = tpu.matmul %267, %269, %cst_178 {dimension_numbers = #tpu.dot_dimension_numbers<[1], [0], [0], [1], [0, 0, 1, 1], [], []>} : vector<2x64xbf16>, vector<64x1xbf16>, vector<2x1xf32> -> vector<2x1xf32>
    %271 = arith.addf %266, %270 : vector<2x1xf32>
    %272 = vector.extract_strided_slice %240 {offsets = [12, 0], sizes = [2, 64], strides = [1, 1]} : vector<32x64xbf16> to vector<2x64xbf16>
    %c6_179 = arith.constant 6 : index
    %c0_180 = arith.constant 0 : index
    %c0_181 = arith.constant 0 : index
    %273 = vector.load %arg14[%c6_179, %c0_180, %c0_181] : memref<16x64x1xbf16, #tpu.memory_space<vmem>>, vector<1x64x1xbf16>
    %274 = vector.shape_cast %273 : vector<1x64x1xbf16> to vector<64x1xbf16>
    %cst_182 = arith.constant dense<0.000000e+00> : vector<2x1xf32>
    %275 = tpu.matmul %272, %274, %cst_182 {dimension_numbers = #tpu.dot_dimension_numbers<[1], [0], [0], [1], [0, 0, 1, 1], [], []>} : vector<2x64xbf16>, vector<64x1xbf16>, vector<2x1xf32> -> vector<2x1xf32>
    %276 = arith.addf %271, %275 : vector<2x1xf32>
    %277 = vector.extract_strided_slice %240 {offsets = [14, 0], sizes = [2, 64], strides = [1, 1]} : vector<32x64xbf16> to vector<2x64xbf16>
    %c7_183 = arith.constant 7 : index
    %c0_184 = arith.constant 0 : index
    %c0_185 = arith.constant 0 : index
    %278 = vector.load %arg14[%c7_183, %c0_184, %c0_185] : memref<16x64x1xbf16, #tpu.memory_space<vmem>>, vector<1x64x1xbf16>
    %279 = vector.shape_cast %278 : vector<1x64x1xbf16> to vector<64x1xbf16>
    %cst_186 = arith.constant dense<0.000000e+00> : vector<2x1xf32>
    %280 = tpu.matmul %277, %279, %cst_186 {dimension_numbers = #tpu.dot_dimension_numbers<[1], [0], [0], [1], [0, 0, 1, 1], [], []>} : vector<2x64xbf16>, vector<64x1xbf16>, vector<2x1xf32> -> vector<2x1xf32>
    %281 = arith.addf %276, %280 : vector<2x1xf32>
    %282 = vector.extract_strided_slice %240 {offsets = [16, 0], sizes = [2, 64], strides = [1, 1]} : vector<32x64xbf16> to vector<2x64xbf16>
    %c8_187 = arith.constant 8 : index
    %c0_188 = arith.constant 0 : index
    %c0_189 = arith.constant 0 : index
    %283 = vector.load %arg14[%c8_187, %c0_188, %c0_189] : memref<16x64x1xbf16, #tpu.memory_space<vmem>>, vector<1x64x1xbf16>
    %284 = vector.shape_cast %283 : vector<1x64x1xbf16> to vector<64x1xbf16>
    %cst_190 = arith.constant dense<0.000000e+00> : vector<2x1xf32>
    %285 = tpu.matmul %282, %284, %cst_190 {dimension_numbers = #tpu.dot_dimension_numbers<[1], [0], [0], [1], [0, 0, 1, 1], [], []>} : vector<2x64xbf16>, vector<64x1xbf16>, vector<2x1xf32> -> vector<2x1xf32>
    %286 = arith.addf %281, %285 : vector<2x1xf32>
    %287 = vector.extract_strided_slice %240 {offsets = [18, 0], sizes = [2, 64], strides = [1, 1]} : vector<32x64xbf16> to vector<2x64xbf16>
    %c9_191 = arith.constant 9 : index
    %c0_192 = arith.constant 0 : index
    %c0_193 = arith.constant 0 : index
    %288 = vector.load %arg14[%c9_191, %c0_192, %c0_193] : memref<16x64x1xbf16, #tpu.memory_space<vmem>>, vector<1x64x1xbf16>
    %289 = vector.shape_cast %288 : vector<1x64x1xbf16> to vector<64x1xbf16>
    %cst_194 = arith.constant dense<0.000000e+00> : vector<2x1xf32>
    %290 = tpu.matmul %287, %289, %cst_194 {dimension_numbers = #tpu.dot_dimension_numbers<[1], [0], [0], [1], [0, 0, 1, 1], [], []>} : vector<2x64xbf16>, vector<64x1xbf16>, vector<2x1xf32> -> vector<2x1xf32>
    %291 = arith.addf %286, %290 : vector<2x1xf32>
    %292 = vector.extract_strided_slice %240 {offsets = [20, 0], sizes = [2, 64], strides = [1, 1]} : vector<32x64xbf16> to vector<2x64xbf16>
    %c10_195 = arith.constant 10 : index
    %c0_196 = arith.constant 0 : index
    %c0_197 = arith.constant 0 : index
    %293 = vector.load %arg14[%c10_195, %c0_196, %c0_197] : memref<16x64x1xbf16, #tpu.memory_space<vmem>>, vector<1x64x1xbf16>
    %294 = vector.shape_cast %293 : vector<1x64x1xbf16> to vector<64x1xbf16>
    %cst_198 = arith.constant dense<0.000000e+00> : vector<2x1xf32>
    %295 = tpu.matmul %292, %294, %cst_198 {dimension_numbers = #tpu.dot_dimension_numbers<[1], [0], [0], [1], [0, 0, 1, 1], [], []>} : vector<2x64xbf16>, vector<64x1xbf16>, vector<2x1xf32> -> vector<2x1xf32>
    %296 = arith.addf %291, %295 : vector<2x1xf32>
    %297 = vector.extract_strided_slice %240 {offsets = [22, 0], sizes = [2, 64], strides = [1, 1]} : vector<32x64xbf16> to vector<2x64xbf16>
    %c11_199 = arith.constant 11 : index
    %c0_200 = arith.constant 0 : index
    %c0_201 = arith.constant 0 : index
    %298 = vector.load %arg14[%c11_199, %c0_200, %c0_201] : memref<16x64x1xbf16, #tpu.memory_space<vmem>>, vector<1x64x1xbf16>
    %299 = vector.shape_cast %298 : vector<1x64x1xbf16> to vector<64x1xbf16>
    %cst_202 = arith.constant dense<0.000000e+00> : vector<2x1xf32>
    %300 = tpu.matmul %297, %299, %cst_202 {dimension_numbers = #tpu.dot_dimension_numbers<[1], [0], [0], [1], [0, 0, 1, 1], [], []>} : vector<2x64xbf16>, vector<64x1xbf16>, vector<2x1xf32> -> vector<2x1xf32>
    %301 = arith.addf %296, %300 : vector<2x1xf32>
    %302 = vector.extract_strided_slice %240 {offsets = [24, 0], sizes = [2, 64], strides = [1, 1]} : vector<32x64xbf16> to vector<2x64xbf16>
    %c12_203 = arith.constant 12 : index
    %c0_204 = arith.constant 0 : index
    %c0_205 = arith.constant 0 : index
    %303 = vector.load %arg14[%c12_203, %c0_204, %c0_205] : memref<16x64x1xbf16, #tpu.memory_space<vmem>>, vector<1x64x1xbf16>
    %304 = vector.shape_cast %303 : vector<1x64x1xbf16> to vector<64x1xbf16>
    %cst_206 = arith.constant dense<0.000000e+00> : vector<2x1xf32>
    %305 = tpu.matmul %302, %304, %cst_206 {dimension_numbers = #tpu.dot_dimension_numbers<[1], [0], [0], [1], [0, 0, 1, 1], [], []>} : vector<2x64xbf16>, vector<64x1xbf16>, vector<2x1xf32> -> vector<2x1xf32>
    %306 = arith.addf %301, %305 : vector<2x1xf32>
    %307 = vector.extract_strided_slice %240 {offsets = [26, 0], sizes = [2, 64], strides = [1, 1]} : vector<32x64xbf16> to vector<2x64xbf16>
    %c13_207 = arith.constant 13 : index
    %c0_208 = arith.constant 0 : index
    %c0_209 = arith.constant 0 : index
    %308 = vector.load %arg14[%c13_207, %c0_208, %c0_209] : memref<16x64x1xbf16, #tpu.memory_space<vmem>>, vector<1x64x1xbf16>
    %309 = vector.shape_cast %308 : vector<1x64x1xbf16> to vector<64x1xbf16>
    %cst_210 = arith.constant dense<0.000000e+00> : vector<2x1xf32>
    %310 = tpu.matmul %307, %309, %cst_210 {dimension_numbers = #tpu.dot_dimension_numbers<[1], [0], [0], [1], [0, 0, 1, 1], [], []>} : vector<2x64xbf16>, vector<64x1xbf16>, vector<2x1xf32> -> vector<2x1xf32>
    %311 = arith.addf %306, %310 : vector<2x1xf32>
    %312 = vector.extract_strided_slice %240 {offsets = [28, 0], sizes = [2, 64], strides = [1, 1]} : vector<32x64xbf16> to vector<2x64xbf16>
    %c14_211 = arith.constant 14 : index
    %c0_212 = arith.constant 0 : index
    %c0_213 = arith.constant 0 : index
    %313 = vector.load %arg14[%c14_211, %c0_212, %c0_213] : memref<16x64x1xbf16, #tpu.memory_space<vmem>>, vector<1x64x1xbf16>
    %314 = vector.shape_cast %313 : vector<1x64x1xbf16> to vector<64x1xbf16>
    %cst_214 = arith.constant dense<0.000000e+00> : vector<2x1xf32>
    %315 = tpu.matmul %312, %314, %cst_214 {dimension_numbers = #tpu.dot_dimension_numbers<[1], [0], [0], [1], [0, 0, 1, 1], [], []>} : vector<2x64xbf16>, vector<64x1xbf16>, vector<2x1xf32> -> vector<2x1xf32>
    %316 = arith.addf %311, %315 : vector<2x1xf32>
    %317 = vector.extract_strided_slice %240 {offsets = [30, 0], sizes = [2, 64], strides = [1, 1]} : vector<32x64xbf16> to vector<2x64xbf16>
    %c15_215 = arith.constant 15 : index
    %c0_216 = arith.constant 0 : index
    %c0_217 = arith.constant 0 : index
    %318 = vector.load %arg14[%c15_215, %c0_216, %c0_217] : memref<16x64x1xbf16, #tpu.memory_space<vmem>>, vector<1x64x1xbf16>
    %319 = vector.shape_cast %318 : vector<1x64x1xbf16> to vector<64x1xbf16>
    %cst_218 = arith.constant dense<0.000000e+00> : vector<2x1xf32>
    %320 = tpu.matmul %317, %319, %cst_218 {dimension_numbers = #tpu.dot_dimension_numbers<[1], [0], [0], [1], [0, 0, 1, 1], [], []>} : vector<2x64xbf16>, vector<64x1xbf16>, vector<2x1xf32> -> vector<2x1xf32>
    %321 = arith.addf %316, %320 : vector<2x1xf32>
    %c0_219 = arith.constant 0 : index
    %c0_220 = arith.constant 0 : index
    %322 = vector.load %arg15[%c0_219, %c0_220] : memref<1x1xf32, #tpu.memory_space<vmem>>, vector<1x1xf32>
    %323 = vector.broadcast %322 : vector<1x1xf32> to vector<2x1xf32>
    %324 = arith.addf %321, %323 : vector<2x1xf32>
    %cst_221 = arith.constant 0.000000e+00 : f32
    %325 = vector.broadcast %cst_221 : f32 to vector<2x1xf32>
    %326 = arith.subf %325, %324 : vector<2x1xf32>
    %327 = math.exp %326 : vector<2x1xf32>
    %cst_222 = arith.constant 1.000000e+00 : f32
    %328 = vector.broadcast %cst_222 : f32 to vector<2x1xf32>
    %329 = arith.addf %328, %327 : vector<2x1xf32>
    %cst_223 = arith.constant 1.000000e+00 : f32
    %330 = vector.broadcast %cst_223 : f32 to vector<2x1xf32>
    %331 = arith.divf %330, %329 : vector<2x1xf32>
    %c0_224 = arith.constant 0 : index
    %c0_225 = arith.constant 0 : index
    %332 = vector.load %arg16[%c0_224, %c0_225] : memref<2x1xf32, #tpu.memory_space<vmem>>, vector<2x1xf32>
    tpu.vector_store %arg16[%c0_224, %c0_225], %331 {strides = array<i32>} : memref<2x1xf32, #tpu.memory_space<vmem>>, vector<2x1xf32>,
    return
  }
}

</mosaic_0001>

<bundles_post_ra>
// kernel: discriminator_forward.1
= control target key start
LH: loop header
LB: loop body
LE: loop exit
PB: predicated region body
PF: predicated region fallthrough
CT: control target
= control target key end

     0   :  { %vm295_vm0 = vcmask 130048   ;;  %v15652_v23 = vmov 0   ;;  %vm6183_vm1 = vcmask 1043456   ;;  %vm6158_vm2 = vcmask 64512   ;;  %s19202_s1 = inlined_call_operand.vmem [shape: bf16[16,8], index: 1, kind: input, shape index: {}]   ;;  %s19203_s0 = inlined_call_operand.vmem [shape: bf16[512,16], index: 0, kind: input, shape index: {}]   ;;  %s19204_s3 = inlined_call_operand.vmem [shape: bf16[2048,512], index: 3, kind: input, shape index: {}]   ;;  %s19205_s2 = inlined_call_operand.vmem [shape: f32[1,8], index: 2, kind: input, shape index: {}]   ;;  %s19206_s4 = inlined_call_operand.vmem [shape: bf16[16,8,32], index: 4, kind: input, shape index: {}]   ;;  %s19207_s5 = inlined_call_operand.vmem [shape: f32[1,32], index: 5, kind: input, shape index: {}, may-alias: {5,7}]   ;;  %s19208_s8 = inlined_call_operand.vmem [shape: bf16[512,128], index: 8, kind: input, shape index: {}]   ;;  %s19209_s9 = inlined_call_operand.vmem [shape: bf16[16,32,64], index: 9, kind: input, shape index: {}]   ;;  %s19210_s6 = inlined_call_operand.vmem [shape: f32[1,32], index: 6, kind: input, shape index: {}]   ;;  %s19211_s7 = inlined_call_operand.vmem [shape: f32[1,32], index: 7, kind: input, shape index: {}, may-alias: {5,7}]   ;;  %s19212_s13 = inlined_call_operand.vmem [shape: bf16[32,32], index: 13, kind: input, shape index: {}]   ;;  %s19213_s14 = inlined_call_operand.vmem [shape: bf16[16,64,1], index: 14, kind: input, shape index: {}]   ;;  %s19214_s10 = inlined_call_operand.vmem [shape: f32[1,64], index: 10, kind: input, shape index: {}, may-alias: {10,12}]   ;;  %s19215_s11 = inlined_call_operand.vmem [shape: f32[1,64], index: 11, kind: input, shape index: {}]   ;;  %s19216_s12 = inlined_call_operand.vmem [shape: f32[1,64], index: 12, kind: input, shape index: {}, may-alias: {10,12}]   ;;  %s19217_s15 = inlined_call_operand.<no memory space> [shape: f32[1,1], index: 15, kind: input, shape index: {}]   ;;  %s19218_s16 = inlined_call_operand.vmem [shape: f32[2,1], index: 16, kind: output, shape index: {}]  }
   0x1   :  { %19219 = sst [smem:[#allocation67_spill]] %s19202_s1  ;;  %v14713_v1 = vld [vmem:[%s19203_s0] sm:$0xff]   ;;  %v14714_v2 = vld [vmem:[%s19203_s0 + $0x8] sm:$0xff]   ;;  %v14715_v3 = vld [vmem:[%s19203_s0 + $0x10] sm:$0xff]   ;;  %14031 = vmatprep.subr.bf16.mxu1 %v15652_v23  ;;  %vm8421_vm3 = vcmask 261120   ;;  %vm10413_vm4 = vcmask 523264  }
   0x2   :  { %s19220_s23 = sld [smem:[#allocation67_spill]]  ;;  %13271 = vmatprep.mubr.msk.bf16.mxu0 %vm295_vm0, %v14713_v1  ;;  %v14716_v4 = vld [vmem:[%s19203_s0 + $0x18] sm:$0xff]   ;;  %v14717_v5 = vld [vmem:[%s19203_s0 + $0x20] sm:$0xff]   ;;  %v14718_v6 = vld [vmem:[%s19203_s0 + $0x28] sm:$0xff]   ;;  %vm15654_vm5 = vmmov 0   ;;  %vm11812_vm6 = vcmask 1024  }
   0x3   :  { %v14719_v7 = vld [vmem:[%s19203_s0 + $0x30] sm:$0xff]   ;;  %v14720_v8 = vld [vmem:[%s19203_s0 + $0x38] sm:$0xff]   ;;  %v14721_v9 = vld [vmem:[%s19203_s0 + $0x40] sm:$0xff]  }
   0x4   :  { %v14722_v10 = vld [vmem:[%s19203_s0 + $0x48] sm:$0xff]   ;;  %v14723_v11 = vld [vmem:[%s19203_s0 + $0x50] sm:$0xff]   ;;  %v14724_v12 = vld [vmem:[%s19203_s0 + $0x58] sm:$0xff]  }
   0x5   :  { %v14725_v13 = vld [vmem:[%s19203_s0 + $0x60] sm:$0xff]   ;;  %v14726_v14 = vld [vmem:[%s19203_s0 + $0x68] sm:$0xff]   ;;  %v14727_v15 = vld [vmem:[%s19203_s0 + $0x70] sm:$0xff]  }
   0x6   :  { %v14728_v16 = vld [vmem:[%s19203_s0 + $0x78] sm:$0xff]   ;;  %v14729_v17 = vld [vmem:[%s19203_s0 + $0x80] sm:$0xff]   ;;  %v14730_v18 = vld [vmem:[%s19203_s0 + $0x88] sm:$0xff]  }
   0x7   :  { %v14731_v19 = vld [vmem:[%s19203_s0 + $0x90] sm:$0xff]   ;;  %v14732_v20 = vld [vmem:[%s19203_s0 + $0x98] sm:$0xff]   ;;  %v14733_v21 = vld [vmem:[%s19203_s0 + $0xa0] sm:$0xff]  }
   0x8   :  { %v14712_v0 = vld [vmem:[%s19220_s23] sm:$0xff]   ;;  %v14734_v22 = vld [vmem:[%s19203_s0 + $0xa8] sm:$0xff]   ;;  %v14735_v24 = vld [vmem:[%s19203_s0 + $0xb0] sm:$0xff]  }
   0x9   :  { %13269 = vmatprep.subr.bf16.mxu0 %v14712_v0  ;;  %v14736_v25 = vld [vmem:[%s19203_s0 + $0xb8] sm:$0xff]   ;;  %v14739_v26 = vld [vmem:[%s19204_s3 + $0x764] ss:$16 sps:$4 sm:$0xff]   ;;  %v14756_v28 = vld [vmem:[%s19203_s0 + $0xc8] sm:$0xff]  }
   0xa   :  { %13270 = vmatpush3.bf16.msra.mxu0 %v14712_v0  ;;  %4417 = vmatprep.mubr.bf16.mxu1 %v14739_v26  ;;  %v14755_v27 = vld [vmem:[%s19203_s0 + $0xc0] sm:$0xff]  }
   0xb   :  { %3913 = vmatprep.subr.bf16.mxu0 %v15652_v23  ;;  %v15855_v29 = vld [vmem:[%s19205_s2] ss:$0 sm:$0xff] }
   0xd   :  { %13272 = vmatmul.mubr.msk.bf16.vlgmr.msra.gmra.mrb[0].mxu0 %vm295_vm0, %v14714_v2 }
   0xe   :  { %13275 = vmatprep.mubr.msk.bf16.mxu0 %vm295_vm0, %v14715_v3 }
  0x15   :  { %13276 = vmatmul.mubr.msk.bf16.gmra.mrb[4].mxu0 %vm295_vm0, %v14716_v4 }
  0x16   :  { %13279 = vmatprep.mubr.msk.bf16.mxu0 %vm295_vm0, %v14717_v5 }
  0x1d   :  { %13280 = vmatmul.mubr.msk.bf16.gmra.mrb[8].mxu0 %vm295_vm0, %v14718_v6 }
  0x1e   :  { %13283 = vmatprep.mubr.msk.bf16.mxu0 %vm295_vm0, %v14719_v7 }
  0x25   :  { %13284 = vmatmul.mubr.msk.bf16.gmra.mrb[12].mxu0 %vm295_vm0, %v14720_v8 }
  0x26   :  { %13287 = vmatprep.mubr.msk.bf16.mxu0 %vm295_vm0, %v14721_v9 }
  0x2d   :  { %13288 = vmatmul.mubr.msk.bf16.gmra.mrb[16].mxu0 %vm295_vm0, %v14722_v10 }
  0x2e   :  { %13291 = vmatprep.mubr.msk.bf16.mxu0 %vm295_vm0, %v14723_v11 }
  0x35   :  { %13292 = vmatmul.mubr.msk.bf16.gmra.mrb[20].mxu0 %vm295_vm0, %v14724_v12 }
  0x36   :  { %13295 = vmatprep.mubr.msk.bf16.mxu0 %vm295_vm0, %v14725_v13 }
  0x3d   :  { %13296 = vmatmul.mubr.msk.bf16.gmra.mrb[24].mxu0 %vm295_vm0, %v14726_v14 }
  0x3e   :  { %13299 = vmatprep.mubr.msk.bf16.mxu0 %vm295_vm0, %v14727_v15 }
  0x45   :  { %13300 = vmatmul.mubr.msk.bf16.gmra.mrb[28].mxu0 %vm295_vm0, %v14728_v16 }
  0x46   :  { %13303 = vmatprep.mubr.msk.bf16.mxu0 %vm295_vm0, %v14729_v17 }
  0x4d   :  { %13304 = vmatmul.mubr.msk.bf16.gmra.mrb[32].mxu0 %vm295_vm0, %v14730_v18 }
  0x4e   :  { %13307 = vmatprep.mubr.msk.bf16.mxu0 %vm295_vm0, %v14731_v19 }
  0x55   :  { %13308 = vmatmul.mubr.msk.bf16.gmra.mrb[36].mxu0 %vm295_vm0, %v14732_v20 }
  0x56   :  { %13311 = vmatprep.mubr.msk.bf16.mxu0 %vm295_vm0, %v14733_v21 }
  0x5d   :  { %13312 = vmatmul.mubr.msk.bf16.gmra.mrb[40].mxu0 %vm295_vm0, %v14734_v22 }
  0x5e   :  { %13315 = vmatprep.mubr.msk.bf16.mxu0 %vm295_vm0, %v14735_v24 }
  0x65   :  { %13316 = vmatmul.mubr.msk.bf16.gmra.mrb[44].mxu0 %vm295_vm0, %v14736_v25 }
  0x66   :  { %13319 = vmatprep.mubr.msk.bf16.mxu0 %vm295_vm0, %v14755_v27 }
  0x6d   :  { %13320 = vmatmul.mubr.msk.bf16.gmra.mrb[48].mxu0 %vm295_vm0, %v14756_v28 }
  0xe0   :  { %v13273_v30 = vpop.f32.mrb[0].mxu0 }
  0xe1   :  { %v435_v31 = vadd.f32 %v13273_v30, %v15855_v29  ;;  %v426_v32 = vpop.f32.mrb[1].mxu0 }
  0xe2   :  { %v427_v33 = vadd.f32 %v15855_v29, %v426_v32  ;;  %v13274_v34 = vpop.f32.mrb[2].mxu0 }
  0xe3   :  { %v683_v35 = vmul.f32 0.2, %v435_v31  ;;  %v438_v36 = vadd.f32 %v13274_v34, %v15855_v29  ;;  %v429_v37 = vpop.f32.mrb[3].mxu0 }
  0xe4   :  { %v681_v38 = vmul.f32 0.2, %v427_v33  ;;  %v430_v39 = vadd.f32 %v15855_v29, %v429_v37 }
  0xe5   :  { %v684_v40 = vmul.f32 0.2, %v438_v36  ;;  %v747_v42 = vmax.f32 %v435_v31, %v683_v35 }
  0xe6   :  { %v682_v41 = vmul.f32 0.2, %v430_v39  ;;  %v745_v44 = vmax.f32 %v427_v33, %v681_v38 }
  0xe7   :  { %v748_v43 = vmax.f32 %v438_v36, %v684_v40 }
  0xe8   :  { %v746_v45 = vmax.f32 %v430_v39, %v682_v41  ;;  %v13277_v46 = vpop.f32.mrb[4].mxu0 }
  0xe9   :  { %v451_v47 = vadd.f32 %v13277_v46, %v15855_v29  ;;  %v442_v48 = vpop.f32.mrb[5].mxu0  ;;  %v810_v49 = vpack.c.bf16 %v748_v43, %v747_v42 }
  0xea   :  { %v443_v50 = vadd.f32 %v15855_v29, %v442_v48  ;;  %v13278_v51 = vpop.f32.mrb[6].mxu0  ;;  %v809_v52 = vpack.c.bf16 %v746_v45, %v745_v44 }
  0xeb   :  { %v687_v53 = vmul.f32 0.2, %v451_v47  ;;  %v454_v54 = vadd.f32 %v13278_v51, %v15855_v29  ;;  %v445_v55 = vpop.f32.mrb[7].mxu0 }
  0xec   :  { %v685_v56 = vmul.f32 0.2, %v443_v50  ;;  %v446_v57 = vadd.f32 %v15855_v29, %v445_v55  ;;  %3914 = vmatpush1.bf16.msra.mxu0 %v809_v52  ;;  %14047 = vmatpush1.bf16.msra.mxu1 %v809_v52 }
  0xed   :  { %v688_v58 = vmul.f32 0.2, %v454_v54  ;;  %3915 = vmatprep.subr.bf16.mxu0 %v15652_v23  ;;  %14032 = vmatprep.subr.bf16.mxu1 %v15652_v23  ;;  %v751_v60 = vmax.f32 %v451_v47, %v687_v53 }
  0xee   :  { %v686_v59 = vmul.f32 0.2, %v446_v57  ;;  %v749_v62 = vmax.f32 %v443_v50, %v685_v56 }
  0xef   :  { %v752_v61 = vmax.f32 %v454_v54, %v688_v58 }
  0xf0   :  { %v750_v63 = vmax.f32 %v446_v57, %v686_v59  ;;  %v13281_v0 = vpop.f32.mrb[8].mxu0  ;;  %3916 = vmatpush1.bf16.msra.mxu0 %v810_v49  ;;  %14048 = vmatpush1.bf16.msra.mxu1 %v810_v49 }
  0xf1   :  { %v467_v1 = vadd.f32 %v13281_v0, %v15855_v29  ;;  %v458_v2 = vpop.f32.mrb[9].mxu0  ;;  %3917 = vmatprep.subr.bf16.mxu0 %v15652_v23  ;;  %14033 = vmatprep.subr.bf16.mxu1 %v15652_v23  ;;  %v812_v3 = vpack.c.bf16 %v752_v61, %v751_v60 }
  0xf2   :  { %v459_v4 = vadd.f32 %v15855_v29, %v458_v2  ;;  %v13282_v5 = vpop.f32.mrb[10].mxu0  ;;  %v811_v6 = vpack.c.bf16 %v750_v63, %v749_v62 }
  0xf3   :  { %v691_v7 = vmul.f32 0.2, %v467_v1  ;;  %v470_v8 = vadd.f32 %v13282_v5, %v15855_v29  ;;  %v461_v9 = vpop.f32.mrb[11].mxu0 }
  0xf4   :  { %v689_v10 = vmul.f32 0.2, %v459_v4  ;;  %v462_v11 = vadd.f32 %v15855_v29, %v461_v9  ;;  %3918 = vmatpush1.bf16.msra.mxu0 %v811_v6  ;;  %14049 = vmatpush1.bf16.msra.mxu1 %v811_v6 }
  0xf5   :  { %v692_v12 = vmul.f32 0.2, %v470_v8  ;;  %3919 = vmatprep.subr.bf16.mxu0 %v15652_v23  ;;  %14034 = vmatprep.subr.bf16.mxu1 %v15652_v23  ;;  %v755_v14 = vmax.f32 %v467_v1, %v691_v7 }
  0xf6   :  { %v690_v13 = vmul.f32 0.2, %v462_v11  ;;  %v753_v16 = vmax.f32 %v459_v4, %v689_v10 }
  0xf7   :  { %v756_v15 = vmax.f32 %v470_v8, %v692_v12 }
  0xf8   :  { %v754_v17 = vmax.f32 %v462_v11, %v690_v13  ;;  %v13285_v18 = vpop.f32.mrb[12].mxu0  ;;  %3920 = vmatpush1.bf16.msra.mxu0 %v812_v3  ;;  %14050 = vmatpush1.bf16.msra.mxu1 %v812_v3 }
  0xf9   :  { %v483_v19 = vadd.f32 %v13285_v18, %v15855_v29  ;;  %v474_v20 = vpop.f32.mrb[13].mxu0  ;;  %3921 = vmatprep.subr.bf16.mxu0 %v15652_v23  ;;  %14035 = vmatprep.subr.bf16.mxu1 %v15652_v23  ;;  %v814_v21 = vpack.c.bf16 %v756_v15, %v755_v14 }
  0xfa   :  { %v475_v22 = vadd.f32 %v15855_v29, %v474_v20  ;;  %v13286_v24 = vpop.f32.mrb[14].mxu0  ;;  %v813_v25 = vpack.c.bf16 %v754_v17, %v753_v16 }
  0xfb   :  { %v695_v26 = vmul.f32 0.2, %v483_v19  ;;  %v486_v27 = vadd.f32 %v13286_v24, %v15855_v29  ;;  %v477_v28 = vpop.f32.mrb[15].mxu0 }
  0xfc   :  { %v693_v30 = vmul.f32 0.2, %v475_v22  ;;  %v478_v31 = vadd.f32 %v15855_v29, %v477_v28  ;;  %3922 = vmatpush1.bf16.msra.mxu0 %v813_v25  ;;  %14051 = vmatpush1.bf16.msra.mxu1 %v813_v25 }
  0xfd   :  { %v696_v32 = vmul.f32 0.2, %v486_v27  ;;  %3923 = vmatprep.subr.bf16.mxu0 %v15652_v23  ;;  %14036 = vmatprep.subr.bf16.mxu1 %v15652_v23  ;;  %v759_v34 = vmax.f32 %v483_v19, %v695_v26 }
  0xfe   :  { %v694_v33 = vmul.f32 0.2, %v478_v31  ;;  %v757_v36 = vmax.f32 %v475_v22, %v693_v30 }
  0xff   :  { %v760_v35 = vmax.f32 %v486_v27, %v696_v32 }
 0x100   :  { %v758_v37 = vmax.f32 %v478_v31, %v694_v33  ;;  %v13289_v38 = vpop.f32.mrb[16].mxu0  ;;  %3924 = vmatpush1.bf16.msra.mxu0 %v814_v21  ;;  %14052 = vmatpush1.bf16.msra.mxu1 %v814_v21 }
 0x101   :  { %v499_v39 = vadd.f32 %v13289_v38, %v15855_v29  ;;  %v490_v40 = vpop.f32.mrb[17].mxu0  ;;  %3925 = vmatprep.subr.bf16.mxu0 %v15652_v23  ;;  %14037 = vmatprep.subr.bf16.mxu1 %v15652_v23  ;;  %v816_v41 = vpack.c.bf16 %v760_v35, %v759_v34 }
 0x102   :  { %v491_v42 = vadd.f32 %v15855_v29, %v490_v40  ;;  %v13290_v43 = vpop.f32.mrb[18].mxu0  ;;  %v815_v44 = vpack.c.bf16 %v758_v37, %v757_v36  ;;  %v14784_v40 = vld [vmem:[%s19203_s0 + $0xd0] sm:$0xff]  }
 0x103   :  { %v699_v45 = vmul.f32 0.2, %v499_v39  ;;  %v502_v46 = vadd.f32 %v13290_v43, %v15855_v29  ;;  %v493_v47 = vpop.f32.mrb[19].mxu0  ;;  %13323 = vmatprep.mubr.msk.bf16.mxu0 %vm295_vm0, %v14784_v40  ;;  %v14745_v40 = vld [vmem:[%s19204_s3 + $0x7a0] ss:$16 sps:$4 sm:$0xff]  }
 0x104   :  { %v697_v48 = vmul.f32 0.2, %v491_v42  ;;  %v494_v49 = vadd.f32 %v15855_v29, %v493_v47  ;;  %3926 = vmatpush1.bf16.msra.mxu0 %v815_v44  ;;  %14053 = vmatpush1.bf16.msra.mxu1 %v815_v44 }
 0x105   :  { %v700_v50 = vmul.f32 0.2, %v502_v46  ;;  %3927 = vmatprep.subr.bf16.mxu0 %v15652_v23  ;;  %14038 = vmatprep.subr.bf16.mxu1 %v15652_v23  ;;  %v763_v52 = vmax.f32 %v499_v39, %v699_v45 }
 0x106   :  { %v698_v51 = vmul.f32 0.2, %v494_v49  ;;  %v761_v54 = vmax.f32 %v491_v42, %v697_v48 }
 0x107   :  { %v764_v53 = vmax.f32 %v502_v46, %v700_v50 }
 0x108   :  { %v762_v55 = vmax.f32 %v494_v49, %v698_v51  ;;  %v13293_v56 = vpop.f32.mrb[20].mxu0  ;;  %3928 = vmatpush1.bf16.msra.mxu0 %v816_v41  ;;  %14054 = vmatpush1.bf16.msra.mxu1 %v816_v41  ;;  %v14785_v41 = vld [vmem:[%s19203_s0 + $0xd8] sm:$0xff]  }
 0x109   :  { %v515_v57 = vadd.f32 %v13293_v56, %v15855_v29  ;;  %v506_v58 = vpop.f32.mrb[21].mxu0  ;;  %3929 = vmatprep.subr.bf16.mxu0 %v15652_v23  ;;  %14039 = vmatprep.subr.bf16.mxu1 %v15652_v23  ;;  %v818_v59 = vpack.c.bf16 %v764_v53, %v763_v52 }
 0x10a   :  { %v507_v60 = vadd.f32 %v15855_v29, %v506_v58  ;;  %v13294_v61 = vpop.f32.mrb[22].mxu0  ;;  %v817_v62 = vpack.c.bf16 %v762_v55, %v761_v54  ;;  %13324 = vmatmul.mubr.msk.bf16.gmra.mrb[52].mxu0 %vm295_vm0, %v14785_v41 }
 0x10b   :  { %v703_v63 = vmul.f32 0.2, %v515_v57  ;;  %v518_v0 = vadd.f32 %v13294_v61, %v15855_v29  ;;  %v509_v1 = vpop.f32.mrb[23].mxu0 }
 0x10c   :  { %v701_v2 = vmul.f32 0.2, %v507_v60  ;;  %v510_v3 = vadd.f32 %v15855_v29, %v509_v1  ;;  %3930 = vmatpush1.bf16.msra.mxu0 %v817_v62  ;;  %14055 = vmatpush1.bf16.msra.mxu1 %v817_v62 }
 0x10d   :  { %v704_v4 = vmul.f32 0.2, %v518_v0  ;;  %3931 = vmatprep.subr.bf16.mxu0 %v15652_v23  ;;  %14040 = vmatprep.subr.bf16.mxu1 %v15652_v23  ;;  %v767_v6 = vmax.f32 %v515_v57, %v703_v63 }
 0x10e   :  { %v702_v5 = vmul.f32 0.2, %v510_v3  ;;  %v765_v8 = vmax.f32 %v507_v60, %v701_v2 }
 0x10f   :  { %v768_v7 = vmax.f32 %v518_v0, %v704_v4  ;;  %v14737_v0 = vld [vmem:[%s19204_s3 + $0x760] ss:$16 sps:$4 sm:$0xff]  }
 0x110   :  { %v766_v9 = vmax.f32 %v510_v3, %v702_v5  ;;  %v13297_v10 = vpop.f32.mrb[24].mxu0  ;;  %3932 = vmatpush1.bf16.msra.mxu0 %v818_v59  ;;  %14056 = vmatpush1.bf16.msra.mxu1 %v818_v59  ;;  %v14740_v3 = vld [vmem:[%s19204_s3 + $0x784] ss:$16 sps:$4 sm:$0xff]  }
 0x111   :  { %v531_v11 = vadd.f32 %v13297_v10, %v15855_v29  ;;  %v522_v12 = vpop.f32.mrb[25].mxu0  ;;  %3933 = vmatprep.subr.bf16.mxu0 %v15652_v23  ;;  %14041 = vmatprep.subr.bf16.mxu1 %v15652_v23  ;;  %v820_v13 = vpack.c.bf16 %v768_v7, %v767_v6 }
 0x112   :  { %v523_v14 = vadd.f32 %v15855_v29, %v522_v12  ;;  %v13298_v15 = vpop.f32.mrb[26].mxu0  ;;  %v819_v16 = vpack.c.bf16 %v766_v9, %v765_v8 }
 0x113   :  { %v707_v17 = vmul.f32 0.2, %v531_v11  ;;  %v534_v18 = vadd.f32 %v13298_v15, %v15855_v29  ;;  %v525_v19 = vpop.f32.mrb[27].mxu0 }
 0x114   :  { %v705_v20 = vmul.f32 0.2, %v523_v14  ;;  %v526_v21 = vadd.f32 %v15855_v29, %v525_v19  ;;  %3934 = vmatpush1.bf16.msra.mxu0 %v819_v16  ;;  %14057 = vmatpush1.bf16.msra.mxu1 %v819_v16 }
 0x115   :  { %v708_v22 = vmul.f32 0.2, %v534_v18  ;;  %3935 = vmatprep.subr.bf16.mxu0 %v15652_v23  ;;  %14042 = vmatprep.subr.bf16.mxu1 %v15652_v23  ;;  %v771_v25 = vmax.f32 %v531_v11, %v707_v17 }
 0x116   :  { %v706_v24 = vmul.f32 0.2, %v526_v21  ;;  %v769_v27 = vmax.f32 %v523_v14, %v705_v20 }
 0x117   :  { %v772_v26 = vmax.f32 %v534_v18, %v708_v22  ;;  %v14742_v18 = vld [vmem:[%s19204_s3 + $0x780] ss:$16 sps:$4 sm:$0xff]  }
 0x118   :  { %v770_v28 = vmax.f32 %v526_v21, %v706_v24  ;;  %v13301_v30 = vpop.f32.mrb[28].mxu0  ;;  %3936 = vmatpush1.bf16.msra.mxu0 %v820_v13  ;;  %14058 = vmatpush1.bf16.msra.mxu1 %v820_v13  ;;  %v14743_v21 = vld [vmem:[%s19204_s3 + $0x7a4] ss:$16 sps:$4 sm:$0xff]  }
 0x119   :  { %v547_v31 = vadd.f32 %v13301_v30, %v15855_v29  ;;  %v538_v32 = vpop.f32.mrb[29].mxu0  ;;  %3937 = vmatprep.subr.bf16.mxu0 %v15652_v23  ;;  %14043 = vmatprep.subr.bf16.mxu1 %v15652_v23  ;;  %v822_v33 = vpack.c.bf16 %v772_v26, %v771_v25 }
 0x11a   :  { %v539_v34 = vadd.f32 %v15855_v29, %v538_v32  ;;  %v13302_v35 = vpop.f32.mrb[30].mxu0  ;;  %v821_v36 = vpack.c.bf16 %v770_v28, %v769_v27 }
 0x11b   :  { %v711_v37 = vmul.f32 0.2, %v547_v31  ;;  %v550_v38 = vadd.f32 %v13302_v35, %v15855_v29  ;;  %v541_v39 = vpop.f32.mrb[31].mxu0 }
 0x11c   :  { %v709_v42 = vmul.f32 0.2, %v539_v34  ;;  %v542_v43 = vadd.f32 %v15855_v29, %v541_v39  ;;  %3938 = vmatpush1.bf16.msra.mxu0 %v821_v36  ;;  %14059 = vmatpush1.bf16.msra.mxu1 %v821_v36 }
 0x11d   :  { %v712_v44 = vmul.f32 0.2, %v550_v38  ;;  %3939 = vmatprep.subr.bf16.mxu0 %v15652_v23  ;;  %14044 = vmatprep.subr.bf16.mxu1 %v15652_v23  ;;  %v775_v46 = vmax.f32 %v547_v31, %v711_v37 }
 0x11e   :  { %v710_v45 = vmul.f32 0.2, %v542_v43  ;;  %v773_v48 = vmax.f32 %v539_v34, %v709_v42 }
 0x11f   :  { %v776_v47 = vmax.f32 %v550_v38, %v712_v44 }
 0x120   :  { %v774_v49 = vmax.f32 %v542_v43, %v710_v45  ;;  %v13305_v50 = vpop.f32.mrb[32].mxu0  ;;  %3940 = vmatpush1.bf16.msra.mxu0 %v822_v33  ;;  %14060 = vmatpush1.bf16.msra.mxu1 %v822_v33  ;;  %v14746_v43 = vld [vmem:[%s19204_s3 + $0x7c4] ss:$16 sps:$4 sm:$0xff]  }
 0x121   :  { %v563_v51 = vadd.f32 %v13305_v50, %v15855_v29  ;;  %v554_v52 = vpop.f32.mrb[33].mxu0  ;;  %3941 = vmatprep.subr.bf16.mxu0 %v15652_v23  ;;  %14045 = vmatprep.subr.bf16.mxu1 %v15652_v23  ;;  %v824_v53 = vpack.c.bf16 %v776_v47, %v775_v46  ;;  %v14749_v50 = vld [vmem:[%s19204_s3 + $0x7e4] ss:$16 sps:$4 sm:$0xff]  }
 0x122   :  { %v555_v54 = vadd.f32 %v15855_v29, %v554_v52  ;;  %v13306_v55 = vpop.f32.mrb[34].mxu0  ;;  %v823_v56 = vpack.c.bf16 %v774_v49, %v773_v48  ;;  %v14748_v49 = vld [vmem:[%s19204_s3 + $0x7c0] ss:$16 sps:$4 sm:$0xff]   ;;  %v14752_v52 = vld [vmem:[%s19204_s3 + $0x804] ss:$16 sps:$4 sm:$0xff]  }
 0x123   :  { %v715_v57 = vmul.f32 0.2, %v563_v51  ;;  %v566_v58 = vadd.f32 %v13306_v55, %v15855_v29  ;;  %v557_v59 = vpop.f32.mrb[35].mxu0  ;;  %v14759_v55 = vld [vmem:[%s19204_s3 + $0x820] ss:$16 sps:$4 sm:$0xff]  }
 0x124   :  { %v713_v60 = vmul.f32 0.2, %v555_v54  ;;  %v558_v61 = vadd.f32 %v15855_v29, %v557_v59  ;;  %3942 = vmatpush1.bf16.msra.mxu0 %v823_v56  ;;  %14061 = vmatpush1.bf16.msra.mxu1 %v823_v56  ;;  %v14760_v56 = vld [vmem:[%s19204_s3 + $0x844] ss:$16 sps:$4 sm:$0xff]   ;;  %v14762_v59 = vld [vmem:[%s19204_s3 + $0x840] ss:$16 sps:$4 sm:$0xff]  }
 0x125   :  { %v779_v62 = vmax.f32 %v563_v51, %v715_v57  ;;  %v716_v63 = vmul.f32 0.2, %v566_v58  ;;  %3943 = vmatprep.subr.bf16.mxu0 %v15652_v23  ;;  %14046 = vmatprep.subr.bf16.mxu1 %v15652_v23  ;;  %v14751_v51 = vld [vmem:[%s19204_s3 + $0x7e0] ss:$16 sps:$4 sm:$0xff]  }
 0x126   :  { %v777_v1 = vmax.f32 %v555_v54, %v713_v60  ;;  %v714_v2 = vmul.f32 0.2, %v558_v61  ;;  %v14757_v54 = vld [vmem:[%s19204_s3 + $0x824] ss:$16 sps:$4 sm:$0xff]  }
 0x127   :  { %v780_v4 = vmax.f32 %v566_v58, %v716_v63  ;;  %v14810_v57 = vld [vmem:[%s19203_s0 + $0xe0] sm:$0xff]   ;;  %v14811_v58 = vld [vmem:[%s19203_s0 + $0xe8] sm:$0xff]  }
 0x128   :  { %v778_v5 = vmax.f32 %v558_v61, %v714_v2  ;;  %3944 = vmatpush1.bf16.msra.mxu0 %v824_v53  ;;  %14062 = vmatpush1.bf16.msra.mxu1 %v824_v53  ;;  %v13309_v6 = vpop.f32.mrb[36].mxu0  ;;  %v14754_v53 = vld [vmem:[%s19204_s3 + $0x800] ss:$16 sps:$4 sm:$0xff]   ;;  %v14763_v60 = vld [vmem:[%s19204_s3 + $0x864] ss:$16 sps:$4 sm:$0xff]  }
 0x129   :  { %4970 = vmatprep.subr.bf16.mxu1 %v15652_v23  ;;  %v826_v7 = vpack.c.bf16 %v780_v4, %v779_v62  ;;  %v579_v8 = vadd.f32 %v13309_v6, %v15855_v29  ;;  %v570_v9 = vpop.f32.mrb[37].mxu0  ;;  %13327 = vmatprep.mubr.msk.bf16.mxu0 %vm295_vm0, %v14810_v57  ;;  %v14765_v61 = vld [vmem:[%s19204_s3 + $0x860] ss:$16 sps:$4 sm:$0xff]   ;;  %v14766_v62 = vld [vmem:[%s19204_s3 + $0x884] ss:$16 sps:$4 sm:$0xff]  }
 0x12a   :  { %v825_v10 = vpack.c.bf16 %v778_v5, %v777_v1  ;;  %v571_v11 = vadd.f32 %v15855_v29, %v570_v9  ;;  %v13310_v12 = vpop.f32.mrb[38].mxu0  ;;  %13328 = vmatmul.mubr.msk.bf16.gmra.mrb[56].mxu0 %vm295_vm0, %v14811_v58  ;;  %v14768_v1 = vld [vmem:[%s19204_s3 + $0x880] ss:$16 sps:$4 sm:$0xff]   ;;  %v14769_v5 = vld [vmem:[%s19204_s3 + $0x8a4] ss:$16 sps:$4 sm:$0xff]  }
 0x12b   :  { %4418 = vmatmul.mubr.bf16.vlgmr.msra.gmra.mrb[0].mxu1 %v14737_v0  ;;  %v719_v13 = vmul.f32 0.2, %v579_v8  ;;  %v582_v14 = vadd.f32 %v13310_v12, %v15855_v29  ;;  %v573_v15 = vpop.f32.mrb[39].mxu0 }
 0x12c   :  { %4971 = vmatpush1.bf16.msra.mxu1 %v825_v10  ;;  %4425 = vmatprep.mubr.bf16.mxu1 %v14740_v3  ;;  %v717_v16 = vmul.f32 0.2, %v571_v11  ;;  %v574_v17 = vadd.f32 %v15855_v29, %v573_v15  ;;  %v16014_v3 = vld [vmem:[%s19205_s2] ss:$0 sm:$0xff] }
 0x12d   :  { %4972 = vmatprep.subr.bf16.mxu1 %v15652_v23  ;;  %v783_v19 = vmax.f32 %v579_v8, %v719_v13  ;;  %v720_v20 = vmul.f32 0.2, %v582_v14 }
 0x12e   :  { %v781_v22 = vmax.f32 %v571_v11, %v717_v16  ;;  %v718_v24 = vmul.f32 0.2, %v574_v17  ;;  %v14771_v16 = vld [vmem:[%s19204_s3 + $0x8a0] ss:$16 sps:$4 sm:$0xff]  }
 0x12f   :  { %v784_v25 = vmax.f32 %v582_v14, %v720_v20  ;;  %v14772_v20 = vld [vmem:[%s19204_s3 + $0x8c4] ss:$16 sps:$4 sm:$0xff]  }
 0x130   :  { %4973 = vmatpush1.bf16.msra.mxu1 %v826_v7  ;;  %v782_v26 = vmax.f32 %v574_v17, %v718_v24  ;;  %v13313_v27 = vpop.f32.mrb[40].mxu0  ;;  %v14775_v24 = vld [vmem:[%s19204_s3 + $0x8e4] ss:$16 sps:$4 sm:$0xff]  }
 0x131   :  { %4974 = vmatprep.subr.bf16.mxu1 %v15652_v23  ;;  %v828_v28 = vpack.c.bf16 %v784_v25, %v783_v19  ;;  %v595_v30 = vadd.f32 %v13313_v27, %v15855_v29  ;;  %v586_v31 = vpop.f32.mrb[41].mxu0  ;;  %v14777_v25 = vld [vmem:[%s19204_s3 + $0x8e0] ss:$16 sps:$4 sm:$0xff]  }
 0x132   :  { %v827_v32 = vpack.c.bf16 %v782_v26, %v781_v22  ;;  %v587_v33 = vadd.f32 %v15855_v29, %v586_v31  ;;  %v13314_v34 = vpop.f32.mrb[42].mxu0  ;;  %v14774_v22 = vld [vmem:[%s19204_s3 + $0x8c0] ss:$16 sps:$4 sm:$0xff]   ;;  %v14778_v26 = vld [vmem:[%s19204_s3 + $0x904] ss:$16 sps:$4 sm:$0xff]  }
 0x133   :  { %4426 = vmatmul.mubr.bf16.gmra.mrb[4].mxu1 %v14742_v18  ;;  %v723_v35 = vmul.f32 0.2, %v595_v30  ;;  %v598_v36 = vadd.f32 %v13314_v34, %v15855_v29  ;;  %v589_v37 = vpop.f32.mrb[43].mxu0  ;;  %v14780_v27 = vld [vmem:[%s19204_s3 + $0x900] ss:$16 sps:$4 sm:$0xff]  }
 0x134   :  { %4433 = vmatprep.mubr.bf16.mxu1 %v14743_v21  ;;  %4975 = vmatpush1.bf16.msra.mxu1 %v827_v32  ;;  %v721_v38 = vmul.f32 0.2, %v587_v33  ;;  %v590_v39 = vadd.f32 %v15855_v29, %v589_v37  ;;  %v14786_v31 = vld [vmem:[%s19204_s3 + $0x944] ss:$16 sps:$4 sm:$0xff]   ;;  %v14788_v32 = vld [vmem:[%s19204_s3 + $0x940] ss:$16 sps:$4 sm:$0xff]  }
 0x135   :  { %4976 = vmatprep.subr.bf16.mxu1 %v15652_v23  ;;  %v787_v41 = vmax.f32 %v595_v30, %v723_v35  ;;  %v724_v42 = vmul.f32 0.2, %v598_v36  ;;  %v14783_v30 = vld [vmem:[%s19204_s3 + $0x920] ss:$16 sps:$4 sm:$0xff]   ;;  %v14840_v35 = vld [vmem:[%s19203_s0 + $0xf8] sm:$0xff]  }
 0x136   :  { %v785_v44 = vmax.f32 %v587_v33, %v721_v38  ;;  %v722_v45 = vmul.f32 0.2, %v590_v39  ;;  %v14789_v33 = vld [vmem:[%s19204_s3 + $0x964] ss:$16 sps:$4 sm:$0xff]  }
 0x137   :  { %v788_v46 = vmax.f32 %v598_v36, %v724_v42  ;;  %v14839_v34 = vld [vmem:[%s19203_s0 + $0xf0] sm:$0xff]  }
 0x138   :  { %4977 = vmatpush1.bf16.msra.mxu1 %v828_v28  ;;  %v786_v47 = vmax.f32 %v590_v39, %v722_v45  ;;  %v13317_v63 = vpop.f32.mrb[44].mxu0  ;;  %v14781_v28 = vld [vmem:[%s19204_s3 + $0x924] ss:$16 sps:$4 sm:$0xff]   ;;  %13331 = vmatprep.mubr.msk.bf16.mxu0 %vm295_vm0, %v14839_v34  ;;  %v14791_v36 = vld [vmem:[%s19204_s3 + $0x960] ss:$16 sps:$4 sm:$0xff]  }
 0x139   :  { %4978 = vmatprep.subr.bf16.mxu1 %v15652_v23  ;;  %v830_v29 = vpack.c.bf16 %v788_v46, %v787_v41  ;;  %v602_v0 = vpop.f32.mrb[45].mxu0  ;;  %v611_v11 = vadd.f32 %v16014_v3, %v13317_v63  ;;  %13332 = vmatmul.mubr.msk.bf16.gmra.mrb[60].mxu0 %vm295_vm0, %v14840_v35  ;;  %v14792_v37 = vld [vmem:[%s19204_s3 + $0x984] ss:$16 sps:$4 sm:$0xff]   ;;  %v14794_v42 = vld [vmem:[%s19204_s3 + $0x980] ss:$16 sps:$4 sm:$0xff]  }
 0x13a   :  { %v829_v48 = vpack.c.bf16 %v786_v47, %v785_v44  ;;  %v13318_v2 = vpop.f32.mrb[46].mxu0  ;;  %v603_v4 = vadd.f32 %v16014_v3, %v602_v0  ;;  %v14806_v63 = vld [vmem:[%s19204_s3 + $0xa00] ss:$16 sps:$4 sm:$0xff]   ;;  %v14807_v0 = vld [vmem:[%s19204_s3 + $0xa24] ss:$16 sps:$4 sm:$0xff]  }
 0x13b   :  { %4434 = vmatmul.mubr.bf16.gmra.mrb[8].mxu1 %v14745_v40  ;;  %v605_v6 = vpop.f32.mrb[47].mxu0  ;;  %v614_v12 = vadd.f32 %v16014_v3, %v13318_v2  ;;  %v727_v14 = vmul.f32 0.2, %v611_v11  ;;  %v14812_v2 = vld [vmem:[%s19204_s3 + $0xa44] ss:$16 sps:$4 sm:$0xff]  }
 0x13c   :  { %4441 = vmatprep.mubr.bf16.mxu1 %v14746_v43  ;;  %4979 = vmatpush1.bf16.msra.mxu1 %v829_v48  ;;  %v606_v7 = vadd.f32 %v16014_v3, %v605_v6  ;;  %v725_v8 = vmul.f32 0.2, %v603_v4  ;;  %v14795_v43 = vld [vmem:[%s19204_s3 + $0x9a4] ss:$16 sps:$4 sm:$0xff]   ;;  %v14817_v6 = vld [vmem:[%s19204_s3 + $0xa60] ss:$16 sps:$4 sm:$0xff]  }
 0x13d   :  { %4980 = vmatprep.subr.bf16.mxu1 %v15652_v23  ;;  %v728_v15 = vmul.f32 0.2, %v614_v12  ;;  %v791_v18 = vmax.f32 %v611_v11, %v727_v14  ;;  %v14823_v14 = vld [vmem:[%s19204_s3 + $0xaa0] ss:$16 sps:$4 sm:$0xff]   ;;  %v14830_v35 = vld [vmem:[%s19204_s3 + $0xb04] ss:$16 sps:$4 sm:$0xff]  }
 0x13e   :  { %v726_v9 = vmul.f32 0.2, %v606_v7  ;;  %v789_v10 = vmax.f32 %v603_v4, %v725_v8  ;;  %v14814_v4 = vld [vmem:[%s19204_s3 + $0xa40] ss:$16 sps:$4 sm:$0xff]  }
 0x13f   :  { %v792_v19 = vmax.f32 %v614_v12, %v728_v15  ;;  %v14820_v8 = vld [vmem:[%s19204_s3 + $0xa80] ss:$16 sps:$4 sm:$0xff]   ;;  %v14824_v15 = vld [vmem:[%s19204_s3 + $0xac4] ss:$16 sps:$4 sm:$0xff]  }
 0x140   :  { %4981 = vmatpush1.bf16.msra.mxu1 %v830_v29  ;;  %v790_v13 = vmax.f32 %v606_v7, %v726_v9  ;;  %v13321_v38 = vpop.f32.mrb[48].mxu0  ;;  %v14797_v29 = vld [vmem:[%s19204_s3 + $0x9a0] ss:$16 sps:$4 sm:$0xff]   ;;  %v14818_v7 = vld [vmem:[%s19204_s3 + $0xa84] ss:$16 sps:$4 sm:$0xff]  }
 0x141   :  { %4982 = vmatprep.subr.bf16.mxu1 %v15652_v23  ;;  %v832_v21 = vpack.c.bf16 %v792_v19, %v791_v18  ;;  %v618_v39 = vpop.f32.mrb[49].mxu0  ;;  %v14821_v9 = vld [vmem:[%s19204_s3 + $0xaa4] ss:$16 sps:$4 sm:$0xff]   ;;  %v14829_v34 = vld [vmem:[%s19204_s3 + $0xae0] ss:$16 sps:$4 sm:$0xff]  }
 0x142   :  { %v831_v17 = vpack.c.bf16 %v790_v13, %v789_v10  ;;  %v13322_v40 = vpop.f32.mrb[50].mxu0  ;;  %v619_v44 = vadd.f32 %v16014_v3, %v618_v39  ;;  %v14887_v39 = vld [vmem:[%s19204_s3 + $0x4] ss:$16 sps:$4 sm:$0xff]  }
 0x143   :  { %4442 = vmatmul.mubr.bf16.gmra.mrb[12].mxu1 %v14748_v49  ;;  %v621_v41 = vpop.f32.mrb[51].mxu0  ;;  %3945 = vmatprep.mubr.bf16.mxu0 %v14887_v39  ;;  %v14870_v39 = vld [vmem:[%s19204_s3 + $0xc80] ss:$16 sps:$4 sm:$0xff]  }
 0x144   :  { %4449 = vmatprep.mubr.bf16.mxu1 %v14749_v50  ;;  %4983 = vmatpush1.bf16.msra.mxu1 %v831_v17  ;;  %v622_v45 = vadd.f32 %v16014_v3, %v621_v41  ;;  %v729_v46 = vmul.f32 0.2, %v619_v44  ;;  %v14798_v50 = vld [vmem:[%s19204_s3 + $0x9c4] ss:$16 sps:$4 sm:$0xff]  }
 0x145   :  { %4984 = vmatprep.subr.bf16.mxu1 %v15652_v23  ;;  %v14836_v41 = vld [vmem:[%s19204_s3 + $0xb44] ss:$16 sps:$4 sm:$0xff]  }
 0x146   :  { %v730_v47 = vmul.f32 0.2, %v622_v45  ;;  %v793_v48 = vmax.f32 %v619_v44, %v729_v46  ;;  %v14841_v44 = vld [vmem:[%s19204_s3 + $0xb64] ss:$16 sps:$4 sm:$0xff]  }
 0x147   :  { %v14897_v46 = vld [vmem:[%s19204_s3 + $0x44] ss:$16 sps:$4 sm:$0xff]  }
 0x148   :  { %4985 = vmatpush1.bf16.msra.mxu1 %v832_v21  ;;  %v794_v49 = vmax.f32 %v622_v45, %v730_v47  ;;  %v14894_v45 = vld [vmem:[%s19204_s3 + $0x20] ss:$16 sps:$4 sm:$0xff]  }
 0x149   :  { %4986 = vmatprep.subr.bf16.mxu1 %v15652_v23  ;;  %v14843_v47 = vld [vmem:[%s19204_s3 + $0xb60] ss:$16 sps:$4 sm:$0xff]  }
 0x14b   :  { %4450 = vmatmul.mubr.bf16.gmra.mrb[16].mxu1 %v14751_v51  ;;  %v833_v51 = vpack.c.bf16 %v794_v49, %v793_v48  ;;  %v14900_v48 = vld [vmem:[%s19204_s3 + $0x40] ss:$16 sps:$4 sm:$0xff]   ;;  %v14903_v49 = vld [vmem:[%s19204_s3 + $0x64] ss:$16 sps:$4 sm:$0xff]  }
 0x14c   :  { %4457 = vmatprep.mubr.bf16.mxu1 %v14752_v52  ;;  %v627_v52 = vadd.f32 %v16014_v3, %v13321_v38  ;;  %v14885_v38 = vld [vmem:[%s19204_s3] ss:$16 sps:$4 sm:$0xff]  }
 0x14d   :  { %4987 = vmatpush1.bf16.msra.mxu1 %v833_v51  ;;  %3946 = vmatmul.mubr.bf16.vlgmr.msra.gmra.mrb[64].mxu0 %v14885_v38  ;;  %v14847_v51 = vld [vmem:[%s19204_s3 + $0xba4] ss:$16 sps:$4 sm:$0xff]  }
 0x14e   :  { %4988 = vmatprep.subr.bf16.mxu1 %v15652_v23  ;;  %v14951_v38 = vld [vmem:[%s19204_s3 + $0x164] ss:$16 sps:$4 sm:$0xff]  }
 0x153   :  { %4458 = vmatmul.mubr.bf16.gmra.mrb[20].mxu1 %v14754_v53  ;;  %v630_v53 = vadd.f32 %v16014_v3, %v13322_v40  ;;  %v14835_v40 = vld [vmem:[%s19204_s3 + $0xb20] ss:$16 sps:$4 sm:$0xff]  }
 0x154   :  { %4465 = vmatprep.mubr.bf16.mxu1 %v14757_v54  ;;  %v731_v54 = vmul.f32 0.2, %v627_v52 }
 0x156   :  { %v795_v57 = vmax.f32 %v627_v52, %v731_v54  ;;  %v14906_v52 = vld [vmem:[%s19204_s3 + $0x60] ss:$16 sps:$4 sm:$0xff]  }
 0x15b   :  { %4466 = vmatmul.mubr.bf16.gmra.mrb[24].mxu1 %v14759_v55  ;;  %v732_v55 = vmul.f32 0.2, %v630_v53 }
 0x15c   :  { %4473 = vmatprep.mubr.bf16.mxu1 %v14760_v56  ;;  %v14800_v56 = vld [vmem:[%s19204_s3 + $0x9c0] ss:$16 sps:$4 sm:$0xff]  }
 0x15d   :  { %v796_v58 = vmax.f32 %v630_v53, %v732_v55  ;;  %v14909_v55 = vld [vmem:[%s19204_s3 + $0x84] ss:$16 sps:$4 sm:$0xff]  }
 0x163   :  { %4474 = vmatmul.mubr.bf16.gmra.mrb[28].mxu1 %v14762_v59  ;;  %v14801_v59 = vld [vmem:[%s19204_s3 + $0x9e4] ss:$16 sps:$4 sm:$0xff]  }
 0x164   :  { %4481 = vmatprep.mubr.bf16.mxu1 %v14763_v60  ;;  %v834_v60 = vpack.c.bf16 %v796_v58, %v795_v57  ;;  %v14849_v58 = vld [vmem:[%s19204_s3 + $0xba0] ss:$16 sps:$4 sm:$0xff]  }
 0x166   :  { %4989 = vmatpush1.bf16.msra.mxu1 %v834_v60  ;;  %v14912_v60 = vld [vmem:[%s19204_s3 + $0x80] ss:$16 sps:$4 sm:$0xff]  }
 0x167   :  { %4990 = vmatprep.subr.bf16.mxu1 %v15652_v23 }
 0x16b   :  { %4482 = vmatmul.mubr.bf16.gmra.mrb[32].mxu1 %v14765_v61  ;;  %v14803_v61 = vld [vmem:[%s19204_s3 + $0x9e0] ss:$16 sps:$4 sm:$0xff]  }
 0x16c   :  { %4489 = vmatprep.mubr.bf16.mxu1 %v14766_v62  ;;  %v14804_v62 = vld [vmem:[%s19204_s3 + $0xa04] ss:$16 sps:$4 sm:$0xff]  }
 0x173   :  { %4490 = vmatmul.mubr.bf16.gmra.mrb[36].mxu1 %v14768_v1  ;;  %v14809_v1 = vld [vmem:[%s19204_s3 + $0xa20] ss:$16 sps:$4 sm:$0xff]  }
 0x174   :  { %4497 = vmatprep.mubr.bf16.mxu1 %v14769_v5  ;;  %v14815_v5 = vld [vmem:[%s19204_s3 + $0xa64] ss:$16 sps:$4 sm:$0xff]  }
 0x17b   :  { %4498 = vmatmul.mubr.bf16.gmra.mrb[40].mxu1 %v14771_v16 }
 0x17c   :  { %4505 = vmatprep.mubr.bf16.mxu1 %v14772_v20 }
 0x183   :  { %4506 = vmatmul.mubr.bf16.gmra.mrb[44].mxu1 %v14774_v22 }
 0x184   :  { %4513 = vmatprep.mubr.bf16.mxu1 %v14775_v24 }
 0x18b   :  { %4514 = vmatmul.mubr.bf16.gmra.mrb[48].mxu1 %v14777_v25  ;;  %v14826_v25 = vld [vmem:[%s19204_s3 + $0xac0] ss:$16 sps:$4 sm:$0xff]  }
 0x18c   :  { %4521 = vmatprep.mubr.bf16.mxu1 %v14778_v26 }
 0x193   :  { %4522 = vmatmul.mubr.bf16.gmra.mrb[52].mxu1 %v14780_v27 }
 0x194   :  { %4529 = vmatprep.mubr.bf16.mxu1 %v14781_v28 }
 0x19b   :  { %4530 = vmatmul.mubr.bf16.gmra.mrb[56].mxu1 %v14783_v30  ;;  %v14827_v30 = vld [vmem:[%s19204_s3 + $0xae4] ss:$16 sps:$4 sm:$0xff]  }
 0x19c   :  { %4537 = vmatprep.mubr.bf16.mxu1 %v14786_v31 }
 0x1a3   :  { %4538 = vmatmul.mubr.bf16.gmra.mrb[60].mxu1 %v14788_v32 }
 0x1a4   :  { %4545 = vmatprep.mubr.bf16.mxu1 %v14789_v33 }
 0x1ab   :  { %4546 = vmatmul.mubr.bf16.gmra.mrb[64].mxu1 %v14791_v36  ;;  %v14832_v36 = vld [vmem:[%s19204_s3 + $0xb00] ss:$16 sps:$4 sm:$0xff]  }
 0x1ac   :  { %4553 = vmatprep.mubr.bf16.mxu1 %v14792_v37  ;;  %v14833_v37 = vld [vmem:[%s19204_s3 + $0xb24] ss:$16 sps:$4 sm:$0xff]  }
 0x1b3   :  { %4554 = vmatmul.mubr.bf16.gmra.mrb[68].mxu1 %v14794_v42  ;;  %v14891_v42 = vld [vmem:[%s19204_s3 + $0x24] ss:$16 sps:$4 sm:$0xff]  }
 0x1b4   :  { %4561 = vmatprep.mubr.bf16.mxu1 %v14795_v43  ;;  %3953 = vmatprep.mubr.bf16.mxu0 %v14891_v42  ;;  %v14838_v43 = vld [vmem:[%s19204_s3 + $0xb40] ss:$16 sps:$4 sm:$0xff]   ;;  %v14957_v42 = vld [vmem:[%s19204_s3 + $0x184] ss:$16 sps:$4 sm:$0xff]  }
 0x1b5   :  { %3954 = vmatmul.mubr.bf16.gmra.mrb[68].mxu0 %v14894_v45 }
 0x1b6   :  { %3961 = vmatprep.mubr.bf16.mxu0 %v14897_v46 }
 0x1bb   :  { %4562 = vmatmul.mubr.bf16.gmra.mrb[72].mxu1 %v14797_v29  ;;  %v14844_v29 = vld [vmem:[%s19204_s3 + $0xb84] ss:$16 sps:$4 sm:$0xff]  }
 0x1bc   :  { %4569 = vmatprep.mubr.bf16.mxu1 %v14798_v50  ;;  %v14846_v50 = vld [vmem:[%s19204_s3 + $0xb80] ss:$16 sps:$4 sm:$0xff]  }
 0x1bd   :  { %3962 = vmatmul.mubr.bf16.gmra.mrb[72].mxu0 %v14900_v48 }
 0x1be   :  { %3969 = vmatprep.mubr.bf16.mxu0 %v14903_v49 }
 0x1c3   :  { %4570 = vmatmul.mubr.bf16.gmra.mrb[76].mxu1 %v14800_v56 }
 0x1c4   :  { %4577 = vmatprep.mubr.bf16.mxu1 %v14801_v59  ;;  %v14850_v59 = vld [vmem:[%s19204_s3 + $0xbc4] ss:$16 sps:$4 sm:$0xff]  }
 0x1c5   :  { %3970 = vmatmul.mubr.bf16.gmra.mrb[76].mxu0 %v14906_v52 }
 0x1c6   :  { %3977 = vmatprep.mubr.bf16.mxu0 %v14909_v55 }
 0x1cb   :  { %4578 = vmatmul.mubr.bf16.gmra.mrb[80].mxu1 %v14803_v61 }
 0x1cc   :  { %4585 = vmatprep.mubr.bf16.mxu1 %v14804_v62 }
 0x1cd   :  { %3978 = vmatmul.mubr.bf16.gmra.mrb[80].mxu0 %v14912_v60  ;;  %v14877_v60 = vld [vmem:[%s19204_s3 + $0xce4] ss:$16 sps:$4 sm:$0xff]  }
 0x1d3   :  { %4586 = vmatmul.mubr.bf16.gmra.mrb[84].mxu1 %v14806_v63  ;;  %v14915_v63 = vld [vmem:[%s19204_s3 + $0xa4] ss:$16 sps:$4 sm:$0xff]  }
 0x1d4   :  { %4593 = vmatprep.mubr.bf16.mxu1 %v14807_v0  ;;  %3985 = vmatprep.mubr.bf16.mxu0 %v14915_v63 }
 0x1db   :  { %4594 = vmatmul.mubr.bf16.gmra.mrb[88].mxu1 %v14809_v1 }
 0x1dc   :  { %4601 = vmatprep.mubr.bf16.mxu1 %v14812_v2  ;;  %v14852_v2 = vld [vmem:[%s19204_s3 + $0xbc0] ss:$16 sps:$4 sm:$0xff]  }
 0x1dd   :  { %v13325_v10 = vpop.f32.mrb[52].mxu0 }
 0x1de   :  { %v634_v11 = vpop.f32.mrb[53].mxu0  ;;  %v643_v18 = vadd.f32 %v16014_v3, %v13325_v10 }
 0x1df   :  { %v13326_v12 = vpop.f32.mrb[54].mxu0  ;;  %v635_v16 = vadd.f32 %v16014_v3, %v634_v11  ;;  %v14921_v11 = vld [vmem:[%s19204_s3 + $0xc4] ss:$16 sps:$4 sm:$0xff]  }
 0x1e0   :  { %v637_v13 = vpop.f32.mrb[55].mxu0  ;;  %v646_v19 = vadd.f32 %v16014_v3, %v13326_v12  ;;  %v735_v22 = vmul.f32 0.2, %v643_v18 }
 0x1e1   :  { %v638_v17 = vadd.f32 %v16014_v3, %v637_v13  ;;  %v733_v20 = vmul.f32 0.2, %v635_v16 }
 0x1e2   :  { %v736_v24 = vmul.f32 0.2, %v646_v19  ;;  %v799_v28 = vmax.f32 %v643_v18, %v735_v22  ;;  %v14859_v22 = vld [vmem:[%s19204_s3 + $0xc24] ss:$16 sps:$4 sm:$0xff]  }
 0x1e3   :  { %4602 = vmatmul.mubr.bf16.gmra.mrb[92].mxu1 %v14814_v4  ;;  %v734_v21 = vmul.f32 0.2, %v638_v17  ;;  %v797_v26 = vmax.f32 %v635_v16, %v733_v20  ;;  %v14927_v20 = vld [vmem:[%s19204_s3 + $0xe4] ss:$16 sps:$4 sm:$0xff]  }
 0x1e4   :  { %4609 = vmatprep.mubr.bf16.mxu1 %v14815_v5  ;;  %v800_v31 = vmax.f32 %v646_v19, %v736_v24  ;;  %v14924_v19 = vld [vmem:[%s19204_s3 + $0xc0] ss:$16 sps:$4 sm:$0xff]  }
 0x1e5   :  { %v798_v27 = vmax.f32 %v638_v17, %v734_v21  ;;  %v14856_v17 = vld [vmem:[%s19204_s3 + $0xc04] ss:$16 sps:$4 sm:$0xff]   ;;  %v14858_v21 = vld [vmem:[%s19204_s3 + $0xc00] ss:$16 sps:$4 sm:$0xff]  }
 0x1e6   :  { %v836_v33 = vpack.c.bf16 %v800_v31, %v799_v28  ;;  %v14930_v24 = vld [vmem:[%s19204_s3 + $0xe0] ss:$16 sps:$4 sm:$0xff]  }
 0x1e7   :  { %v835_v32 = vpack.c.bf16 %v798_v27, %v797_v26  ;;  %v14861_v26 = vld [vmem:[%s19204_s3 + $0xc20] ss:$16 sps:$4 sm:$0xff]   ;;  %v14862_v27 = vld [vmem:[%s19204_s3 + $0xc44] ss:$16 sps:$4 sm:$0xff]  }
 0x1e8   :  { %v14936_v28 = vld [vmem:[%s19204_s3 + $0x100] ss:$16 sps:$4 sm:$0xff]  }
 0x1e9   :  { %4991 = vmatpush1.bf16.msra.mxu1 %v835_v32  ;;  %v14864_v31 = vld [vmem:[%s19204_s3 + $0xc40] ss:$16 sps:$4 sm:$0xff]   ;;  %v14865_v32 = vld [vmem:[%s19204_s3 + $0xc64] ss:$16 sps:$4 sm:$0xff]  }
 0x1ea   :  { %4992 = vmatprep.subr.bf16.mxu1 %v15652_v23 }
 0x1eb   :  { %4610 = vmatmul.mubr.bf16.gmra.mrb[96].mxu1 %v14817_v6  ;;  %v14853_v6 = vld [vmem:[%s19204_s3 + $0xbe4] ss:$16 sps:$4 sm:$0xff]  }
 0x1ec   :  { %4617 = vmatprep.mubr.bf16.mxu1 %v14818_v7 }
 0x1ed   :  { %4993 = vmatpush1.bf16.msra.mxu1 %v836_v33  ;;  %v14942_v33 = vld [vmem:[%s19204_s3 + $0x120] ss:$16 sps:$4 sm:$0xff]  }
 0x1ee   :  { %4994 = vmatprep.subr.bf16.mxu1 %v15652_v23 }
 0x1f3   :  { %4618 = vmatmul.mubr.bf16.gmra.mrb[100].mxu1 %v14820_v8  ;;  %v14918_v8 = vld [vmem:[%s19204_s3 + $0xa0] ss:$16 sps:$4 sm:$0xff]  }
 0x1f4   :  { %4625 = vmatprep.mubr.bf16.mxu1 %v14821_v9  ;;  %3986 = vmatmul.mubr.bf16.gmra.mrb[84].mxu0 %v14918_v8  ;;  %v14883_v8 = vld [vmem:[%s19204_s3 + $0xd24] ss:$16 sps:$4 sm:$0xff]  }
 0x1f5   :  { %3993 = vmatprep.mubr.bf16.mxu0 %v14921_v11  ;;  %v14888_v11 = vld [vmem:[%s19204_s3 + $0xd20] ss:$16 sps:$4 sm:$0xff]  }
 0x1fb   :  { %4626 = vmatmul.mubr.bf16.gmra.mrb[104].mxu1 %v14823_v14  ;;  %v14855_v14 = vld [vmem:[%s19204_s3 + $0xbe0] ss:$16 sps:$4 sm:$0xff]  }
 0x1fc   :  { %4633 = vmatprep.mubr.bf16.mxu1 %v14824_v15  ;;  %3994 = vmatmul.mubr.bf16.gmra.mrb[88].mxu0 %v14924_v19  ;;  %v14901_v19 = vld [vmem:[%s19204_s3 + $0xd84] ss:$16 sps:$4 sm:$0xff]  }
 0x1fd   :  { %v13329_v53 = vpop.f32.mrb[56].mxu0  ;;  %4001 = vmatprep.mubr.bf16.mxu0 %v14927_v20  ;;  %v14994_v20 = vld [vmem:[%s19204_s3 + $0x244] ss:$16 sps:$4 sm:$0xff]  }
 0x1fe   :  { %v650_v54 = vpop.f32.mrb[57].mxu0  ;;  %v659_v9 = vadd.f32 %v16014_v3, %v13329_v53  ;;  %v14963_v53 = vld [vmem:[%s19204_s3 + $0x1a4] ss:$16 sps:$4 sm:$0xff]  }
 0x1ff   :  { %v13330_v56 = vpop.f32.mrb[58].mxu0  ;;  %v651_v61 = vadd.f32 %v16014_v3, %v650_v54 }
 0x200   :  { %v653_v57 = vpop.f32.mrb[59].mxu0  ;;  %v662_v10 = vadd.f32 %v16014_v3, %v13330_v56  ;;  %v739_v12 = vmul.f32 0.2, %v659_v9 }
 0x201   :  { %v654_v62 = vadd.f32 %v16014_v3, %v653_v57  ;;  %v737_v0 = vmul.f32 0.2, %v651_v61  ;;  %v14876_v57 = vld [vmem:[%s19204_s3 + $0xcc0] ss:$16 sps:$4 sm:$0xff]  }
 0x202   :  { %v740_v13 = vmul.f32 0.2, %v662_v10  ;;  %v803_v15 = vmax.f32 %v659_v9, %v739_v12  ;;  %v14978_v9 = vld [vmem:[%s19204_s3 + $0x1e0] ss:$16 sps:$4 sm:$0xff]   ;;  %v14889_v12 = vld [vmem:[%s19204_s3 + $0xd44] ss:$16 sps:$4 sm:$0xff]  }
 0x203   :  { %4634 = vmatmul.mubr.bf16.gmra.mrb[108].mxu1 %v14826_v25  ;;  %v738_v1 = vmul.f32 0.2, %v654_v62  ;;  %v801_v4 = vmax.f32 %v651_v61, %v737_v0  ;;  %v14933_v25 = vld [vmem:[%s19204_s3 + $0x104] ss:$16 sps:$4 sm:$0xff]   ;;  %v14966_v0 = vld [vmem:[%s19204_s3 + $0x1a0] ss:$16 sps:$4 sm:$0xff]  }
 0x204   :  { %4641 = vmatprep.mubr.bf16.mxu1 %v14827_v30  ;;  %v804_v16 = vmax.f32 %v662_v10, %v740_v13  ;;  %4002 = vmatmul.mubr.bf16.gmra.mrb[92].mxu0 %v14930_v24  ;;  %v14939_v30 = vld [vmem:[%s19204_s3 + $0x124] ss:$16 sps:$4 sm:$0xff]   ;;  %v14984_v13 = vld [vmem:[%s19204_s3 + $0x200] ss:$16 sps:$4 sm:$0xff]  }
 0x205   :  { %v802_v5 = vmax.f32 %v654_v62, %v738_v1  ;;  %4009 = vmatprep.mubr.bf16.mxu0 %v14933_v25  ;;  %v14981_v10 = vld [vmem:[%s19204_s3 + $0x204] ss:$16 sps:$4 sm:$0xff]  }
 0x206   :  { %v838_v18 = vpack.c.bf16 %v804_v16, %v803_v15  ;;  %v14893_v15 = vld [vmem:[%s19204_s3 + $0xd40] ss:$16 sps:$4 sm:$0xff]   ;;  %v14895_v16 = vld [vmem:[%s19204_s3 + $0xd64] ss:$16 sps:$4 sm:$0xff]  }
 0x207   :  { %v837_v7 = vpack.c.bf16 %v802_v5, %v801_v4  ;;  %v14879_v4 = vld [vmem:[%s19204_s3 + $0xce0] ss:$16 sps:$4 sm:$0xff]   ;;  %v14880_v5 = vld [vmem:[%s19204_s3 + $0xd04] ss:$16 sps:$4 sm:$0xff]  }
 0x208   :  { %v14907_v24 = vld [vmem:[%s19204_s3 + $0xda4] ss:$16 sps:$4 sm:$0xff]  }
 0x209   :  { %4995 = vmatpush1.bf16.msra.mxu1 %v837_v7  ;;  %v14882_v7 = vld [vmem:[%s19204_s3 + $0xd00] ss:$16 sps:$4 sm:$0xff]   ;;  %v15000_v25 = vld [vmem:[%s19204_s3 + $0x264] ss:$16 sps:$4 sm:$0xff]  }
 0x20a   :  { %4996 = vmatprep.subr.bf16.mxu1 %v15652_v23 }
 0x20b   :  { %4642 = vmatmul.mubr.bf16.gmra.mrb[112].mxu1 %v14829_v34  ;;  %v14945_v34 = vld [vmem:[%s19204_s3 + $0x144] ss:$16 sps:$4 sm:$0xff]  }
 0x20c   :  { %4649 = vmatprep.mubr.bf16.mxu1 %v14830_v35  ;;  %4010 = vmatmul.mubr.bf16.gmra.mrb[96].mxu0 %v14936_v28  ;;  %v14867_v35 = vld [vmem:[%s19204_s3 + $0xc60] ss:$16 sps:$4 sm:$0xff]   ;;  %v13333_v45 = vpop.f32.mrb[60].mxu0  ;;  %v14913_v28 = vld [vmem:[%s19204_s3 + $0xdc4] ss:$16 sps:$4 sm:$0xff]  }
 0x20d   :  { %4997 = vmatpush1.bf16.msra.mxu1 %v838_v18  ;;  %4017 = vmatprep.mubr.bf16.mxu0 %v14939_v30  ;;  %v675_v46 = vadd.f32 %v16014_v3, %v13333_v45  ;;  %v14899_v18 = vld [vmem:[%s19204_s3 + $0xd60] ss:$16 sps:$4 sm:$0xff]   ;;  %v15006_v30 = vld [vmem:[%s19204_s3 + $0x284] ss:$16 sps:$4 sm:$0xff]  }
 0x20e   :  { %4998 = vmatprep.subr.bf16.mxu1 %v15652_v23  ;;  %v14937_v45 = vld [vmem:[%s19204_s3 + $0xe44] ss:$16 sps:$4 sm:$0xff]  }
 0x213   :  { %4650 = vmatmul.mubr.bf16.gmra.mrb[116].mxu1 %v14832_v36  ;;  %v14868_v36 = vld [vmem:[%s19204_s3 + $0xc84] ss:$16 sps:$4 sm:$0xff]  }
 0x214   :  { %4657 = vmatprep.mubr.bf16.mxu1 %v14833_v37  ;;  %4018 = vmatmul.mubr.bf16.gmra.mrb[100].mxu0 %v14942_v33  ;;  %v14948_v37 = vld [vmem:[%s19204_s3 + $0x140] ss:$16 sps:$4 sm:$0xff]   ;;  %v14919_v33 = vld [vmem:[%s19204_s3 + $0xde4] ss:$16 sps:$4 sm:$0xff]  }
 0x215   :  { %4025 = vmatprep.mubr.bf16.mxu0 %v14945_v34  ;;  %v15012_v34 = vld [vmem:[%s19204_s3 + $0x2a4] ss:$16 sps:$4 sm:$0xff]  }
 0x21b   :  { %4658 = vmatmul.mubr.bf16.gmra.mrb[120].mxu1 %v14835_v40  ;;  %v14871_v40 = vld [vmem:[%s19204_s3 + $0xca4] ss:$16 sps:$4 sm:$0xff]  }
 0x21c   :  { %4665 = vmatprep.mubr.bf16.mxu1 %v14836_v41  ;;  %4026 = vmatmul.mubr.bf16.gmra.mrb[104].mxu0 %v14948_v37  ;;  %v14954_v41 = vld [vmem:[%s19204_s3 + $0x160] ss:$16 sps:$4 sm:$0xff]   ;;  %v14925_v37 = vld [vmem:[%s19204_s3 + $0xe04] ss:$16 sps:$4 sm:$0xff]  }
 0x21d   :  { %4033 = vmatprep.mubr.bf16.mxu0 %v14951_v38  ;;  %v15018_v38 = vld [vmem:[%s19204_s3 + $0x2c4] ss:$16 sps:$4 sm:$0xff]  }
 0x223   :  { %4666 = vmatmul.mubr.bf16.gmra.mrb[124].mxu1 %v14838_v43  ;;  %v14873_v43 = vld [vmem:[%s19204_s3 + $0xca0] ss:$16 sps:$4 sm:$0xff]  }
 0x224   :  { %4673 = vmatprep.mubr.bf16.mxu1 %v14841_v44  ;;  %4034 = vmatmul.mubr.bf16.gmra.mrb[108].mxu0 %v14954_v41  ;;  %v14874_v44 = vld [vmem:[%s19204_s3 + $0xcc4] ss:$16 sps:$4 sm:$0xff]  }
 0x225   :  { %4041 = vmatprep.mubr.bf16.mxu0 %v14957_v42  ;;  %v14931_v41 = vld [vmem:[%s19204_s3 + $0xe24] ss:$16 sps:$4 sm:$0xff]  }
 0x226   :  { %v15024_v42 = vld [vmem:[%s19204_s3 + $0x2e4] ss:$16 sps:$4 sm:$0xff]  }
 0x22b   :  { %4674 = vmatmul.mubr.bf16.gmra.mrb[128].mxu1 %v14843_v47  ;;  %v666_v47 = vpop.f32.mrb[61].mxu0 }
 0x22c   :  { %4681 = vmatprep.mubr.bf16.mxu1 %v14844_v29  ;;  %v14960_v29 = vld [vmem:[%s19204_s3 + $0x180] ss:$16 sps:$4 sm:$0xff]   ;;  %v667_v48 = vadd.f32 %v16014_v3, %v666_v47  ;;  %v13334_v49 = vpop.f32.mrb[62].mxu0 }
 0x22d   :  { %v669_v52 = vpop.f32.mrb[63].mxu0  ;;  %4042 = vmatmul.mubr.bf16.gmra.mrb[112].mxu0 %v14960_v29  ;;  %v15032_v47 = vld [vmem:[%s19204_s3 + $0x300] ss:$16 sps:$4 sm:$0xff]  }
 0x22e   :  { %v741_v54 = vmul.f32 0.2, %v667_v48  ;;  %v670_v55 = vadd.f32 %v16014_v3, %v669_v52  ;;  %4049 = vmatprep.mubr.bf16.mxu0 %v14963_v53  ;;  %v14941_v29 = vld [vmem:[%s19204_s3 + $0xe40] ss:$16 sps:$4 sm:$0xff]   ;;  %v14949_v52 = vld [vmem:[%s19204_s3 + $0xe84] ss:$16 sps:$4 sm:$0xff]  }
 0x22f   :  { %v15042_v53 = vld [vmem:[%s19204_s3 + $0x344] ss:$16 sps:$4 sm:$0xff]  }
 0x233   :  { %4682 = vmatmul.mubr.bf16.gmra.mrb[132].mxu1 %v14846_v50  ;;  %v743_v50 = vmul.f32 0.2, %v675_v46 }
 0x234   :  { %4689 = vmatprep.mubr.bf16.mxu1 %v14847_v51  ;;  %v678_v51 = vadd.f32 %v16014_v3, %v13334_v49  ;;  %v15036_v49 = vld [vmem:[%s19204_s3 + $0x324] ss:$16 sps:$4 sm:$0xff]  }
 0x235   :  { %v807_v61 = vmax.f32 %v675_v46, %v743_v50  ;;  %4050 = vmatmul.mubr.bf16.gmra.mrb[116].mxu0 %v14966_v0  ;;  %v15030_v46 = vld [vmem:[%s19204_s3 + $0x304] ss:$16 sps:$4 sm:$0xff]   ;;  %v15038_v50 = vld [vmem:[%s19204_s3 + $0x320] ss:$16 sps:$4 sm:$0xff]  }
 0x236   :  { %v744_v56 = vmul.f32 0.2, %v678_v51  ;;  %v14967_v0 = vld [vmem:[%s19204_s3 + $0xee4] ss:$16 sps:$4 sm:$0xff]  }
 0x238   :  { %v808_v62 = vmax.f32 %v678_v51, %v744_v56  ;;  %v14947_v51 = vld [vmem:[%s19204_s3 + $0xe60] ss:$16 sps:$4 sm:$0xff]   ;;  %v14955_v56 = vld [vmem:[%s19204_s3 + $0xea4] ss:$16 sps:$4 sm:$0xff]  }
 0x23a   :  { %v840_v1 = vpack.c.bf16 %v808_v62, %v807_v61  ;;  %v15054_v61 = vld [vmem:[%s19204_s3 + $0x384] ss:$16 sps:$4 sm:$0xff]   ;;  %v15056_v62 = vld [vmem:[%s19204_s3 + $0x380] ss:$16 sps:$4 sm:$0xff]  }
 0x23b   :  { %4690 = vmatmul.mubr.bf16.gmra.mrb[136].mxu1 %v14849_v58  ;;  %v805_v58 = vmax.f32 %v667_v48, %v741_v54  ;;  %v14943_v48 = vld [vmem:[%s19204_s3 + $0xe64] ss:$16 sps:$4 sm:$0xff]   ;;  %v15044_v54 = vld [vmem:[%s19204_s3 + $0x340] ss:$16 sps:$4 sm:$0xff]  }
 0x23c   :  { %4697 = vmatprep.mubr.bf16.mxu1 %v14850_v59  ;;  %v742_v59 = vmul.f32 0.2, %v670_v55 }
 0x23e   :  { %v806_v63 = vmax.f32 %v670_v55, %v742_v59  ;;  %v14953_v55 = vld [vmem:[%s19204_s3 + $0xe80] ss:$16 sps:$4 sm:$0xff]  }
 0x23f   :  { %v14959_v59 = vld [vmem:[%s19204_s3 + $0xea0] ss:$16 sps:$4 sm:$0xff]  }
 0x240   :  { %v839_v3 = vpack.c.bf16 %v806_v63, %v805_v58  ;;  %v15050_v58 = vld [vmem:[%s19204_s3 + $0x360] ss:$16 sps:$4 sm:$0xff]  }
 0x241   :  { %v14965_v63 = vld [vmem:[%s19204_s3 + $0xec0] ss:$16 sps:$4 sm:$0xff]  }
 0x242   :  { %4999 = vmatpush1.bf16.msra.mxu1 %v839_v3  ;;  %v15060_v3 = vld [vmem:[%s19204_s3 + $0x3a4] ss:$16 sps:$4 sm:$0xff]  }
 0x243   :  { %4698 = vmatmul.mubr.bf16.gmra.mrb[140].mxu1 %v14852_v2  ;;  %v14969_v2 = vld [vmem:[%s19204_s3 + $0x1c4] ss:$16 sps:$4 sm:$0xff]   ;;  %5000 = vmatprep.subr.bf16.mxu1 %v15652_v23 }
 0x244   :  { %4705 = vmatprep.mubr.bf16.mxu1 %v14853_v6  ;;  %4057 = vmatprep.mubr.bf16.mxu0 %v14969_v2  ;;  %v14972_v6 = vld [vmem:[%s19204_s3 + $0x1c0] ss:$16 sps:$4 sm:$0xff]   ;;  %v14975_v23 = vld [vmem:[%s19204_s3 + $0x1e4] ss:$16 sps:$4 sm:$0xff]  }
 0x245   :  { %4058 = vmatmul.mubr.bf16.gmra.mrb[120].mxu0 %v14972_v6  ;;  %v14971_v2 = vld [vmem:[%s19204_s3 + $0xee0] ss:$16 sps:$4 sm:$0xff]  }
 0x246   :  { %5001 = vmatpush1.bf16.msra.mxu1 %v840_v1  ;;  %4065 = vmatprep.mubr.bf16.mxu0 %v14975_v23  ;;  %v15062_v1 = vld [vmem:[%s19204_s3 + $0x3a0] ss:$16 sps:$4 sm:$0xff]  }
 0x247   :  { %v15068_v6 = vld [vmem:[%s19204_s3 + $0x3c0] ss:$16 sps:$4 sm:$0xff]  }
 0x248   :  { %v14977_v23 = vld [vmem:[%s19204_s3 + $0xf00] ss:$16 sps:$4 sm:$0xff]  }
 0x24b   :  { %4706 = vmatmul.mubr.bf16.gmra.mrb[144].mxu1 %v14855_v14  ;;  %v14987_v14 = vld [vmem:[%s19204_s3 + $0x224] ss:$16 sps:$4 sm:$0xff]  }
 0x24c   :  { %4713 = vmatprep.mubr.bf16.mxu1 %v14856_v17  ;;  %v14990_v17 = vld [vmem:[%s19204_s3 + $0x220] ss:$16 sps:$4 sm:$0xff]  }
 0x24d   :  { %4066 = vmatmul.mubr.bf16.gmra.mrb[124].mxu0 %v14978_v9  ;;  %v15074_v9 = vld [vmem:[%s19204_s3 + $0x3e0] ss:$16 sps:$4 sm:$0xff]  }
 0x24e   :  { %4073 = vmatprep.mubr.bf16.mxu0 %v14981_v10  ;;  %v14983_v10 = vld [vmem:[%s19204_s3 + $0xf20] ss:$16 sps:$4 sm:$0xff]  }
 0x253   :  { %4714 = vmatmul.mubr.bf16.gmra.mrb[148].mxu1 %v14858_v21  ;;  %v14996_v21 = vld [vmem:[%s19204_s3 + $0x240] ss:$16 sps:$4 sm:$0xff]  }
 0x254   :  { %4721 = vmatprep.mubr.bf16.mxu1 %v14859_v22  ;;  %v14905_v22 = vld [vmem:[%s19204_s3 + $0xd80] ss:$16 sps:$4 sm:$0xff]  }
 0x255   :  { %4074 = vmatmul.mubr.bf16.gmra.mrb[128].mxu0 %v14984_v13  ;;  %v15080_v13 = vld [vmem:[%s19204_s3 + $0x400] ss:$16 sps:$4 sm:$0xff]  }
 0x256   :  { %4081 = vmatprep.mubr.bf16.mxu0 %v14987_v14  ;;  %v14989_v14 = vld [vmem:[%s19204_s3 + $0xf40] ss:$16 sps:$4 sm:$0xff]  }
 0x25b   :  { %4722 = vmatmul.mubr.bf16.gmra.mrb[152].mxu1 %v14861_v26  ;;  %v15002_v26 = vld [vmem:[%s19204_s3 + $0x260] ss:$16 sps:$4 sm:$0xff]  }
 0x25c   :  { %4729 = vmatprep.mubr.bf16.mxu1 %v14862_v27  ;;  %v14911_v27 = vld [vmem:[%s19204_s3 + $0xda0] ss:$16 sps:$4 sm:$0xff]  }
 0x25d   :  { %4082 = vmatmul.mubr.bf16.gmra.mrb[132].mxu0 %v14990_v17  ;;  %v15086_v17 = vld [vmem:[%s19204_s3 + $0x420] ss:$16 sps:$4 sm:$0xff]  }
 0x25e   :  { %4089 = vmatprep.mubr.bf16.mxu0 %v14994_v20  ;;  %v14991_v20 = vld [vmem:[%s19204_s3 + $0xf60] ss:$16 sps:$4 sm:$0xff]  }
 0x263   :  { %4730 = vmatmul.mubr.bf16.gmra.mrb[156].mxu1 %v14864_v31  ;;  %v15008_v31 = vld [vmem:[%s19204_s3 + $0x280] ss:$16 sps:$4 sm:$0xff]  }
 0x264   :  { %4737 = vmatprep.mubr.bf16.mxu1 %v14865_v32  ;;  %v14917_v32 = vld [vmem:[%s19204_s3 + $0xdc0] ss:$16 sps:$4 sm:$0xff]  }
 0x265   :  { %4090 = vmatmul.mubr.bf16.gmra.mrb[136].mxu0 %v14996_v21 }
 0x266   :  { %4097 = vmatprep.mubr.bf16.mxu0 %v15000_v25  ;;  %v15090_v25 = vld [vmem:[%s19204_s3 + $0x444] ss:$16 sps:$4 sm:$0xff]  }
 0x26b   :  { %4738 = vmatmul.mubr.bf16.gmra.mrb[160].mxu1 %v14867_v35  ;;  %v15014_v35 = vld [vmem:[%s19204_s3 + $0x2a0] ss:$16 sps:$4 sm:$0xff]  }
 0x26c   :  { %4745 = vmatprep.mubr.bf16.mxu1 %v14868_v36  ;;  %v14923_v36 = vld [vmem:[%s19204_s3 + $0xde0] ss:$16 sps:$4 sm:$0xff]  }
 0x26d   :  { %4098 = vmatmul.mubr.bf16.gmra.mrb[140].mxu0 %v15002_v26  ;;  %v15092_v26 = vld [vmem:[%s19204_s3 + $0x440] ss:$16 sps:$4 sm:$0xff]  }
 0x26e   :  { %4105 = vmatprep.mubr.bf16.mxu0 %v15006_v30  ;;  %v14997_v30 = vld [vmem:[%s19204_s3 + $0xf80] ss:$16 sps:$4 sm:$0xff]  }
 0x273   :  { %4746 = vmatmul.mubr.bf16.gmra.mrb[164].mxu1 %v14870_v39  ;;  %v15020_v39 = vld [vmem:[%s19204_s3 + $0x2c0] ss:$16 sps:$4 sm:$0xff]  }
 0x274   :  { %4753 = vmatprep.mubr.bf16.mxu1 %v14871_v40  ;;  %v14929_v40 = vld [vmem:[%s19204_s3 + $0xe00] ss:$16 sps:$4 sm:$0xff]  }
 0x275   :  { %4106 = vmatmul.mubr.bf16.gmra.mrb[144].mxu0 %v15008_v31 }
 0x276   :  { %4113 = vmatprep.mubr.bf16.mxu0 %v15012_v34  ;;  %v15096_v34 = vld [vmem:[%s19204_s3 + $0x464] ss:$16 sps:$4 sm:$0xff]  }
 0x27b   :  { %4754 = vmatmul.mubr.bf16.gmra.mrb[168].mxu1 %v14873_v43  ;;  %v15026_v43 = vld [vmem:[%s19204_s3 + $0x2e0] ss:$16 sps:$4 sm:$0xff]  }
 0x27c   :  { %4761 = vmatprep.mubr.bf16.mxu1 %v14874_v44  ;;  %v14935_v44 = vld [vmem:[%s19204_s3 + $0xe20] ss:$16 sps:$4 sm:$0xff]  }
 0x27d   :  { %4114 = vmatmul.mubr.bf16.gmra.mrb[148].mxu0 %v15014_v35  ;;  %v15098_v35 = vld [vmem:[%s19204_s3 + $0x460] ss:$16 sps:$4 sm:$0xff]  }
 0x27e   :  { %4121 = vmatprep.mubr.bf16.mxu0 %v15018_v38  ;;  %v15003_v38 = vld [vmem:[%s19204_s3 + $0xfa0] ss:$16 sps:$4 sm:$0xff]  }
 0x283   :  { %4762 = vmatmul.mubr.bf16.gmra.mrb[172].mxu1 %v14876_v57  ;;  %v15048_v57 = vld [vmem:[%s19204_s3 + $0x364] ss:$16 sps:$4 sm:$0xff]  }
 0x284   :  { %4769 = vmatprep.mubr.bf16.mxu1 %v14877_v60  ;;  %v14961_v60 = vld [vmem:[%s19204_s3 + $0xec4] ss:$16 sps:$4 sm:$0xff]  }
 0x285   :  { %4122 = vmatmul.mubr.bf16.gmra.mrb[152].mxu0 %v15020_v39 }
 0x286   :  { %4129 = vmatprep.mubr.bf16.mxu0 %v15024_v42  ;;  %v15102_v42 = vld [vmem:[%s19204_s3 + $0x484] ss:$16 sps:$4 sm:$0xff]  }
 0x28b   :  { %4770 = vmatmul.mubr.bf16.gmra.mrb[176].mxu1 %v14879_v4  ;;  %v14973_v4 = vld [vmem:[%s19204_s3 + $0xf04] ss:$16 sps:$4 sm:$0xff]  }
 0x28c   :  { %4777 = vmatprep.mubr.bf16.mxu1 %v14880_v5  ;;  %v15066_v5 = vld [vmem:[%s19204_s3 + $0x3c4] ss:$16 sps:$4 sm:$0xff]  }
 0x28d   :  { %4130 = vmatmul.mubr.bf16.gmra.mrb[156].mxu0 %v15026_v43  ;;  %v15104_v43 = vld [vmem:[%s19204_s3 + $0x480] ss:$16 sps:$4 sm:$0xff]  }
 0x28e   :  { %4137 = vmatprep.mubr.bf16.mxu0 %v15030_v46  ;;  %v15009_v46 = vld [vmem:[%s19204_s3 + $0xfc0] ss:$16 sps:$4 sm:$0xff]  }
 0x293   :  { %4778 = vmatmul.mubr.bf16.gmra.mrb[180].mxu1 %v14882_v7  ;;  %v14979_v7 = vld [vmem:[%s19204_s3 + $0xf24] ss:$16 sps:$4 sm:$0xff]  }
 0x294   :  { %4785 = vmatprep.mubr.bf16.mxu1 %v14883_v8  ;;  %v15072_v8 = vld [vmem:[%s19204_s3 + $0x3e4] ss:$16 sps:$4 sm:$0xff]  }
 0x295   :  { %4138 = vmatmul.mubr.bf16.gmra.mrb[160].mxu0 %v15032_v47 }
 0x296   :  { %4145 = vmatprep.mubr.bf16.mxu0 %v15036_v49  ;;  %v15108_v49 = vld [vmem:[%s19204_s3 + $0x4a4] ss:$16 sps:$4 sm:$0xff]  }
 0x29b   :  { %4786 = vmatmul.mubr.bf16.gmra.mrb[184].mxu1 %v14888_v11  ;;  %v14985_v11 = vld [vmem:[%s19204_s3 + $0xf44] ss:$16 sps:$4 sm:$0xff]  }
 0x29c   :  { %4793 = vmatprep.mubr.bf16.mxu1 %v14889_v12  ;;  %v15078_v12 = vld [vmem:[%s19204_s3 + $0x404] ss:$16 sps:$4 sm:$0xff]  }
 0x29d   :  { %4146 = vmatmul.mubr.bf16.gmra.mrb[164].mxu0 %v15038_v50  ;;  %v15110_v50 = vld [vmem:[%s19204_s3 + $0x4a0] ss:$16 sps:$4 sm:$0xff]  }
 0x29e   :  { %4153 = vmatprep.mubr.bf16.mxu0 %v15042_v53  ;;  %v15015_v53 = vld [vmem:[%s19204_s3 + $0xfe0] ss:$16 sps:$4 sm:$0xff]  }
 0x2a3   :  { %4794 = vmatmul.mubr.bf16.gmra.mrb[188].mxu1 %v14893_v15  ;;  %v14993_v15 = vld [vmem:[%s19204_s3 + $0xf64] ss:$16 sps:$4 sm:$0xff]  }
 0x2a4   :  { %4801 = vmatprep.mubr.bf16.mxu1 %v14895_v16  ;;  %v15084_v16 = vld [vmem:[%s19204_s3 + $0x424] ss:$16 sps:$4 sm:$0xff]  }
 0x2a5   :  { %4154 = vmatmul.mubr.bf16.gmra.mrb[168].mxu0 %v15044_v54 }
 0x2a6   :  { %4161 = vmatprep.mubr.bf16.mxu0 %v15048_v57  ;;  %v15114_v57 = vld [vmem:[%s19204_s3 + $0x4c4] ss:$16 sps:$4 sm:$0xff]  }
 0x2ab   :  { %4802 = vmatmul.mubr.bf16.gmra.mrb[192].mxu1 %v14899_v18 }
 0x2ac   :  { %4809 = vmatprep.mubr.bf16.mxu1 %v14901_v19 }
 0x2ad   :  { %4162 = vmatmul.mubr.bf16.gmra.mrb[172].mxu0 %v15050_v58  ;;  %v15116_v58 = vld [vmem:[%s19204_s3 + $0x4c0] ss:$16 sps:$4 sm:$0xff]  }
 0x2ae   :  { %4169 = vmatprep.mubr.bf16.mxu0 %v15054_v61  ;;  %v15021_v61 = vld [vmem:[%s19204_s3 + $0x8] ss:$16 sps:$4 sm:$0xff]  }
 0x2b3   :  { %4810 = vmatmul.mubr.bf16.gmra.mrb[196].mxu1 %v14905_v22  ;;  %v14999_v22 = vld [vmem:[%s19204_s3 + $0xf84] ss:$16 sps:$4 sm:$0xff]  }
 0x2b4   :  { %4817 = vmatprep.mubr.bf16.mxu1 %v14907_v24 }
 0x2b5   :  { %4170 = vmatmul.mubr.bf16.gmra.mrb[176].mxu0 %v15056_v62 }
 0x2b6   :  { %4177 = vmatprep.mubr.bf16.mxu0 %v15060_v3  ;;  %v15120_v3 = vld [vmem:[%s19204_s3 + $0x4e4] ss:$16 sps:$4 sm:$0xff]  }
 0x2bb   :  { %4818 = vmatmul.mubr.bf16.gmra.mrb[200].mxu1 %v14911_v27 }
 0x2bc   :  { %4825 = vmatprep.mubr.bf16.mxu1 %v14913_v28 }
 0x2bd   :  { %4178 = vmatmul.mubr.bf16.gmra.mrb[180].mxu0 %v15062_v1  ;;  %v15122_v1 = vld [vmem:[%s19204_s3 + $0x4e0] ss:$16 sps:$4 sm:$0xff]  }
 0x2be   :  { %4185 = vmatprep.mubr.bf16.mxu0 %v15066_v5  ;;  %v15027_v5 = vld [vmem:[%s19204_s3 + $0x28] ss:$16 sps:$4 sm:$0xff]  }
 0x2c3   :  { %4826 = vmatmul.mubr.bf16.gmra.mrb[204].mxu1 %v14917_v32  ;;  %v15005_v32 = vld [vmem:[%s19204_s3 + $0xfa4] ss:$16 sps:$4 sm:$0xff]  }
 0x2c4   :  { %4833 = vmatprep.mubr.bf16.mxu1 %v14919_v33 }
 0x2c5   :  { %4186 = vmatmul.mubr.bf16.gmra.mrb[184].mxu0 %v15068_v6 }
 0x2c6   :  { %4193 = vmatprep.mubr.bf16.mxu0 %v15072_v8  ;;  %v15126_v8 = vld [vmem:[%s19204_s3 + $0x504] ss:$16 sps:$4 sm:$0xff]  }
 0x2cb   :  { %4834 = vmatmul.mubr.bf16.gmra.mrb[208].mxu1 %v14923_v36 }
 0x2cc   :  { %4841 = vmatprep.mubr.bf16.mxu1 %v14925_v37 }
 0x2cd   :  { %4194 = vmatmul.mubr.bf16.gmra.mrb[188].mxu0 %v15074_v9  ;;  %v15128_v9 = vld [vmem:[%s19204_s3 + $0x500] ss:$16 sps:$4 sm:$0xff]  }
 0x2ce   :  { %4201 = vmatprep.mubr.bf16.mxu0 %v15078_v12  ;;  %v15033_v12 = vld [vmem:[%s19204_s3 + $0x48] ss:$16 sps:$4 sm:$0xff]  }
 0x2d3   :  { %4842 = vmatmul.mubr.bf16.gmra.mrb[212].mxu1 %v14929_v40  ;;  %v15011_v40 = vld [vmem:[%s19204_s3 + $0xfc4] ss:$16 sps:$4 sm:$0xff]  }
 0x2d4   :  { %4849 = vmatprep.mubr.bf16.mxu1 %v14931_v41 }
 0x2d5   :  { %4202 = vmatmul.mubr.bf16.gmra.mrb[192].mxu0 %v15080_v13 }
 0x2d6   :  { %4209 = vmatprep.mubr.bf16.mxu0 %v15084_v16  ;;  %v15132_v16 = vld [vmem:[%s19204_s3 + $0x524] ss:$16 sps:$4 sm:$0xff]  }
 0x2db   :  { %4850 = vmatmul.mubr.bf16.gmra.mrb[216].mxu1 %v14935_v44 }
 0x2dc   :  { %4857 = vmatprep.mubr.bf16.mxu1 %v14937_v45 }
 0x2dd   :  { %4210 = vmatmul.mubr.bf16.gmra.mrb[196].mxu0 %v15086_v17  ;;  %v15134_v17 = vld [vmem:[%s19204_s3 + $0x520] ss:$16 sps:$4 sm:$0xff]  }
 0x2de   :  { %4217 = vmatprep.mubr.bf16.mxu0 %v15090_v25  ;;  %v15047_v25 = vld [vmem:[%s19204_s3 + $0x8c] ss:$16 sps:$4 sm:$0xff]  }
 0x2e3   :  { %4858 = vmatmul.mubr.bf16.gmra.mrb[220].mxu1 %v14941_v29  ;;  %v15017_v29 = vld [vmem:[%s19204_s3 + $0xfe4] ss:$16 sps:$4 sm:$0xff]  }
 0x2e4   :  { %4865 = vmatprep.mubr.bf16.mxu1 %v14943_v48 }
 0x2e5   :  { %4218 = vmatmul.mubr.bf16.gmra.mrb[200].mxu0 %v15092_v26 }
 0x2e6   :  { %4225 = vmatprep.mubr.bf16.mxu0 %v15096_v34  ;;  %v15045_v34 = vld [vmem:[%s19204_s3 + $0x88] ss:$16 sps:$4 sm:$0xff]  }
 0x2eb   :  { %4866 = vmatmul.mubr.bf16.gmra.mrb[224].mxu1 %v14947_v51 }
 0x2ec   :  { %4873 = vmatprep.mubr.bf16.mxu1 %v14949_v52 }
 0x2ed   :  { %4226 = vmatmul.mubr.bf16.gmra.mrb[204].mxu0 %v15098_v35 }
 0x2ee   :  { %4233 = vmatprep.mubr.bf16.mxu0 %v15102_v42 }
 0x2f3   :  { %4874 = vmatmul.mubr.bf16.gmra.mrb[228].mxu1 %v14953_v55  ;;  %v15023_v55 = vld [vmem:[%s19204_s3 + $0xc] ss:$16 sps:$4 sm:$0xff]  }
 0x2f4   :  { %4881 = vmatprep.mubr.bf16.mxu1 %v14955_v56 }
 0x2f5   :  { %4234 = vmatmul.mubr.bf16.gmra.mrb[208].mxu0 %v15104_v43 }
 0x2f6   :  { %4241 = vmatprep.mubr.bf16.mxu0 %v15108_v49  ;;  %v15150_v49 = vld [vmem:[%s19204_s3 + $0x584] ss:$16 sps:$4 sm:$0xff]  }
 0x2fb   :  { %4882 = vmatmul.mubr.bf16.gmra.mrb[232].mxu1 %v14959_v59 }
 0x2fc   :  { %4889 = vmatprep.mubr.bf16.mxu1 %v14961_v60 }
 0x2fd   :  { %4242 = vmatmul.mubr.bf16.gmra.mrb[212].mxu0 %v15110_v50  ;;  %v15152_v50 = vld [vmem:[%s19204_s3 + $0x580] ss:$16 sps:$4 sm:$0xff]  }
 0x2fe   :  { %4249 = vmatprep.mubr.bf16.mxu0 %v15114_v57  ;;  %v15065_v57 = vld [vmem:[%s19204_s3 + $0xec] ss:$16 sps:$4 sm:$0xff]  }
 0x303   :  { %4890 = vmatmul.mubr.bf16.gmra.mrb[236].mxu1 %v14965_v63  ;;  %v15029_v63 = vld [vmem:[%s19204_s3 + $0x2c] ss:$16 sps:$4 sm:$0xff]  }
 0x304   :  { %4897 = vmatprep.mubr.bf16.mxu1 %v14967_v0 }
 0x305   :  { %4250 = vmatmul.mubr.bf16.gmra.mrb[216].mxu0 %v15116_v58 }
 0x306   :  { %4257 = vmatprep.mubr.bf16.mxu0 %v15120_v3  ;;  %v15063_v3 = vld [vmem:[%s19204_s3 + $0xe8] ss:$16 sps:$4 sm:$0xff]  }
 0x30b   :  { %4898 = vmatmul.mubr.bf16.gmra.mrb[240].mxu1 %v14971_v2 }
 0x30c   :  { %4905 = vmatprep.mubr.bf16.mxu1 %v14973_v4 }
 0x30d   :  { %4258 = vmatmul.mubr.bf16.gmra.mrb[220].mxu0 %v15122_v1 }
 0x30e   :  { %4265 = vmatprep.mubr.bf16.mxu0 %v15126_v8 }
 0x313   :  { %4906 = vmatmul.mubr.bf16.gmra.mrb[244].mxu1 %v14977_v23  ;;  %v15035_v23 = vld [vmem:[%s19204_s3 + $0x4c] ss:$16 sps:$4 sm:$0xff]  }
 0x314   :  { %4913 = vmatprep.mubr.bf16.mxu1 %v14979_v7 }
 0x315   :  { %4266 = vmatmul.mubr.bf16.gmra.mrb[224].mxu0 %v15128_v9 }
 0x316   :  { %4273 = vmatprep.mubr.bf16.mxu0 %v15132_v16  ;;  %v15168_v16 = vld [vmem:[%s19204_s3 + $0x5e4] ss:$16 sps:$4 sm:$0xff]  }
 0x31b   :  { %4914 = vmatmul.mubr.bf16.gmra.mrb[248].mxu1 %v14983_v10 }
 0x31c   :  { %4921 = vmatprep.mubr.bf16.mxu1 %v14985_v11 }
 0x31d   :  { %4274 = vmatmul.mubr.bf16.gmra.mrb[228].mxu0 %v15134_v17  ;;  %v15170_v17 = vld [vmem:[%s19204_s3 + $0x5e0] ss:$16 sps:$4 sm:$0xff]  }
 0x323   :  { %4922 = vmatmul.mubr.bf16.gmra.mrb[252].mxu1 %v14989_v14  ;;  %v15041_v14 = vld [vmem:[%s19204_s3 + $0x6c] ss:$16 sps:$4 sm:$0xff]  }
 0x324   :  { %4929 = vmatprep.mubr.bf16.mxu1 %v14993_v15 }
 0x326   :  { %v16584_v18 = vpop.f32.mrb[148].mxu1 }
 0x327   :  { %19221 = vst [vmem:[#allocation3_spill] sm:$0xff] %v16584_v18  ;;  %v4717_v19 = vpop.f32.mrb[149].mxu1 }
 0x328   :  { %v16589_v21 = vpop.f32.mrb[150].mxu1 }
 0x329   :  { %19222 = vst [vmem:[#allocation4_spill] sm:$0xff] %v16589_v21  ;;  %v4720_v24 = vpop.f32.mrb[151].mxu1 }
 0x32b   :  { %4930 = vmatmul.mubr.bf16.gmra.mrb[148].mxu1 %v14991_v20 }
 0x32c   :  { %4937 = vmatprep.mubr.bf16.mxu1 %v14999_v22  ;;  %v15039_v22 = vld [vmem:[%s19204_s3 + $0x68] ss:$16 sps:$4 sm:$0xff]  }
 0x32e   :  { %v16600_v27 = vpop.f32.mrb[152].mxu1 }
 0x32f   :  { %19223 = vst [vmem:[#allocation5_spill] sm:$0xff] %v16600_v27  ;;  %v4725_v28 = vpop.f32.mrb[153].mxu1 }
 0x330   :  { %v16605_v31 = vpop.f32.mrb[154].mxu1  ;;  %v15138_v28 = vld [vmem:[%s19204_s3 + $0x544] ss:$16 sps:$4 sm:$0xff]  }
 0x331   :  { %19224 = vst [vmem:[#allocation6_spill] sm:$0xff] %v16605_v31  ;;  %v4728_v33 = vpop.f32.mrb[155].mxu1  ;;  %4281 = vmatprep.mubr.bf16.mxu0 %v15138_v28  ;;  %v15083_v28 = vld [vmem:[%s19204_s3 + $0x14c] ss:$16 sps:$4 sm:$0xff]  }
 0x333   :  { %4938 = vmatmul.mubr.bf16.gmra.mrb[152].mxu1 %v14997_v30  ;;  %v15140_v30 = vld [vmem:[%s19204_s3 + $0x540] ss:$16 sps:$4 sm:$0xff]  }
 0x334   :  { %4945 = vmatprep.mubr.bf16.mxu1 %v15005_v32  ;;  %4282 = vmatmul.mubr.bf16.gmra.mrb[232].mxu0 %v15140_v30 }
 0x336   :  { %v16616_v36 = vpop.f32.mrb[156].mxu1 }
 0x337   :  { %19225 = vst [vmem:[#allocation7_spill] sm:$0xff] %v16616_v36  ;;  %v4733_v37 = vpop.f32.mrb[157].mxu1 }
 0x338   :  { %v16621_v39 = vpop.f32.mrb[158].mxu1  ;;  %v15053_v37 = vld [vmem:[%s19204_s3 + $0xac] ss:$16 sps:$4 sm:$0xff]  }
 0x339   :  { %19226 = vst [vmem:[#allocation8_spill] sm:$0xff] %v16621_v39  ;;  %v4736_v41 = vpop.f32.mrb[159].mxu1 }
 0x33a   :  { %v15146_v41 = vld [vmem:[%s19204_s3 + $0x560] ss:$16 sps:$4 sm:$0xff]  }
 0x33b   :  { %4946 = vmatmul.mubr.bf16.gmra.mrb[156].mxu1 %v15003_v38 }
 0x33c   :  { %4953 = vmatprep.mubr.bf16.mxu1 %v15011_v40  ;;  %v15144_v40 = vld [vmem:[%s19204_s3 + $0x564] ss:$16 sps:$4 sm:$0xff]  }
 0x33d   :  { %4289 = vmatprep.mubr.bf16.mxu0 %v15144_v40  ;;  %v15081_v40 = vld [vmem:[%s19204_s3 + $0x148] ss:$16 sps:$4 sm:$0xff]  }
 0x33e   :  { %v16632_v44 = vpop.f32.mrb[160].mxu1  ;;  %4290 = vmatmul.mubr.bf16.gmra.mrb[236].mxu0 %v15146_v41 }
 0x33f   :  { %19227 = vst [vmem:[#allocation9_spill] sm:$0xff] %v16632_v44  ;;  %v4741_v45 = vpop.f32.mrb[161].mxu1  ;;  %4297 = vmatprep.mubr.bf16.mxu0 %v15150_v49  ;;  %v16840_v49 = vpop.f32.mrb[64].mxu0 }
 0x340   :  { %v16637_v47 = vpop.f32.mrb[162].mxu1  ;;  %v15051_v45 = vld [vmem:[%s19204_s3 + $0xa8] ss:$16 sps:$4 sm:$0xff]  }
 0x341   :  { %19228 = vst [vmem:[#allocation10_spill] sm:$0xff] %v16637_v47  ;;  %v4744_v48 = vpop.f32.mrb[163].mxu1 }
 0x343   :  { %4954 = vmatmul.mubr.bf16.gmra.mrb[160].mxu1 %v15009_v46 }
 0x344   :  { %4961 = vmatprep.mubr.bf16.mxu1 %v15017_v29  ;;  %v15059_v29 = vld [vmem:[%s19204_s3 + $0xcc] ss:$16 sps:$4 sm:$0xff]  }
 0x346   :  { %v16648_v51 = vpop.f32.mrb[164].mxu1  ;;  %4298 = vmatmul.mubr.bf16.gmra.mrb[240].mxu0 %v15152_v50  ;;  %v3949_v50 = vpop.f32.mrb[65].mxu0 }
 0x347   :  { %19229 = vst [vmem:[#allocation11_spill] sm:$0xff] %v16648_v51  ;;  %v4749_v52 = vpop.f32.mrb[165].mxu1 }
 0x348   :  { %v16653_v54 = vpop.f32.mrb[166].mxu1 }
 0x349   :  { %19230 = vst [vmem:[#allocation12_spill] sm:$0xff] %v16653_v54  ;;  %v4752_v56 = vpop.f32.mrb[167].mxu1 }
 0x34b   :  { %4962 = vmatmul.mubr.bf16.gmra.mrb[164].mxu1 %v15015_v53 }
 0x34c   :  { %5002 = vmatprep.mubr.bf16.mxu1 %v15023_v55  ;;  %v15057_v55 = vld [vmem:[%s19204_s3 + $0xc8] ss:$16 sps:$4 sm:$0xff]  }
 0x34e   :  { %v16664_v59 = vpop.f32.mrb[168].mxu1 }
 0x34f   :  { %19231 = vst [vmem:[#allocation13_spill] sm:$0xff] %v16664_v59  ;;  %v4757_v60 = vpop.f32.mrb[169].mxu1 }
 0x350   :  { %v16669_v62 = vpop.f32.mrb[170].mxu1  ;;  %v15156_v60 = vld [vmem:[%s19204_s3 + $0x5a4] ss:$16 sps:$4 sm:$0xff]  }
 0x351   :  { %19232 = vst [vmem:[#allocation14_spill] sm:$0xff] %v16669_v62  ;;  %v4760_v0 = vpop.f32.mrb[171].mxu1  ;;  %4305 = vmatprep.mubr.bf16.mxu0 %v15156_v60 }
 0x353   :  { %5003 = vmatmul.mubr.bf16.vlgmr.msra.gmra.mrb[168].mxu1 %v15021_v61  ;;  %v15158_v61 = vld [vmem:[%s19204_s3 + $0x5a0] ss:$16 sps:$4 sm:$0xff]  }
 0x354   :  { %5010 = vmatprep.mubr.bf16.mxu1 %v15029_v63  ;;  %4306 = vmatmul.mubr.bf16.gmra.mrb[244].mxu0 %v15158_v61  ;;  %v15095_v61 = vld [vmem:[%s19204_s3 + $0x18c] ss:$16 sps:$4 sm:$0xff]  }
 0x356   :  { %v16680_v2 = vpop.f32.mrb[172].mxu1 }
 0x357   :  { %19233 = vst [vmem:[#allocation15_spill] sm:$0xff] %v16680_v2  ;;  %v4765_v4 = vpop.f32.mrb[173].mxu1 }
 0x358   :  { %v16685_v6 = vpop.f32.mrb[174].mxu1  ;;  %v15071_v4 = vld [vmem:[%s19204_s3 + $0x10c] ss:$16 sps:$4 sm:$0xff]  }
 0x359   :  { %19234 = vst [vmem:[#allocation16_spill] sm:$0xff] %v16685_v6  ;;  %v4768_v7 = vpop.f32.mrb[175].mxu1 }
 0x35a   :  { %v15164_v7 = vld [vmem:[%s19204_s3 + $0x5c0] ss:$16 sps:$4 sm:$0xff]  }
 0x35b   :  { %5011 = vmatmul.mubr.bf16.gmra.mrb[172].mxu1 %v15027_v5 }
 0x35c   :  { %5018 = vmatprep.mubr.bf16.mxu1 %v15035_v23  ;;  %v15162_v23 = vld [vmem:[%s19204_s3 + $0x5c4] ss:$16 sps:$4 sm:$0xff]  }
 0x35d   :  { %4313 = vmatprep.mubr.bf16.mxu0 %v15162_v23 }
 0x35e   :  { %v16696_v10 = vpop.f32.mrb[176].mxu1  ;;  %4314 = vmatmul.mubr.bf16.gmra.mrb[248].mxu0 %v15164_v7 }
 0x35f   :  { %19235 = vst [vmem:[#allocation17_spill] sm:$0xff] %v16696_v10  ;;  %v4773_v11 = vpop.f32.mrb[177].mxu1  ;;  %4321 = vmatprep.mubr.bf16.mxu0 %v15168_v16 }
 0x360   :  { %v16701_v13 = vpop.f32.mrb[178].mxu1  ;;  %v15069_v11 = vld [vmem:[%s19204_s3 + $0x108] ss:$16 sps:$4 sm:$0xff]  }
 0x361   :  { %19236 = vst [vmem:[#allocation18_spill] sm:$0xff] %v16701_v13  ;;  %v4776_v15 = vpop.f32.mrb[179].mxu1 }
 0x363   :  { %5019 = vmatmul.mubr.bf16.gmra.mrb[176].mxu1 %v15033_v12 }
 0x364   :  { %5026 = vmatprep.mubr.bf16.mxu1 %v15041_v14  ;;  %v15077_v14 = vld [vmem:[%s19204_s3 + $0x12c] ss:$16 sps:$4 sm:$0xff]  }
 0x366   :  { %v16712_v19 = vpop.f32.mrb[180].mxu1  ;;  %4322 = vmatmul.mubr.bf16.gmra.mrb[252].mxu0 %v15170_v17  ;;  %v15101_v17 = vld [vmem:[%s19204_s3 + $0x1ac] ss:$16 sps:$4 sm:$0xff]  }
 0x367   :  { %19237 = vst [vmem:[#allocation19_spill] sm:$0xff] %v16712_v19  ;;  %v4781_v20 = vpop.f32.mrb[181].mxu1 }
 0x368   :  { %v16717_v24 = vpop.f32.mrb[182].mxu1 }
 0x369   :  { %19238 = vst [vmem:[#allocation20_spill] sm:$0xff] %v16717_v24  ;;  %v4784_v26 = vpop.f32.mrb[183].mxu1 }
 0x36b   :  { %5027 = vmatmul.mubr.bf16.gmra.mrb[180].mxu1 %v15039_v22 }
 0x36c   :  { %5034 = vmatprep.mubr.bf16.mxu1 %v15047_v25  ;;  %v15075_v25 = vld [vmem:[%s19204_s3 + $0x128] ss:$16 sps:$4 sm:$0xff]  }
 0x36e   :  { %v16728_v32 = vpop.f32.mrb[184].mxu1 }
 0x36f   :  { %19239 = vst [vmem:[#allocation21_spill] sm:$0xff] %v16728_v32  ;;  %v4789_v33 = vpop.f32.mrb[185].mxu1 }
 0x370   :  { %v16733_v35 = vpop.f32.mrb[186].mxu1  ;;  %v15174_v33 = vld [vmem:[%s19204_s3 + $0x600] ss:$16 sps:$4 sm:$0xff]  }
 0x371   :  { %19240 = vst [vmem:[#allocation22_spill] sm:$0xff] %v16733_v35  ;;  %v4792_v38 = vpop.f32.mrb[187].mxu1 }
 0x373   :  { %5035 = vmatmul.mubr.bf16.gmra.mrb[184].mxu1 %v15045_v34  ;;  %v15176_v34 = vld [vmem:[%s19204_s3 + $0x604] ss:$16 sps:$4 sm:$0xff]  }
 0x374   :  { %5042 = vmatprep.mubr.bf16.mxu1 %v15053_v37  ;;  %4329 = vmatprep.mubr.bf16.mxu0 %v15176_v34 }
 0x375   :  { %4330 = vmatmul.mubr.bf16.gmra.mrb[0].mxu0 %v15174_v33 }
 0x376   :  { %v16744_v42 = vpop.f32.mrb[188].mxu1 }
 0x377   :  { %19241 = vst [vmem:[#allocation23_spill] sm:$0xff] %v16744_v42  ;;  %v4797_v43 = vpop.f32.mrb[189].mxu1 }
 0x378   :  { %v16749_v46 = vpop.f32.mrb[190].mxu1  ;;  %v15089_v43 = vld [vmem:[%s19204_s3 + $0x16c] ss:$16 sps:$4 sm:$0xff]  }
 0x379   :  { %19242 = vst [vmem:[#allocation24_spill] sm:$0xff] %v16749_v46  ;;  %v4800_v48 = vpop.f32.mrb[191].mxu1 }
 0x37a   :  { %v15182_v48 = vld [vmem:[%s19204_s3 + $0x624] ss:$16 sps:$4 sm:$0xff]  }
 0x37b   :  { %5043 = vmatmul.mubr.bf16.gmra.mrb[188].mxu1 %v15051_v45  ;;  %4337 = vmatprep.mubr.bf16.mxu0 %v15182_v48  ;;  %v15107_v48 = vld [vmem:[%s19204_s3 + $0x1cc] ss:$16 sps:$4 sm:$0xff]  }
 0x37c   :  { %5050 = vmatprep.mubr.bf16.mxu1 %v15059_v29  ;;  %v15180_v29 = vld [vmem:[%s19204_s3 + $0x620] ss:$16 sps:$4 sm:$0xff]  }
 0x37d   :  { %4338 = vmatmul.mubr.bf16.gmra.mrb[4].mxu0 %v15180_v29 }
 0x37e   :  { %v16760_v52 = vpop.f32.mrb[192].mxu1 }
 0x37f   :  { %19243 = vst [vmem:[#allocation25_spill] sm:$0xff] %v16760_v52  ;;  %v4805_v53 = vpop.f32.mrb[193].mxu1 }
 0x380   :  { %v16765_v56 = vpop.f32.mrb[194].mxu1 }
 0x381   :  { %19244 = vst [vmem:[#allocation26_spill] sm:$0xff] %v16765_v56  ;;  %v4808_v58 = vpop.f32.mrb[195].mxu1 }
 0x382   :  { %v16847_v58 = vpop.f32.mrb[66].mxu0 }
 0x383   :  { %5051 = vmatmul.mubr.bf16.gmra.mrb[192].mxu1 %v15057_v55 }
 0x384   :  { %5058 = vmatprep.mubr.bf16.mxu1 %v15065_v57  ;;  %v15087_v57 = vld [vmem:[%s19204_s3 + $0x168] ss:$16 sps:$4 sm:$0xff]  }
 0x386   :  { %v16776_v63 = vpop.f32.mrb[196].mxu1 }
 0x387   :  { %19245 = vst [vmem:[#allocation27_spill] sm:$0xff] %v16776_v63  ;;  %v4813_v0 = vpop.f32.mrb[197].mxu1  ;;  %v15177_v63 = vld [vmem:[%s19204_s3 + $0x348] ss:$16 sps:$4 sm:$0xff]  }
 0x388   :  { %v16781_v1 = vpop.f32.mrb[198].mxu1  ;;  %v3952_v0 = vpop.f32.mrb[67].mxu0 }
 0x389   :  { %19246 = vst [vmem:[#allocation28_spill] sm:$0xff] %v16781_v1  ;;  %v4816_v5 = vpop.f32.mrb[199].mxu1  ;;  %v16860_v23 = vpop.f32.mrb[68].mxu0 }
 0x38a   :  { %v15186_v5 = vld [vmem:[%s19204_s3 + $0x640] ss:$16 sps:$4 sm:$0xff]   ;;  %v3957_v7 = vpop.f32.mrb[69].mxu0 }
 0x38b   :  { %5059 = vmatmul.mubr.bf16.gmra.mrb[196].mxu1 %v15063_v3  ;;  %v15105_v7 = vld [vmem:[%s19204_s3 + $0x1c8] ss:$16 sps:$4 sm:$0xff]  }
 0x38c   :  { %5066 = vmatprep.mubr.bf16.mxu1 %v15071_v4  ;;  %v15188_v4 = vld [vmem:[%s19204_s3 + $0x644] ss:$16 sps:$4 sm:$0xff]  }
 0x38d   :  { %4345 = vmatprep.mubr.bf16.mxu0 %v15188_v4 }
 0x38e   :  { %v16792_v8 = vpop.f32.mrb[200].mxu1  ;;  %4346 = vmatmul.mubr.bf16.gmra.mrb[8].mxu0 %v15186_v5 }
 0x38f   :  { %19247 = vst [vmem:[#allocation29_spill] sm:$0xff] %v16792_v8  ;;  %v4821_v9 = vpop.f32.mrb[201].mxu1  ;;  %v15171_v8 = vld [vmem:[%s19204_s3 + $0x328] ss:$16 sps:$4 sm:$0xff]  }
 0x390   :  { %v16797_v12 = vpop.f32.mrb[202].mxu1 }
 0x391   :  { %19248 = vst [vmem:[#allocation30_spill] sm:$0xff] %v16797_v12  ;;  %v4824_v15 = vpop.f32.mrb[203].mxu1 }
 0x392   :  { %v16867_v15 = vpop.f32.mrb[70].mxu0 }
 0x393   :  { %5067 = vmatmul.mubr.bf16.gmra.mrb[200].mxu1 %v15069_v11 }
 0x394   :  { %5074 = vmatprep.mubr.bf16.mxu1 %v15077_v14  ;;  %v15093_v14 = vld [vmem:[%s19204_s3 + $0x188] ss:$16 sps:$4 sm:$0xff]  }
 0x396   :  { %v16808_v20 = vpop.f32.mrb[204].mxu1 }
 0x397   :  { %19249 = vst [vmem:[#allocation31_spill] sm:$0xff] %v16808_v20  ;;  %v4829_v22 = vpop.f32.mrb[205].mxu1  ;;  %v15165_v20 = vld [vmem:[%s19204_s3 + $0x308] ss:$16 sps:$4 sm:$0xff]  }
 0x398   :  { %v16813_v26 = vpop.f32.mrb[206].mxu1  ;;  %v3960_v22 = vpop.f32.mrb[71].mxu0 }
 0x399   :  { %19250 = vst [vmem:[#allocation32_spill] sm:$0xff] %v16813_v26  ;;  %v4832_v30 = vpop.f32.mrb[207].mxu1  ;;  %v16880_v33 = vpop.f32.mrb[72].mxu0 }
 0x39a   :  { %v15192_v30 = vld [vmem:[%s19204_s3 + $0x660] ss:$16 sps:$4 sm:$0xff]   ;;  %v3965_v34 = vpop.f32.mrb[73].mxu0 }
 0x39b   :  { %5075 = vmatmul.mubr.bf16.gmra.mrb[204].mxu1 %v15075_v25 }
 0x39c   :  { %5082 = vmatprep.mubr.bf16.mxu1 %v15083_v28  ;;  %v15194_v28 = vld [vmem:[%s19204_s3 + $0x664] ss:$16 sps:$4 sm:$0xff]  }
 0x39d   :  { %4353 = vmatprep.mubr.bf16.mxu0 %v15194_v28  ;;  %v15206_v28 = vld [vmem:[%s19204_s3 + $0x6a4] ss:$16 sps:$4 sm:$0xff]  }
 0x39e   :  { %v16824_v37 = vpop.f32.mrb[208].mxu1  ;;  %4354 = vmatmul.mubr.bf16.gmra.mrb[12].mxu0 %v15192_v30  ;;  %v15204_v30 = vld [vmem:[%s19204_s3 + $0x6a0] ss:$16 sps:$4 sm:$0xff]  }
 0x39f   :  { %19251 = vst [vmem:[#allocation33_spill] sm:$0xff] %v16824_v37  ;;  %v4837_v38 = vpop.f32.mrb[209].mxu1  ;;  %v15159_v37 = vld [vmem:[%s19204_s3 + $0x2e8] ss:$16 sps:$4 sm:$0xff]  }
 0x3a0   :  { %v16829_v41 = vpop.f32.mrb[210].mxu1 }
 0x3a1   :  { %19252 = vst [vmem:[#allocation34_spill] sm:$0xff] %v16829_v41  ;;  %v4840_v45 = vpop.f32.mrb[211].mxu1 }
 0x3a2   :  { %v16887_v45 = vpop.f32.mrb[74].mxu0 }
 0x3a3   :  { %5083 = vmatmul.mubr.bf16.gmra.mrb[208].mxu1 %v15081_v40  ;;  %v3968_v50 = vpop.f32.mrb[75].mxu0 }
 0x3a4   :  { %5090 = vmatprep.mubr.bf16.mxu1 %v15089_v43  ;;  %v15099_v43 = vld [vmem:[%s19204_s3 + $0x1a8] ss:$16 sps:$4 sm:$0xff]   ;;  %v16900_v0 = vpop.f32.mrb[76].mxu0 }
 0x3a5   :  { %v15111_v50 = vld [vmem:[%s19204_s3 + $0x1e8] ss:$16 sps:$4 sm:$0xff]  }
 0x3a6   :  { %v16842_v53 = vpop.f32.mrb[212].mxu1 }
 0x3a7   :  { %19253 = vst [vmem:[#allocation35_spill] sm:$0xff] %v16842_v53  ;;  %v4845_v55 = vpop.f32.mrb[213].mxu1  ;;  %v15153_v53 = vld [vmem:[%s19204_s3 + $0x2c8] ss:$16 sps:$4 sm:$0xff]  }
 0x3a8   :  { %v16849_v60 = vpop.f32.mrb[214].mxu1 }
 0x3a9   :  { %19254 = vst [vmem:[#allocation36_spill] sm:$0xff] %v16849_v60  ;;  %v4848_v3 = vpop.f32.mrb[215].mxu1 }
 0x3aa   :  { %v3973_v3 = vpop.f32.mrb[77].mxu0 }
 0x3ab   :  { %5091 = vmatmul.mubr.bf16.gmra.mrb[212].mxu1 %v15087_v57  ;;  %v15200_v57 = vld [vmem:[%s19204_s3 + $0x684] ss:$16 sps:$4 sm:$0xff]  }
 0x3ac   :  { %5098 = vmatprep.mubr.bf16.mxu1 %v15095_v61  ;;  %v15198_v61 = vld [vmem:[%s19204_s3 + $0x680] ss:$16 sps:$4 sm:$0xff]   ;;  %4361 = vmatprep.mubr.bf16.mxu0 %v15200_v57 }
 0x3ad   :  { %4362 = vmatmul.mubr.bf16.gmra.mrb[16].mxu0 %v15198_v61  ;;  %v15119_v61 = vld [vmem:[%s19204_s3 + $0x20c] ss:$16 sps:$4 sm:$0xff]  }
 0x3ae   :  { %v16862_v9 = vpop.f32.mrb[216].mxu1  ;;  %4369 = vmatprep.mubr.bf16.mxu0 %v15206_v28 }
 0x3af   :  { %19255 = vst [vmem:[#allocation37_spill] sm:$0xff] %v16862_v9  ;;  %v4853_v11 = vpop.f32.mrb[217].mxu1  ;;  %v15147_v9 = vld [vmem:[%s19204_s3 + $0x2a8] ss:$16 sps:$4 sm:$0xff]  }
 0x3b0   :  { %v16869_v16 = vpop.f32.mrb[218].mxu1  ;;  %v16907_v11 = vpop.f32.mrb[78].mxu0 }
 0x3b1   :  { %19256 = vst [vmem:[#allocation38_spill] sm:$0xff] %v16869_v16  ;;  %v4856_v25 = vpop.f32.mrb[219].mxu1  ;;  %v3976_v22 = vpop.f32.mrb[79].mxu0 }
 0x3b2   :  { %v16920_v34 = vpop.f32.mrb[80].mxu0 }
 0x3b3   :  { %5099 = vmatmul.mubr.bf16.gmra.mrb[216].mxu1 %v15093_v14 }
 0x3b4   :  { %5106 = vmatprep.mubr.bf16.mxu1 %v15101_v17  ;;  %v15113_v17 = vld [vmem:[%s19204_s3 + $0x1ec] ss:$16 sps:$4 sm:$0xff]  }
 0x3b5   :  { %4370 = vmatmul.mubr.bf16.gmra.mrb[20].mxu0 %v15204_v30 }
 0x3b6   :  { %v16882_v38 = vpop.f32.mrb[220].mxu1 }
 0x3b7   :  { %19257 = vst [vmem:[#allocation39_spill] sm:$0xff] %v16882_v38  ;;  %v4861_v40 = vpop.f32.mrb[221].mxu1 }
 0x3b8   :  { %v16889_v29 = vpop.f32.mrb[222].mxu1  ;;  %v3981_v40 = vpop.f32.mrb[81].mxu0 }
 0x3b9   :  { %19258 = vst [vmem:[#allocation40_spill] sm:$0xff] %v16889_v29  ;;  %v4864_v55 = vpop.f32.mrb[223].mxu1  ;;  %v15117_v40 = vld [vmem:[%s19204_s3 + $0x208] ss:$16 sps:$4 sm:$0xff]  }
 0x3ba   :  { %v16927_v55 = vpop.f32.mrb[82].mxu0 }
 0x3bb   :  { %5107 = vmatmul.mubr.bf16.gmra.mrb[220].mxu1 %v15099_v43  ;;  %v3984_v3 = vpop.f32.mrb[83].mxu0 }
 0x3bc   :  { %5114 = vmatprep.mubr.bf16.mxu1 %v15107_v48  ;;  %v16940_v22 = vpop.f32.mrb[84].mxu0 }
 0x3be   :  { %v16902_v4 = vpop.f32.mrb[224].mxu1 }
 0x3bf   :  { %19259 = vst [vmem:[#allocation41_spill] sm:$0xff] %v16902_v4  ;;  %v4869_v5 = vpop.f32.mrb[225].mxu1 }
 0x3c0   :  { %v16909_v14 = vpop.f32.mrb[226].mxu1 }
 0x3c1   :  { %19260 = vst [vmem:[#allocation42_spill] sm:$0xff] %v16909_v14  ;;  %v4872_v25 = vpop.f32.mrb[227].mxu1 }
 0x3c2   :  { %v3989_v25 = vpop.f32.mrb[85].mxu0 }
 0x3c3   :  { %5115 = vmatmul.mubr.bf16.gmra.mrb[224].mxu1 %v15105_v7  ;;  %v15212_v7 = vld [vmem:[%s19204_s3 + $0x6c4] ss:$16 sps:$4 sm:$0xff]  }
 0x3c4   :  { %5122 = vmatprep.mubr.bf16.mxu1 %v15113_v17  ;;  %v15210_v17 = vld [vmem:[%s19204_s3 + $0x6c0] ss:$16 sps:$4 sm:$0xff]   ;;  %4377 = vmatprep.mubr.bf16.mxu0 %v15212_v7 }
 0x3c5   :  { %4378 = vmatmul.mubr.bf16.gmra.mrb[24].mxu0 %v15210_v17  ;;  %v15216_v17 = vld [vmem:[%s19204_s3 + $0x6e0] ss:$16 sps:$4 sm:$0xff]  }
 0x3c6   :  { %v16922_v43 = vpop.f32.mrb[228].mxu1 }
 0x3c7   :  { %19261 = vst [vmem:[#allocation43_spill] sm:$0xff] %v16922_v43  ;;  %v4877_v48 = vpop.f32.mrb[229].mxu1 }
 0x3c8   :  { %v16929_v57 = vpop.f32.mrb[230].mxu1  ;;  %v16947_v48 = vpop.f32.mrb[86].mxu0 }
 0x3c9   :  { %19262 = vst [vmem:[#allocation44_spill] sm:$0xff] %v16929_v57  ;;  %v4880_v5 = vpop.f32.mrb[231].mxu1 }
 0x3ca   :  { %v3992_v5 = vpop.f32.mrb[87].mxu0 }
 0x3cb   :  { %5123 = vmatmul.mubr.bf16.gmra.mrb[228].mxu1 %v15111_v50  ;;  %v15125_v50 = vld [vmem:[%s19204_s3 + $0x22c] ss:$16 sps:$4 sm:$0xff]   ;;  %v16960_v25 = vpop.f32.mrb[88].mxu0 }
 0x3cc   :  { %5130 = vmatprep.mubr.bf16.mxu1 %v15119_v61  ;;  %v15218_v61 = vld [vmem:[%s19204_s3 + $0x6e4] ss:$16 sps:$4 sm:$0xff]   ;;  %v3997_v5 = vpop.f32.mrb[89].mxu0 }
 0x3cd   :  { %4385 = vmatprep.mubr.bf16.mxu0 %v15218_v61  ;;  %v15131_v5 = vld [vmem:[%s19204_s3 + $0x24c] ss:$16 sps:$4 sm:$0xff]  }
 0x3ce   :  { %v16942_v28 = vpop.f32.mrb[232].mxu1  ;;  %4386 = vmatmul.mubr.bf16.gmra.mrb[28].mxu0 %v15216_v17 }
 0x3cf   :  { %19263 = vst [vmem:[#allocation45_spill] sm:$0xff] %v16942_v28  ;;  %v4885_v30 = vpop.f32.mrb[233].mxu1  ;;  %v16972_v28 = vpop.f32.mrb[90].mxu0 }
 0x3d0   :  { %v16949_v3 = vpop.f32.mrb[234].mxu1  ;;  %v12396_v30 = vld [vmem:[%s19206_s4 + $0x4] sm:$0xf]  ;;  %v4000_v17 = vpop.f32.mrb[91].mxu0 }
 0x3d1   :  { %19264 = vst [vmem:[#allocation46_spill] sm:$0xff] %v16949_v3  ;;  %v4888_v7 = vpop.f32.mrb[235].mxu1  ;;  %14693 = vmatprep.subr.msk.bf16.mxu0 %vm6183_vm1, %v12396_v30  ;;  %v6185_v61 = vsel %vm6183_vm1, %v12396_v30, 0  ;;  %v16985_v30 = vpop.f32.mrb[92].mxu0 }
 0x3d2   :  { %13336 = vmatpush3.bf16.msra.mxu0 %v6185_v61 }
 0x3d3   :  { %5131 = vmatmul.mubr.bf16.gmra.mrb[232].mxu1 %v15117_v40  ;;  %v15123_v40 = vld [vmem:[%s19204_s3 + $0x228] ss:$16 sps:$4 sm:$0xff]  }
 0x3d4   :  { %5138 = vmatprep.mubr.bf16.mxu1 %v15125_v50 }
 0x3d6   :  { %v16966_v7 = vpop.f32.mrb[236].mxu1 }
 0x3d7   :  { %19265 = vst [vmem:[#allocation47_spill] sm:$0xff] %v16966_v7  ;;  %v4893_v3 = vpop.f32.mrb[237].mxu1  ;;  %v15222_v7 = vld [vmem:[%s19204_s3 + $0x700] ss:$16 sps:$4 sm:$0xff]  }
 0x3d8   :  { %v16974_v50 = vpop.f32.mrb[238].mxu1  ;;  %v15224_v3 = vld [vmem:[%s19204_s3 + $0x704] ss:$16 sps:$4 sm:$0xff]  }
 0x3d9   :  { %19266 = vst [vmem:[#allocation48_spill] sm:$0xff] %v16974_v50  ;;  %v4896_v57 = vpop.f32.mrb[239].mxu1  ;;  %4393 = vmatprep.mubr.bf16.mxu0 %v15224_v3  ;;  %v4005_v50 = vpop.f32.mrb[93].mxu0 }
 0x3da   :  { %4394 = vmatmul.mubr.bf16.gmra.mrb[32].mxu0 %v15222_v7  ;;  %v15129_v57 = vld [vmem:[%s19204_s3 + $0x248] ss:$16 sps:$4 sm:$0xff]   ;;  %v16992_v17 = vpop.f32.mrb[94].mxu0  ;;  %v15230_v7 = vld [vmem:[%s19204_s3 + $0x724] ss:$16 sps:$4 sm:$0xff]  }
 0x3db   :  { %5139 = vmatmul.mubr.bf16.gmra.mrb[236].mxu1 %v15123_v40  ;;  %v15137_v40 = vld [vmem:[%s19204_s3 + $0x26c] ss:$16 sps:$4 sm:$0xff]   ;;  %v4008_v3 = vpop.f32.mrb[95].mxu0  ;;  %v15228_v50 = vld [vmem:[%s19204_s3 + $0x720] ss:$16 sps:$4 sm:$0xff]   ;;  %4401 = vmatprep.mubr.bf16.mxu0 %v15230_v7 }
 0x3dc   :  { %5146 = vmatprep.mubr.bf16.mxu1 %v15131_v5  ;;  %v17005_v5 = vpop.f32.mrb[96].mxu0 }
 0x3de   :  { %v16987_v43 = vpop.f32.mrb[240].mxu1 }
 0x3df   :  { %19267 = vst [vmem:[#allocation49_spill] sm:$0xff] %v16987_v43  ;;  %v4901_v61 = vpop.f32.mrb[241].mxu1 }
 0x3e0   :  { %v16994_v14 = vpop.f32.mrb[242].mxu1  ;;  %v4013_v61 = vpop.f32.mrb[97].mxu0 }
 0x3e1   :  { %19268 = vst [vmem:[#allocation50_spill] sm:$0xff] %v16994_v14  ;;  %v4904_v4 = vpop.f32.mrb[243].mxu1  ;;  %v17012_v3 = vpop.f32.mrb[98].mxu0 }
 0x3e2   :  { %4402 = vmatmul.mubr.bf16.gmra.mrb[36].mxu0 %v15228_v50  ;;  %v15135_v4 = vld [vmem:[%s19204_s3 + $0x268] ss:$16 sps:$4 sm:$0xff]   ;;  %v4016_v7 = vpop.f32.mrb[99].mxu0 }
 0x3e3   :  { %5147 = vmatmul.mubr.bf16.gmra.mrb[240].mxu1 %v15129_v57  ;;  %v15143_v57 = vld [vmem:[%s19204_s3 + $0x28c] ss:$16 sps:$4 sm:$0xff]   ;;  %v17025_v50 = vpop.f32.mrb[100].mxu0 }
 0x3e4   :  { %5154 = vmatprep.mubr.bf16.mxu1 %v15137_v40  ;;  %v15236_v40 = vld [vmem:[%s19204_s3 + $0x744] ss:$16 sps:$4 sm:$0xff]  }
 0x3e5   :  { %4409 = vmatprep.mubr.bf16.mxu0 %v15236_v40 }
 0x3e6   :  { %v17007_v14 = vpop.f32.mrb[244].mxu1 }
 0x3e7   :  { %19269 = vst [vmem:[#allocation51_spill] sm:$0xff] %v17007_v14  ;;  %v4909_v43 = vpop.f32.mrb[245].mxu1 }
 0x3e8   :  { %v17014_v29 = vpop.f32.mrb[246].mxu1  ;;  %v15234_v43 = vld [vmem:[%s19204_s3 + $0x740] ss:$16 sps:$4 sm:$0xff]  }
 0x3e9   :  { %19270 = vst [vmem:[#allocation52_spill] sm:$0xff] %v17014_v29  ;;  %v4912_v38 = vpop.f32.mrb[247].mxu1  ;;  %v4021_v29 = vpop.f32.mrb[101].mxu0 }
 0x3ea   :  { %4410 = vmatmul.mubr.bf16.gmra.mrb[40].mxu0 %v15234_v43  ;;  %v15141_v38 = vld [vmem:[%s19204_s3 + $0x288] ss:$16 sps:$4 sm:$0xff]   ;;  %v17032_v7 = vpop.f32.mrb[102].mxu0 }
 0x3eb   :  { %5155 = vmatmul.mubr.bf16.gmra.mrb[244].mxu1 %v15135_v4  ;;  %v15149_v4 = vld [vmem:[%s19204_s3 + $0x2ac] ss:$16 sps:$4 sm:$0xff]  }
 0x3ec   :  { %5162 = vmatprep.mubr.bf16.mxu1 %v15143_v57  ;;  %v4024_v57 = vpop.f32.mrb[103].mxu0 }
 0x3ed   :  { %v17039_v43 = vpop.f32.mrb[104].mxu0  ;;  %v15155_v57 = vld [vmem:[%s19204_s3 + $0x2cc] ss:$16 sps:$4 sm:$0xff]  }
 0x3ee   :  { %v17027_v61 = vpop.f32.mrb[248].mxu1 }
 0x3ef   :  { %19271 = vst [vmem:[#allocation53_spill] sm:$0xff] %v17027_v61  ;;  %v4917_v14 = vpop.f32.mrb[249].mxu1 }
 0x3f0   :  { %v17034_v16 = vpop.f32.mrb[250].mxu1  ;;  %v4029_v14 = vpop.f32.mrb[105].mxu0 }
 0x3f1   :  { %19272 = vst [vmem:[#allocation54_spill] sm:$0xff] %v17034_v16  ;;  %v4920_v40 = vpop.f32.mrb[251].mxu1  ;;  %v17046_v60 = vpop.f32.mrb[106].mxu0 }
 0x3f3   :  { %5163 = vmatmul.mubr.bf16.gmra.mrb[248].mxu1 %v15141_v38  ;;  %v4032_v38 = vpop.f32.mrb[107].mxu0 }
 0x3f4   :  { %5170 = vmatprep.mubr.bf16.mxu1 %v15149_v4  ;;  %v17053_v40 = vpop.f32.mrb[108].mxu0  ;;  %v15161_v38 = vld [vmem:[%s19204_s3 + $0x2ec] ss:$16 sps:$4 sm:$0xff]  }
 0x3f6   :  { %v17041_v29 = vpop.f32.mrb[252].mxu1 }
 0x3f7   :  { %19273 = vst [vmem:[#allocation55_spill] sm:$0xff] %v17041_v29  ;;  %v4925_v61 = vpop.f32.mrb[253].mxu1 }
 0x3f8   :  { %v17048_v16 = vpop.f32.mrb[254].mxu1  ;;  %v4037_v61 = vpop.f32.mrb[109].mxu0 }
 0x3f9   :  { %19274 = vst [vmem:[#allocation56_spill] sm:$0xff] %v17048_v16  ;;  %v4928_v4 = vpop.f32.mrb[255].mxu1  ;;  %v17060_v41 = vpop.f32.mrb[110].mxu0 }
 0x3fb   :  { %5171 = vmatmul.mubr.bf16.gmra.mrb[252].mxu1 %v15147_v9  ;;  %v4040_v9 = vpop.f32.mrb[111].mxu0 }
 0x3fc   :  { %5178 = vmatprep.mubr.bf16.mxu1 %v15155_v57  ;;  %v17067_v4 = vpop.f32.mrb[112].mxu0  ;;  %v15167_v9 = vld [vmem:[%s19204_s3 + $0x30c] ss:$16 sps:$4 sm:$0xff]  }
 0x3fe   :  { %v17055_v14 = vpop.f32.mrb[148].mxu1 }
 0x3ff   :  { %19275 = vst [vmem:[#allocation57_spill] sm:$0xff] %v17055_v14  ;;  %v4933_v29 = vpop.f32.mrb[149].mxu1 }
 0x400   :  { %v17062_v16 = vpop.f32.mrb[150].mxu1  ;;  %v4045_v29 = vpop.f32.mrb[113].mxu0 }
 0x401   :  { %19276 = vst [vmem:[#allocation58_spill] sm:$0xff] %v17062_v16  ;;  %v4936_v57 = vpop.f32.mrb[151].mxu1  ;;  %v17074_v26 = vpop.f32.mrb[114].mxu0 }
 0x403   :  { %5179 = vmatmul.mubr.bf16.gmra.mrb[148].mxu1 %v15153_v53  ;;  %v4048_v53 = vpop.f32.mrb[115].mxu0 }
 0x404   :  { %5186 = vmatprep.mubr.bf16.mxu1 %v15161_v38  ;;  %v17081_v57 = vpop.f32.mrb[116].mxu0  ;;  %v15173_v53 = vld [vmem:[%s19204_s3 + $0x32c] ss:$16 sps:$4 sm:$0xff]  }
 0x406   :  { %v17069_v61 = vpop.f32.mrb[152].mxu1 }
 0x407   :  { %19277 = vst [vmem:[#allocation59_spill] sm:$0xff] %v17069_v61  ;;  %v4941_v14 = vpop.f32.mrb[153].mxu1 }
 0x408   :  { %v17076_v16 = vpop.f32.mrb[154].mxu1  ;;  %v4053_v14 = vpop.f32.mrb[117].mxu0 }
 0x409   :  { %19278 = vst [vmem:[#allocation60_spill] sm:$0xff] %v17076_v16  ;;  %v4944_v38 = vpop.f32.mrb[155].mxu1  ;;  %v17088_v12 = vpop.f32.mrb[118].mxu0 }
 0x40b   :  { %5187 = vmatmul.mubr.bf16.gmra.mrb[152].mxu1 %v15159_v37  ;;  %v4056_v37 = vpop.f32.mrb[119].mxu0 }
 0x40c   :  { %5194 = vmatprep.mubr.bf16.mxu1 %v15167_v9  ;;  %v17095_v38 = vpop.f32.mrb[120].mxu0  ;;  %v15179_v37 = vld [vmem:[%s19204_s3 + $0x34c] ss:$16 sps:$4 sm:$0xff]  }
 0x40e   :  { %v17083_v29 = vpop.f32.mrb[156].mxu1 }
 0x40f   :  { %19279 = vst [vmem:[#allocation61_spill] sm:$0xff] %v17083_v29  ;;  %v4949_v61 = vpop.f32.mrb[157].mxu1 }
 0x410   :  { %v17090_v16 = vpop.f32.mrb[158].mxu1  ;;  %v4061_v61 = vpop.f32.mrb[121].mxu0 }
 0x411   :  { %19280 = vst [vmem:[#allocation62_spill] sm:$0xff] %v17090_v16  ;;  %v4952_v9 = vpop.f32.mrb[159].mxu1  ;;  %v17102_v1 = vpop.f32.mrb[122].mxu0 }
 0x413   :  { %5195 = vmatmul.mubr.bf16.gmra.mrb[156].mxu1 %v15165_v20  ;;  %v4064_v20 = vpop.f32.mrb[123].mxu0 }
 0x414   :  { %5202 = vmatprep.mubr.bf16.mxu1 %v15173_v53  ;;  %v17109_v9 = vpop.f32.mrb[124].mxu0  ;;  %v15185_v20 = vld [vmem:[%s19204_s3 + $0x36c] ss:$16 sps:$4 sm:$0xff]  }
 0x416   :  { %v17097_v14 = vpop.f32.mrb[160].mxu1 }
 0x417   :  { %19281 = vst [vmem:[#allocation63_spill] sm:$0xff] %v17097_v14  ;;  %v4957_v29 = vpop.f32.mrb[161].mxu1 }
 0x418   :  { %v17104_v16 = vpop.f32.mrb[162].mxu1  ;;  %v4069_v29 = vpop.f32.mrb[125].mxu0 }
 0x419   :  { %19282 = vst [vmem:[#allocation64_spill] sm:$0xff] %v17104_v16  ;;  %v4960_v53 = vpop.f32.mrb[163].mxu1  ;;  %v17116_v56 = vpop.f32.mrb[126].mxu0 }
 0x41b   :  { %5203 = vmatmul.mubr.bf16.gmra.mrb[160].mxu1 %v15171_v8  ;;  %v4072_v8 = vpop.f32.mrb[127].mxu0 }
 0x41c   :  { %5210 = vmatprep.mubr.bf16.mxu1 %v15179_v37  ;;  %v17123_v53 = vpop.f32.mrb[128].mxu0 }
 0x41e   :  { %v17111_v61 = vpop.f32.mrb[164].mxu1 }
 0x41f   :  { %19283 = vst [vmem:[#allocation65_spill] sm:$0xff] %v17111_v61  ;;  %v4965_v14 = vpop.f32.mrb[165].mxu1 }
 0x420   :  { %v17118_v16 = vpop.f32.mrb[166].mxu1  ;;  %v4077_v14 = vpop.f32.mrb[129].mxu0 }
 0x421   :  { %19284 = vst [vmem:[#allocation66_spill] sm:$0xff] %v17118_v16  ;;  %v4968_v37 = vpop.f32.mrb[167].mxu1  ;;  %v15183_v16 = vld [vmem:[%s19204_s3 + $0x368] ss:$16 sps:$4 sm:$0xff]   ;;  %v17131_v46 = vpop.f32.mrb[130].mxu0 }
 0x422   :  { %v4080_v8 = vpop.f32.mrb[131].mxu0 }
 0x423   :  { %5211 = vmatmul.mubr.bf16.gmra.mrb[164].mxu1 %v15177_v63  ;;  %v15191_v63 = vld [vmem:[%s19204_s3 + $0x38c] ss:$16 sps:$4 sm:$0xff]  }
 0x424   :  { %5218 = vmatprep.mubr.bf16.mxu1 %v15185_v20  ;;  %v17139_v20 = vld [vmem:[%s19206_s4] sm:$0xf] }
 0x425   :  { %14694 = vmatprep.subr.msk.bf16.mxu0 %vm6183_vm1, %v17139_v20 }
 0x426   :  { %v5004_v29 = vpop.f32.mrb[168].mxu1 }
 0x427   :  { %v17126_v61 = vadd.f32 %v5004_v29, %v16840_v49  ;;  %v5006_v52 = vpop.f32.mrb[169].mxu1  ;;  %v17148_v29 = vpop.f32.mrb[132].mxu0 }
 0x428   :  { %v5007_v42 = vpop.f32.mrb[170].mxu1  ;;  %v4085_v35 = vpop.f32.mrb[133].mxu0 }
 0x429   :  { %v17142_v49 = vadd.f32 %v5007_v42, %v16847_v58  ;;  %v5009_v52 = vpop.f32.mrb[171].mxu1  ;;  %v15189_v42 = vld [vmem:[%s19204_s3 + $0x388] ss:$16 sps:$4 sm:$0xff]   ;;  %v17156_v58 = vpop.f32.mrb[134].mxu0 }
 0x42b   :  { %5219 = vmatmul.mubr.bf16.gmra.mrb[168].mxu1 %v15183_v16  ;;  %v15197_v16 = vld [vmem:[%s19204_s3 + $0x3ac] ss:$16 sps:$4 sm:$0xff]  }
 0x42c   :  { %5226 = vmatprep.mubr.bf16.mxu1 %v15191_v63  ;;  %v4088_v63 = vpop.f32.mrb[135].mxu0 }
 0x42d   :  { %v15195_v63 = vld [vmem:[%s19204_s3 + $0x3a8] ss:$16 sps:$4 sm:$0xff]  }
 0x42e   :  { %v5012_v14 = vpop.f32.mrb[172].mxu1 }
 0x42f   :  { %v17151_v32 = vadd.f32 %v5012_v14, %v16860_v23  ;;  %v5014_v8 = vpop.f32.mrb[173].mxu1  ;;  %v17166_v14 = vpop.f32.mrb[136].mxu0 }
 0x430   :  { %v5015_v52 = vpop.f32.mrb[174].mxu1  ;;  %v4093_v24 = vpop.f32.mrb[137].mxu0 }
 0x431   :  { %v17162_v37 = vadd.f32 %v5015_v52, %v16867_v15  ;;  %v5017_v35 = vpop.f32.mrb[175].mxu1  ;;  %v17174_v15 = vpop.f32.mrb[138].mxu0 }
 0x433   :  { %5227 = vmatmul.mubr.bf16.gmra.mrb[172].mxu1 %v15189_v42  ;;  %v15203_v42 = vld [vmem:[%s19204_s3 + $0x3cc] ss:$16 sps:$4 sm:$0xff]  }
 0x434   :  { %5234 = vmatprep.mubr.bf16.mxu1 %v15197_v16  ;;  %v4096_v16 = vpop.f32.mrb[139].mxu0 }
 0x435   :  { %v15201_v16 = vld [vmem:[%s19204_s3 + $0x3c8] ss:$16 sps:$4 sm:$0xff]  }
 0x436   :  { %v5020_v8 = vpop.f32.mrb[176].mxu1 }
 0x437   :  { %v17169_v19 = vadd.f32 %v5020_v8, %v16880_v33  ;;  %v5022_v13 = vpop.f32.mrb[177].mxu1 }
 0x438   :  { %v5023_v52 = vpop.f32.mrb[178].mxu1  ;;  %v17184_v13 = vpop.f32.mrb[140].mxu0 }
 0x439   :  { %v17180_v35 = vadd.f32 %v5023_v52, %v16887_v45  ;;  %v5025_v24 = vpop.f32.mrb[179].mxu1  ;;  %v4101_v23 = vpop.f32.mrb[141].mxu0 }
 0x43a   :  { %v17192_v45 = vpop.f32.mrb[142].mxu0 }
 0x43b   :  { %5235 = vmatmul.mubr.bf16.gmra.mrb[176].mxu1 %v15195_v63  ;;  %v15209_v63 = vld [vmem:[%s19204_s3 + $0x3ec] ss:$16 sps:$4 sm:$0xff]  }
 0x43c   :  { %5242 = vmatprep.mubr.bf16.mxu1 %v15203_v42  ;;  %v4104_v42 = vpop.f32.mrb[143].mxu0 }
 0x43d   :  { %v15207_v42 = vld [vmem:[%s19204_s3 + $0x3e8] ss:$16 sps:$4 sm:$0xff]  }
 0x43e   :  { %v5028_v8 = vpop.f32.mrb[180].mxu1 }
 0x43f   :  { %v17187_v10 = vadd.f32 %v5028_v8, %v16900_v0  ;;  %v5030_v6 = vpop.f32.mrb[181].mxu1 }
 0x440   :  { %v5031_v52 = vpop.f32.mrb[182].mxu1  ;;  %v17202_v6 = vpop.f32.mrb[144].mxu0 }
 0x441   :  { %v17198_v24 = vadd.f32 %v5031_v52, %v16907_v11  ;;  %v5033_v23 = vpop.f32.mrb[183].mxu1  ;;  %v4109_v33 = vpop.f32.mrb[145].mxu0 }
 0x442   :  { %v17210_v11 = vpop.f32.mrb[146].mxu0 }
 0x443   :  { %5243 = vmatmul.mubr.bf16.gmra.mrb[180].mxu1 %v15201_v16  ;;  %v15215_v16 = vld [vmem:[%s19204_s3 + $0x40c] ss:$16 sps:$4 sm:$0xff]  }
 0x444   :  { %5250 = vmatprep.mubr.bf16.mxu1 %v15209_v63  ;;  %v4112_v63 = vpop.f32.mrb[147].mxu0 }
 0x445   :  { %v15213_v63 = vld [vmem:[%s19204_s3 + $0x408] ss:$16 sps:$4 sm:$0xff]  }
 0x446   :  { %v5036_v8 = vpop.f32.mrb[184].mxu1 }
 0x447   :  { %v17205_v2 = vadd.f32 %v5036_v8, %v16920_v34  ;;  %v5038_v62 = vpop.f32.mrb[185].mxu1 }
 0x448   :  { %v5039_v52 = vpop.f32.mrb[186].mxu1  ;;  %v17220_v62 = vpop.f32.mrb[148].mxu0 }
 0x449   :  { %v17216_v23 = vadd.f32 %v5039_v52, %v16927_v55  ;;  %v5041_v33 = vpop.f32.mrb[187].mxu1  ;;  %v4117_v0 = vpop.f32.mrb[149].mxu0 }
 0x44a   :  { %v17228_v55 = vpop.f32.mrb[150].mxu0 }
 0x44b   :  { %5251 = vmatmul.mubr.bf16.gmra.mrb[184].mxu1 %v15207_v42  ;;  %v15221_v42 = vld [vmem:[%s19204_s3 + $0x42c] ss:$16 sps:$4 sm:$0xff]  }
 0x44c   :  { %5258 = vmatprep.mubr.bf16.mxu1 %v15215_v16  ;;  %v4120_v16 = vpop.f32.mrb[151].mxu0 }
 0x44d   :  { %v15219_v16 = vld [vmem:[%s19204_s3 + $0x428] ss:$16 sps:$4 sm:$0xff]  }
 0x44e   :  { %v5044_v8 = vpop.f32.mrb[188].mxu1 }
 0x44f   :  { %v17223_v59 = vadd.f32 %v5044_v8, %v16940_v22  ;;  %v5046_v54 = vpop.f32.mrb[189].mxu1 }
 0x450   :  { %v5047_v52 = vpop.f32.mrb[190].mxu1  ;;  %v17238_v54 = vpop.f32.mrb[152].mxu0 }
 0x451   :  { %v17234_v33 = vadd.f32 %v5047_v52, %v16947_v48  ;;  %v5049_v0 = vpop.f32.mrb[191].mxu1  ;;  %v4125_v34 = vpop.f32.mrb[153].mxu0 }
 0x452   :  { %v17246_v48 = vpop.f32.mrb[154].mxu0 }
 0x453   :  { %5259 = vmatmul.mubr.bf16.gmra.mrb[188].mxu1 %v15213_v63  ;;  %v15227_v63 = vld [vmem:[%s19204_s3 + $0x44c] ss:$16 sps:$4 sm:$0xff]  }
 0x454   :  { %5266 = vmatprep.mubr.bf16.mxu1 %v15221_v42  ;;  %v4128_v42 = vpop.f32.mrb[155].mxu0 }
 0x455   :  { %v15225_v42 = vld [vmem:[%s19204_s3 + $0x448] ss:$16 sps:$4 sm:$0xff]  }
 0x456   :  { %v5052_v8 = vpop.f32.mrb[192].mxu1 }
 0x457   :  { %v17241_v51 = vadd.f32 %v5052_v8, %v16960_v25  ;;  %v5054_v47 = vpop.f32.mrb[193].mxu1 }
 0x458   :  { %v5055_v52 = vpop.f32.mrb[194].mxu1  ;;  %v17256_v47 = vpop.f32.mrb[156].mxu0 }
 0x459   :  { %v17252_v0 = vadd.f32 %v5055_v52, %v16972_v28  ;;  %v5057_v34 = vpop.f32.mrb[195].mxu1  ;;  %v4133_v22 = vpop.f32.mrb[157].mxu0 }
 0x45a   :  { %v17264_v28 = vpop.f32.mrb[158].mxu0 }
 0x45b   :  { %5267 = vmatmul.mubr.bf16.gmra.mrb[192].mxu1 %v15219_v16  ;;  %v15233_v16 = vld [vmem:[%s19204_s3 + $0x46c] ss:$16 sps:$4 sm:$0xff]  }
 0x45c   :  { %5274 = vmatprep.mubr.bf16.mxu1 %v15227_v63  ;;  %v4136_v63 = vpop.f32.mrb[159].mxu0 }
 0x45d   :  { %v15231_v63 = vld [vmem:[%s19204_s3 + $0x468] ss:$16 sps:$4 sm:$0xff]  }
 0x45e   :  { %v5060_v8 = vpop.f32.mrb[196].mxu1 }
 0x45f   :  { %v17259_v44 = vadd.f32 %v5060_v8, %v16985_v30  ;;  %v5062_v39 = vpop.f32.mrb[197].mxu1 }
 0x460   :  { %v5063_v52 = vpop.f32.mrb[198].mxu1  ;;  %v17274_v39 = vpop.f32.mrb[160].mxu0 }
 0x461   :  { %v17270_v34 = vadd.f32 %v5063_v52, %v16992_v17  ;;  %v5065_v22 = vpop.f32.mrb[199].mxu1  ;;  %v4141_v25 = vpop.f32.mrb[161].mxu0  ;;  %v15239_v52 = vld [vmem:[%s19204_s3 + $0x48c] ss:$16 sps:$4 sm:$0xff]  }
 0x462   :  { %v17280_v27 = vpop.f32.mrb[162].mxu0 }
 0x463   :  { %5275 = vmatmul.mubr.bf16.gmra.mrb[196].mxu1 %v15225_v42  ;;  %v4144_v42 = vpop.f32.mrb[163].mxu0 }
 0x464   :  { %5282 = vmatprep.mubr.bf16.mxu1 %v15233_v16  ;;  %v15237_v42 = vld [vmem:[%s19204_s3 + $0x488] ss:$16 sps:$4 sm:$0xff]  }
 0x466   :  { %v5068_v8 = vpop.f32.mrb[200].mxu1 }
 0x467   :  { %v5069_v36 = vadd.f32 %v5068_v8, %v17005_v5  ;;  %v5070_v31 = vpop.f32.mrb[201].mxu1 }
 0x468   :  { %v5071_v17 = vpop.f32.mrb[202].mxu1  ;;  %v17287_v31 = vpop.f32.mrb[164].mxu0 }
 0x469   :  { %v5072_v16 = vadd.f32 %v5071_v17, %v17012_v3  ;;  %v5073_v22 = vpop.f32.mrb[203].mxu1  ;;  %v4149_v8 = vpop.f32.mrb[165].mxu0 }
 0x46a   :  { %v17293_v18 = vpop.f32.mrb[166].mxu0 }
 0x46b   :  { %v6035_v25 = vpack.c.bf16 %v5072_v16, %v5069_v36  ;;  %5283 = vmatmul.mubr.bf16.gmra.mrb[200].mxu1 %v15231_v63  ;;  %v15242_v36 = vld [vmem:[%s19204_s3 + $0x4ac] ss:$16 sps:$4 sm:$0xff]   ;;  %v4152_v63 = vpop.f32.mrb[167].mxu0 }
 0x46c   :  { %5290 = vmatprep.mubr.bf16.mxu1 %v15239_v52  ;;  %v17307_v22 = vpop.f32.mrb[168].mxu0 }
 0x46d   :  { %13337 = vmatprep.mubr.msk.bf16.mxu0 %vm6158_vm2, %v6035_v25 }
 0x46e   :  { %v5076_v5 = vpop.f32.mrb[204].mxu1 }
 0x46f   :  { %v5077_v30 = vadd.f32 %v5076_v5, %v17025_v50  ;;  %v5078_v21 = vpop.f32.mrb[205].mxu1  ;;  %v17304_v50 = vld [vmem:[%s19206_s4 + $0x8] sm:$0xf]  ;;  %v4157_v5 = vpop.f32.mrb[169].mxu0 }
 0x470   :  { %v5079_v3 = vpop.f32.mrb[206].mxu1  ;;  %v6309_v21 = vsel %vm6183_vm1, %v17139_v20, 0  ;;  %v15240_v20 = vld [vmem:[%s19204_s3 + $0x4a8] ss:$16 sps:$4 sm:$0xff]   ;;  %v17315_v8 = vpop.f32.mrb[170].mxu0 }
 0x471   :  { %v5080_v17 = vadd.f32 %v5079_v3, %v17032_v7  ;;  %v5081_v52 = vpop.f32.mrb[207].mxu1  ;;  %v15245_v3 = vld [vmem:[%s19204_s3 + $0x4cc] ss:$16 sps:$4 sm:$0xff]  }
 0x473   :  { %v6036_v16 = vpack.c.bf16 %v5080_v17, %v5077_v30  ;;  %5291 = vmatmul.mubr.bf16.gmra.mrb[204].mxu1 %v15237_v42 }
 0x474   :  { %5298 = vmatprep.mubr.bf16.mxu1 %v15242_v36  ;;  %v4160_v36 = vpop.f32.mrb[171].mxu0 }
 0x475   :  { %13338 = vmatmul.mubr.msk.bf16.vlgmr.msra.gmra.mrb[44].mxu0 %vm6158_vm2, %v6036_v16  ;;  %v17322_v52 = vpop.f32.mrb[172].mxu0 }
 0x476   :  { %v5084_v25 = vpop.f32.mrb[208].mxu1  ;;  %13354 = vmatpush3.bf16.msra.mxu0 %v6309_v21  ;;  %v4165_v21 = vpop.f32.mrb[173].mxu0 }
 0x477   :  { %v5085_v7 = vadd.f32 %v5084_v25, %v17039_v43  ;;  %v5086_v30 = vpop.f32.mrb[209].mxu1  ;;  %14695 = vmatprep.subr.msk.bf16.mxu0 %vm6183_vm1, %v17304_v50  ;;  %v17328_v36 = vpop.f32.mrb[174].mxu0 }
 0x478   :  { %v5087_v42 = vpop.f32.mrb[210].mxu1  ;;  %v15243_v30 = vld [vmem:[%s19204_s3 + $0x4c8] ss:$16 sps:$4 sm:$0xff]  }
 0x479   :  { %v5088_v63 = vadd.f32 %v5087_v42, %v17046_v60  ;;  %v5089_v17 = vpop.f32.mrb[211].mxu1 }
 0x47b   :  { %v6037_v43 = vpack.c.bf16 %v5088_v63, %v5085_v7  ;;  %5299 = vmatmul.mubr.bf16.gmra.mrb[208].mxu1 %v15240_v20  ;;  %v15248_v7 = vld [vmem:[%s19204_s3 + $0x4ec] ss:$16 sps:$4 sm:$0xff]   ;;  %v4168_v20 = vpop.f32.mrb[175].mxu0 }
 0x47c   :  { %5306 = vmatprep.mubr.bf16.mxu1 %v15245_v3 }
 0x47d   :  { %13341 = vmatprep.mubr.msk.bf16.mxu0 %vm6158_vm2, %v6037_v43 }
 0x47e   :  { %v5092_v16 = vpop.f32.mrb[212].mxu1 }
 0x47f   :  { %v5093_v25 = vadd.f32 %v5092_v16, %v17053_v40  ;;  %v5094_v5 = vpop.f32.mrb[213].mxu1  ;;  %v17335_v40 = vpop.f32.mrb[176].mxu0 }
 0x480   :  { %v5095_v60 = vpop.f32.mrb[214].mxu1  ;;  %v4173_v43 = vpop.f32.mrb[177].mxu0  ;;  %v15246_v5 = vld [vmem:[%s19204_s3 + $0x4e8] ss:$16 sps:$4 sm:$0xff]  }
 0x481   :  { %v5096_v42 = vadd.f32 %v5095_v60, %v17060_v41  ;;  %v5097_v3 = vpop.f32.mrb[215].mxu1  ;;  %v17341_v20 = vpop.f32.mrb[178].mxu0 }
 0x483   :  { %v6038_v63 = vpack.c.bf16 %v5096_v42, %v5093_v25  ;;  %5307 = vmatmul.mubr.bf16.gmra.mrb[212].mxu1 %v15243_v30  ;;  %v15251_v25 = vld [vmem:[%s19204_s3 + $0x50c] ss:$16 sps:$4 sm:$0xff]   ;;  %v4176_v30 = vpop.f32.mrb[179].mxu0 }
 0x484   :  { %5314 = vmatprep.mubr.bf16.mxu1 %v15248_v7 }
 0x485   :  { %13342 = vmatmul.mubr.msk.bf16.gmra.mrb[48].mxu0 %vm6158_vm2, %v6038_v63 }
 0x486   :  { %v5100_v17 = vpop.f32.mrb[216].mxu1 }
 0x487   :  { %v5101_v16 = vadd.f32 %v5100_v17, %v17067_v4  ;;  %v5102_v21 = vpop.f32.mrb[217].mxu1  ;;  %v17348_v4 = vpop.f32.mrb[180].mxu0 }
 0x488   :  { %v5103_v41 = vpop.f32.mrb[218].mxu1  ;;  %v4181_v63 = vpop.f32.mrb[181].mxu0  ;;  %v15249_v21 = vld [vmem:[%s19204_s3 + $0x508] ss:$16 sps:$4 sm:$0xff]  }
 0x489   :  { %v5104_v60 = vadd.f32 %v5103_v41, %v17074_v26  ;;  %v5105_v7 = vpop.f32.mrb[219].mxu1  ;;  %v17354_v30 = vpop.f32.mrb[182].mxu0 }
 0x48b   :  { %v6039_v42 = vpack.c.bf16 %v5104_v60, %v5101_v16  ;;  %5315 = vmatmul.mubr.bf16.gmra.mrb[216].mxu1 %v15246_v5  ;;  %v15254_v16 = vld [vmem:[%s19204_s3 + $0x52c] ss:$16 sps:$4 sm:$0xff]   ;;  %v4184_v5 = vpop.f32.mrb[183].mxu0 }
 0x48c   :  { %5322 = vmatprep.mubr.bf16.mxu1 %v15251_v25 }
 0x48d   :  { %13345 = vmatprep.mubr.msk.bf16.mxu0 %vm6158_vm2, %v6039_v42 }
 0x48e   :  { %v5108_v3 = vpop.f32.mrb[220].mxu1 }
 0x48f   :  { %v5109_v17 = vadd.f32 %v5108_v3, %v17081_v57  ;;  %v5110_v43 = vpop.f32.mrb[221].mxu1  ;;  %v17361_v57 = vpop.f32.mrb[184].mxu0 }
 0x490   :  { %v5111_v26 = vpop.f32.mrb[222].mxu1  ;;  %v4189_v42 = vpop.f32.mrb[185].mxu0  ;;  %v15252_v43 = vld [vmem:[%s19204_s3 + $0x528] ss:$16 sps:$4 sm:$0xff]  }
 0x491   :  { %v5112_v41 = vadd.f32 %v5111_v26, %v17088_v12  ;;  %v5113_v25 = vpop.f32.mrb[223].mxu1  ;;  %v17367_v5 = vpop.f32.mrb[186].mxu0 }
 0x493   :  { %v6040_v60 = vpack.c.bf16 %v5112_v41, %v5109_v17  ;;  %5323 = vmatmul.mubr.bf16.gmra.mrb[220].mxu1 %v15249_v21  ;;  %v15257_v17 = vld [vmem:[%s19204_s3 + $0x54c] ss:$16 sps:$4 sm:$0xff]   ;;  %v4192_v21 = vpop.f32.mrb[187].mxu0 }
 0x494   :  { %5330 = vmatprep.mubr.bf16.mxu1 %v15254_v16 }
 0x495   :  { %13346 = vmatmul.mubr.msk.bf16.gmra.mrb[52].mxu0 %vm6158_vm2, %v6040_v60 }
 0x496   :  { %v5116_v7 = vpop.f32.mrb[224].mxu1 }
 0x497   :  { %v5117_v3 = vadd.f32 %v5116_v7, %v17095_v38  ;;  %v5118_v63 = vpop.f32.mrb[225].mxu1  ;;  %v17374_v38 = vpop.f32.mrb[188].mxu0 }
 0x498   :  { %v5119_v12 = vpop.f32.mrb[226].mxu1  ;;  %v4197_v60 = vpop.f32.mrb[189].mxu0  ;;  %v15255_v63 = vld [vmem:[%s19204_s3 + $0x548] ss:$16 sps:$4 sm:$0xff]  }
 0x499   :  { %v5120_v26 = vadd.f32 %v5119_v12, %v17102_v1  ;;  %v5121_v16 = vpop.f32.mrb[227].mxu1  ;;  %v17380_v21 = vpop.f32.mrb[190].mxu0 }
 0x49b   :  { %v6041_v41 = vpack.c.bf16 %v5120_v26, %v5117_v3  ;;  %5331 = vmatmul.mubr.bf16.gmra.mrb[224].mxu1 %v15252_v43  ;;  %v15260_v3 = vld [vmem:[%s19204_s3 + $0x56c] ss:$16 sps:$4 sm:$0xff]   ;;  %v4200_v43 = vpop.f32.mrb[191].mxu0 }
 0x49c   :  { %5338 = vmatprep.mubr.bf16.mxu1 %v15257_v17  ;;  %v6435_v43 = vsel %vm6183_vm1, %v17304_v50, 0 }
 0x49d   :  { %13349 = vmatprep.mubr.msk.bf16.mxu0 %vm6158_vm2, %v6041_v41  ;;  %v19285_v41 = vpack.c.bf16 %v17142_v49, %v17126_v61 }
 0x49e   :  { %v5124_v25 = vpop.f32.mrb[228].mxu1 }
 0x49f   :  { %v5125_v7 = vadd.f32 %v5124_v25, %v17109_v9  ;;  %v5126_v42 = vpop.f32.mrb[229].mxu1  ;;  %v17387_v9 = vpop.f32.mrb[192].mxu0 }
 0x4a0   :  { %v5127_v1 = vpop.f32.mrb[230].mxu1  ;;  %v4205_v25 = vpop.f32.mrb[193].mxu0 }
 0x4a1   :  { %v5128_v12 = vadd.f32 %v5127_v1, %v17116_v56  ;;  %v5129_v17 = vpop.f32.mrb[231].mxu1  ;;  %v15258_v56 = vld [vmem:[%s19204_s3 + $0x568] ss:$16 sps:$4 sm:$0xff]   ;;  %v15263_v1 = vld [vmem:[%s19204_s3 + $0x58c] ss:$16 sps:$4 sm:$0xff]  }
 0x4a2   :  { %v19286_v17 = vpack.c.bf16 %v17162_v37, %v17151_v32  ;;  %v15261_v32 = vld [vmem:[%s19204_s3 + $0x588] ss:$16 sps:$4 sm:$0xff]  }
 0x4a3   :  { %v6042_v26 = vpack.c.bf16 %v5128_v12, %v5125_v7  ;;  %5339 = vmatmul.mubr.bf16.gmra.mrb[228].mxu1 %v15255_v63  ;;  %v17399_v7 = vpop.f32.mrb[194].mxu0  ;;  %v17414_v12 = vld [vmem:[%s19206_s4 + $0xc] sm:$0xf] }
 0x4a4   :  { %5346 = vmatprep.mubr.bf16.mxu1 %v15260_v3  ;;  %v4208_v3 = vpop.f32.mrb[195].mxu0 }
 0x4a5   :  { %13350 = vmatmul.mubr.msk.bf16.gmra.mrb[56].mxu0 %vm6158_vm2, %v6042_v26 }
 0x4a6   :  { %v5132_v16 = vpop.f32.mrb[232].mxu1  ;;  %13355 = vmatprep.mubr.msk.bf16.mxu0 %vm6158_vm2, %v19285_v41 }
 0x4a7   :  { %v17394_v60 = vadd.f32 %v5132_v16, %v17123_v53  ;;  %v5134_v42 = vpop.f32.mrb[233].mxu1  ;;  %v19287_v16 = vpack.c.bf16 %v17180_v35, %v17169_v19  ;;  %v15266_v19 = vld [vmem:[%s19204_s3 + $0x5ac] ss:$16 sps:$4 sm:$0xff]  }
 0x4a8   :  { %v5135_v63 = vpop.f32.mrb[234].mxu1 }
 0x4a9   :  { %v17405_v61 = vadd.f32 %v5135_v63, %v17131_v46  ;;  %v5137_v49 = vpop.f32.mrb[235].mxu1  ;;  %v17420_v46 = vpop.f32.mrb[196].mxu0  ;;  %v19288_v63 = vpack.c.bf16 %v17198_v24, %v17187_v10  ;;  %v15269_v24 = vld [vmem:[%s19204_s3 + $0x5cc] ss:$16 sps:$4 sm:$0xff]  }
 0x4aa   :  { %v4213_v50 = vpop.f32.mrb[197].mxu0 }
 0x4ab   :  { %v6043_v53 = vpack.c.bf16 %v17405_v61, %v17394_v60  ;;  %5347 = vmatmul.mubr.bf16.gmra.mrb[232].mxu1 %v15258_v56  ;;  %v17434_v37 = vpop.f32.mrb[198].mxu0  ;;  %v19289_v61 = vpack.c.bf16 %v17216_v23, %v17205_v2 }
 0x4ac   :  { %5354 = vmatprep.mubr.bf16.mxu1 %v15263_v1  ;;  %v4216_v35 = vpop.f32.mrb[199].mxu0 }
 0x4ad   :  { %13356 = vmatmul.mubr.msk.bf16.vlgmr.msra.gmra.mrb[44].mxu0 %vm6158_vm2, %v19286_v17  ;;  %v17445_v1 = vpop.f32.mrb[200].mxu0  ;;  %v15264_v17 = vld [vmem:[%s19204_s3 + $0x5a8] ss:$16 sps:$4 sm:$0xff]  }
 0x4ae   :  { %v5140_v26 = vpop.f32.mrb[236].mxu1  ;;  %13359 = vmatprep.mubr.msk.bf16.mxu0 %vm6158_vm2, %v19287_v16  ;;  %13372 = vmatpush3.bf16.msra.mxu0 %v6435_v43  ;;  %v4221_v49 = vpop.f32.mrb[201].mxu0  ;;  %v15267_v35 = vld [vmem:[%s19204_s3 + $0x5c8] ss:$16 sps:$4 sm:$0xff]  }
 0x4af   :  { %v17427_v41 = vadd.f32 %v5140_v26, %v17148_v29  ;;  %v5142_v25 = vpop.f32.mrb[237].mxu1  ;;  %14696 = vmatprep.subr.msk.bf16.mxu0 %vm6183_vm1, %v17414_v12  ;;  %v17455_v26 = vpop.f32.mrb[202].mxu0 }
 0x4b0   :  { %v5143_v60 = vpop.f32.mrb[238].mxu1  ;;  %v4224_v16 = vpop.f32.mrb[203].mxu0 }
 0x4b1   :  { %v5144_v42 = vadd.f32 %v5143_v60, %v17156_v58  ;;  %v5145_v29 = vpop.f32.mrb[239].mxu1 }
 0x4b3   :  { %v6044_v56 = vpack.c.bf16 %v5144_v42, %v17427_v41  ;;  %5355 = vmatmul.mubr.bf16.gmra.mrb[236].mxu1 %v15261_v32  ;;  %v17465_v41 = vpop.f32.mrb[204].mxu0  ;;  %v19291_v32 = vpack.c.bf16 %v17252_v0, %v17241_v51 }
 0x4b4   :  { %5362 = vmatprep.mubr.bf16.mxu1 %v15266_v19  ;;  %v4229_v60 = vpop.f32.mrb[205].mxu0 }
 0x4b5   :  { %13360 = vmatmul.mubr.msk.bf16.gmra.mrb[48].mxu0 %vm6158_vm2, %v19288_v63  ;;  %v17475_v42 = vpop.f32.mrb[206].mxu0 }
 0x4b6   :  { %v5148_v3 = vpop.f32.mrb[240].mxu1  ;;  %13363 = vmatprep.mubr.msk.bf16.mxu0 %vm6158_vm2, %v19289_v61  ;;  %v4232_v29 = vpop.f32.mrb[207].mxu0 }
 0x4b7   :  { %v5149_v58 = vadd.f32 %v5148_v3, %v17166_v14  ;;  %v5150_v43 = vpop.f32.mrb[241].mxu1  ;;  %v19290_v14 = vpack.c.bf16 %v17234_v33, %v17223_v59  ;;  %v15272_v33 = vld [vmem:[%s19204_s3 + $0x5ec] ss:$16 sps:$4 sm:$0xff]   ;;  %v17485_v3 = vpop.f32.mrb[208].mxu0 }
 0x4b8   :  { %v5151_v10 = vpop.f32.mrb[242].mxu1  ;;  %v4237_v49 = vpop.f32.mrb[209].mxu0 }
 0x4b9   :  { %v5152_v2 = vadd.f32 %v5151_v10, %v17174_v15  ;;  %v5153_v23 = vpop.f32.mrb[243].mxu1 }
 0x4bb   :  { %v6045_v50 = vpack.c.bf16 %v5152_v2, %v5149_v58  ;;  %5363 = vmatmul.mubr.bf16.gmra.mrb[240].mxu1 %v15264_v17  ;;  %v17492_v17 = vpop.f32.mrb[210].mxu0  ;;  %v17503_v2 = vld [vmem:[%s19206_s4 + $0x10] sm:$0xf] }
 0x4bc   :  { %5370 = vmatprep.mubr.bf16.mxu1 %v15269_v24 }
 0x4bd   :  { %13364 = vmatmul.mubr.msk.bf16.gmra.mrb[52].mxu0 %vm6158_vm2, %v19290_v14 }
 0x4be   :  { %v5156_v25 = vpop.f32.mrb[244].mxu1  ;;  %13367 = vmatprep.mubr.msk.bf16.mxu0 %vm6158_vm2, %v19291_v32 }
 0x4bf   :  { %v5157_v15 = vadd.f32 %v5156_v25, %v17184_v13  ;;  %v5158_v19 = vpop.f32.mrb[245].mxu1  ;;  %v19292_v13 = vpack.c.bf16 %v17270_v34, %v17259_v44  ;;  %v15275_v44 = vld [vmem:[%s19204_s3 + $0x60c] ss:$16 sps:$4 sm:$0xff]   ;;  %v4240_v34 = vpop.f32.mrb[211].mxu0 }
 0x4c0   :  { %v5159_v59 = vpop.f32.mrb[246].mxu1  ;;  %v17506_v23 = vpop.f32.mrb[212].mxu0 }
 0x4c1   :  { %v5160_v51 = vadd.f32 %v5159_v59, %v17192_v45  ;;  %v5161_v0 = vpop.f32.mrb[247].mxu1  ;;  %v15270_v45 = vld [vmem:[%s19204_s3 + $0x5e8] ss:$16 sps:$4 sm:$0xff]  }
 0x4c3   :  { %v6046_v63 = vpack.c.bf16 %v5160_v51, %v5157_v15  ;;  %5371 = vmatmul.mubr.bf16.gmra.mrb[244].mxu1 %v15267_v35  ;;  %v15278_v15 = vld [vmem:[%s19204_s3 + $0x62c] ss:$16 sps:$4 sm:$0xff]  }
 0x4c4   :  { %5378 = vmatprep.mubr.bf16.mxu1 %v15272_v33 }
 0x4c5   :  { %13368 = vmatmul.mubr.msk.bf16.gmra.mrb[56].mxu0 %vm6158_vm2, %v19292_v13  ;;  %v15276_v13 = vld [vmem:[%s19204_s3 + $0x628] ss:$16 sps:$4 sm:$0xff]  }
 0x4c6   :  { %v5164_v61 = vpop.f32.mrb[248].mxu1  ;;  %13373 = vmatprep.mubr.msk.bf16.mxu0 %vm6158_vm2, %v6043_v53 }
 0x4c7   :  { %v5165_v58 = vadd.f32 %v5164_v61, %v17202_v6  ;;  %v5166_v43 = vpop.f32.mrb[249].mxu1  ;;  %v6577_v6 = vsel %vm6183_vm1, %v17414_v12, 0  ;;  %v15273_v12 = vld [vmem:[%s19204_s3 + $0x608] ss:$16 sps:$4 sm:$0xff]  }
 0x4c8   :  { %v5167_v10 = vpop.f32.mrb[250].mxu1 }
 0x4c9   :  { %v5168_v24 = vadd.f32 %v5167_v10, %v17210_v11  ;;  %v5169_v16 = vpop.f32.mrb[251].mxu1  ;;  %v4245_v11 = vpop.f32.mrb[213].mxu0 }
 0x4ca   :  { %v17515_v60 = vpop.f32.mrb[214].mxu0  ;;  %v15279_v16 = vld [vmem:[%s19204_s3 + $0x648] ss:$16 sps:$4 sm:$0xff]  }
 0x4cb   :  { %v6047_v53 = vpack.c.bf16 %v5168_v24, %v5165_v58  ;;  %5379 = vmatmul.mubr.bf16.gmra.mrb[248].mxu1 %v15270_v45 }
 0x4cc   :  { %5386 = vmatprep.mubr.bf16.mxu1 %v15275_v44 }
 0x4cd   :  { %13374 = vmatmul.mubr.msk.bf16.vlgmr.msra.gmra.mrb[44].mxu0 %vm6158_vm2, %v6044_v56 }
 0x4ce   :  { %v5172_v14 = vpop.f32.mrb[252].mxu1  ;;  %13377 = vmatprep.mubr.msk.bf16.mxu0 %vm6158_vm2, %v6045_v50  ;;  %13390 = vmatpush3.bf16.msra.mxu0 %v6577_v6  ;;  %v4248_v50 = vpop.f32.mrb[215].mxu0  ;;  %v15284_v6 = vld [vmem:[%s19204_s3 + $0x66c] ss:$16 sps:$4 sm:$0xff]  }
 0x4cf   :  { %v5173_v25 = vadd.f32 %v5172_v14, %v17220_v62  ;;  %v5174_v32 = vpop.f32.mrb[253].mxu1  ;;  %14697 = vmatprep.subr.msk.bf16.mxu0 %vm6183_vm1, %v17503_v2  ;;  %v17522_v59 = vpop.f32.mrb[216].mxu0 }
 0x4d0   :  { %v5175_v56 = vpop.f32.mrb[254].mxu1  ;;  %v4253_v29 = vpop.f32.mrb[217].mxu0 }
 0x4d1   :  { %v5176_v19 = vadd.f32 %v5175_v56, %v17228_v55  ;;  %v5177_v35 = vpop.f32.mrb[255].mxu1  ;;  %v17529_v55 = vpop.f32.mrb[218].mxu0 }
 0x4d2   :  { %v4256_v49 = vpop.f32.mrb[219].mxu0 }
 0x4d3   :  { %v6048_v62 = vpack.c.bf16 %v5176_v19, %v5173_v25  ;;  %5387 = vmatmul.mubr.bf16.gmra.mrb[252].mxu1 %v15273_v12  ;;  %v15282_v19 = vld [vmem:[%s19204_s3 + $0x668] ss:$16 sps:$4 sm:$0xff]  }
 0x4d4   :  { %5394 = vmatprep.mubr.bf16.mxu1 %v15278_v15 }
 0x4d5   :  { %13378 = vmatmul.mubr.msk.bf16.gmra.mrb[48].mxu0 %vm6158_vm2, %v6046_v63  ;;  %v15281_v63 = vld [vmem:[%s19204_s3 + $0x64c] ss:$16 sps:$4 sm:$0xff]  }
 0x4d6   :  { %v5180_v33 = vpop.f32.mrb[148].mxu1  ;;  %13381 = vmatprep.mubr.msk.bf16.mxu0 %vm6158_vm2, %v6047_v53 }
 0x4d7   :  { %v5181_v51 = vadd.f32 %v5180_v33, %v17238_v54  ;;  %v5182_v0 = vpop.f32.mrb[149].mxu1  ;;  %v17536_v54 = vpop.f32.mrb[220].mxu0 }
 0x4d8   :  { %v5183_v61 = vpop.f32.mrb[150].mxu1  ;;  %v4261_v44 = vpop.f32.mrb[221].mxu0 }
 0x4d9   :  { %v5184_v58 = vadd.f32 %v5183_v61, %v17246_v48  ;;  %v5185_v43 = vpop.f32.mrb[151].mxu1  ;;  %v17543_v48 = vpop.f32.mrb[222].mxu0 }
 0x4da   :  { %v4264_v14 = vpop.f32.mrb[223].mxu0 }
 0x4db   :  { %v6049_v45 = vpack.c.bf16 %v5184_v58, %v5181_v51  ;;  %5395 = vmatmul.mubr.bf16.gmra.mrb[148].mxu1 %v15276_v13  ;;  %v15285_v58 = vld [vmem:[%s19204_s3 + $0x688] ss:$16 sps:$4 sm:$0xff]  }
 0x4dc   :  { %5402 = vmatprep.mubr.bf16.mxu1 %v15281_v63 }
 0x4dd   :  { %13382 = vmatmul.mubr.msk.bf16.gmra.mrb[52].mxu0 %vm6158_vm2, %v6048_v62  ;;  %v15287_v62 = vld [vmem:[%s19204_s3 + $0x68c] ss:$16 sps:$4 sm:$0xff]  }
 0x4de   :  { %v5188_v10 = vpop.f32.mrb[152].mxu1  ;;  %13385 = vmatprep.mubr.msk.bf16.mxu0 %vm6158_vm2, %v6049_v45  ;;  %v15290_v45 = vld [vmem:[%s19204_s3 + $0x6ac] ss:$16 sps:$4 sm:$0xff]  }
 0x4df   :  { %v5189_v34 = vadd.f32 %v5188_v10, %v17256_v47  ;;  %v5190_v24 = vpop.f32.mrb[153].mxu1  ;;  %v17550_v47 = vpop.f32.mrb[224].mxu0 }
 0x4e0   :  { %v5191_v53 = vpop.f32.mrb[154].mxu1  ;;  %v4269_v56 = vpop.f32.mrb[225].mxu0 }
 0x4e1   :  { %v5192_v11 = vadd.f32 %v5191_v53, %v17264_v28  ;;  %v5193_v25 = vpop.f32.mrb[155].mxu1  ;;  %v17556_v35 = vpop.f32.mrb[226].mxu0 }
 0x4e2   :  { %v4272_v33 = vpop.f32.mrb[227].mxu0 }
 0x4e3   :  { %v6050_v32 = vpack.c.bf16 %v5192_v11, %v5189_v34  ;;  %5403 = vmatmul.mubr.bf16.gmra.mrb[152].mxu1 %v15279_v16  ;;  %v17580_v16 = vld [vmem:[%s19206_s4 + $0x14] sm:$0xf] }
 0x4e4   :  { %5410 = vmatprep.mubr.bf16.mxu1 %v15284_v6 }
 0x4e5   :  { %13386 = vmatmul.mubr.msk.bf16.gmra.mrb[56].mxu0 %vm6158_vm2, %v6050_v32 }
 0x4e6   :  { %v5196_v12 = vpop.f32.mrb[156].mxu1 }
 0x4e7   :  { %v5197_v15 = vadd.f32 %v5196_v12, %v17274_v39  ;;  %v5198_v50 = vpop.f32.mrb[157].mxu1  ;;  %v17563_v39 = vpop.f32.mrb[228].mxu0  ;;  %v15293_v12 = vld [vmem:[%s19204_s3 + $0x6cc] ss:$16 sps:$4 sm:$0xff]  }
 0x4e8   :  { %v5199_v28 = vpop.f32.mrb[158].mxu1  ;;  %v4277_v61 = vpop.f32.mrb[229].mxu0 }
 0x4e9   :  { %v5200_v29 = vadd.f32 %v5199_v28, %v17280_v27  ;;  %v5201_v51 = vpop.f32.mrb[159].mxu1  ;;  %v17569_v43 = vpop.f32.mrb[230].mxu0 }
 0x4ea   :  { %v4280_v10 = vpop.f32.mrb[231].mxu0  ;;  %v15291_v51 = vld [vmem:[%s19204_s3 + $0x6c8] ss:$16 sps:$4 sm:$0xff]  }
 0x4eb   :  { %v6051_v0 = vpack.c.bf16 %v5200_v29, %v5197_v15  ;;  %5411 = vmatmul.mubr.bf16.gmra.mrb[156].mxu1 %v15282_v19  ;;  %v17583_v53 = vpop.f32.mrb[232].mxu0 }
 0x4ec   :  { %5418 = vmatprep.mubr.bf16.mxu1 %v15287_v62  ;;  %v4285_v14 = vpop.f32.mrb[233].mxu0 }
 0x4ed   :  { %13391 = vmatprep.mubr.msk.bf16.mxu0 %vm6158_vm2, %v6051_v0  ;;  %v17591_v25 = vpop.f32.mrb[234].mxu0 }
 0x4ee   :  { %v5204_v13 = vpop.f32.mrb[160].mxu1  ;;  %v4288_v56 = vpop.f32.mrb[235].mxu0 }
 0x4ef   :  { %v5205_v63 = vadd.f32 %v5204_v13, %v17287_v31  ;;  %v5206_v49 = vpop.f32.mrb[161].mxu1  ;;  %v6719_v31 = vsel %vm6183_vm1, %v17503_v2, 0  ;;  %v15288_v2 = vld [vmem:[%s19204_s3 + $0x6a8] ss:$16 sps:$4 sm:$0xff]   ;;  %v17598_v19 = vpop.f32.mrb[236].mxu0 }
 0x4f0   :  { %v5207_v27 = vpop.f32.mrb[162].mxu1  ;;  %v4293_v62 = vpop.f32.mrb[237].mxu0  ;;  %v15296_v13 = vld [vmem:[%s19204_s3 + $0x6ec] ss:$16 sps:$4 sm:$0xff]  }
 0x4f1   :  { %v5208_v44 = vadd.f32 %v5207_v27, %v17293_v18  ;;  %v5209_v34 = vpop.f32.mrb[163].mxu1  ;;  %v17604_v0 = vpop.f32.mrb[238].mxu0 }
 0x4f2   :  { %v4296_v61 = vpop.f32.mrb[239].mxu0  ;;  %v15294_v34 = vld [vmem:[%s19204_s3 + $0x6e8] ss:$16 sps:$4 sm:$0xff]  }
 0x4f3   :  { %v6052_v24 = vpack.c.bf16 %v5208_v44, %v5205_v63  ;;  %5419 = vmatmul.mubr.bf16.gmra.mrb[160].mxu1 %v15285_v58 }
 0x4f4   :  { %5426 = vmatprep.mubr.bf16.mxu1 %v15290_v45 }
 0x4f5   :  { %13392 = vmatmul.mubr.msk.bf16.vlgmr.msra.gmra.mrb[44].mxu0 %vm6158_vm2, %v6052_v24 }
 0x4f6   :  { %v5212_v6 = vpop.f32.mrb[164].mxu1  ;;  %13408 = vmatpush3.bf16.msra.mxu0 %v6719_v31  ;;  %v15299_v31 = vld [vmem:[%s19204_s3 + $0x70c] ss:$16 sps:$4 sm:$0xff]  }
 0x4f7   :  { %v5213_v18 = vadd.f32 %v5212_v6, %v17307_v22  ;;  %v5214_v11 = vpop.f32.mrb[165].mxu1  ;;  %14698 = vmatprep.subr.msk.bf16.mxu0 %vm6183_vm1, %v17580_v16 }
 0x4f8   :  { %v5215_v32 = vpop.f32.mrb[166].mxu1 }
 0x4f9   :  { %v5216_v15 = vadd.f32 %v5215_v32, %v17315_v8  ;;  %v5217_v50 = vpop.f32.mrb[167].mxu1 }
 0x4fb   :  { %v6053_v22 = vpack.c.bf16 %v5216_v15, %v5213_v18  ;;  %5427 = vmatmul.mubr.bf16.gmra.mrb[164].mxu1 %v15288_v2  ;;  %v15297_v15 = vld [vmem:[%s19204_s3 + $0x708] ss:$16 sps:$4 sm:$0xff]  }
 0x4fc   :  { %5434 = vmatprep.mubr.bf16.mxu1 %v15293_v12 }
 0x4fd   :  { %13395 = vmatprep.mubr.msk.bf16.mxu0 %vm6158_vm2, %v6053_v22  ;;  %v15302_v22 = vld [vmem:[%s19204_s3 + $0x72c] ss:$16 sps:$4 sm:$0xff]  }
 0x4fe   :  { %v5220_v28 = vpop.f32.mrb[168].mxu1 }
 0x4ff   :  { %v5221_v33 = vadd.f32 %v5220_v28, %v17322_v52  ;;  %v5222_v29 = vpop.f32.mrb[169].mxu1  ;;  %v17611_v52 = vpop.f32.mrb[240].mxu0 }
 0x500   :  { %v5223_v8 = vpop.f32.mrb[170].mxu1  ;;  %v4301_v45 = vpop.f32.mrb[241].mxu0 }
 0x501   :  { %v5224_v63 = vadd.f32 %v5223_v8, %v17328_v36  ;;  %v5225_v49 = vpop.f32.mrb[171].mxu1  ;;  %v17617_v24 = vpop.f32.mrb[242].mxu0 }
 0x502   :  { %v4304_v6 = vpop.f32.mrb[243].mxu0 }
 0x503   :  { %v6054_v58 = vpack.c.bf16 %v5224_v63, %v5221_v33  ;;  %5435 = vmatmul.mubr.bf16.gmra.mrb[168].mxu1 %v15291_v51  ;;  %v15300_v63 = vld [vmem:[%s19204_s3 + $0x728] ss:$16 sps:$4 sm:$0xff]  }
 0x504   :  { %5442 = vmatprep.mubr.bf16.mxu1 %v15296_v13 }
 0x505   :  { %13396 = vmatmul.mubr.msk.bf16.gmra.mrb[48].mxu0 %vm6158_vm2, %v6054_v58  ;;  %v15305_v58 = vld [vmem:[%s19204_s3 + $0x74c] ss:$16 sps:$4 sm:$0xff]  }
 0x506   :  { %v5228_v27 = vpop.f32.mrb[172].mxu1 }
 0x507   :  { %v5229_v10 = vadd.f32 %v5228_v27, %v17335_v40  ;;  %v5230_v44 = vpop.f32.mrb[173].mxu1  ;;  %v17624_v40 = vpop.f32.mrb[244].mxu0 }
 0x508   :  { %v5231_v36 = vpop.f32.mrb[174].mxu1  ;;  %v4309_v32 = vpop.f32.mrb[245].mxu0 }
 0x509   :  { %v5232_v14 = vadd.f32 %v5231_v36, %v17341_v20  ;;  %v5233_v18 = vpop.f32.mrb[175].mxu1  ;;  %v17630_v50 = vpop.f32.mrb[246].mxu0 }
 0x50a   :  { %v4312_v28 = vpop.f32.mrb[247].mxu0 }
 0x50b   :  { %v6055_v11 = vpack.c.bf16 %v5232_v14, %v5229_v10  ;;  %5443 = vmatmul.mubr.bf16.gmra.mrb[172].mxu1 %v15294_v34  ;;  %v15303_v14 = vld [vmem:[%s19204_s3 + $0x748] ss:$16 sps:$4 sm:$0xff]  }
 0x50c   :  { %5450 = vmatprep.mubr.bf16.mxu1 %v15299_v31 }
 0x50d   :  { %13399 = vmatprep.mubr.msk.bf16.mxu0 %vm6158_vm2, %v6055_v11  ;;  %v15306_v11 = vld [vmem:[%s19204_s3 + $0x76c] ss:$16 sps:$4 sm:$0xff]  }
 0x50e   :  { %v5236_v2 = vpop.f32.mrb[176].mxu1 }
 0x50f   :  { %v5237_v12 = vadd.f32 %v5236_v2, %v17348_v4  ;;  %v5238_v56 = vpop.f32.mrb[177].mxu1  ;;  %v17637_v4 = vpop.f32.mrb[248].mxu0 }
 0x510   :  { %v5239_v20 = vpop.f32.mrb[178].mxu1  ;;  %v4317_v8 = vpop.f32.mrb[249].mxu0 }
 0x511   :  { %v5240_v62 = vadd.f32 %v5239_v20, %v17354_v30  ;;  %v5241_v33 = vpop.f32.mrb[179].mxu1  ;;  %v17643_v49 = vpop.f32.mrb[250].mxu0 }
 0x512   :  { %v4320_v27 = vpop.f32.mrb[251].mxu0 }
 0x513   :  { %v6056_v29 = vpack.c.bf16 %v5240_v62, %v5237_v12  ;;  %5451 = vmatmul.mubr.bf16.gmra.mrb[176].mxu1 %v15297_v15  ;;  %v15308_v62 = vld [vmem:[%s19204_s3 + $0x768] ss:$16 sps:$4 sm:$0xff]  }
 0x514   :  { %5458 = vmatprep.mubr.bf16.mxu1 %v15302_v22 }
 0x515   :  { %13400 = vmatmul.mubr.msk.bf16.gmra.mrb[52].mxu0 %vm6158_vm2, %v6056_v29  ;;  %v15309_v29 = vld [vmem:[%s19204_s3 + $0x78c] ss:$16 sps:$4 sm:$0xff]  }
 0x516   :  { %v5244_v51 = vpop.f32.mrb[180].mxu1 }
 0x517   :  { %v5245_v13 = vadd.f32 %v5244_v51, %v17361_v57  ;;  %v5246_v61 = vpop.f32.mrb[181].mxu1  ;;  %v17650_v57 = vpop.f32.mrb[252].mxu0 }
 0x518   :  { %v5247_v30 = vpop.f32.mrb[182].mxu1  ;;  %v4325_v36 = vpop.f32.mrb[253].mxu0 }
 0x519   :  { %v5248_v45 = vadd.f32 %v5247_v30, %v17367_v5  ;;  %v5249_v10 = vpop.f32.mrb[183].mxu1  ;;  %v17656_v18 = vpop.f32.mrb[254].mxu0 }
 0x51a   :  { %v4328_v2 = vpop.f32.mrb[255].mxu0 }
 0x51b   :  { %v6057_v44 = vpack.c.bf16 %v5248_v45, %v5245_v13  ;;  %5459 = vmatmul.mubr.bf16.gmra.mrb[180].mxu1 %v15300_v63  ;;  %v15311_v45 = vld [vmem:[%s19204_s3 + $0x788] ss:$16 sps:$4 sm:$0xff]  }
 0x51c   :  { %5466 = vmatprep.mubr.bf16.mxu1 %v15305_v58 }
 0x51d   :  { %13403 = vmatprep.mubr.msk.bf16.mxu0 %vm6158_vm2, %v6057_v44  ;;  %v15312_v44 = vld [vmem:[%s19204_s3 + $0x7ac] ss:$16 sps:$4 sm:$0xff]  }
 0x51e   :  { %v5252_v34 = vpop.f32.mrb[184].mxu1 }
 0x51f   :  { %v5253_v31 = vadd.f32 %v5252_v34, %v17374_v38  ;;  %v5254_v6 = vpop.f32.mrb[185].mxu1  ;;  %v17663_v38 = vpop.f32.mrb[0].mxu0 }
 0x520   :  { %v5255_v5 = vpop.f32.mrb[186].mxu1  ;;  %v4333_v20 = vpop.f32.mrb[1].mxu0 }
 0x521   :  { %v5256_v32 = vadd.f32 %v5255_v5, %v17380_v21  ;;  %v5257_v12 = vpop.f32.mrb[187].mxu1  ;;  %v17669_v33 = vpop.f32.mrb[2].mxu0 }
 0x522   :  { %v4336_v51 = vpop.f32.mrb[3].mxu0 }
 0x523   :  { %v6058_v56 = vpack.c.bf16 %v5256_v32, %v5253_v31  ;;  %5467 = vmatmul.mubr.bf16.gmra.mrb[184].mxu1 %v15303_v14  ;;  %v17693_v14 = vld [vmem:[%s19206_s4 + $0x18] sm:$0xf] }
 0x524   :  { %5474 = vmatprep.mubr.bf16.mxu1 %v15306_v11 }
 0x525   :  { %13404 = vmatmul.mubr.msk.bf16.gmra.mrb[56].mxu0 %vm6158_vm2, %v6058_v56 }
 0x526   :  { %v5260_v15 = vpop.f32.mrb[188].mxu1 }
 0x527   :  { %v5261_v22 = vadd.f32 %v5260_v15, %v17387_v9  ;;  %v5262_v28 = vpop.f32.mrb[189].mxu1  ;;  %v17676_v9 = vpop.f32.mrb[4].mxu0  ;;  %v15315_v15 = vld [vmem:[%s19204_s3 + $0x7cc] ss:$16 sps:$4 sm:$0xff]  }
 0x528   :  { %v5263_v21 = vpop.f32.mrb[190].mxu1  ;;  %v4341_v30 = vpop.f32.mrb[5].mxu0 }
 0x529   :  { %v5264_v8 = vadd.f32 %v5263_v21, %v17399_v7  ;;  %v5265_v13 = vpop.f32.mrb[191].mxu1  ;;  %v17682_v10 = vpop.f32.mrb[6].mxu0 }
 0x52a   :  { %v4344_v34 = vpop.f32.mrb[7].mxu0  ;;  %v15317_v13 = vld [vmem:[%s19204_s3 + $0x7c8] ss:$16 sps:$4 sm:$0xff]  }
 0x52b   :  { %v6059_v61 = vpack.c.bf16 %v5264_v8, %v5261_v22  ;;  %5475 = vmatmul.mubr.bf16.gmra.mrb[0].mxu1 %v15308_v62  ;;  %v17696_v5 = vpop.f32.mrb[8].mxu0 }
 0x52c   :  { %5482 = vmatprep.mubr.bf16.mxu1 %v15309_v29  ;;  %v4349_v2 = vpop.f32.mrb[9].mxu0 }
 0x52d   :  { %13409 = vmatprep.mubr.msk.bf16.mxu0 %vm6158_vm2, %v6059_v61  ;;  %v17704_v12 = vpop.f32.mrb[10].mxu0 }
 0x52e   :  { %v5268_v63 = vpop.f32.mrb[192].mxu1  ;;  %v4352_v20 = vpop.f32.mrb[11].mxu0 }
 0x52f   :  { %v5269_v58 = vadd.f32 %v5268_v63, %v17420_v46  ;;  %v5270_v27 = vpop.f32.mrb[193].mxu1  ;;  %v6861_v46 = vsel %vm6183_vm1, %v17580_v16, 0  ;;  %v15314_v16 = vld [vmem:[%s19204_s3 + $0x7a8] ss:$16 sps:$4 sm:$0xff]   ;;  %v17711_v62 = vpop.f32.mrb[12].mxu0 }
 0x530   :  { %v5271_v7 = vpop.f32.mrb[194].mxu1  ;;  %v4357_v29 = vpop.f32.mrb[13].mxu0  ;;  %v15318_v63 = vld [vmem:[%s19204_s3 + $0x7ec] ss:$16 sps:$4 sm:$0xff]  }
 0x531   :  { %v5272_v36 = vadd.f32 %v5271_v7, %v17434_v37  ;;  %v5273_v31 = vpop.f32.mrb[195].mxu1  ;;  %v17717_v61 = vpop.f32.mrb[14].mxu0 }
 0x532   :  { %v4360_v30 = vpop.f32.mrb[15].mxu0  ;;  %v15320_v31 = vld [vmem:[%s19204_s3 + $0x7e8] ss:$16 sps:$4 sm:$0xff]  }
 0x533   :  { %v6060_v6 = vpack.c.bf16 %v5272_v36, %v5269_v58  ;;  %5483 = vmatmul.mubr.bf16.gmra.mrb[4].mxu1 %v15311_v45 }
 0x534   :  { %5490 = vmatprep.mubr.bf16.mxu1 %v15312_v44 }
 0x535   :  { %13410 = vmatmul.mubr.msk.bf16.vlgmr.msra.gmra.mrb[44].mxu0 %vm6158_vm2, %v6060_v6 }
 0x536   :  { %v5276_v11 = vpop.f32.mrb[196].mxu1  ;;  %13426 = vmatpush3.bf16.msra.mxu0 %v6861_v46  ;;  %v15321_v46 = vld [vmem:[%s19204_s3 + $0x80c] ss:$16 sps:$4 sm:$0xff]  }
 0x537   :  { %v5277_v37 = vadd.f32 %v5276_v11, %v17445_v1  ;;  %v5278_v32 = vpop.f32.mrb[197].mxu1  ;;  %14699 = vmatprep.subr.msk.bf16.mxu0 %vm6183_vm1, %v17693_v14 }
 0x538   :  { %v5279_v56 = vpop.f32.mrb[198].mxu1 }
 0x539   :  { %v5280_v22 = vadd.f32 %v5279_v56, %v17455_v26  ;;  %v5281_v28 = vpop.f32.mrb[199].mxu1 }
 0x53b   :  { %v6061_v1 = vpack.c.bf16 %v5280_v22, %v5277_v37  ;;  %5491 = vmatmul.mubr.bf16.gmra.mrb[8].mxu1 %v15314_v16  ;;  %v15323_v22 = vld [vmem:[%s19204_s3 + $0x808] ss:$16 sps:$4 sm:$0xff]  }
 0x53c   :  { %5498 = vmatprep.mubr.bf16.mxu1 %v15315_v15 }
 0x53d   :  { %13413 = vmatprep.mubr.msk.bf16.mxu0 %vm6158_vm2, %v6061_v1  ;;  %v15324_v1 = vld [vmem:[%s19204_s3 + $0x82c] ss:$16 sps:$4 sm:$0xff]  }
 0x53e   :  { %v5284_v21 = vpop.f32.mrb[200].mxu1 }
 0x53f   :  { %v5285_v51 = vadd.f32 %v5284_v21, %v17465_v41  ;;  %v5286_v8 = vpop.f32.mrb[201].mxu1  ;;  %v17724_v41 = vpop.f32.mrb[16].mxu0 }
 0x540   :  { %v5287_v26 = vpop.f32.mrb[202].mxu1  ;;  %v4365_v44 = vpop.f32.mrb[17].mxu0 }
 0x541   :  { %v5288_v58 = vadd.f32 %v5287_v26, %v17475_v42  ;;  %v5289_v27 = vpop.f32.mrb[203].mxu1  ;;  %v17730_v6 = vpop.f32.mrb[18].mxu0 }
 0x542   :  { %v4368_v11 = vpop.f32.mrb[19].mxu0 }
 0x543   :  { %v6062_v45 = vpack.c.bf16 %v5288_v58, %v5285_v51  ;;  %5499 = vmatmul.mubr.bf16.gmra.mrb[12].mxu1 %v15317_v13  ;;  %v15326_v58 = vld [vmem:[%s19204_s3 + $0x828] ss:$16 sps:$4 sm:$0xff]  }
 0x544   :  { %5506 = vmatprep.mubr.bf16.mxu1 %v15318_v63 }
 0x545   :  { %13414 = vmatmul.mubr.msk.bf16.gmra.mrb[48].mxu0 %vm6158_vm2, %v6062_v45  ;;  %v15327_v45 = vld [vmem:[%s19204_s3 + $0x84c] ss:$16 sps:$4 sm:$0xff]  }
 0x546   :  { %v5292_v7 = vpop.f32.mrb[204].mxu1 }
 0x547   :  { %v5293_v34 = vadd.f32 %v5292_v7, %v17485_v3  ;;  %v5294_v36 = vpop.f32.mrb[205].mxu1  ;;  %v17737_v3 = vpop.f32.mrb[20].mxu0 }
 0x548   :  { %v5295_v42 = vpop.f32.mrb[206].mxu1  ;;  %v4373_v56 = vpop.f32.mrb[21].mxu0 }
 0x549   :  { %v5296_v2 = vadd.f32 %v5295_v42, %v17492_v17  ;;  %v5297_v37 = vpop.f32.mrb[207].mxu1  ;;  %v17743_v28 = vpop.f32.mrb[22].mxu0 }
 0x54a   :  { %v4376_v21 = vpop.f32.mrb[23].mxu0 }
 0x54b   :  { %v6063_v32 = vpack.c.bf16 %v5296_v2, %v5293_v34  ;;  %5507 = vmatmul.mubr.bf16.gmra.mrb[16].mxu1 %v15320_v31  ;;  %v15329_v2 = vld [vmem:[%s19204_s3 + $0x848] ss:$16 sps:$4 sm:$0xff]  }
 0x54c   :  { %5514 = vmatprep.mubr.bf16.mxu1 %v15321_v46 }
 0x54d   :  { %13417 = vmatprep.mubr.msk.bf16.mxu0 %vm6158_vm2, %v6063_v32  ;;  %v15330_v32 = vld [vmem:[%s19204_s3 + $0x86c] ss:$16 sps:$4 sm:$0xff]  }
 0x54e   :  { %v5300_v16 = vpop.f32.mrb[208].mxu1 }
 0x54f   :  { %v5301_v15 = vadd.f32 %v5300_v16, %v17506_v23  ;;  %v5302_v20 = vpop.f32.mrb[209].mxu1  ;;  %v17750_v23 = vpop.f32.mrb[24].mxu0 }
 0x550   :  { %v5303_v17 = vpop.f32.mrb[210].mxu1  ;;  %v4381_v26 = vpop.f32.mrb[25].mxu0 }
 0x551   :  { %v5304_v29 = vadd.f32 %v5303_v17, %v17515_v60  ;;  %v5305_v51 = vpop.f32.mrb[211].mxu1  ;;  %v17756_v27 = vpop.f32.mrb[26].mxu0 }
 0x552   :  { %v4384_v7 = vpop.f32.mrb[27].mxu0 }
 0x553   :  { %v6064_v8 = vpack.c.bf16 %v5304_v29, %v5301_v15  ;;  %5515 = vmatmul.mubr.bf16.gmra.mrb[20].mxu1 %v15323_v22  ;;  %v15332_v29 = vld [vmem:[%s19204_s3 + $0x868] ss:$16 sps:$4 sm:$0xff]  }
 0x554   :  { %5522 = vmatprep.mubr.bf16.mxu1 %v15324_v1 }
 0x555   :  { %13418 = vmatmul.mubr.msk.bf16.gmra.mrb[52].mxu0 %vm6158_vm2, %v6064_v8  ;;  %v15333_v8 = vld [vmem:[%s19204_s3 + $0x88c] ss:$16 sps:$4 sm:$0xff]  }
 0x556   :  { %v5308_v13 = vpop.f32.mrb[212].mxu1 }
 0x557   :  { %v5309_v63 = vadd.f32 %v5308_v13, %v17522_v59  ;;  %v5310_v30 = vpop.f32.mrb[213].mxu1  ;;  %v17763_v59 = vpop.f32.mrb[28].mxu0 }
 0x558   :  { %v5311_v60 = vpop.f32.mrb[214].mxu1  ;;  %v4389_v42 = vpop.f32.mrb[29].mxu0 }
 0x559   :  { %v5312_v44 = vadd.f32 %v5311_v60, %v17529_v55  ;;  %v5313_v34 = vpop.f32.mrb[215].mxu1  ;;  %v17769_v37 = vpop.f32.mrb[30].mxu0 }
 0x55a   :  { %v4392_v16 = vpop.f32.mrb[31].mxu0 }
 0x55b   :  { %v6065_v36 = vpack.c.bf16 %v5312_v44, %v5309_v63  ;;  %5523 = vmatmul.mubr.bf16.gmra.mrb[24].mxu1 %v15326_v58  ;;  %v15335_v44 = vld [vmem:[%s19204_s3 + $0x888] ss:$16 sps:$4 sm:$0xff]  }
 0x55c   :  { %5530 = vmatprep.mubr.bf16.mxu1 %v15327_v45 }
 0x55d   :  { %13421 = vmatprep.mubr.msk.bf16.mxu0 %vm6158_vm2, %v6065_v36  ;;  %v15336_v36 = vld [vmem:[%s19204_s3 + $0x8ac] ss:$16 sps:$4 sm:$0xff]  }
 0x55e   :  { %v5316_v31 = vpop.f32.mrb[216].mxu1 }
 0x55f   :  { %v5317_v46 = vadd.f32 %v5316_v31, %v17536_v54  ;;  %v5318_v11 = vpop.f32.mrb[217].mxu1  ;;  %v17776_v54 = vpop.f32.mrb[32].mxu0 }
 0x560   :  { %v5319_v55 = vpop.f32.mrb[218].mxu1  ;;  %v4397_v17 = vpop.f32.mrb[33].mxu0 }
 0x561   :  { %v5320_v56 = vadd.f32 %v5319_v55, %v17543_v48  ;;  %v5321_v15 = vpop.f32.mrb[219].mxu1  ;;  %v17782_v51 = vpop.f32.mrb[34].mxu0 }
 0x562   :  { %v4400_v13 = vpop.f32.mrb[35].mxu0 }
 0x563   :  { %v6066_v20 = vpack.c.bf16 %v5320_v56, %v5317_v46  ;;  %5531 = vmatmul.mubr.bf16.gmra.mrb[28].mxu1 %v15329_v2  ;;  %v17806_v2 = vld [vmem:[%s19206_s4 + $0x1c] sm:$0xf]  ;;  %v15341_v13 = vld [vmem:[%s19204_s3 + $0x8c8] ss:$16 sps:$4 sm:$0xff]  }
 0x564   :  { %5538 = vmatprep.mubr.bf16.mxu1 %v15330_v32 }
 0x565   :  { %13422 = vmatmul.mubr.msk.bf16.gmra.mrb[56].mxu0 %vm6158_vm2, %v6066_v20 }
 0x566   :  { %v5324_v22 = vpop.f32.mrb[220].mxu1 }
 0x567   :  { %v5325_v1 = vadd.f32 %v5324_v22, %v17550_v47  ;;  %v5326_v21 = vpop.f32.mrb[221].mxu1  ;;  %v17789_v47 = vpop.f32.mrb[36].mxu0  ;;  %v15339_v22 = vld [vmem:[%s19204_s3 + $0x8cc] ss:$16 sps:$4 sm:$0xff]  }
 0x568   :  { %v5327_v48 = vpop.f32.mrb[222].mxu1  ;;  %v4405_v60 = vpop.f32.mrb[37].mxu0 }
 0x569   :  { %v5328_v26 = vadd.f32 %v5327_v48, %v17556_v35  ;;  %v5329_v63 = vpop.f32.mrb[223].mxu1  ;;  %v17795_v34 = vpop.f32.mrb[38].mxu0 }
 0x56a   :  { %v4408_v31 = vpop.f32.mrb[39].mxu0  ;;  %v15342_v63 = vld [vmem:[%s19204_s3 + $0x8ec] ss:$16 sps:$4 sm:$0xff]  }
 0x56b   :  { %v6067_v30 = vpack.c.bf16 %v5328_v26, %v5325_v1  ;;  %5539 = vmatmul.mubr.bf16.gmra.mrb[32].mxu1 %v15332_v29  ;;  %v17809_v55 = vpop.f32.mrb[40].mxu0 }
 0x56c   :  { %5546 = vmatprep.mubr.bf16.mxu1 %v15333_v8  ;;  %v4413_v16 = vpop.f32.mrb[41].mxu0 }
 0x56d   :  { %13427 = vmatprep.mubr.msk.bf16.mxu0 %vm6158_vm2, %v6067_v30  ;;  %v17817_v15 = vpop.f32.mrb[42].mxu0 }
 0x56e   :  { %v5332_v58 = vpop.f32.mrb[224].mxu1  ;;  %v4416_v17 = vpop.f32.mrb[43].mxu0 }
 0x56f   :  { %v5333_v45 = vadd.f32 %v5332_v58, %v17563_v39  ;;  %v5334_v7 = vpop.f32.mrb[225].mxu1  ;;  %v7003_v39 = vsel %vm6183_vm1, %v17693_v14, 0  ;;  %v15338_v14 = vld [vmem:[%s19204_s3 + $0x8a8] ss:$16 sps:$4 sm:$0xff]   ;;  %v15351_v17 = vld [vmem:[%s19204_s3 + $0x94c] ss:$16 sps:$4 sm:$0xff]  }
 0x570   :  { %v5335_v35 = vpop.f32.mrb[226].mxu1  ;;  %v15344_v7 = vld [vmem:[%s19204_s3 + $0x8e8] ss:$16 sps:$4 sm:$0xff]  }
 0x571   :  { %v5336_v42 = vadd.f32 %v5335_v35, %v17569_v43  ;;  %v5337_v46 = vpop.f32.mrb[227].mxu1  ;;  %v15345_v35 = vld [vmem:[%s19204_s3 + $0x90c] ss:$16 sps:$4 sm:$0xff]  }
 0x573   :  { %v6068_v11 = vpack.c.bf16 %v5336_v42, %v5333_v45  ;;  %5547 = vmatmul.mubr.bf16.gmra.mrb[36].mxu1 %v15335_v44 }
 0x574   :  { %5554 = vmatprep.mubr.bf16.mxu1 %v15336_v36 }
 0x575   :  { %13428 = vmatmul.mubr.msk.bf16.vlgmr.msra.gmra.mrb[44].mxu0 %vm6158_vm2, %v6068_v11  ;;  %v15347_v11 = vld [vmem:[%s19204_s3 + $0x908] ss:$16 sps:$4 sm:$0xff]  }
 0x576   :  { %v5340_v32 = vpop.f32.mrb[228].mxu1  ;;  %13444 = vmatpush3.bf16.msra.mxu0 %v7003_v39 }
 0x577   :  { %v5341_v43 = vadd.f32 %v5340_v32, %v17583_v53  ;;  %v5342_v56 = vpop.f32.mrb[229].mxu1  ;;  %14700 = vmatprep.subr.msk.bf16.mxu0 %vm6183_vm1, %v17806_v2  ;;  %v15348_v32 = vld [vmem:[%s19204_s3 + $0x92c] ss:$16 sps:$4 sm:$0xff]  }
 0x578   :  { %v5343_v20 = vpop.f32.mrb[230].mxu1 }
 0x579   :  { %v5344_v1 = vadd.f32 %v5343_v20, %v17591_v25  ;;  %v5345_v21 = vpop.f32.mrb[231].mxu1  ;;  %v15350_v20 = vld [vmem:[%s19204_s3 + $0x928] ss:$16 sps:$4 sm:$0xff]  }
 0x57b   :  { %v6069_v53 = vpack.c.bf16 %v5344_v1, %v5341_v43  ;;  %5555 = vmatmul.mubr.bf16.gmra.mrb[40].mxu1 %v15338_v14 }
 0x57c   :  { %5562 = vmatprep.mubr.bf16.mxu1 %v15339_v22 }
 0x57d   :  { %13431 = vmatprep.mubr.msk.bf16.mxu0 %vm6158_vm2, %v6069_v53 }
 0x57e   :  { %v5348_v29 = vpop.f32.mrb[232].mxu1 }
 0x57f   :  { %v5349_v48 = vadd.f32 %v5348_v29, %v17598_v19  ;;  %v5350_v8 = vpop.f32.mrb[233].mxu1 }
 0x580   :  { %v5351_v26 = vpop.f32.mrb[234].mxu1 }
 0x581   :  { %v5352_v25 = vadd.f32 %v5351_v26, %v17604_v0  ;;  %v5353_v30 = vpop.f32.mrb[235].mxu1 }
 0x583   :  { %v6070_v58 = vpack.c.bf16 %v5352_v25, %v5349_v48  ;;  %5563 = vmatmul.mubr.bf16.gmra.mrb[44].mxu1 %v15341_v13  ;;  %v15353_v48 = vld [vmem:[%s19204_s3 + $0x948] ss:$16 sps:$4 sm:$0xff]   ;;  %v15354_v13 = vld [vmem:[%s19204_s3 + $0x96c] ss:$16 sps:$4 sm:$0xff]  }
 0x584   :  { %5570 = vmatprep.mubr.bf16.mxu1 %v15342_v63 }
 0x585   :  { %13432 = vmatmul.mubr.msk.bf16.gmra.mrb[48].mxu0 %vm6158_vm2, %v6070_v58  ;;  %v15356_v58 = vld [vmem:[%s19204_s3 + $0x968] ss:$16 sps:$4 sm:$0xff]  }
 0x586   :  { %v5356_v60 = vpop.f32.mrb[236].mxu1 }
 0x587   :  { %v5357_v19 = vadd.f32 %v5356_v60, %v17611_v52  ;;  %v5358_v45 = vpop.f32.mrb[237].mxu1 }
 0x588   :  { %v5359_v44 = vpop.f32.mrb[238].mxu1 }
 0x589   :  { %v5360_v0 = vadd.f32 %v5359_v44, %v17617_v24  ;;  %v5361_v36 = vpop.f32.mrb[239].mxu1 }
 0x58b   :  { %v6071_v31 = vpack.c.bf16 %v5360_v0, %v5357_v19  ;;  %5571 = vmatmul.mubr.bf16.gmra.mrb[48].mxu1 %v15344_v7  ;;  %v15357_v19 = vld [vmem:[%s19204_s3 + $0x98c] ss:$16 sps:$4 sm:$0xff]   ;;  %v15359_v0 = vld [vmem:[%s19204_s3 + $0x988] ss:$16 sps:$4 sm:$0xff]  }
 0x58c   :  { %5578 = vmatprep.mubr.bf16.mxu1 %v15345_v35 }
 0x58d   :  { %13435 = vmatprep.mubr.msk.bf16.mxu0 %vm6158_vm2, %v6071_v31  ;;  %v15360_v31 = vld [vmem:[%s19204_s3 + $0x9ac] ss:$16 sps:$4 sm:$0xff]  }
 0x58e   :  { %v5364_v42 = vpop.f32.mrb[240].mxu1 }
 0x58f   :  { %v5365_v52 = vadd.f32 %v5364_v42, %v17624_v40  ;;  %v5366_v46 = vpop.f32.mrb[241].mxu1 }
 0x590   :  { %v5367_v39 = vpop.f32.mrb[242].mxu1  ;;  %v7145_v46 = vsel %vm6183_vm1, %v17806_v2, 0 }
 0x591   :  { %v5368_v24 = vadd.f32 %v5367_v39, %v17630_v50  ;;  %v5369_v16 = vpop.f32.mrb[243].mxu1 }
 0x593   :  { %v6072_v43 = vpack.c.bf16 %v5368_v24, %v5365_v52  ;;  %5579 = vmatmul.mubr.bf16.gmra.mrb[52].mxu1 %v15347_v11  ;;  %v15363_v24 = vld [vmem:[%s19204_s3 + $0x9cc] ss:$16 sps:$4 sm:$0xff]  }
 0x594   :  { %5586 = vmatprep.mubr.bf16.mxu1 %v15348_v32 }
 0x595   :  { %13436 = vmatmul.mubr.msk.bf16.gmra.mrb[52].mxu0 %vm6158_vm2, %v6072_v43 }
 0x596   :  { %v5372_v56 = vpop.f32.mrb[244].mxu1 }
 0x597   :  { %v5373_v40 = vadd.f32 %v5372_v56, %v17637_v4  ;;  %v5374_v14 = vpop.f32.mrb[245].mxu1 }
 0x598   :  { %v5375_v22 = vpop.f32.mrb[246].mxu1 }
 0x599   :  { %v5376_v50 = vadd.f32 %v5375_v22, %v17643_v49  ;;  %v5377_v1 = vpop.f32.mrb[247].mxu1 }
 0x59b   :  { %v6073_v21 = vpack.c.bf16 %v5376_v50, %v5373_v40  ;;  %5587 = vmatmul.mubr.bf16.gmra.mrb[56].mxu1 %v15350_v20  ;;  %v15365_v20 = vld [vmem:[%s19204_s3 + $0x9c8] ss:$16 sps:$4 sm:$0xff]  }
 0x59c   :  { %5594 = vmatprep.mubr.bf16.mxu1 %v15351_v17  ;;  %v15366_v17 = vld [vmem:[%s19204_s3 + $0x9ec] ss:$16 sps:$4 sm:$0xff]  }
 0x59d   :  { %13439 = vmatprep.mubr.msk.bf16.mxu0 %vm6158_vm2, %v6073_v21 }
 0x59e   :  { %v5380_v53 = vpop.f32.mrb[248].mxu1 }
 0x59f   :  { %v5381_v4 = vadd.f32 %v5380_v53, %v17650_v57  ;;  %v5382_v29 = vpop.f32.mrb[249].mxu1 }
 0x5a0   :  { %v5383_v8 = vpop.f32.mrb[250].mxu1 }
 0x5a1   :  { %v5384_v49 = vadd.f32 %v5383_v8, %v17656_v18  ;;  %v5385_v26 = vpop.f32.mrb[251].mxu1 }
 0x5a3   :  { %v6074_v63 = vpack.c.bf16 %v5384_v49, %v5381_v4  ;;  %5595 = vmatmul.mubr.bf16.gmra.mrb[60].mxu1 %v15353_v48  ;;  %v15368_v4 = vld [vmem:[%s19204_s3 + $0x9e8] ss:$16 sps:$4 sm:$0xff]   ;;  %v15369_v48 = vld [vmem:[%s19204_s3 + $0xa0c] ss:$16 sps:$4 sm:$0xff]  }
 0x5a4   :  { %5602 = vmatprep.mubr.bf16.mxu1 %v15354_v13 }
 0x5a5   :  { %13440 = vmatmul.mubr.msk.bf16.gmra.mrb[56].mxu0 %vm6158_vm2, %v6074_v63  ;;  %v15371_v63 = vld [vmem:[%s19204_s3 + $0xa08] ss:$16 sps:$4 sm:$0xff]  }
 0x5a6   :  { %v5388_v25 = vpop.f32.mrb[252].mxu1 }
 0x5a7   :  { %v5389_v57 = vadd.f32 %v5388_v25, %v17663_v38  ;;  %v5390_v30 = vpop.f32.mrb[253].mxu1 }
 0x5a8   :  { %v5391_v60 = vpop.f32.mrb[254].mxu1 }
 0x5a9   :  { %v5392_v18 = vadd.f32 %v5391_v60, %v17669_v33  ;;  %v5393_v45 = vpop.f32.mrb[255].mxu1 }
 0x5ab   :  { %v6075_v7 = vpack.c.bf16 %v5392_v18, %v5389_v57  ;;  %5603 = vmatmul.mubr.bf16.gmra.mrb[64].mxu1 %v15356_v58  ;;  %v15372_v57 = vld [vmem:[%s19204_s3 + $0xa2c] ss:$16 sps:$4 sm:$0xff]   ;;  %v15374_v18 = vld [vmem:[%s19204_s3 + $0xa28] ss:$16 sps:$4 sm:$0xff]  }
 0x5ac   :  { %5610 = vmatprep.mubr.bf16.mxu1 %v15357_v19 }
 0x5ad   :  { %13445 = vmatprep.mubr.msk.bf16.mxu0 %vm6158_vm2, %v6075_v7  ;;  %v15375_v7 = vld [vmem:[%s19204_s3 + $0xa4c] ss:$16 sps:$4 sm:$0xff]  }
 0x5ae   :  { %v5396_v44 = vpop.f32.mrb[148].mxu1 }
 0x5af   :  { %v5397_v38 = vadd.f32 %v5396_v44, %v17676_v9  ;;  %v5398_v35 = vpop.f32.mrb[149].mxu1  ;;  %v17891_v9 = vld [vmem:[%s19206_s4 + $0x20] sm:$0xf] }
 0x5b0   :  { %v5399_v36 = vpop.f32.mrb[150].mxu1 }
 0x5b1   :  { %v5400_v33 = vadd.f32 %v5399_v36, %v17682_v10  ;;  %v5401_v42 = vpop.f32.mrb[151].mxu1  ;;  %v15362_v10 = vld [vmem:[%s19204_s3 + $0x9a8] ss:$16 sps:$4 sm:$0xff]  }
 0x5b2   :  { %v15377_v36 = vld [vmem:[%s19204_s3 + $0xa48] ss:$16 sps:$4 sm:$0xff]  }
 0x5b3   :  { %v6076_v52 = vpack.c.bf16 %v5400_v33, %v5397_v38  ;;  %5611 = vmatmul.mubr.bf16.gmra.mrb[68].mxu1 %v15359_v0  ;;  %v15378_v33 = vld [vmem:[%s19204_s3 + $0xa6c] ss:$16 sps:$4 sm:$0xff]  }
 0x5b4   :  { %5618 = vmatprep.mubr.bf16.mxu1 %v15360_v31 }
 0x5b5   :  { %13446 = vmatmul.mubr.msk.bf16.vlgmr.msra.gmra.mrb[44].mxu0 %vm6158_vm2, %v6076_v52 }
 0x5b6   :  { %v5404_v11 = vpop.f32.mrb[152].mxu1  ;;  %13462 = vmatpush3.bf16.msra.mxu0 %v7145_v46 }
 0x5b7   :  { %v5405_v39 = vadd.f32 %v5404_v11, %v17696_v5  ;;  %v5406_v32 = vpop.f32.mrb[153].mxu1  ;;  %14701 = vmatprep.subr.msk.bf16.mxu0 %vm6183_vm1, %v17891_v9 }
 0x5b8   :  { %v5407_v2 = vpop.f32.mrb[154].mxu1 }
 0x5b9   :  { %v5408_v16 = vadd.f32 %v5407_v2, %v17704_v12  ;;  %v5409_v43 = vpop.f32.mrb[155].mxu1 }
 0x5bb   :  { %v6077_v56 = vpack.c.bf16 %v5408_v16, %v5405_v39  ;;  %5619 = vmatmul.mubr.bf16.gmra.mrb[72].mxu1 %v15362_v10  ;;  %v15380_v39 = vld [vmem:[%s19204_s3 + $0xa68] ss:$16 sps:$4 sm:$0xff]   ;;  %v15381_v10 = vld [vmem:[%s19204_s3 + $0xa8c] ss:$16 sps:$4 sm:$0xff]  }
 0x5bc   :  { %5626 = vmatprep.mubr.bf16.mxu1 %v15363_v24 }
 0x5bd   :  { %13449 = vmatprep.mubr.msk.bf16.mxu0 %vm6158_vm2, %v6077_v56  ;;  %v15383_v56 = vld [vmem:[%s19204_s3 + $0xa88] ss:$16 sps:$4 sm:$0xff]  }
 0x5be   :  { %v5412_v5 = vpop.f32.mrb[156].mxu1 }
 0x5bf   :  { %v5413_v40 = vadd.f32 %v5412_v5, %v17711_v62  ;;  %v5414_v14 = vpop.f32.mrb[157].mxu1 }
 0x5c0   :  { %v5415_v22 = vpop.f32.mrb[158].mxu1 }
 0x5c1   :  { %v5416_v12 = vadd.f32 %v5415_v22, %v17717_v61  ;;  %v5417_v50 = vpop.f32.mrb[159].mxu1  ;;  %v7287_v22 = vsel %vm6183_vm1, %v17891_v9, 0 }
 0x5c3   :  { %v6078_v1 = vpack.c.bf16 %v5416_v12, %v5413_v40  ;;  %5627 = vmatmul.mubr.bf16.gmra.mrb[76].mxu1 %v15365_v20  ;;  %v15384_v40 = vld [vmem:[%s19204_s3 + $0xaac] ss:$16 sps:$4 sm:$0xff]  }
 0x5c4   :  { %5634 = vmatprep.mubr.bf16.mxu1 %v15366_v17 }
 0x5c5   :  { %13450 = vmatmul.mubr.msk.bf16.gmra.mrb[48].mxu0 %vm6158_vm2, %v6078_v1  ;;  %v15387_v1 = vld [vmem:[%s19204_s3 + $0xacc] ss:$16 sps:$4 sm:$0xff]  }
 0x5c6   :  { %v5420_v21 = vpop.f32.mrb[160].mxu1 }
 0x5c7   :  { %v5421_v62 = vadd.f32 %v5420_v21, %v17724_v41  ;;  %v5422_v53 = vpop.f32.mrb[161].mxu1 }
 0x5c8   :  { %v5423_v29 = vpop.f32.mrb[162].mxu1 }
 0x5c9   :  { %v5424_v61 = vadd.f32 %v5423_v29, %v17730_v6  ;;  %v5425_v8 = vpop.f32.mrb[163].mxu1  ;;  %v15389_v29 = vld [vmem:[%s19204_s3 + $0xac8] ss:$16 sps:$4 sm:$0xff]  }
 0x5cb   :  { %v6079_v13 = vpack.c.bf16 %v5424_v61, %v5421_v62  ;;  %5635 = vmatmul.mubr.bf16.gmra.mrb[80].mxu1 %v15368_v4  ;;  %v15390_v61 = vld [vmem:[%s19204_s3 + $0xaec] ss:$16 sps:$4 sm:$0xff]  }
 0x5cc   :  { %5642 = vmatprep.mubr.bf16.mxu1 %v15369_v48 }
 0x5cd   :  { %13453 = vmatprep.mubr.msk.bf16.mxu0 %vm6158_vm2, %v6079_v13 }
 0x5ce   :  { %v5428_v49 = vpop.f32.mrb[164].mxu1 }
 0x5cf   :  { %v5429_v41 = vadd.f32 %v5428_v49, %v17737_v3  ;;  %v5430_v26 = vpop.f32.mrb[165].mxu1 }
 0x5d0   :  { %v5431_v25 = vpop.f32.mrb[166].mxu1 }
 0x5d1   :  { %v5432_v6 = vadd.f32 %v5431_v25, %v17743_v28  ;;  %v5433_v30 = vpop.f32.mrb[167].mxu1 }
 0x5d3   :  { %v6080_v58 = vpack.c.bf16 %v5432_v6, %v5429_v41  ;;  %5643 = vmatmul.mubr.bf16.gmra.mrb[84].mxu1 %v15371_v63  ;;  %v15392_v41 = vld [vmem:[%s19204_s3 + $0xae8] ss:$16 sps:$4 sm:$0xff]   ;;  %v15393_v63 = vld [vmem:[%s19204_s3 + $0xb0c] ss:$16 sps:$4 sm:$0xff]  }
 0x5d4   :  { %5650 = vmatprep.mubr.bf16.mxu1 %v15372_v57 }
 0x5d5   :  { %13454 = vmatmul.mubr.msk.bf16.gmra.mrb[52].mxu0 %vm6158_vm2, %v6080_v58  ;;  %v15395_v58 = vld [vmem:[%s19204_s3 + $0xb08] ss:$16 sps:$4 sm:$0xff]  }
 0x5d6   :  { %v5436_v60 = vpop.f32.mrb[168].mxu1 }
 0x5d7   :  { %v5437_v3 = vadd.f32 %v5436_v60, %v17750_v23  ;;  %v5438_v19 = vpop.f32.mrb[169].mxu1 }
 0x5d8   :  { %v5439_v45 = vpop.f32.mrb[170].mxu1 }
 0x5d9   :  { %v5440_v28 = vadd.f32 %v5439_v45, %v17756_v27  ;;  %v5441_v44 = vpop.f32.mrb[171].mxu1 }
 0x5db   :  { %v6081_v38 = vpack.c.bf16 %v5440_v28, %v5437_v3  ;;  %5651 = vmatmul.mubr.bf16.gmra.mrb[88].mxu1 %v15374_v18  ;;  %v15396_v3 = vld [vmem:[%s19204_s3 + $0xb2c] ss:$16 sps:$4 sm:$0xff]   ;;  %v15398_v28 = vld [vmem:[%s19204_s3 + $0xb28] ss:$16 sps:$4 sm:$0xff]  }
 0x5dc   :  { %5658 = vmatprep.mubr.bf16.mxu1 %v15375_v7 }
 0x5dd   :  { %13457 = vmatprep.mubr.msk.bf16.mxu0 %vm6158_vm2, %v6081_v38  ;;  %v15399_v38 = vld [vmem:[%s19204_s3 + $0xb4c] ss:$16 sps:$4 sm:$0xff]  }
 0x5de   :  { %v5444_v35 = vpop.f32.mrb[172].mxu1 }
 0x5df   :  { %v5445_v23 = vadd.f32 %v5444_v35, %v17763_v59  ;;  %v5446_v0 = vpop.f32.mrb[173].mxu1 }
 0x5e0   :  { %v5447_v31 = vpop.f32.mrb[174].mxu1 }
 0x5e1   :  { %v5448_v27 = vadd.f32 %v5447_v31, %v17769_v37  ;;  %v5449_v42 = vpop.f32.mrb[175].mxu1  ;;  %v15401_v31 = vld [vmem:[%s19204_s3 + $0xb48] ss:$16 sps:$4 sm:$0xff]  }
 0x5e3   :  { %v6082_v52 = vpack.c.bf16 %v5448_v27, %v5445_v23  ;;  %5659 = vmatmul.mubr.bf16.gmra.mrb[92].mxu1 %v15377_v36  ;;  %v15402_v27 = vld [vmem:[%s19204_s3 + $0xb6c] ss:$16 sps:$4 sm:$0xff]  }
 0x5e4   :  { %5666 = vmatprep.mubr.bf16.mxu1 %v15378_v33 }
 0x5e5   :  { %13458 = vmatmul.mubr.msk.bf16.gmra.mrb[56].mxu0 %vm6158_vm2, %v6082_v52 }
 0x5e6   :  { %v5452_v46 = vpop.f32.mrb[176].mxu1 }
 0x5e7   :  { %v5453_v59 = vadd.f32 %v5452_v46, %v17776_v54  ;;  %v5454_v11 = vpop.f32.mrb[177].mxu1 }
 0x5e8   :  { %v5455_v32 = vpop.f32.mrb[178].mxu1  ;;  %v15404_v11 = vld [vmem:[%s19204_s3 + $0xb68] ss:$16 sps:$4 sm:$0xff]  }
 0x5e9   :  { %v5456_v37 = vadd.f32 %v5455_v32, %v17782_v51  ;;  %v5457_v2 = vpop.f32.mrb[179].mxu1  ;;  %v15405_v32 = vld [vmem:[%s19204_s3 + $0xb8c] ss:$16 sps:$4 sm:$0xff]  }
 0x5eb   :  { %v6083_v24 = vpack.c.bf16 %v5456_v37, %v5453_v59  ;;  %5667 = vmatmul.mubr.bf16.gmra.mrb[96].mxu1 %v15380_v39 }
 0x5ec   :  { %5674 = vmatprep.mubr.bf16.mxu1 %v15381_v10 }
 0x5ed   :  { %13463 = vmatprep.mubr.msk.bf16.mxu0 %vm6158_vm2, %v6083_v24 }
 0x5ee   :  { %v5460_v16 = vpop.f32.mrb[180].mxu1 }
 0x5ef   :  { %v5461_v54 = vadd.f32 %v5460_v16, %v17789_v47  ;;  %v5462_v43 = vpop.f32.mrb[181].mxu1  ;;  %v17972_v47 = vld [vmem:[%s19206_s4 + $0x24] sm:$0xf]  ;;  %v15407_v16 = vld [vmem:[%s19204_s3 + $0xb88] ss:$16 sps:$4 sm:$0xff]  }
 0x5f0   :  { %v5463_v5 = vpop.f32.mrb[182].mxu1  ;;  %v15408_v43 = vld [vmem:[%s19204_s3 + $0xbac] ss:$16 sps:$4 sm:$0xff]  }
 0x5f1   :  { %v5464_v51 = vadd.f32 %v5463_v5, %v17795_v34  ;;  %v5465_v14 = vpop.f32.mrb[183].mxu1  ;;  %v15386_v34 = vld [vmem:[%s19204_s3 + $0xaa8] ss:$16 sps:$4 sm:$0xff]  }
 0x5f3   :  { %v6084_v20 = vpack.c.bf16 %v5464_v51, %v5461_v54  ;;  %5675 = vmatmul.mubr.bf16.gmra.mrb[100].mxu1 %v15383_v56  ;;  %v18039_v51 = vld [vmem:[%s19206_s4 + $0x28] sm:$0xf] }
 0x5f4   :  { %5682 = vmatprep.mubr.bf16.mxu1 %v15384_v40  ;;  %v7429_v40 = vsel %vm6183_vm1, %v17972_v47, 0 }
 0x5f5   :  { %13464 = vmatmul.mubr.msk.bf16.vlgmr.msra.gmra.mrb[44].mxu0 %vm6158_vm2, %v6084_v20 }
 0x5f6   :  { %v5468_v17 = vpop.f32.mrb[184].mxu1  ;;  %13480 = vmatpush3.bf16.msra.mxu0 %v7287_v22  ;;  %v15410_v22 = vld [vmem:[%s19204_s3 + $0xba8] ss:$16 sps:$4 sm:$0xff]  }
 0x5f7   :  { %v5469_v12 = vadd.f32 %v5468_v17, %v17809_v55  ;;  %v5470_v50 = vpop.f32.mrb[185].mxu1  ;;  %14702 = vmatprep.subr.msk.bf16.mxu0 %vm6183_vm1, %v17972_v47  ;;  %v15411_v17 = vld [vmem:[%s19204_s3 + $0xbcc] ss:$16 sps:$4 sm:$0xff]  }
 0x5f8   :  { %v5471_v9 = vpop.f32.mrb[186].mxu1 }
 0x5f9   :  { %v5472_v21 = vadd.f32 %v5471_v9, %v17817_v15  ;;  %v5473_v62 = vpop.f32.mrb[187].mxu1 }
 0x5fa   :  { %v15414_v62 = vld [vmem:[%s19204_s3 + $0xbec] ss:$16 sps:$4 sm:$0xff]  }
 0x5fb   :  { %v6085_v53 = vpack.c.bf16 %v5472_v21, %v5469_v12  ;;  %5683 = vmatmul.mubr.bf16.gmra.mrb[104].mxu1 %v15386_v34 }
 0x5fc   :  { %5690 = vmatprep.mubr.bf16.mxu1 %v15387_v1  ;;  %v15413_v1 = vld [vmem:[%s19204_s3 + $0xbc8] ss:$16 sps:$4 sm:$0xff]  }
 0x5fd   :  { %13467 = vmatprep.mubr.msk.bf16.mxu0 %vm6158_vm2, %v6085_v53 }
 0x5fe   :  { %v5476_v55 = vpop.f32.mrb[0].mxu1 }
 0x5ff   :  { %v5478_v4 = vpop.f32.mrb[1].mxu1 }
 0x600   :  { %v5479_v48 = vpop.f32.mrb[2].mxu1 }
 0x601   :  { %v6086_v8 = vpack.c.bf16 %v5479_v48, %v5476_v55  ;;  %v5481_v13 = vpop.f32.mrb[3].mxu1  ;;  %v15416_v48 = vld [vmem:[%s19204_s3 + $0xbe8] ss:$16 sps:$4 sm:$0xff]  }
 0x603   :  { %5691 = vmatmul.mubr.bf16.gmra.mrb[108].mxu1 %v15389_v29  ;;  %13468 = vmatmul.mubr.msk.bf16.gmra.mrb[48].mxu0 %vm6158_vm2, %v6086_v8  ;;  %v15419_v8 = vld [vmem:[%s19204_s3 + $0xc0c] ss:$16 sps:$4 sm:$0xff]  }
 0x604   :  { %5698 = vmatprep.mubr.bf16.mxu1 %v15390_v61 }
 0x606   :  { %v5484_v15 = vpop.f32.mrb[4].mxu1 }
 0x607   :  { %v5486_v49 = vpop.f32.mrb[5].mxu1 }
 0x608   :  { %v5487_v26 = vpop.f32.mrb[6].mxu1 }
 0x609   :  { %v6087_v25 = vpack.c.bf16 %v5487_v26, %v5484_v15  ;;  %v5489_v57 = vpop.f32.mrb[7].mxu1  ;;  %v15417_v26 = vld [vmem:[%s19204_s3 + $0xc08] ss:$16 sps:$4 sm:$0xff]  }
 0x60b   :  { %5699 = vmatmul.mubr.bf16.gmra.mrb[112].mxu1 %v15392_v41  ;;  %13471 = vmatprep.mubr.msk.bf16.mxu0 %vm6158_vm2, %v6087_v25  ;;  %v15422_v25 = vld [vmem:[%s19204_s3 + $0xc2c] ss:$16 sps:$4 sm:$0xff]  }
 0x60c   :  { %5706 = vmatprep.mubr.bf16.mxu1 %v15393_v63 }
 0x60e   :  { %v5492_v6 = vpop.f32.mrb[8].mxu1 }
 0x60f   :  { %v5494_v30 = vpop.f32.mrb[9].mxu1 }
 0x610   :  { %v5495_v60 = vpop.f32.mrb[10].mxu1 }
 0x611   :  { %v6088_v19 = vpack.c.bf16 %v5495_v60, %v5492_v6  ;;  %v5497_v18 = vpop.f32.mrb[11].mxu1  ;;  %v15420_v60 = vld [vmem:[%s19204_s3 + $0xc28] ss:$16 sps:$4 sm:$0xff]  }
 0x613   :  { %5707 = vmatmul.mubr.bf16.gmra.mrb[116].mxu1 %v15395_v58  ;;  %13472 = vmatmul.mubr.msk.bf16.gmra.mrb[52].mxu0 %vm6158_vm2, %v6088_v19  ;;  %v15425_v19 = vld [vmem:[%s19204_s3 + $0xc4c] ss:$16 sps:$4 sm:$0xff]  }
 0x614   :  { %5714 = vmatprep.mubr.bf16.mxu1 %v15396_v3 }
 0x616   :  { %v5500_v45 = vpop.f32.mrb[12].mxu1 }
 0x617   :  { %v5502_v7 = vpop.f32.mrb[13].mxu1 }
 0x618   :  { %v5503_v44 = vpop.f32.mrb[14].mxu1 }
 0x619   :  { %v6089_v35 = vpack.c.bf16 %v5503_v44, %v5500_v45  ;;  %v5505_v23 = vpop.f32.mrb[15].mxu1  ;;  %v15423_v44 = vld [vmem:[%s19204_s3 + $0xc48] ss:$16 sps:$4 sm:$0xff]  }
 0x61b   :  { %5715 = vmatmul.mubr.bf16.gmra.mrb[120].mxu1 %v15398_v28  ;;  %13475 = vmatprep.mubr.msk.bf16.mxu0 %vm6158_vm2, %v6089_v35  ;;  %v15428_v35 = vld [vmem:[%s19204_s3 + $0xc6c] ss:$16 sps:$4 sm:$0xff]  }
 0x61c   :  { %5722 = vmatprep.mubr.bf16.mxu1 %v15399_v38 }
 0x61e   :  { %v5508_v0 = vpop.f32.mrb[16].mxu1 }
 0x61f   :  { %v5510_v36 = vpop.f32.mrb[17].mxu1 }
 0x620   :  { %v5511_v33 = vpop.f32.mrb[18].mxu1 }
 0x621   :  { %v6090_v42 = vpack.c.bf16 %v5511_v33, %v5508_v0  ;;  %v5513_v52 = vpop.f32.mrb[19].mxu1  ;;  %v15426_v33 = vld [vmem:[%s19204_s3 + $0xc68] ss:$16 sps:$4 sm:$0xff]  }
 0x623   :  { %5723 = vmatmul.mubr.bf16.gmra.mrb[124].mxu1 %v15401_v31  ;;  %13476 = vmatmul.mubr.msk.bf16.gmra.mrb[56].mxu0 %vm6158_vm2, %v6090_v42  ;;  %v15431_v42 = vld [vmem:[%s19204_s3 + $0xc8c] ss:$16 sps:$4 sm:$0xff]  }
 0x624   :  { %5730 = vmatprep.mubr.bf16.mxu1 %v15402_v27 }
 0x626   :  { %v5516_v46 = vpop.f32.mrb[20].mxu1 }
 0x627   :  { %v5518_v59 = vpop.f32.mrb[21].mxu1 }
 0x628   :  { %v5519_v39 = vpop.f32.mrb[22].mxu1 }
 0x629   :  { %v6091_v10 = vpack.c.bf16 %v5519_v39, %v5516_v46  ;;  %v5521_v37 = vpop.f32.mrb[23].mxu1  ;;  %v15429_v39 = vld [vmem:[%s19204_s3 + $0xc88] ss:$16 sps:$4 sm:$0xff]  }
 0x62b   :  { %5731 = vmatmul.mubr.bf16.gmra.mrb[128].mxu1 %v15404_v11  ;;  %13481 = vmatprep.mubr.msk.bf16.mxu0 %vm6158_vm2, %v6091_v10  ;;  %v15434_v10 = vld [vmem:[%s19204_s3 + $0xcac] ss:$16 sps:$4 sm:$0xff]  }
 0x62c   :  { %5738 = vmatprep.mubr.bf16.mxu1 %v15405_v32 }
 0x62e   :  { %v5524_v2 = vpop.f32.mrb[24].mxu1 }
 0x62f   :  { %v5526_v24 = vpop.f32.mrb[25].mxu1 }
 0x630   :  { %v5527_v54 = vpop.f32.mrb[26].mxu1  ;;  %v7571_v24 = vsel %vm6183_vm1, %v18039_v51, 0 }
 0x631   :  { %v6092_v56 = vpack.c.bf16 %v5527_v54, %v5524_v2  ;;  %v5529_v5 = vpop.f32.mrb[27].mxu1 }
 0x633   :  { %5739 = vmatmul.mubr.bf16.gmra.mrb[132].mxu1 %v15407_v16  ;;  %13482 = vmatmul.mubr.msk.bf16.vlgmr.msra.gmra.mrb[44].mxu0 %vm6158_vm2, %v6092_v56  ;;  %v18104_v16 = vld [vmem:[%s19206_s4 + $0x2c] sm:$0xf]  ;;  %v15432_v56 = vld [vmem:[%s19204_s3 + $0xca8] ss:$16 sps:$4 sm:$0xff]  }
 0x634   :  { %5746 = vmatprep.mubr.bf16.mxu1 %v15408_v43  ;;  %13498 = vmatpush3.bf16.msra.mxu0 %v7429_v40  ;;  %v15437_v40 = vld [vmem:[%s19204_s3 + $0xccc] ss:$16 sps:$4 sm:$0xff]  }
 0x635   :  { %14703 = vmatprep.subr.msk.bf16.mxu0 %vm6183_vm1, %v18039_v51 }
 0x636   :  { %v5532_v14 = vpop.f32.mrb[28].mxu1 }
 0x637   :  { %v5534_v20 = vpop.f32.mrb[29].mxu1 }
 0x638   :  { %v5535_v47 = vpop.f32.mrb[30].mxu1 }
 0x639   :  { %v6093_v12 = vpack.c.bf16 %v5535_v47, %v5532_v14  ;;  %v5537_v50 = vpop.f32.mrb[31].mxu1  ;;  %v15435_v47 = vld [vmem:[%s19204_s3 + $0xcc8] ss:$16 sps:$4 sm:$0xff]  }
 0x63b   :  { %5747 = vmatmul.mubr.bf16.gmra.mrb[136].mxu1 %v15410_v22  ;;  %13485 = vmatprep.mubr.msk.bf16.mxu0 %vm6158_vm2, %v6093_v12  ;;  %v15440_v12 = vld [vmem:[%s19204_s3 + $0xcec] ss:$16 sps:$4 sm:$0xff]  }
 0x63c   :  { %5754 = vmatprep.mubr.bf16.mxu1 %v15411_v17 }
 0x63e   :  { %v5540_v34 = vpop.f32.mrb[32].mxu1 }
 0x63f   :  { %v5542_v9 = vpop.f32.mrb[33].mxu1 }
 0x640   :  { %v5543_v21 = vpop.f32.mrb[34].mxu1 }
 0x641   :  { %v6094_v53 = vpack.c.bf16 %v5543_v21, %v5540_v34  ;;  %v5545_v55 = vpop.f32.mrb[35].mxu1  ;;  %v15438_v21 = vld [vmem:[%s19204_s3 + $0xce8] ss:$16 sps:$4 sm:$0xff]  }
 0x643   :  { %5755 = vmatmul.mubr.bf16.gmra.mrb[140].mxu1 %v15413_v1  ;;  %13486 = vmatmul.mubr.msk.bf16.gmra.mrb[48].mxu0 %vm6158_vm2, %v6094_v53  ;;  %v15443_v53 = vld [vmem:[%s19204_s3 + $0xd0c] ss:$16 sps:$4 sm:$0xff]  }
 0x644   :  { %5762 = vmatprep.mubr.bf16.mxu1 %v15414_v62 }
 0x646   :  { %v5548_v4 = vpop.f32.mrb[36].mxu1 }
 0x647   :  { %v5550_v29 = vpop.f32.mrb[37].mxu1 }
 0x648   :  { %v5551_v61 = vpop.f32.mrb[38].mxu1 }
 0x649   :  { %v6095_v13 = vpack.c.bf16 %v5551_v61, %v5548_v4  ;;  %v5553_v15 = vpop.f32.mrb[39].mxu1  ;;  %v15441_v61 = vld [vmem:[%s19204_s3 + $0xd08] ss:$16 sps:$4 sm:$0xff]  }
 0x64b   :  { %5763 = vmatmul.mubr.bf16.gmra.mrb[144].mxu1 %v15416_v48  ;;  %13489 = vmatprep.mubr.msk.bf16.mxu0 %vm6158_vm2, %v6095_v13  ;;  %v15446_v13 = vld [vmem:[%s19204_s3 + $0xd2c] ss:$16 sps:$4 sm:$0xff]  }
 0x64c   :  { %5770 = vmatprep.mubr.bf16.mxu1 %v15419_v8 }
 0x64e   :  { %v5556_v49 = vpop.f32.mrb[40].mxu1 }
 0x64f   :  { %v5558_v41 = vpop.f32.mrb[41].mxu1 }
 0x650   :  { %v5559_v63 = vpop.f32.mrb[42].mxu1 }
 0x651   :  { %v6096_v57 = vpack.c.bf16 %v5559_v63, %v5556_v49  ;;  %v5561_v6 = vpop.f32.mrb[43].mxu1  ;;  %v15444_v63 = vld [vmem:[%s19204_s3 + $0xd28] ss:$16 sps:$4 sm:$0xff]  }
 0x653   :  { %5771 = vmatmul.mubr.bf16.gmra.mrb[188].mxu1 %v15417_v26  ;;  %13490 = vmatmul.mubr.msk.bf16.gmra.mrb[52].mxu0 %vm6158_vm2, %v6096_v57  ;;  %v15449_v57 = vld [vmem:[%s19204_s3 + $0xd4c] ss:$16 sps:$4 sm:$0xff]  }
 0x654   :  { %5778 = vmatprep.mubr.bf16.mxu1 %v15422_v25 }
 0x656   :  { %v5564_v30 = vpop.f32.mrb[44].mxu1 }
 0x657   :  { %v5566_v58 = vpop.f32.mrb[45].mxu1 }
 0x658   :  { %v5567_v3 = vpop.f32.mrb[46].mxu1 }
 0x659   :  { %v6097_v18 = vpack.c.bf16 %v5567_v3, %v5564_v30  ;;  %v5569_v45 = vpop.f32.mrb[47].mxu1  ;;  %v15447_v3 = vld [vmem:[%s19204_s3 + $0xd48] ss:$16 sps:$4 sm:$0xff]  }
 0x65b   :  { %5779 = vmatmul.mubr.bf16.gmra.mrb[192].mxu1 %v15420_v60  ;;  %13493 = vmatprep.mubr.msk.bf16.mxu0 %vm6158_vm2, %v6097_v18  ;;  %v15452_v18 = vld [vmem:[%s19204_s3 + $0xd6c] ss:$16 sps:$4 sm:$0xff]  }
 0x65c   :  { %5786 = vmatprep.mubr.bf16.mxu1 %v15425_v19 }
 0x65e   :  { %v5572_v7 = vpop.f32.mrb[48].mxu1 }
 0x65f   :  { %v5574_v28 = vpop.f32.mrb[49].mxu1 }
 0x660   :  { %v5575_v38 = vpop.f32.mrb[50].mxu1 }
 0x661   :  { %v6098_v23 = vpack.c.bf16 %v5575_v38, %v5572_v7  ;;  %v5577_v0 = vpop.f32.mrb[51].mxu1  ;;  %v15450_v38 = vld [vmem:[%s19204_s3 + $0xd68] ss:$16 sps:$4 sm:$0xff]  }
 0x663   :  { %5787 = vmatmul.mubr.bf16.gmra.mrb[196].mxu1 %v15423_v44  ;;  %13494 = vmatmul.mubr.msk.bf16.gmra.mrb[56].mxu0 %vm6158_vm2, %v6098_v23  ;;  %v15455_v23 = vld [vmem:[%s19204_s3 + $0xd8c] ss:$16 sps:$4 sm:$0xff]  }
 0x664   :  { %5794 = vmatprep.mubr.bf16.mxu1 %v15428_v35 }
 0x666   :  { %v5580_v36 = vpop.f32.mrb[52].mxu1 }
 0x667   :  { %v5582_v31 = vpop.f32.mrb[53].mxu1 }
 0x668   :  { %v5583_v27 = vpop.f32.mrb[54].mxu1 }
 0x669   :  { %v6099_v52 = vpack.c.bf16 %v5583_v27, %v5580_v36  ;;  %v5585_v46 = vpop.f32.mrb[55].mxu1  ;;  %v15453_v27 = vld [vmem:[%s19204_s3 + $0xd88] ss:$16 sps:$4 sm:$0xff]  }
 0x66b   :  { %5795 = vmatmul.mubr.bf16.gmra.mrb[200].mxu1 %v15426_v33  ;;  %13499 = vmatprep.mubr.msk.bf16.mxu0 %vm6158_vm2, %v6099_v52  ;;  %v15458_v52 = vld [vmem:[%s19204_s3 + $0xdac] ss:$16 sps:$4 sm:$0xff]  }
 0x66c   :  { %5802 = vmatprep.mubr.bf16.mxu1 %v15431_v42 }
 0x66e   :  { %v5588_v59 = vpop.f32.mrb[56].mxu1 }
 0x66f   :  { %v5590_v11 = vpop.f32.mrb[57].mxu1 }
 0x670   :  { %v5591_v32 = vpop.f32.mrb[58].mxu1  ;;  %v7713_v11 = vsel %vm6183_vm1, %v18104_v16, 0 }
 0x671   :  { %v6100_v37 = vpack.c.bf16 %v5591_v32, %v5588_v59  ;;  %v5593_v2 = vpop.f32.mrb[59].mxu1 }
 0x673   :  { %5803 = vmatmul.mubr.bf16.gmra.mrb[204].mxu1 %v15429_v39  ;;  %13500 = vmatmul.mubr.msk.bf16.vlgmr.msra.gmra.mrb[44].mxu0 %vm6158_vm2, %v6100_v37  ;;  %v18169_v39 = vld [vmem:[%s19206_s4 + $0x30] sm:$0xf]  ;;  %v15456_v37 = vld [vmem:[%s19204_s3 + $0xda8] ss:$16 sps:$4 sm:$0xff]  }
 0x674   :  { %5810 = vmatprep.mubr.bf16.mxu1 %v15434_v10  ;;  %13516 = vmatpush3.bf16.msra.mxu0 %v7571_v24  ;;  %v15461_v24 = vld [vmem:[%s19204_s3 + $0xdcc] ss:$16 sps:$4 sm:$0xff]  }
 0x675   :  { %14704 = vmatprep.subr.msk.bf16.mxu0 %vm6183_vm1, %v18104_v16 }
 0x676   :  { %v5596_v54 = vpop.f32.mrb[60].mxu1 }
 0x677   :  { %v5598_v43 = vpop.f32.mrb[61].mxu1 }
 0x678   :  { %v5599_v5 = vpop.f32.mrb[62].mxu1 }
 0x679   :  { %v6101_v51 = vpack.c.bf16 %v5599_v5, %v5596_v54  ;;  %v5601_v14 = vpop.f32.mrb[63].mxu1  ;;  %v15459_v5 = vld [vmem:[%s19204_s3 + $0xdc8] ss:$16 sps:$4 sm:$0xff]  }
 0x67b   :  { %5811 = vmatmul.mubr.bf16.gmra.mrb[208].mxu1 %v15432_v56  ;;  %13503 = vmatprep.mubr.msk.bf16.mxu0 %vm6158_vm2, %v6101_v51  ;;  %v15464_v51 = vld [vmem:[%s19204_s3 + $0xdec] ss:$16 sps:$4 sm:$0xff]  }
 0x67c   :  { %5818 = vmatprep.mubr.bf16.mxu1 %v15437_v40 }
 0x67e   :  { %v5604_v20 = vpop.f32.mrb[64].mxu1 }
 0x67f   :  { %v5606_v22 = vpop.f32.mrb[65].mxu1 }
 0x680   :  { %v5607_v17 = vpop.f32.mrb[66].mxu1 }
 0x681   :  { %v6102_v50 = vpack.c.bf16 %v5607_v17, %v5604_v20  ;;  %v5609_v34 = vpop.f32.mrb[67].mxu1  ;;  %v15462_v17 = vld [vmem:[%s19204_s3 + $0xde8] ss:$16 sps:$4 sm:$0xff]  }
 0x683   :  { %5819 = vmatmul.mubr.bf16.gmra.mrb[212].mxu1 %v15435_v47  ;;  %13504 = vmatmul.mubr.msk.bf16.gmra.mrb[48].mxu0 %vm6158_vm2, %v6102_v50  ;;  %v15467_v50 = vld [vmem:[%s19204_s3 + $0xe0c] ss:$16 sps:$4 sm:$0xff]  }
 0x684   :  { %5826 = vmatprep.mubr.bf16.mxu1 %v15440_v12 }
 0x686   :  { %v5612_v9 = vpop.f32.mrb[68].mxu1 }
 0x687   :  { %v5614_v1 = vpop.f32.mrb[69].mxu1 }
 0x688   :  { %v5615_v62 = vpop.f32.mrb[70].mxu1 }
 0x689   :  { %v6103_v55 = vpack.c.bf16 %v5615_v62, %v5612_v9  ;;  %v5617_v4 = vpop.f32.mrb[71].mxu1  ;;  %v15465_v62 = vld [vmem:[%s19204_s3 + $0xe08] ss:$16 sps:$4 sm:$0xff]  }
 0x68b   :  { %5827 = vmatmul.mubr.bf16.gmra.mrb[216].mxu1 %v15438_v21  ;;  %13507 = vmatprep.mubr.msk.bf16.mxu0 %vm6158_vm2, %v6103_v55  ;;  %v15470_v55 = vld [vmem:[%s19204_s3 + $0xe2c] ss:$16 sps:$4 sm:$0xff]  }
 0x68c   :  { %5834 = vmatprep.mubr.bf16.mxu1 %v15443_v53 }
 0x68e   :  { %v5620_v29 = vpop.f32.mrb[72].mxu1 }
 0x68f   :  { %v5622_v48 = vpop.f32.mrb[73].mxu1 }
 0x690   :  { %v5623_v8 = vpop.f32.mrb[74].mxu1 }
 0x691   :  { %v6104_v15 = vpack.c.bf16 %v5623_v8, %v5620_v29  ;;  %v5625_v49 = vpop.f32.mrb[75].mxu1  ;;  %v15468_v8 = vld [vmem:[%s19204_s3 + $0xe28] ss:$16 sps:$4 sm:$0xff]  }
 0x693   :  { %5835 = vmatmul.mubr.bf16.gmra.mrb[220].mxu1 %v15441_v61  ;;  %13508 = vmatmul.mubr.msk.bf16.gmra.mrb[52].mxu0 %vm6158_vm2, %v6104_v15  ;;  %v15473_v15 = vld [vmem:[%s19204_s3 + $0xe4c] ss:$16 sps:$4 sm:$0xff]  }
 0x694   :  { %5842 = vmatprep.mubr.bf16.mxu1 %v15446_v13 }
 0x696   :  { %v5628_v41 = vpop.f32.mrb[76].mxu1 }
 0x697   :  { %v5630_v26 = vpop.f32.mrb[77].mxu1 }
 0x698   :  { %v5631_v25 = vpop.f32.mrb[78].mxu1 }
 0x699   :  { %v6105_v6 = vpack.c.bf16 %v5631_v25, %v5628_v41  ;;  %v5633_v30 = vpop.f32.mrb[79].mxu1  ;;  %v15471_v25 = vld [vmem:[%s19204_s3 + $0xe48] ss:$16 sps:$4 sm:$0xff]  }
 0x69b   :  { %5843 = vmatmul.mubr.bf16.gmra.mrb[224].mxu1 %v15444_v63  ;;  %13511 = vmatprep.mubr.msk.bf16.mxu0 %vm6158_vm2, %v6105_v6  ;;  %v15476_v6 = vld [vmem:[%s19204_s3 + $0xe6c] ss:$16 sps:$4 sm:$0xff]  }
 0x69c   :  { %5850 = vmatprep.mubr.bf16.mxu1 %v15449_v57 }
 0x69e   :  { %v5636_v58 = vpop.f32.mrb[80].mxu1 }
 0x69f   :  { %v5638_v60 = vpop.f32.mrb[81].mxu1 }
 0x6a0   :  { %v5639_v19 = vpop.f32.mrb[82].mxu1 }
 0x6a1   :  { %v6106_v45 = vpack.c.bf16 %v5639_v19, %v5636_v58  ;;  %v5641_v7 = vpop.f32.mrb[83].mxu1  ;;  %v15474_v19 = vld [vmem:[%s19204_s3 + $0xe68] ss:$16 sps:$4 sm:$0xff]  }
 0x6a3   :  { %5851 = vmatmul.mubr.bf16.gmra.mrb[228].mxu1 %v15447_v3  ;;  %13512 = vmatmul.mubr.msk.bf16.gmra.mrb[56].mxu0 %vm6158_vm2, %v6106_v45  ;;  %v15479_v45 = vld [vmem:[%s19204_s3 + $0xe8c] ss:$16 sps:$4 sm:$0xff]  }
 0x6a4   :  { %5858 = vmatprep.mubr.bf16.mxu1 %v15452_v18 }
 0x6a6   :  { %v5644_v28 = vpop.f32.mrb[84].mxu1 }
 0x6a7   :  { %v5646_v44 = vpop.f32.mrb[85].mxu1 }
 0x6a8   :  { %v5647_v35 = vpop.f32.mrb[86].mxu1 }
 0x6a9   :  { %v6107_v0 = vpack.c.bf16 %v5647_v35, %v5644_v28  ;;  %v5649_v36 = vpop.f32.mrb[87].mxu1  ;;  %v15477_v35 = vld [vmem:[%s19204_s3 + $0xe88] ss:$16 sps:$4 sm:$0xff]  }
 0x6ab   :  { %5859 = vmatmul.mubr.bf16.gmra.mrb[232].mxu1 %v15450_v38  ;;  %13517 = vmatprep.mubr.msk.bf16.mxu0 %vm6158_vm2, %v6107_v0  ;;  %v15482_v0 = vld [vmem:[%s19204_s3 + $0xeac] ss:$16 sps:$4 sm:$0xff]  }
 0x6ac   :  { %5866 = vmatprep.mubr.bf16.mxu1 %v15455_v23 }
 0x6ae   :  { %v5652_v31 = vpop.f32.mrb[88].mxu1 }
 0x6af   :  { %v5654_v33 = vpop.f32.mrb[89].mxu1 }
 0x6b0   :  { %v5655_v42 = vpop.f32.mrb[90].mxu1  ;;  %v7855_v33 = vsel %vm6183_vm1, %v18169_v39, 0 }
 0x6b1   :  { %v6108_v46 = vpack.c.bf16 %v5655_v42, %v5652_v31  ;;  %v5657_v59 = vpop.f32.mrb[91].mxu1 }
 0x6b3   :  { %5867 = vmatmul.mubr.bf16.gmra.mrb[236].mxu1 %v15453_v27  ;;  %13518 = vmatmul.mubr.msk.bf16.vlgmr.msra.gmra.mrb[44].mxu0 %vm6158_vm2, %v6108_v46  ;;  %v18234_v27 = vld [vmem:[%s19206_s4 + $0x34] sm:$0xf]  ;;  %v15480_v46 = vld [vmem:[%s19204_s3 + $0xea8] ss:$16 sps:$4 sm:$0xff]  }
 0x6b4   :  { %5874 = vmatprep.mubr.bf16.mxu1 %v15458_v52  ;;  %13534 = vmatpush3.bf16.msra.mxu0 %v7713_v11  ;;  %v15485_v11 = vld [vmem:[%s19204_s3 + $0xecc] ss:$16 sps:$4 sm:$0xff]  }
 0x6b5   :  { %14705 = vmatprep.subr.msk.bf16.mxu0 %vm6183_vm1, %v18169_v39 }
 0x6b6   :  { %v5660_v32 = vpop.f32.mrb[92].mxu1 }
 0x6b7   :  { %v5662_v10 = vpop.f32.mrb[93].mxu1 }
 0x6b8   :  { %v5663_v2 = vpop.f32.mrb[94].mxu1 }
 0x6b9   :  { %v6109_v16 = vpack.c.bf16 %v5663_v2, %v5660_v32  ;;  %v5665_v54 = vpop.f32.mrb[95].mxu1  ;;  %v15483_v2 = vld [vmem:[%s19204_s3 + $0xec8] ss:$16 sps:$4 sm:$0xff]  }
 0x6bb   :  { %5875 = vmatmul.mubr.bf16.gmra.mrb[240].mxu1 %v15456_v37  ;;  %13521 = vmatprep.mubr.msk.bf16.mxu0 %vm6158_vm2, %v6109_v16  ;;  %v15488_v16 = vld [vmem:[%s19204_s3 + $0xeec] ss:$16 sps:$4 sm:$0xff]  }
 0x6bc   :  { %5882 = vmatprep.mubr.bf16.mxu1 %v15461_v24 }
 0x6be   :  { %v5668_v43 = vpop.f32.mrb[96].mxu1 }
 0x6bf   :  { %v5670_v56 = vpop.f32.mrb[97].mxu1 }
 0x6c0   :  { %v5671_v40 = vpop.f32.mrb[98].mxu1 }
 0x6c1   :  { %v6110_v14 = vpack.c.bf16 %v5671_v40, %v5668_v43  ;;  %v5673_v20 = vpop.f32.mrb[99].mxu1  ;;  %v15486_v40 = vld [vmem:[%s19204_s3 + $0xee8] ss:$16 sps:$4 sm:$0xff]  }
 0x6c3   :  { %5883 = vmatmul.mubr.bf16.gmra.mrb[244].mxu1 %v15459_v5  ;;  %13522 = vmatmul.mubr.msk.bf16.gmra.mrb[48].mxu0 %vm6158_vm2, %v6110_v14  ;;  %v15491_v14 = vld [vmem:[%s19204_s3 + $0xf0c] ss:$16 sps:$4 sm:$0xff]  }
 0x6c4   :  { %5890 = vmatprep.mubr.bf16.mxu1 %v15464_v51 }
 0x6c6   :  { %v5676_v22 = vpop.f32.mrb[100].mxu1 }
 0x6c7   :  { %v5678_v47 = vpop.f32.mrb[101].mxu1 }
 0x6c8   :  { %v5679_v12 = vpop.f32.mrb[102].mxu1 }
 0x6c9   :  { %v6111_v34 = vpack.c.bf16 %v5679_v12, %v5676_v22  ;;  %v5681_v9 = vpop.f32.mrb[103].mxu1  ;;  %v15489_v12 = vld [vmem:[%s19204_s3 + $0xf08] ss:$16 sps:$4 sm:$0xff]  }
 0x6cb   :  { %5891 = vmatmul.mubr.bf16.gmra.mrb[248].mxu1 %v15462_v17  ;;  %13525 = vmatprep.mubr.msk.bf16.mxu0 %vm6158_vm2, %v6111_v34  ;;  %v15494_v34 = vld [vmem:[%s19204_s3 + $0xf2c] ss:$16 sps:$4 sm:$0xff]  }
 0x6cc   :  { %5898 = vmatprep.mubr.bf16.mxu1 %v15467_v50 }
 0x6ce   :  { %v5684_v1 = vpop.f32.mrb[104].mxu1 }
 0x6cf   :  { %v5686_v21 = vpop.f32.mrb[105].mxu1 }
 0x6d0   :  { %v5687_v53 = vpop.f32.mrb[106].mxu1 }
 0x6d1   :  { %v6112_v4 = vpack.c.bf16 %v5687_v53, %v5684_v1  ;;  %v5689_v29 = vpop.f32.mrb[107].mxu1  ;;  %v15492_v53 = vld [vmem:[%s19204_s3 + $0xf28] ss:$16 sps:$4 sm:$0xff]  }
 0x6d3   :  { %5899 = vmatmul.mubr.bf16.gmra.mrb[252].mxu1 %v15465_v62  ;;  %13526 = vmatmul.mubr.msk.bf16.gmra.mrb[52].mxu0 %vm6158_vm2, %v6112_v4  ;;  %v15497_v4 = vld [vmem:[%s19204_s3 + $0xf4c] ss:$16 sps:$4 sm:$0xff]  }
 0x6d4   :  { %5906 = vmatprep.mubr.bf16.mxu1 %v15470_v55 }
 0x6d6   :  { %v5692_v48 = vpop.f32.mrb[108].mxu1 }
 0x6d7   :  { %v5694_v61 = vpop.f32.mrb[109].mxu1 }
 0x6d8   :  { %v5695_v13 = vpop.f32.mrb[110].mxu1 }
 0x6d9   :  { %v6113_v49 = vpack.c.bf16 %v5695_v13, %v5692_v48  ;;  %v5697_v41 = vpop.f32.mrb[111].mxu1  ;;  %v15495_v13 = vld [vmem:[%s19204_s3 + $0xf48] ss:$16 sps:$4 sm:$0xff]  }
 0x6db   :  { %5907 = vmatmul.mubr.bf16.gmra.mrb[148].mxu1 %v15468_v8  ;;  %13529 = vmatprep.mubr.msk.bf16.mxu0 %vm6158_vm2, %v6113_v49  ;;  %v15500_v49 = vld [vmem:[%s19204_s3 + $0xf6c] ss:$16 sps:$4 sm:$0xff]  }
 0x6dc   :  { %5914 = vmatprep.mubr.bf16.mxu1 %v15473_v15 }
 0x6de   :  { %v5700_v26 = vpop.f32.mrb[112].mxu1 }
 0x6df   :  { %v5702_v63 = vpop.f32.mrb[113].mxu1 }
 0x6e0   :  { %v5703_v57 = vpop.f32.mrb[114].mxu1 }
 0x6e1   :  { %v6114_v30 = vpack.c.bf16 %v5703_v57, %v5700_v26  ;;  %v5705_v58 = vpop.f32.mrb[115].mxu1 }
 0x6e3   :  { %5915 = vmatmul.mubr.bf16.gmra.mrb[152].mxu1 %v15471_v25  ;;  %13530 = vmatmul.mubr.msk.bf16.gmra.mrb[56].mxu0 %vm6158_vm2, %v6114_v30  ;;  %v19293_v25 = vld [vmem:[#allocation3_spill] sm:$0xff] }
 0x6e4   :  { %5922 = vmatprep.mubr.bf16.mxu1 %v15476_v6  ;;  %v15498_v30 = vld [vmem:[%s19204_s3 + $0xf68] ss:$16 sps:$4 sm:$0xff]  }
 0x6e6   :  { %v5708_v60 = vpop.f32.mrb[116].mxu1 }
 0x6e7   :  { %v5710_v3 = vpop.f32.mrb[117].mxu1 }
 0x6e8   :  { %v5711_v18 = vpop.f32.mrb[118].mxu1  ;;  %v19294_v3 = vld [vmem:[#allocation4_spill] sm:$0xff] }
 0x6e9   :  { %v6115_v7 = vpack.c.bf16 %v5711_v18, %v5708_v60  ;;  %v5713_v28 = vpop.f32.mrb[119].mxu1  ;;  %v15503_v60 = vld [vmem:[%s19204_s3 + $0xf8c] ss:$16 sps:$4 sm:$0xff]  }
 0x6ea   :  { %v19295_v28 = vld [vmem:[#allocation5_spill] sm:$0xff] }
 0x6eb   :  { %5923 = vmatmul.mubr.bf16.gmra.mrb[156].mxu1 %v15474_v19  ;;  %13535 = vmatprep.mubr.msk.bf16.mxu0 %vm6158_vm2, %v6115_v7 }
 0x6ec   :  { %5930 = vmatprep.mubr.bf16.mxu1 %v15479_v45 }
 0x6ee   :  { %v5716_v44 = vpop.f32.mrb[120].mxu1 }
 0x6ef   :  { %v5718_v38 = vpop.f32.mrb[121].mxu1 }
 0x6f0   :  { %v5719_v23 = vpop.f32.mrb[122].mxu1 }
 0x6f1   :  { %v6116_v36 = vpack.c.bf16 %v5719_v23, %v5716_v44  ;;  %v5721_v31 = vpop.f32.mrb[123].mxu1 }
 0x6f3   :  { %5931 = vmatmul.mubr.bf16.gmra.mrb[160].mxu1 %v15477_v35  ;;  %13536 = vmatmul.mubr.msk.bf16.vlgmr.msra.gmra.mrb[44].mxu0 %vm6158_vm2, %v6116_v36  ;;  %v15501_v35 = vld [vmem:[%s19204_s3 + $0xf88] ss:$16 sps:$4 sm:$0xff]  }
 0x6f4   :  { %5938 = vmatprep.mubr.bf16.mxu1 %v15482_v0  ;;  %13552 = vmatpush3.bf16.msra.mxu0 %v7855_v33  ;;  %v15506_v0 = vld [vmem:[%s19204_s3 + $0xfac] ss:$16 sps:$4 sm:$0xff]  }
 0x6f5   :  { %14706 = vmatprep.subr.msk.bf16.mxu0 %vm6183_vm1, %v18234_v27  ;;  %v19296_v36 = vld [vmem:[#allocation6_spill] sm:$0xff] }
 0x6f6   :  { %v5724_v42 = vpop.f32.mrb[124].mxu1 }
 0x6f7   :  { %v5726_v52 = vpop.f32.mrb[125].mxu1 }
 0x6f8   :  { %v5727_v59 = vpop.f32.mrb[126].mxu1  ;;  %v7997_v52 = vsel %vm6183_vm1, %v18234_v27, 0 }
 0x6f9   :  { %v6117_v39 = vpack.c.bf16 %v5727_v59, %v5724_v42  ;;  %v5729_v32 = vpop.f32.mrb[127].mxu1 }
 0x6fb   :  { %5939 = vmatmul.mubr.bf16.gmra.mrb[164].mxu1 %v15480_v46  ;;  %13539 = vmatprep.mubr.msk.bf16.mxu0 %vm6158_vm2, %v6117_v39  ;;  %v18303_v46 = vld [vmem:[%s19206_s4 + $0x38] sm:$0xf] }
 0x6fc   :  { %5946 = vmatprep.mubr.bf16.mxu1 %v15485_v11  ;;  %v19297_v11 = vld [vmem:[#allocation7_spill] sm:$0xff] }
 0x6fe   :  { %v5732_v10 = vpop.f32.mrb[128].mxu1 }
 0x6ff   :  { %v5734_v37 = vpop.f32.mrb[129].mxu1 }
 0x700   :  { %v5735_v24 = vpop.f32.mrb[130].mxu1  ;;  %v15509_v37 = vld [vmem:[%s19204_s3 + $0xfcc] ss:$16 sps:$4 sm:$0xff]  }
 0x701   :  { %v6118_v54 = vpack.c.bf16 %v5735_v24, %v5732_v10  ;;  %v5737_v43 = vpop.f32.mrb[131].mxu1  ;;  %v15504_v10 = vld [vmem:[%s19204_s3 + $0xfa8] ss:$16 sps:$4 sm:$0xff]  }
 0x703   :  { %5947 = vmatmul.mubr.bf16.gmra.mrb[168].mxu1 %v15483_v2  ;;  %13540 = vmatmul.mubr.msk.bf16.gmra.mrb[48].mxu0 %vm6158_vm2, %v6118_v54  ;;  %v19298_v2 = vld [vmem:[#allocation8_spill] sm:$0xff] }
 0x704   :  { %5954 = vmatprep.mubr.bf16.mxu1 %v15488_v16 }
 0x706   :  { %v5740_v56 = vpop.f32.mrb[132].mxu1 }
 0x707   :  { %v5742_v5 = vpop.f32.mrb[133].mxu1 }
 0x708   :  { %v5743_v51 = vpop.f32.mrb[134].mxu1 }
 0x709   :  { %v6119_v20 = vpack.c.bf16 %v5743_v51, %v5740_v56  ;;  %v5745_v22 = vpop.f32.mrb[135].mxu1  ;;  %v19299_v56 = vld [vmem:[#allocation9_spill] sm:$0xff] }
 0x70a   :  { %v15507_v51 = vld [vmem:[%s19204_s3 + $0xfc8] ss:$16 sps:$4 sm:$0xff]  }
 0x70b   :  { %5955 = vmatmul.mubr.bf16.gmra.mrb[172].mxu1 %v15486_v40  ;;  %13543 = vmatprep.mubr.msk.bf16.mxu0 %vm6158_vm2, %v6119_v20  ;;  %v15512_v20 = vld [vmem:[%s19204_s3 + $0xfec] ss:$16 sps:$4 sm:$0xff]  }
 0x70c   :  { %5962 = vmatprep.mubr.bf16.mxu1 %v15491_v14  ;;  %v19300_v22 = vld [vmem:[#allocation10_spill] sm:$0xff] }
 0x70e   :  { %v5748_v47 = vpop.f32.mrb[136].mxu1 }
 0x70f   :  { %v5750_v17 = vpop.f32.mrb[137].mxu1 }
 0x710   :  { %v5751_v50 = vpop.f32.mrb[138].mxu1 }
 0x711   :  { %v6120_v9 = vpack.c.bf16 %v5751_v50, %v5748_v47  ;;  %v5753_v1 = vpop.f32.mrb[139].mxu1 }
 0x713   :  { %5963 = vmatmul.mubr.bf16.gmra.mrb[176].mxu1 %v15489_v12  ;;  %13544 = vmatmul.mubr.msk.bf16.gmra.mrb[52].mxu0 %vm6158_vm2, %v6120_v9 }
 0x714   :  { %5970 = vmatprep.mubr.bf16.mxu1 %v15494_v34  ;;  %v19301_v34 = vld [vmem:[#allocation11_spill] sm:$0xff] }
 0x716   :  { %v5756_v21 = vpop.f32.mrb[140].mxu1 }
 0x717   :  { %v5758_v62 = vpop.f32.mrb[141].mxu1 }
 0x718   :  { %v5759_v55 = vpop.f32.mrb[142].mxu1 }
 0x719   :  { %v6121_v29 = vpack.c.bf16 %v5759_v55, %v5756_v21  ;;  %v5761_v48 = vpop.f32.mrb[143].mxu1  ;;  %v15510_v21 = vld [vmem:[%s19204_s3 + $0xfe8] ss:$16 sps:$4 sm:$0xff]  }
 0x71b   :  { %5971 = vmatmul.mubr.bf16.gmra.mrb[180].mxu1 %v15492_v53  ;;  %13547 = vmatprep.mubr.msk.bf16.mxu0 %vm6158_vm2, %v6121_v29  ;;  %v19302_v53 = vld [vmem:[#allocation12_spill] sm:$0xff] }
 0x71c   :  { %5978 = vmatprep.mubr.bf16.mxu1 %v15497_v4 }
 0x71e   :  { %v5764_v61 = vpop.f32.mrb[144].mxu1 }
 0x71f   :  { %v5766_v8 = vpop.f32.mrb[145].mxu1 }
 0x720   :  { %v5767_v15 = vpop.f32.mrb[146].mxu1 }
 0x721   :  { %v6122_v41 = vpack.c.bf16 %v5767_v15, %v5764_v61  ;;  %v5769_v26 = vpop.f32.mrb[147].mxu1  ;;  %v19303_v61 = vld [vmem:[#allocation13_spill] sm:$0xff] }
 0x723   :  { %5979 = vmatmul.mubr.bf16.gmra.mrb[184].mxu1 %v15495_v13  ;;  %13548 = vmatmul.mubr.msk.bf16.gmra.mrb[56].mxu0 %vm6158_vm2, %v6122_v41 }
 0x724   :  { %5986 = vmatprep.mubr.bf16.mxu1 %v15500_v49  ;;  %v19304_v49 = vld [vmem:[#allocation14_spill] sm:$0xff] }
 0x726   :  { %v5772_v63 = vpop.f32.mrb[188].mxu1 }
 0x727   :  { %v5773_v57 = vadd.f32 %v5772_v63, %v19293_v25  ;;  %v5774_v6 = vpop.f32.mrb[189].mxu1 }
 0x728   :  { %v5775_v58 = vpop.f32.mrb[190].mxu1 }
 0x729   :  { %v5776_v19 = vadd.f32 %v5775_v58, %v19294_v3  ;;  %v5777_v18 = vpop.f32.mrb[191].mxu1 }
 0x72b   :  { %v6123_v45 = vpack.c.bf16 %v5776_v19, %v5773_v57  ;;  %5987 = vmatmul.mubr.bf16.gmra.mrb[0].mxu1 %v15498_v30  ;;  %v19305_v57 = vld [vmem:[#allocation15_spill] sm:$0xff] }
 0x72c   :  { %5994 = vmatprep.mubr.bf16.mxu1 %v15503_v60  ;;  %v19306_v60 = vld [vmem:[#allocation16_spill] sm:$0xff] }
 0x72d   :  { %13553 = vmatprep.mubr.msk.bf16.mxu0 %vm6158_vm2, %v6123_v45 }
 0x72e   :  { %v5780_v7 = vpop.f32.mrb[192].mxu1 }
 0x72f   :  { %v5781_v44 = vadd.f32 %v5780_v7, %v19295_v28  ;;  %v5782_v38 = vpop.f32.mrb[193].mxu1  ;;  %v19307_v7 = vld [vmem:[#allocation17_spill] sm:$0xff] }
 0x730   :  { %v5783_v23 = vpop.f32.mrb[194].mxu1 }
 0x731   :  { %v5784_v31 = vadd.f32 %v5783_v23, %v19296_v36  ;;  %v5785_v33 = vpop.f32.mrb[195].mxu1 }
 0x732   :  { %v19309_v33 = vld [vmem:[#allocation19_spill] sm:$0xff] }
 0x733   :  { %v6124_v42 = vpack.c.bf16 %v5784_v31, %v5781_v44  ;;  %5995 = vmatmul.mubr.bf16.gmra.mrb[4].mxu1 %v15501_v35  ;;  %v19308_v35 = vld [vmem:[#allocation18_spill] sm:$0xff] }
 0x734   :  { %6002 = vmatprep.mubr.bf16.mxu1 %v15506_v0 }
 0x735   :  { %13554 = vmatmul.mubr.msk.bf16.vlgmr.msra.gmra.mrb[44].mxu0 %vm6158_vm2, %v6124_v42 }
 0x736   :  { %v5788_v59 = vpop.f32.mrb[196].mxu1  ;;  %13570 = vmatpush3.bf16.msra.mxu0 %v7997_v52 }
 0x737   :  { %v5789_v39 = vadd.f32 %v5788_v59, %v19297_v11  ;;  %v5790_v32 = vpop.f32.mrb[197].mxu1  ;;  %14707 = vmatprep.subr.msk.bf16.mxu0 %vm6183_vm1, %v18303_v46  ;;  %v19310_v11 = vld [vmem:[#allocation20_spill] sm:$0xff] }
 0x738   :  { %v5791_v27 = vpop.f32.mrb[198].mxu1 }
 0x739   :  { %v5792_v24 = vadd.f32 %v5791_v27, %v19298_v2  ;;  %v5793_v16 = vpop.f32.mrb[199].mxu1 }
 0x73b   :  { %v6125_v54 = vpack.c.bf16 %v5792_v24, %v5789_v39  ;;  %6003 = vmatmul.mubr.bf16.gmra.mrb[8].mxu1 %v15504_v10 }
 0x73c   :  { %6010 = vmatprep.mubr.bf16.mxu1 %v15509_v37  ;;  %v19311_v37 = vld [vmem:[#allocation21_spill] sm:$0xff] }
 0x73d   :  { %13557 = vmatprep.mubr.msk.bf16.mxu0 %vm6158_vm2, %v6125_v54  ;;  %v19312_v54 = vld [vmem:[#allocation22_spill] sm:$0xff] }
 0x73e   :  { %v5796_v43 = vpop.f32.mrb[200].mxu1 }
 0x73f   :  { %v5797_v5 = vadd.f32 %v5796_v43, %v19299_v56  ;;  %v5798_v40 = vpop.f32.mrb[201].mxu1 }
 0x740   :  { %v5799_v14 = vpop.f32.mrb[202].mxu1  ;;  %v8139_v40 = vsel %vm6183_vm1, %v18303_v46, 0 }
 0x741   :  { %v5800_v47 = vadd.f32 %v5799_v14, %v19300_v22  ;;  %v5801_v17 = vpop.f32.mrb[203].mxu1 }
 0x743   :  { %v6126_v12 = vpack.c.bf16 %v5800_v47, %v5797_v5  ;;  %6011 = vmatmul.mubr.bf16.gmra.mrb[12].mxu1 %v15507_v51  ;;  %v18351_v51 = vld [vmem:[%s19206_s4 + $0x3c] sm:$0xf] }
 0x744   :  { %6018 = vmatprep.mubr.bf16.mxu1 %v15512_v20  ;;  %v19313_v20 = vld [vmem:[#allocation23_spill] sm:$0xff] }
 0x745   :  { %13558 = vmatmul.mubr.msk.bf16.gmra.mrb[48].mxu0 %vm6158_vm2, %v6126_v12  ;;  %v19314_v12 = vld [vmem:[#allocation24_spill] sm:$0xff] }
 0x746   :  { %v5804_v50 = vpop.f32.mrb[204].mxu1 }
 0x747   :  { %v5805_v9 = vadd.f32 %v5804_v50, %v19301_v34  ;;  %v5806_v1 = vpop.f32.mrb[205].mxu1 }
 0x748   :  { %v5807_v62 = vpop.f32.mrb[206].mxu1  ;;  %v19315_v1 = vld [vmem:[#allocation25_spill] sm:$0xff] }
 0x749   :  { %v5808_v55 = vadd.f32 %v5807_v62, %v19302_v53  ;;  %v5809_v4 = vpop.f32.mrb[207].mxu1 }
 0x74b   :  { %v6127_v29 = vpack.c.bf16 %v5808_v55, %v5805_v9  ;;  %6019 = vmatmul.mubr.bf16.gmra.mrb[16].mxu1 %v15510_v21  ;;  %v19316_v55 = vld [vmem:[#allocation26_spill] sm:$0xff] }
 0x74d   :  { %13561 = vmatprep.mubr.msk.bf16.mxu0 %vm6158_vm2, %v6127_v29 }
 0x74e   :  { %v5812_v48 = vpop.f32.mrb[208].mxu1 }
 0x74f   :  { %v5813_v8 = vadd.f32 %v5812_v48, %v19303_v61  ;;  %v5814_v13 = vpop.f32.mrb[209].mxu1 }
 0x750   :  { %v5815_v15 = vpop.f32.mrb[210].mxu1 }
 0x751   :  { %v5816_v41 = vadd.f32 %v5815_v15, %v19304_v49  ;;  %v5817_v26 = vpop.f32.mrb[211].mxu1 }
 0x753   :  { %v6128_v63 = vpack.c.bf16 %v5816_v41, %v5813_v8  ;;  %v19317_v8 = vld [vmem:[#allocation27_spill] sm:$0xff]  ;;  %v19318_v41 = vld [vmem:[#allocation28_spill] sm:$0xff] }
 0x755   :  { %13562 = vmatmul.mubr.msk.bf16.gmra.mrb[52].mxu0 %vm6158_vm2, %v6128_v63 }
 0x756   :  { %v5820_v25 = vpop.f32.mrb[212].mxu1 }
 0x757   :  { %v5821_v6 = vadd.f32 %v5820_v25, %v19305_v57  ;;  %v5822_v30 = vpop.f32.mrb[213].mxu1 }
 0x758   :  { %v5823_v58 = vpop.f32.mrb[214].mxu1 }
 0x759   :  { %v5824_v3 = vadd.f32 %v5823_v58, %v19306_v60  ;;  %v5825_v19 = vpop.f32.mrb[215].mxu1 }
 0x75b   :  { %v6129_v18 = vpack.c.bf16 %v5824_v3, %v5821_v6  ;;  %v19319_v6 = vld [vmem:[#allocation29_spill] sm:$0xff]  ;;  %v19320_v3 = vld [vmem:[#allocation30_spill] sm:$0xff] }
 0x75d   :  { %13565 = vmatprep.mubr.msk.bf16.mxu0 %vm6158_vm2, %v6129_v18 }
 0x75e   :  { %v5828_v45 = vpop.f32.mrb[216].mxu1 }
 0x75f   :  { %v5829_v28 = vadd.f32 %v5828_v45, %v19307_v7  ;;  %v5830_v44 = vpop.f32.mrb[217].mxu1 }
 0x760   :  { %v5831_v38 = vpop.f32.mrb[218].mxu1 }
 0x761   :  { %v5832_v23 = vadd.f32 %v5831_v38, %v19308_v35  ;;  %v5833_v0 = vpop.f32.mrb[219].mxu1 }
 0x763   :  { %v6130_v36 = vpack.c.bf16 %v5832_v23, %v5829_v28  ;;  %v19321_v28 = vld [vmem:[#allocation31_spill] sm:$0xff]  ;;  %v19322_v23 = vld [vmem:[#allocation32_spill] sm:$0xff] }
 0x765   :  { %13566 = vmatmul.mubr.msk.bf16.gmra.mrb[56].mxu0 %vm6158_vm2, %v6130_v36 }
 0x766   :  { %v5836_v31 = vpop.f32.mrb[220].mxu1 }
 0x767   :  { %v5837_v42 = vadd.f32 %v5836_v31, %v19309_v33  ;;  %v5838_v52 = vpop.f32.mrb[221].mxu1 }
 0x768   :  { %v5839_v59 = vpop.f32.mrb[222].mxu1 }
 0x769   :  { %v5840_v39 = vadd.f32 %v5839_v59, %v19310_v11  ;;  %v5841_v32 = vpop.f32.mrb[223].mxu1 }
 0x76b   :  { %v6131_v10 = vpack.c.bf16 %v5840_v39, %v5837_v42  ;;  %v19323_v42 = vld [vmem:[#allocation33_spill] sm:$0xff]  ;;  %v19324_v39 = vld [vmem:[#allocation34_spill] sm:$0xff] }
 0x76d   :  { %13571 = vmatprep.mubr.msk.bf16.mxu0 %vm6158_vm2, %v6131_v10 }
 0x76e   :  { %v5844_v27 = vpop.f32.mrb[224].mxu1 }
 0x76f   :  { %v5845_v2 = vadd.f32 %v5844_v27, %v19311_v37  ;;  %v5846_v24 = vpop.f32.mrb[225].mxu1 }
 0x770   :  { %v5847_v16 = vpop.f32.mrb[226].mxu1 }
 0x771   :  { %v5848_v43 = vadd.f32 %v5847_v16, %v19312_v54  ;;  %v5849_v56 = vpop.f32.mrb[227].mxu1 }
 0x773   :  { %v6132_v5 = vpack.c.bf16 %v5848_v43, %v5845_v2  ;;  %v19325_v2 = vld [vmem:[#allocation35_spill] sm:$0xff]  ;;  %v19326_v43 = vld [vmem:[#allocation36_spill] sm:$0xff] }
 0x775   :  { %13572 = vmatmul.mubr.msk.bf16.vlgmr.msra.gmra.mrb[44].mxu0 %vm6158_vm2, %v6132_v5 }
 0x776   :  { %v5852_v14 = vpop.f32.mrb[228].mxu1  ;;  %13588 = vmatpush3.bf16.msra.mxu0 %v8139_v40 }
 0x777   :  { %v5853_v22 = vadd.f32 %v5852_v14, %v19313_v20  ;;  %v5854_v47 = vpop.f32.mrb[229].mxu1  ;;  %14708 = vmatprep.subr.msk.bf16.mxu0 %vm6183_vm1, %v18351_v51  ;;  %v19327_v20 = vld [vmem:[#allocation37_spill] sm:$0xff] }
 0x778   :  { %v5855_v17 = vpop.f32.mrb[230].mxu1 }
 0x779   :  { %v5856_v50 = vadd.f32 %v5855_v17, %v19314_v12  ;;  %v5857_v34 = vpop.f32.mrb[231].mxu1  ;;  %v19328_v12 = vld [vmem:[#allocation38_spill] sm:$0xff] }
 0x77b   :  { %v6133_v46 = vpack.c.bf16 %v5856_v50, %v5853_v22 }
 0x77d   :  { %13575 = vmatprep.mubr.msk.bf16.mxu0 %vm6158_vm2, %v6133_v46 }
 0x77e   :  { %v5860_v9 = vpop.f32.mrb[232].mxu1 }
 0x77f   :  { %v5861_v21 = vadd.f32 %v5860_v9, %v19315_v1  ;;  %v5862_v62 = vpop.f32.mrb[233].mxu1  ;;  %v8281_v9 = vsel %vm6183_vm1, %v18351_v51, 0  ;;  %v19332_v51 = vld [vmem:[#allocation42_spill] sm:$0xff] }
 0x780   :  { %v5863_v53 = vpop.f32.mrb[234].mxu1 }
 0x781   :  { %v5864_v4 = vadd.f32 %v5863_v53, %v19316_v55  ;;  %v5865_v29 = vpop.f32.mrb[235].mxu1 }
 0x783   :  { %v6134_v48 = vpack.c.bf16 %v5864_v4, %v5861_v21  ;;  %v19329_v21 = vld [vmem:[#allocation39_spill] sm:$0xff]  ;;  %v19330_v4 = vld [vmem:[#allocation40_spill] sm:$0xff] }
 0x785   :  { %13576 = vmatmul.mubr.msk.bf16.gmra.mrb[48].mxu0 %vm6158_vm2, %v6134_v48 }
 0x786   :  { %v5868_v61 = vpop.f32.mrb[236].mxu1 }
 0x787   :  { %v5869_v13 = vadd.f32 %v5868_v61, %v19317_v8  ;;  %v5870_v15 = vpop.f32.mrb[237].mxu1 }
 0x788   :  { %v5871_v49 = vpop.f32.mrb[238].mxu1 }
 0x789   :  { %v5872_v26 = vadd.f32 %v5871_v49, %v19318_v41  ;;  %v5873_v63 = vpop.f32.mrb[239].mxu1 }
 0x78b   :  { %v6135_v25 = vpack.c.bf16 %v5872_v26, %v5869_v13  ;;  %v19331_v13 = vld [vmem:[#allocation41_spill] sm:$0xff] }
 0x78d   :  { %13579 = vmatprep.mubr.msk.bf16.mxu0 %vm6158_vm2, %v6135_v25 }
 0x78e   :  { %v5876_v57 = vpop.f32.mrb[240].mxu1 }
 0x78f   :  { %v5877_v30 = vadd.f32 %v5876_v57, %v19319_v6  ;;  %v5878_v58 = vpop.f32.mrb[241].mxu1  ;;  %v19333_v6 = vld [vmem:[#allocation43_spill] sm:$0xff] }
 0x790   :  { %v5879_v60 = vpop.f32.mrb[242].mxu1 }
 0x791   :  { %v5880_v19 = vadd.f32 %v5879_v60, %v19320_v3  ;;  %v5881_v18 = vpop.f32.mrb[243].mxu1  ;;  %v19334_v3 = vld [vmem:[#allocation44_spill] sm:$0xff] }
 0x793   :  { %v6136_v45 = vpack.c.bf16 %v5880_v19, %v5877_v30 }
 0x795   :  { %13580 = vmatmul.mubr.msk.bf16.gmra.mrb[52].mxu0 %vm6158_vm2, %v6136_v45 }
 0x796   :  { %v5884_v7 = vpop.f32.mrb[244].mxu1 }
 0x797   :  { %v5885_v44 = vadd.f32 %v5884_v7, %v19321_v28  ;;  %v5886_v38 = vpop.f32.mrb[245].mxu1  ;;  %v19335_v28 = vld [vmem:[#allocation45_spill] sm:$0xff] }
 0x798   :  { %v5887_v35 = vpop.f32.mrb[246].mxu1 }
 0x799   :  { %v5888_v0 = vadd.f32 %v5887_v35, %v19322_v23  ;;  %v5889_v36 = vpop.f32.mrb[247].mxu1  ;;  %v19336_v23 = vld [vmem:[#allocation46_spill] sm:$0xff] }
 0x79b   :  { %v6137_v31 = vpack.c.bf16 %v5888_v0, %v5885_v44 }
 0x79d   :  { %13583 = vmatprep.mubr.msk.bf16.mxu0 %vm6158_vm2, %v6137_v31 }
 0x79e   :  { %v5892_v33 = vpop.f32.mrb[248].mxu1 }
 0x79f   :  { %v5893_v52 = vadd.f32 %v5892_v33, %v19323_v42  ;;  %v5894_v59 = vpop.f32.mrb[249].mxu1  ;;  %v19337_v42 = vld [vmem:[#allocation47_spill] sm:$0xff] }
 0x7a0   :  { %v5895_v11 = vpop.f32.mrb[250].mxu1 }
 0x7a1   :  { %v5896_v32 = vadd.f32 %v5895_v11, %v19324_v39  ;;  %v5897_v10 = vpop.f32.mrb[251].mxu1  ;;  %v19338_v39 = vld [vmem:[#allocation48_spill] sm:$0xff] }
 0x7a3   :  { %v6138_v27 = vpack.c.bf16 %v5896_v32, %v5893_v52 }
 0x7a5   :  { %13584 = vmatmul.mubr.msk.bf16.gmra.mrb[56].mxu0 %vm6158_vm2, %v6138_v27 }
 0x7a6   :  { %v5900_v37 = vpop.f32.mrb[252].mxu1 }
 0x7a7   :  { %v5901_v24 = vadd.f32 %v5900_v37, %v19325_v2  ;;  %v5902_v16 = vpop.f32.mrb[253].mxu1  ;;  %v19339_v2 = vld [vmem:[#allocation49_spill] sm:$0xff] }
 0x7a8   :  { %v5903_v54 = vpop.f32.mrb[254].mxu1 }
 0x7a9   :  { %v5904_v56 = vadd.f32 %v5903_v54, %v19326_v43  ;;  %v5905_v5 = vpop.f32.mrb[255].mxu1  ;;  %v19340_v43 = vld [vmem:[#allocation50_spill] sm:$0xff] }
 0x7ab   :  { %v6139_v40 = vpack.c.bf16 %v5904_v56, %v5901_v24 }
 0x7ad   :  { %13589 = vmatprep.mubr.msk.bf16.mxu0 %vm6158_vm2, %v6139_v40 }
 0x7ae   :  { %v5908_v14 = vpop.f32.mrb[148].mxu1 }
 0x7af   :  { %v5909_v22 = vadd.f32 %v5908_v14, %v19327_v20  ;;  %v5910_v47 = vpop.f32.mrb[149].mxu1  ;;  %v19341_v20 = vld [vmem:[#allocation51_spill] sm:$0xff] }
 0x7b0   :  { %v5911_v17 = vpop.f32.mrb[150].mxu1 }
 0x7b1   :  { %v5912_v50 = vadd.f32 %v5911_v17, %v19328_v12  ;;  %v5913_v34 = vpop.f32.mrb[151].mxu1  ;;  %v19342_v12 = vld [vmem:[#allocation52_spill] sm:$0xff] }
 0x7b3   :  { %v6140_v46 = vpack.c.bf16 %v5912_v50, %v5909_v22 }
 0x7b5   :  { %13590 = vmatmul.mubr.msk.bf16.vlgmr.msra.gmra.mrb[44].mxu0 %vm6158_vm2, %v6140_v46 }
 0x7b6   :  { %v5916_v1 = vpop.f32.mrb[152].mxu1  ;;  %13606 = vmatpush3.bf16.msra.mxu0 %v8281_v9 }
 0x7b7   :  { %v5917_v62 = vadd.f32 %v5916_v1, %v19329_v21  ;;  %v5918_v53 = vpop.f32.mrb[153].mxu1  ;;  %v19343_v1 = vld [vmem:[#allocation53_spill] sm:$0xff] }
 0x7b8   :  { %v5919_v55 = vpop.f32.mrb[154].mxu1 }
 0x7b9   :  { %v5920_v29 = vadd.f32 %v5919_v55, %v19330_v4  ;;  %v5921_v48 = vpop.f32.mrb[155].mxu1  ;;  %v19344_v55 = vld [vmem:[#allocation54_spill] sm:$0xff] }
 0x7bb   :  { %v6141_v61 = vpack.c.bf16 %v5920_v29, %v5917_v62 }
 0x7bd   :  { %13593 = vmatprep.mubr.msk.bf16.mxu0 %vm6158_vm2, %v6141_v61 }
 0x7be   :  { %v5924_v8 = vpop.f32.mrb[156].mxu1 }
 0x7bf   :  { %v5925_v15 = vadd.f32 %v5924_v8, %v19331_v13  ;;  %v5926_v49 = vpop.f32.mrb[157].mxu1  ;;  %v19345_v8 = vld [vmem:[#allocation55_spill] sm:$0xff] }
 0x7c0   :  { %v5927_v41 = vpop.f32.mrb[158].mxu1 }
 0x7c1   :  { %v5928_v26 = vadd.f32 %v5927_v41, %v19332_v51  ;;  %v5929_v63 = vpop.f32.mrb[159].mxu1  ;;  %v19346_v41 = vld [vmem:[#allocation56_spill] sm:$0xff] }
 0x7c3   :  { %v6142_v25 = vpack.c.bf16 %v5928_v26, %v5925_v15 }
 0x7c5   :  { %13594 = vmatmul.mubr.msk.bf16.gmra.mrb[48].mxu0 %vm6158_vm2, %v6142_v25 }
 0x7c6   :  { %v5932_v57 = vpop.f32.mrb[160].mxu1 }
 0x7c7   :  { %v5933_v30 = vadd.f32 %v5932_v57, %v19333_v6  ;;  %v5934_v58 = vpop.f32.mrb[161].mxu1  ;;  %v19347_v57 = vld [vmem:[#allocation57_spill] sm:$0xff] }
 0x7c8   :  { %v5935_v60 = vpop.f32.mrb[162].mxu1 }
 0x7c9   :  { %v5936_v19 = vadd.f32 %v5935_v60, %v19334_v3  ;;  %v5937_v18 = vpop.f32.mrb[163].mxu1  ;;  %v19348_v60 = vld [vmem:[#allocation58_spill] sm:$0xff] }
 0x7cb   :  { %v6143_v45 = vpack.c.bf16 %v5936_v19, %v5933_v30 }
 0x7cd   :  { %13597 = vmatprep.mubr.msk.bf16.mxu0 %vm6158_vm2, %v6143_v45 }
 0x7ce   :  { %v5940_v7 = vpop.f32.mrb[164].mxu1 }
 0x7cf   :  { %v5941_v44 = vadd.f32 %v5940_v7, %v19335_v28  ;;  %v5942_v38 = vpop.f32.mrb[165].mxu1  ;;  %v19349_v7 = vld [vmem:[#allocation59_spill] sm:$0xff] }
 0x7d0   :  { %v5943_v35 = vpop.f32.mrb[166].mxu1 }
 0x7d1   :  { %v5944_v0 = vadd.f32 %v5943_v35, %v19336_v23  ;;  %v5945_v36 = vpop.f32.mrb[167].mxu1  ;;  %v19350_v35 = vld [vmem:[#allocation60_spill] sm:$0xff] }
 0x7d3   :  { %v6144_v31 = vpack.c.bf16 %v5944_v0, %v5941_v44 }
 0x7d5   :  { %13598 = vmatmul.mubr.msk.bf16.gmra.mrb[52].mxu0 %vm6158_vm2, %v6144_v31 }
 0x7d6   :  { %v5948_v33 = vpop.f32.mrb[168].mxu1 }
 0x7d7   :  { %v5949_v52 = vadd.f32 %v5948_v33, %v19337_v42  ;;  %v5950_v59 = vpop.f32.mrb[169].mxu1  ;;  %v19351_v33 = vld [vmem:[#allocation61_spill] sm:$0xff] }
 0x7d8   :  { %v5951_v11 = vpop.f32.mrb[170].mxu1 }
 0x7d9   :  { %v5952_v32 = vadd.f32 %v5951_v11, %v19338_v39  ;;  %v5953_v10 = vpop.f32.mrb[171].mxu1  ;;  %v19352_v11 = vld [vmem:[#allocation62_spill] sm:$0xff] }
 0x7db   :  { %v6145_v27 = vpack.c.bf16 %v5952_v32, %v5949_v52 }
 0x7dd   :  { %13601 = vmatprep.mubr.msk.bf16.mxu0 %vm6158_vm2, %v6145_v27 }
 0x7de   :  { %v5956_v37 = vpop.f32.mrb[172].mxu1 }
 0x7df   :  { %v5957_v24 = vadd.f32 %v5956_v37, %v19339_v2  ;;  %v5958_v16 = vpop.f32.mrb[173].mxu1  ;;  %v19353_v37 = vld [vmem:[#allocation63_spill] sm:$0xff] }
 0x7e0   :  { %v5959_v54 = vpop.f32.mrb[174].mxu1 }
 0x7e1   :  { %v5960_v56 = vadd.f32 %v5959_v54, %v19340_v43  ;;  %v5961_v5 = vpop.f32.mrb[175].mxu1  ;;  %v19354_v54 = vld [vmem:[#allocation64_spill] sm:$0xff] }
 0x7e3   :  { %v6146_v40 = vpack.c.bf16 %v5960_v56, %v5957_v24 }
 0x7e5   :  { %13602 = vmatmul.mubr.msk.bf16.gmra.mrb[56].mxu0 %vm6158_vm2, %v6146_v40 }
 0x7e6   :  { %v5964_v14 = vpop.f32.mrb[176].mxu1 }
 0x7e7   :  { %v5965_v22 = vadd.f32 %v5964_v14, %v19341_v20  ;;  %v5966_v47 = vpop.f32.mrb[177].mxu1  ;;  %v19355_v14 = vld [vmem:[#allocation65_spill] sm:$0xff] }
 0x7e8   :  { %v5967_v17 = vpop.f32.mrb[178].mxu1 }
 0x7e9   :  { %v5968_v50 = vadd.f32 %v5967_v17, %v19342_v12  ;;  %v5969_v34 = vpop.f32.mrb[179].mxu1  ;;  %v19356_v17 = vld [vmem:[#allocation66_spill] sm:$0xff] }
 0x7eb   :  { %v6147_v46 = vpack.c.bf16 %v5968_v50, %v5965_v22 }
 0x7ed   :  { %13607 = vmatprep.mubr.msk.bf16.mxu0 %vm6158_vm2, %v6147_v46  ;;  %v12539_v46 = vld [vmem:[%s19207_s5] ss:$0 sm:$0xff] }
 0x7ee   :  { %v5972_v9 = vpop.f32.mrb[180].mxu1 }
 0x7ef   :  { %v5973_v21 = vadd.f32 %v5972_v9, %v19343_v1  ;;  %v5974_v62 = vpop.f32.mrb[181].mxu1 }
 0x7f0   :  { %v5975_v53 = vpop.f32.mrb[182].mxu1 }
 0x7f1   :  { %v5976_v4 = vadd.f32 %v5975_v53, %v19344_v55  ;;  %v5977_v29 = vpop.f32.mrb[183].mxu1 }
 0x7f3   :  { %v6148_v48 = vpack.c.bf16 %v5976_v4, %v5973_v21 }
 0x7f5   :  { %13608 = vmatmul.mubr.msk.bf16.vlgmr.msra.gmra.mrb[44].mxu0 %vm6158_vm2, %v6148_v48 }
 0x7f6   :  { %v5980_v61 = vpop.f32.mrb[184].mxu1 }
 0x7f7   :  { %v5981_v13 = vadd.f32 %v5980_v61, %v19345_v8  ;;  %v5982_v15 = vpop.f32.mrb[185].mxu1 }
 0x7f8   :  { %v5983_v49 = vpop.f32.mrb[186].mxu1 }
 0x7f9   :  { %v5984_v51 = vadd.f32 %v5983_v49, %v19346_v41  ;;  %v5985_v26 = vpop.f32.mrb[187].mxu1 }
 0x7fb   :  { %v6149_v63 = vpack.c.bf16 %v5984_v51, %v5981_v13 }
 0x7fd   :  { %13611 = vmatprep.mubr.msk.bf16.mxu0 %vm6158_vm2, %v6149_v63 }
 0x7fe   :  { %v5988_v25 = vpop.f32.mrb[0].mxu1 }
 0x7ff   :  { %v5989_v6 = vadd.f32 %v5988_v25, %v19347_v57  ;;  %v5990_v30 = vpop.f32.mrb[1].mxu1 }
 0x800   :  { %v5991_v58 = vpop.f32.mrb[2].mxu1 }
 0x801   :  { %v5992_v3 = vadd.f32 %v5991_v58, %v19348_v60  ;;  %v5993_v19 = vpop.f32.mrb[3].mxu1 }
 0x803   :  { %v6150_v18 = vpack.c.bf16 %v5992_v3, %v5989_v6 }
 0x805   :  { %13612 = vmatmul.mubr.msk.bf16.gmra.mrb[48].mxu0 %vm6158_vm2, %v6150_v18 }
 0x806   :  { %v5996_v45 = vpop.f32.mrb[4].mxu1 }
 0x807   :  { %v5997_v28 = vadd.f32 %v5996_v45, %v19349_v7  ;;  %v5998_v44 = vpop.f32.mrb[5].mxu1 }
 0x808   :  { %v5999_v38 = vpop.f32.mrb[6].mxu1 }
 0x809   :  { %v6000_v23 = vadd.f32 %v5999_v38, %v19350_v35  ;;  %v6001_v0 = vpop.f32.mrb[7].mxu1 }
 0x80b   :  { %v6151_v36 = vpack.c.bf16 %v6000_v23, %v5997_v28 }
 0x80d   :  { %13615 = vmatprep.mubr.msk.bf16.mxu0 %vm6158_vm2, %v6151_v36 }
 0x80e   :  { %v6004_v31 = vpop.f32.mrb[8].mxu1 }
 0x80f   :  { %v6005_v42 = vadd.f32 %v6004_v31, %v19351_v33  ;;  %v6006_v52 = vpop.f32.mrb[9].mxu1 }
 0x810   :  { %v6007_v59 = vpop.f32.mrb[10].mxu1 }
 0x811   :  { %v6008_v39 = vadd.f32 %v6007_v59, %v19352_v11  ;;  %v6009_v32 = vpop.f32.mrb[11].mxu1 }
 0x813   :  { %v6152_v10 = vpack.c.bf16 %v6008_v39, %v6005_v42 }
 0x815   :  { %13616 = vmatmul.mubr.msk.bf16.gmra.mrb[52].mxu0 %vm6158_vm2, %v6152_v10 }
 0x816   :  { %v6012_v27 = vpop.f32.mrb[12].mxu1 }
 0x817   :  { %v6013_v2 = vadd.f32 %v6012_v27, %v19353_v37  ;;  %v6014_v24 = vpop.f32.mrb[13].mxu1 }
 0x818   :  { %v6015_v16 = vpop.f32.mrb[14].mxu1 }
 0x819   :  { %v6016_v43 = vadd.f32 %v6015_v16, %v19354_v54  ;;  %v6017_v56 = vpop.f32.mrb[15].mxu1 }
 0x81b   :  { %v6153_v5 = vpack.c.bf16 %v6016_v43, %v6013_v2 }
 0x81d   :  { %13619 = vmatprep.mubr.msk.bf16.mxu0 %vm6158_vm2, %v6153_v5 }
 0x81e   :  { %v6020_v40 = vpop.f32.mrb[16].mxu1 }
 0x81f   :  { %v6021_v20 = vadd.f32 %v6020_v40, %v19355_v14  ;;  %v6022_v22 = vpop.f32.mrb[17].mxu1 }
 0x820   :  { %v6023_v47 = vpop.f32.mrb[18].mxu1 }
 0x821   :  { %v6024_v12 = vadd.f32 %v6023_v47, %v19356_v17  ;;  %v6025_v50 = vpop.f32.mrb[19].mxu1 }
 0x822   :  { %v15513_v50 = vld [vmem:[%s19208_s8] sm:$0xff]  }
 0x823   :  { %v6154_v34 = vpack.c.bf16 %v6024_v12, %v6021_v20 }
 0x825   :  { %13620 = vmatmul.mubr.msk.bf16.gmra.mrb[56].mxu0 %vm6158_vm2, %v6154_v34 }
 0x826   :  { %13639 = vmatprep.mubr.bf16.mxu0 %v15513_v50 }
 0x8c8   :  { %v13609_v9 = vpop.f32.mrb[44].mxu0 }
 0x8c9   :  { %v8317_v1 = vpop.f32.mrb[45].mxu0  ;;  %v18429_v55 = vadd.f32 %v13609_v9, %v12539_v46 }
 0x8ca   :  { %v18427_v21 = vadd.f32 %v12539_v46, %v8317_v1  ;;  %v13610_v62 = vpop.f32.mrb[46].mxu0 }
 0x8cb   :  { %v8320_v53 = vpop.f32.mrb[47].mxu0  ;;  %v18435_v48 = vadd.f32 %v13610_v62, %v12539_v46  ;;  %v8425_v13 = vsel %vm8421_vm3, %v18429_v55, 0.0 }
 0x8cc   :  { %v18431_v4 = vadd.f32 %v12539_v46, %v8320_v53  ;;  %v8422_v29 = vsel %vm8421_vm3, %v18427_v21, 0.0 }
 0x8cd   :  { %v8427_v49 = vsel %vm8421_vm3, %v18435_v48, 0.0 }
 0x8ce   :  { %v8423_v61 = vsel %vm8421_vm3, %v18431_v4, 0.0 }
 0x8cf   :  { %v8424_v8 = vadd.f32 %v8423_v61, %v8422_v29 }
 0x8d1   :  { %v8426_v15 = vadd.f32 %v8425_v13, %v8424_v8 }
 0x8d3   :  { %v8428_v41 = vadd.f32 %v8427_v49, %v8426_v15 }
 0x8d8   :  { %v13613_v51 = vpop.f32.mrb[48].mxu0 }
 0x8d9   :  { %v8333_v26 = vpop.f32.mrb[49].mxu0  ;;  %v8409_v6 = vadd.f32 %v13613_v51, %v12539_v46 }
 0x8da   :  { %v8407_v63 = vadd.f32 %v12539_v46, %v8333_v26  ;;  %v13614_v25 = vpop.f32.mrb[50].mxu0 }
 0x8db   :  { %v8336_v57 = vpop.f32.mrb[51].mxu0  ;;  %v8410_v3 = vadd.f32 %v13614_v25, %v12539_v46  ;;  %v8433_v45 = vsel %vm8421_vm3, %v8409_v6, 0.0 }
 0x8dc   :  { %v8429_v30 = vsel %vm8421_vm3, %v8407_v63, 0.0  ;;  %v8408_v58 = vadd.f32 %v12539_v46, %v8336_v57 }
 0x8dd   :  { %v8430_v60 = vadd.f32 %v8429_v30, %v8428_v41  ;;  %v8435_v28 = vsel %vm8421_vm3, %v8410_v3, 0.0 }
 0x8de   :  { %v8431_v19 = vsel %vm8421_vm3, %v8408_v58, 0.0 }
 0x8df   :  { %v8432_v18 = vadd.f32 %v8431_v19, %v8430_v60 }
 0x8e1   :  { %v8434_v7 = vadd.f32 %v8433_v45, %v8432_v18 }
 0x8e3   :  { %v8436_v44 = vadd.f32 %v8435_v28, %v8434_v7 }
 0x8e8   :  { %v13617_v38 = vpop.f32.mrb[52].mxu0 }
 0x8e9   :  { %v8349_v35 = vpop.f32.mrb[53].mxu0  ;;  %v8413_v31 = vadd.f32 %v13617_v38, %v12539_v46 }
 0x8ea   :  { %v8411_v23 = vadd.f32 %v12539_v46, %v8349_v35  ;;  %v13618_v0 = vpop.f32.mrb[54].mxu0 }
 0x8eb   :  { %v8352_v36 = vpop.f32.mrb[55].mxu0  ;;  %v8414_v59 = vadd.f32 %v13618_v0, %v12539_v46  ;;  %v8441_v32 = vsel %vm8421_vm3, %v8413_v31, 0.0 }
 0x8ec   :  { %v8437_v33 = vsel %vm8421_vm3, %v8411_v23, 0.0  ;;  %v8412_v42 = vadd.f32 %v12539_v46, %v8352_v36 }
 0x8ed   :  { %v8438_v52 = vadd.f32 %v8437_v33, %v8436_v44  ;;  %v8443_v27 = vsel %vm8421_vm3, %v8414_v59, 0.0 }
 0x8ee   :  { %v8439_v11 = vsel %vm8421_vm3, %v8412_v42, 0.0 }
 0x8ef   :  { %v8440_v39 = vadd.f32 %v8439_v11, %v8438_v52 }
 0x8f1   :  { %v8442_v10 = vadd.f32 %v8441_v32, %v8440_v39 }
 0x8f3   :  { %v8444_v37 = vadd.f32 %v8443_v27, %v8442_v10 }
 0x8f8   :  { %v13621_v2 = vpop.f32.mrb[56].mxu0 }
 0x8f9   :  { %v8365_v24 = vpop.f32.mrb[57].mxu0  ;;  %v8417_v56 = vadd.f32 %v13621_v2, %v12539_v46 }
 0x8fa   :  { %v8415_v16 = vadd.f32 %v12539_v46, %v8365_v24  ;;  %v13622_v54 = vpop.f32.mrb[58].mxu0 }
 0x8fb   :  { %v8368_v43 = vpop.f32.mrb[59].mxu0  ;;  %v8418_v20 = vadd.f32 %v13622_v54, %v12539_v46  ;;  %v8449_v17 = vsel %vm8421_vm3, %v8417_v56, 0.0 }
 0x8fc   :  { %v8445_v5 = vsel %vm8421_vm3, %v8415_v16, 0.0  ;;  %v8416_v40 = vadd.f32 %v12539_v46, %v8368_v43 }
 0x8fd   :  { %v8446_v14 = vadd.f32 %v8445_v5, %v8444_v37  ;;  %v8451_v34 = vsel %vm8421_vm3, %v8418_v20, 0.0 }
 0x8fe   :  { %v8447_v22 = vsel %vm8421_vm3, %v8416_v40, 0.0 }
 0x8ff   :  { %v8448_v47 = vadd.f32 %v8447_v22, %v8446_v14 }
 0x901   :  { %v8450_v12 = vadd.f32 %v8449_v17, %v8448_v47 }
 0x903   :  { %v8452_v9 = vadd.f32 %v8451_v34, %v8450_v12 }
 0x905   :  { %v8453_v1 = vrot.slane %v8452_v9, 4 }
 0x907   :  { %v8454_v62 = vadd.f32 %v8453_v1, %v8452_v9 }
 0x909   :  { %v8455_v53 = vrot.slane %v8454_v62, 2 }
 0x90b   :  { %v8456_v29 = vadd.f32 %v8455_v53, %v8454_v62 }
 0x90d   :  { %v8457_v61 = vrot.slane %v8456_v29, 1 }
 0x90f   :  { %v8458_v46 = vadd.f32 %v8457_v61, %v8456_v29 }
 0x911   :  { %v8460_v8 = vmul.f32 0.0078125, %v8458_v46 }
 0x913   :  { %v18459_v13 = vsub.f32 %v18427_v21, %v8460_v8  ;;  %v18462_v15 = vsub.f32 %v18431_v4, %v8460_v8  ;;  %v18465_v49 = vsub.f32 %v18429_v55, %v8460_v8  ;;  %v18468_v41 = vsub.f32 %v18435_v48, %v8460_v8 }
 0x914   :  { %v18470_v51 = vsub.f32 %v8407_v63, %v8460_v8  ;;  %v18472_v26 = vsub.f32 %v8408_v58, %v8460_v8  ;;  %v18474_v25 = vsub.f32 %v8409_v6, %v8460_v8  ;;  %v18476_v57 = vsub.f32 %v8410_v3, %v8460_v8 }
 0x915   :  { %v18478_v30 = vsub.f32 %v8411_v23, %v8460_v8  ;;  %v18480_v21 = vsub.f32 %v8412_v42, %v8460_v8  ;;  %v18482_v4 = vsub.f32 %v8413_v31, %v8460_v8  ;;  %v18484_v60 = vsub.f32 %v8414_v59, %v8460_v8 }
 0x916   :  { %v18486_v55 = vsub.f32 %v8415_v16, %v8460_v8  ;;  %v18488_v48 = vsub.f32 %v8416_v40, %v8460_v8  ;;  %v18490_v63 = vsub.f32 %v8417_v56, %v8460_v8  ;;  %v18492_v58 = vsub.f32 %v8418_v20, %v8460_v8 }
 0x917   :  { %v8477_v6 = vmul.f32 %v18459_v13, %v18459_v13  ;;  %v8478_v3 = vmul.f32 %v18462_v15, %v18462_v15  ;;  %v8479_v19 = vmul.f32 %v18465_v49, %v18465_v49  ;;  %v8480_v18 = vmul.f32 %v18468_v41, %v18468_v41 }
 0x918   :  { %v8481_v44 = vmul.f32 %v18470_v51, %v18470_v51  ;;  %v8482_v23 = vmul.f32 %v18472_v26, %v18472_v26  ;;  %v8483_v31 = vmul.f32 %v18474_v25, %v18474_v25  ;;  %v8484_v52 = vmul.f32 %v18476_v57, %v18476_v57 }
 0x919   :  { %v8493_v45 = vsel %vm8421_vm3, %v8477_v6, 0.0  ;;  %v8494_v7 = vsel %vm8421_vm3, %v8478_v3, 0.0  ;;  %v8496_v38 = vsel %vm8421_vm3, %v8479_v19, 0.0  ;;  %v8498_v0 = vsel %vm8421_vm3, %v8480_v18, 0.0 }
 0x91a   :  { %v8495_v28 = vadd.f32 %v8494_v7, %v8493_v45  ;;  %v8500_v33 = vsel %vm8421_vm3, %v8481_v44, 0.0  ;;  %v8502_v59 = vsel %vm8421_vm3, %v8482_v23, 0.0  ;;  %v8485_v39 = vmul.f32 %v18478_v30, %v18478_v30 }
 0x91b   :  { %v8504_v32 = vsel %vm8421_vm3, %v8483_v31, 0.0  ;;  %v8486_v27 = vmul.f32 %v18480_v21, %v18480_v21  ;;  %v8506_v37 = vsel %vm8421_vm3, %v8484_v52, 0.0  ;;  %v8487_v24 = vmul.f32 %v18482_v4, %v18482_v4 }
 0x91c   :  { %v8497_v35 = vadd.f32 %v8496_v38, %v8495_v28  ;;  %v8508_v16 = vsel %vm8421_vm3, %v8485_v39, 0.0  ;;  %v8488_v43 = vmul.f32 %v18484_v60, %v18484_v60  ;;  %v8489_v40 = vmul.f32 %v18486_v55, %v18486_v55 }
 0x91d   :  { %v8510_v56 = vsel %vm8421_vm3, %v8486_v27, 0.0  ;;  %v8512_v14 = vsel %vm8421_vm3, %v8487_v24, 0.0  ;;  %v8490_v22 = vmul.f32 %v18488_v48, %v18488_v48  ;;  %v8491_v12 = vmul.f32 %v18490_v63, %v18490_v63 }
 0x91e   :  { %v8499_v36 = vadd.f32 %v8498_v0, %v8497_v35  ;;  %v8514_v47 = vsel %vm8421_vm3, %v8488_v43, 0.0  ;;  %v8516_v50 = vsel %vm8421_vm3, %v8489_v40, 0.0  ;;  %v8492_v9 = vmul.f32 %v18492_v58, %v18492_v58  ;;  %v8419_v35 = vld [vmem:[%s19210_s6] sm:$0x1] }
 0x91f   :  { %v8518_v1 = vsel %vm8421_vm3, %v8490_v22, 0.0  ;;  %v8520_v53 = vsel %vm8421_vm3, %v8491_v12, 0.0  ;;  %v8534_v44 = vlaneseq }
 0x920   :  { %v8501_v42 = vadd.f32 %v8500_v33, %v8499_v36  ;;  %v8522_v61 = vsel %vm8421_vm3, %v8492_v9, 0.0  ;;  %v18553_v33 = vld [vmem:[%s19211_s7] ss:$0 sm:$0xff] }
 0x921   :  { %v18542_v38 = vshrl.u32 %v8534_v44, 7 }
 0x922   :  { %v8503_v11 = vadd.f32 %v8502_v59, %v8501_v42 }
 0x923   :  { %v8536_v23 = vsub.s32 0, %v18542_v38 }
 0x924   :  { %v8505_v10 = vadd.f32 %v8504_v32, %v8503_v11 }
 0x926   :  { %v8507_v2 = vadd.f32 %v8506_v37, %v8505_v10 }
 0x928   :  { %v8509_v54 = vadd.f32 %v8508_v16, %v8507_v2 }
 0x92a   :  { %v8511_v5 = vadd.f32 %v8510_v56, %v8509_v54 }
 0x92c   :  { %v8513_v20 = vadd.f32 %v8512_v14, %v8511_v5 }
 0x92e   :  { %v8515_v17 = vadd.f32 %v8514_v47, %v8513_v20 }
 0x930   :  { %v8517_v34 = vadd.f32 %v8516_v50, %v8515_v17 }
 0x932   :  { %v8519_v62 = vadd.f32 %v8518_v1, %v8517_v34 }
 0x934   :  { %v8521_v29 = vadd.f32 %v8520_v53, %v8519_v62 }
 0x936   :  { %v8523_v46 = vadd.f32 %v8522_v61, %v8521_v29 }
 0x938   :  { %v8524_v8 = vrot.slane %v8523_v46, 4 }
 0x93a   :  { %v8525_v6 = vadd.f32 %v8524_v8, %v8523_v46 }
 0x93c   :  { %v8526_v3 = vrot.slane %v8525_v6, 2 }
 0x93e   :  { %v8527_v19 = vadd.f32 %v8526_v3, %v8525_v6 }
 0x940   :  { %v8528_v18 = vrot.slane %v8527_v19, 1 }
 0x942   :  { %v8529_v45 = vadd.f32 %v8528_v18, %v8527_v19 }
 0x944   :  { %v8530_v7 = vmul.f32 0.0078125, %v8529_v45 }
 0x946   :  { %v8531_v28 = vadd.f32 1e-05, %v8530_v7 }
 0x948   :  { %15643 = vrsqrt.f32 %v8531_v28 }
 0x952   :  { %v15644_v0 = vpop.eup %15643 }
 0x953   :  { %v8533_v36 = vmul.f32 %v15644_v0, %v8419_v35 }
 0x955   :  { %v8537_v31 = vrot.slane %v8533_v36, %v8536_v23 }
 0x957   :  { %v8551_v42 = vmul.f32 %v8537_v31, %v18488_v48  ;;  %v8538_v52 = vmul.f32 %v8537_v31, %v18459_v13  ;;  %v8539_v59 = vmul.f32 %v8537_v31, %v18462_v15  ;;  %v8540_v11 = vmul.f32 %v8537_v31, %v18465_v49 }
 0x958   :  { %v8541_v39 = vmul.f32 %v8537_v31, %v18468_v41  ;;  %v8542_v32 = vmul.f32 %v8537_v31, %v18470_v51  ;;  %v8543_v10 = vmul.f32 %v8537_v31, %v18472_v26  ;;  %v8544_v27 = vmul.f32 %v8537_v31, %v18474_v25 }
 0x959   :  { %v18564_v37 = vadd.f32 %v18553_v33, %v8551_v42  ;;  %v8560_v2 = vadd.f32 %v18553_v33, %v8538_v52  ;;  %v8561_v48 = vadd.f32 %v18553_v33, %v8539_v59  ;;  %v8562_v13 = vadd.f32 %v18553_v33, %v8540_v11 }
 0x95a   :  { %v8563_v15 = vadd.f32 %v18553_v33, %v8541_v39  ;;  %v8564_v49 = vadd.f32 %v18553_v33, %v8542_v32  ;;  %v8565_v41 = vadd.f32 %v18553_v33, %v8543_v10  ;;  %v8545_v51 = vmul.f32 %v8537_v31, %v18476_v57 }
 0x95b   :  { %v8576_v26 = vmul.f32 0.2, %v8560_v2  ;;  %v8577_v24 = vmul.f32 0.2, %v8561_v48  ;;  %v8578_v25 = vmul.f32 0.2, %v8562_v13  ;;  %v8566_v16 = vadd.f32 %v18553_v33, %v8544_v27 }
 0x95c   :  { %v8579_v54 = vmul.f32 0.2, %v8563_v15  ;;  %v8580_v43 = vmul.f32 0.2, %v8564_v49  ;;  %v8581_v56 = vmul.f32 0.2, %v8565_v41  ;;  %v8567_v5 = vadd.f32 %v18553_v33, %v8545_v51 }
 0x95d   :  { %v8592_v40 = vmax.f32 %v8560_v2, %v8576_v26  ;;  %v8593_v14 = vmax.f32 %v8561_v48, %v8577_v24  ;;  %v8594_v20 = vmax.f32 %v8562_v13, %v8578_v25  ;;  %v8582_v22 = vmul.f32 0.2, %v8566_v16  ;;  %v15514_v13 = vld [vmem:[%s19208_s8 + $0x8] sm:$0xff]   ;;  %v15517_v51 = vld [vmem:[%s19208_s8 + $0x20] sm:$0xff]   ;;  %v15519_v24 = vld [vmem:[%s19208_s8 + $0x30] sm:$0xff]  }
 0x95e   :  { %v8595_v47 = vmax.f32 %v8563_v15, %v8579_v54  ;;  %v8596_v17 = vmax.f32 %v8564_v49, %v8580_v43  ;;  %v8597_v12 = vmax.f32 %v8565_v41, %v8581_v56  ;;  %v8583_v50 = vmul.f32 0.2, %v8567_v5  ;;  %v15515_v15 = vld [vmem:[%s19208_s8 + $0x10] sm:$0xff]   ;;  %v15542_v49 = vld [vmem:[%s19209_s9 + $0x18] sm:$0xff]   ;;  %v15518_v26 = vld [vmem:[%s19208_s8 + $0x28] sm:$0xff]  }
 0x95f   :  { %v8608_v34 = vpack.c.bf16 %v8593_v14, %v8592_v40  ;;  %v8598_v57 = vmax.f32 %v8566_v16, %v8582_v22  ;;  %v8546_v9 = vmul.f32 %v8537_v31, %v18478_v30  ;;  %v8547_v1 = vmul.f32 %v8537_v31, %v18480_v21  ;;  %v15516_v41 = vld [vmem:[%s19208_s8 + $0x18] sm:$0xff]   ;;  %v15521_v16 = vld [vmem:[%s19208_s8 + $0x40] sm:$0xff]   ;;  %v15522_v54 = vld [vmem:[%s19208_s8 + $0x48] sm:$0xff]  }
 0x960   :  { %v8609_v62 = vpack.c.bf16 %v8595_v47, %v8594_v20  ;;  %v8610_v53 = vpack.c.bf16 %v8597_v12, %v8596_v17  ;;  %v8599_v29 = vmax.f32 %v8567_v5, %v8583_v50  ;;  %v8548_v61 = vmul.f32 %v8537_v31, %v18482_v4  ;;  %v15520_v25 = vld [vmem:[%s19208_s8 + $0x38] sm:$0xff]   ;;  %v15523_v43 = vld [vmem:[%s19208_s8 + $0x50] sm:$0xff]   ;;  %v15525_v5 = vld [vmem:[%s19208_s8 + $0x60] sm:$0xff]  }
 0x961   :  { %13623 = vmatprep.subr.bf16.mxu0 %v8608_v34  ;;  %v8568_v46 = vadd.f32 %v18553_v33, %v8546_v9  ;;  %v8569_v8 = vadd.f32 %v18553_v33, %v8547_v1  ;;  %v8549_v6 = vmul.f32 %v8537_v31, %v18484_v60  ;;  %v8550_v3 = vmul.f32 %v8537_v31, %v18486_v55  ;;  %v15524_v56 = vld [vmem:[%s19208_s8 + $0x58] sm:$0xff]   ;;  %v15526_v40 = vld [vmem:[%s19208_s8 + $0x68] sm:$0xff]   ;;  %v15527_v14 = vld [vmem:[%s19208_s8 + $0x70] sm:$0xff]  }
 0x962   :  { %13624 = vmatpush3.bf16.msra.mxu0 %v8608_v34  ;;  %v8611_v19 = vpack.c.bf16 %v8599_v29, %v8598_v57  ;;  %v8570_v30 = vadd.f32 %v18553_v33, %v8548_v61  ;;  %v8589_v21 = vmul.f32 0.2, %v18564_v37  ;;  %v8552_v18 = vmul.f32 %v8537_v31, %v18490_v63  ;;  %v15528_v20 = vld [vmem:[%s19208_s8 + $0x78] sm:$0xff]   ;;  %v15530_v22 = vld [vmem:[%s19208_s8 + $0x80] sm:$0xff]   ;;  %v15531_v47 = vld [vmem:[%s19208_s8 + $0x88] sm:$0xff]  }
 0x963   :  { %13625 = vmatprep.subr.bf16.mxu0 %v8609_v62  ;;  %v8584_v45 = vmul.f32 0.2, %v8568_v46  ;;  %v8585_v4 = vmul.f32 0.2, %v8569_v8  ;;  %v8571_v7 = vadd.f32 %v18553_v33, %v8549_v6  ;;  %v8572_v28 = vadd.f32 %v18553_v33, %v8550_v3  ;;  %v15532_v17 = vld [vmem:[%s19208_s8 + $0x90] sm:$0xff]   ;;  %v15533_v12 = vld [vmem:[%s19208_s8 + $0x98] sm:$0xff]  }
 0x964   :  { %v8586_v44 = vmul.f32 0.2, %v8570_v30  ;;  %v8605_v60 = vmax.f32 %v18564_v37, %v8589_v21  ;;  %v8553_v55 = vmul.f32 %v8537_v31, %v18492_v58  ;;  %v8574_v35 = vadd.f32 %v18553_v33, %v8552_v18  ;;  %v15534_v50 = vld [vmem:[%s19208_s8 + $0xa0] sm:$0xff]   ;;  %v15535_v34 = vld [vmem:[%s19208_s8 + $0xa8] sm:$0xff]   ;;  %v15536_v57 = vld [vmem:[%s19208_s8 + $0xb0] sm:$0xff]  }
 0x965   :  { %v8600_v0 = vmax.f32 %v8568_v46, %v8584_v45  ;;  %v8601_v36 = vmax.f32 %v8569_v8, %v8585_v4  ;;  %v8587_v42 = vmul.f32 0.2, %v8571_v7  ;;  %v8588_v52 = vmul.f32 0.2, %v8572_v28  ;;  %v15537_v9 = vld [vmem:[%s19208_s8 + $0xb8] sm:$0xff]   ;;  %v15538_v1 = vld [vmem:[%s19208_s8 + $0xc0] sm:$0xff]  }
 0x966   :  { %13626 = vmatpush3.bf16.msra.mxu0 %v8609_v62  ;;  %v8602_v63 = vmax.f32 %v8570_v30, %v8586_v44  ;;  %v8575_v59 = vadd.f32 %v18553_v33, %v8553_v55  ;;  %v8590_v11 = vmul.f32 0.2, %v8574_v35  ;;  %v15529_v33 = vld [vmem:[%s19209_s9 + $0x10] sm:$0xff]   ;;  %v15539_v62 = vld [vmem:[%s19208_s8 + $0xc8] sm:$0xff]   ;;  %v15547_v29 = vld [vmem:[%s19209_s9] sm:$0xff]  }
 0x967   :  { %13627 = vmatprep.subr.bf16.mxu0 %v8610_v53  ;;  %v8612_v39 = vpack.c.bf16 %v8601_v36, %v8600_v0  ;;  %v8603_v32 = vmax.f32 %v8571_v7, %v8587_v42  ;;  %v8604_v10 = vmax.f32 %v8572_v28, %v8588_v52  ;;  %v15541_v61 = vld [vmem:[%s19208_s8 + $0xd8] sm:$0xff]   ;;  %v15543_v46 = vld [vmem:[%s19208_s8 + $0xe0] sm:$0xff]   ;;  %v15544_v8 = vld [vmem:[%s19208_s8 + $0xe8] sm:$0xff]  }
 0x968   :  { %v8591_v27 = vmul.f32 0.2, %v8575_v59  ;;  %v8606_v2 = vmax.f32 %v8574_v35, %v8590_v11  ;;  %v15545_v6 = vld [vmem:[%s19208_s8 + $0xf0] sm:$0xff]   ;;  %v15546_v3 = vld [vmem:[%s19208_s8 + $0xf8] sm:$0xff]   ;;  %v15548_v0 = vld [vmem:[%s19209_s9 + $0x8] sm:$0xff]  }
 0x969   :  { %v8613_v37 = vpack.c.bf16 %v8603_v32, %v8602_v63  ;;  %v8614_v48 = vpack.c.bf16 %v8605_v60, %v8604_v10  ;;  %v15549_v42 = vld [vmem:[%s19209_s9 + $0x20] sm:$0xff]   ;;  %v15550_v10 = vld [vmem:[%s19209_s9 + $0x28] sm:$0xff]  }
 0x96a   :  { %13628 = vmatpush3.bf16.msra.mxu0 %v8610_v53  ;;  %v8607_v58 = vmax.f32 %v8575_v59, %v8591_v27  ;;  %v15540_v53 = vld [vmem:[%s19208_s8 + $0xd0] sm:$0xff]  }
 0x96b   :  { %13629 = vmatprep.subr.bf16.mxu0 %v8611_v19 }
 0x96c   :  { %v8615_v31 = vpack.c.bf16 %v8607_v58, %v8606_v2 }
 0x96e   :  { %13630 = vmatpush3.bf16.msra.mxu0 %v8611_v19 }
 0x96f   :  { %13631 = vmatprep.subr.bf16.mxu0 %v8612_v39 }
 0x972   :  { %13632 = vmatpush3.bf16.msra.mxu0 %v8612_v39 }
 0x973   :  { %13633 = vmatprep.subr.bf16.mxu0 %v8613_v37 }
 0x976   :  { %13634 = vmatpush3.bf16.msra.mxu0 %v8613_v37 }
 0x977   :  { %13635 = vmatprep.subr.bf16.mxu0 %v8614_v48 }
 0x97a   :  { %13636 = vmatpush3.bf16.msra.mxu0 %v8614_v48 }
 0x97b   :  { %13637 = vmatprep.subr.bf16.mxu0 %v8615_v31 }
 0x97e   :  { %13638 = vmatpush3.bf16.msra.mxu0 %v8615_v31  ;;  %v15551_v31 = vld [vmem:[%s19209_s9 + $0x30] sm:$0xff]  }
 0x97f   :  { %13703 = vmatprep.subr.bf16.mxu0 %v15529_v33 }
 0x981   :  { %13640 = vmatmul.mubr.bf16.vlgmr.msra.gmra.mrb[60].mxu0 %v15514_v13 }
 0x982   :  { %13643 = vmatprep.mubr.bf16.mxu0 %v15515_v15  ;;  %13704 = vmatpush3.bf16.msra.mxu0 %v15529_v33 }
 0x983   :  { %13705 = vmatprep.subr.bf16.mxu0 %v15542_v49 }
 0x986   :  { %13706 = vmatpush3.bf16.msra.mxu0 %v15542_v49 }
 0x987   :  { %13711 = vmatprep.subr.bf16.mxu0 %v15547_v29 }
 0x989   :  { %13644 = vmatmul.mubr.bf16.gmra.mrb[64].mxu0 %v15516_v41 }
 0x98a   :  { %13647 = vmatprep.mubr.bf16.mxu0 %v15517_v51 }
 0x991   :  { %13648 = vmatmul.mubr.bf16.gmra.mrb[68].mxu0 %v15518_v26  ;;  %v15552_v26 = vld [vmem:[%s19209_s9 + $0x38] sm:$0xff]  }
 0x992   :  { %13651 = vmatprep.mubr.bf16.mxu0 %v15519_v24 }
 0x999   :  { %13652 = vmatmul.mubr.bf16.gmra.mrb[72].mxu0 %v15520_v25  ;;  %v15553_v25 = vld [vmem:[%s19209_s9 + $0x40] sm:$0xff]  }
 0x99a   :  { %13655 = vmatprep.mubr.bf16.mxu0 %v15521_v16 }
 0x9a1   :  { %13656 = vmatmul.mubr.bf16.gmra.mrb[76].mxu0 %v15522_v54 }
 0x9a2   :  { %13659 = vmatprep.mubr.bf16.mxu0 %v15523_v43 }
 0x9a9   :  { %13660 = vmatmul.mubr.bf16.gmra.mrb[80].mxu0 %v15524_v56 }
 0x9aa   :  { %13663 = vmatprep.mubr.bf16.mxu0 %v15525_v5 }
 0x9b1   :  { %13664 = vmatmul.mubr.bf16.gmra.mrb[84].mxu0 %v15526_v40 }
 0x9b2   :  { %13667 = vmatprep.mubr.bf16.mxu0 %v15527_v14  ;;  %v15554_v14 = vld [vmem:[%s19209_s9 + $0x48] sm:$0xff]  }
 0x9b9   :  { %13668 = vmatmul.mubr.bf16.gmra.mrb[88].mxu0 %v15528_v20 }
 0x9ba   :  { %13671 = vmatprep.mubr.bf16.mxu0 %v15530_v22 }
 0x9c1   :  { %13672 = vmatmul.mubr.bf16.gmra.mrb[92].mxu0 %v15531_v47 }
 0x9c2   :  { %13675 = vmatprep.mubr.bf16.mxu0 %v15532_v17 }
 0x9c9   :  { %13676 = vmatmul.mubr.bf16.gmra.mrb[96].mxu0 %v15533_v12 }
 0x9ca   :  { %13679 = vmatprep.mubr.bf16.mxu0 %v15534_v50  ;;  %v15555_v50 = vld [vmem:[%s19209_s9 + $0x50] sm:$0xff]  }
 0x9d1   :  { %13680 = vmatmul.mubr.bf16.gmra.mrb[100].mxu0 %v15535_v34 }
 0x9d2   :  { %13683 = vmatprep.mubr.bf16.mxu0 %v15536_v57 }
 0x9d9   :  { %13684 = vmatmul.mubr.bf16.gmra.mrb[104].mxu0 %v15537_v9 }
 0x9da   :  { %13687 = vmatprep.mubr.bf16.mxu0 %v15538_v1 }
 0x9e1   :  { %13688 = vmatmul.mubr.bf16.gmra.mrb[108].mxu0 %v15539_v62 }
 0x9e2   :  { %13691 = vmatprep.mubr.bf16.mxu0 %v15540_v53 }
 0x9e9   :  { %13692 = vmatmul.mubr.bf16.gmra.mrb[112].mxu0 %v15541_v61 }
 0x9ea   :  { %13695 = vmatprep.mubr.bf16.mxu0 %v15543_v46  ;;  %v15557_v46 = vld [vmem:[%s19209_s9 + $0x60] sm:$0xff]  }
 0x9f1   :  { %13696 = vmatmul.mubr.bf16.gmra.mrb[116].mxu0 %v15544_v8 }
 0x9f2   :  { %13699 = vmatprep.mubr.bf16.mxu0 %v15545_v6 }
 0x9f9   :  { %13700 = vmatmul.mubr.bf16.gmra.mrb[120].mxu0 %v15546_v3 }
 0xa54   :  { %v13641_v19 = vpop.f32.mrb[60].mxu0 }
 0xa55   :  { %v8906_v30 = vpop.f32.mrb[61].mxu0 }
 0xa56   :  { %v13642_v21 = vpop.f32.mrb[62].mxu0 }
 0xa57   :  { %v9162_v18 = vpack.c.bf16 %v13642_v21, %v13641_v19  ;;  %v8909_v45 = vpop.f32.mrb[63].mxu0 }
 0xa58   :  { %v9161_v4 = vpack.c.bf16 %v8909_v45, %v8906_v30 }
 0xa5c   :  { %v13645_v7 = vpop.f32.mrb[64].mxu0 }
 0xa5d   :  { %v8922_v28 = vpop.f32.mrb[65].mxu0 }
 0xa5e   :  { %v13646_v44 = vpop.f32.mrb[66].mxu0 }
 0xa5f   :  { %v9164_v60 = vpack.c.bf16 %v13646_v44, %v13645_v7  ;;  %v8925_v55 = vpop.f32.mrb[67].mxu0 }
 0xa60   :  { %v9163_v35 = vpack.c.bf16 %v8925_v55, %v8922_v28 }
 0xa62   :  { %13707 = vmatprep.mubr.msk.bf16.mxu0 %vm8421_vm3, %v9163_v35 }
 0xa63   :  { %13708 = vmatmul.mubr.msk.bf16.vlgmr.msra.gmra.mrb[124].mxu0 %vm8421_vm3, %v9164_v60  ;;  %v15559_v60 = vld [vmem:[%s19209_s9 + $0x70] sm:$0xff]  }
 0xa64   :  { %13712 = vmatpush3.bf16.msra.mxu0 %v15547_v29  ;;  %13715 = vmatprep.mubr.msk.bf16.mxu0 %vm8421_vm3, %v9161_v4  ;;  %v13649_v36 = vpop.f32.mrb[68].mxu0  ;;  %v15556_v29 = vld [vmem:[%s19209_s9 + $0x58] sm:$0xff]  }
 0xa65   :  { %13713 = vmatprep.subr.bf16.mxu0 %v15548_v0  ;;  %v8938_v52 = vpop.f32.mrb[69].mxu0 }
 0xa66   :  { %v13650_v63 = vpop.f32.mrb[70].mxu0 }
 0xa67   :  { %v9166_v59 = vpack.c.bf16 %v13650_v63, %v13649_v36  ;;  %v8941_v11 = vpop.f32.mrb[71].mxu0  ;;  %v15560_v63 = vld [vmem:[%s19209_s9 + $0x78] sm:$0xff]  }
 0xa68   :  { %13714 = vmatpush3.bf16.msra.mxu0 %v15548_v0  ;;  %v9165_v39 = vpack.c.bf16 %v8941_v11, %v8938_v52  ;;  %v15561_v11 = vld [vmem:[%s19209_s9 + $0x80] sm:$0xff]  }
 0xa69   :  { %13719 = vmatprep.subr.bf16.mxu0 %v15549_v42 }
 0xa6c   :  { %v13653_v32 = vpop.f32.mrb[72].mxu0 }
 0xa6d   :  { %v8954_v27 = vpop.f32.mrb[73].mxu0 }
 0xa6e   :  { %v13654_v2 = vpop.f32.mrb[74].mxu0 }
 0xa6f   :  { %13716 = vmatmul.mubr.msk.bf16.vlgmr.msra.gmra.mrb[124].mxu0 %vm8421_vm3, %v9162_v18  ;;  %v9168_v37 = vpack.c.bf16 %v13654_v2, %v13653_v32  ;;  %v8957_v48 = vpop.f32.mrb[75].mxu0  ;;  %v15558_v18 = vld [vmem:[%s19209_s9 + $0x68] sm:$0xff]  }
 0xa70   :  { %13720 = vmatpush3.bf16.msra.mxu0 %v15549_v42  ;;  %13723 = vmatprep.mubr.msk.bf16.mxu0 %vm8421_vm3, %v9165_v39  ;;  %v9167_v58 = vpack.c.bf16 %v8957_v48, %v8954_v27  ;;  %v15562_v48 = vld [vmem:[%s19209_s9 + $0x88] sm:$0xff]  }
 0xa71   :  { %13721 = vmatprep.subr.bf16.mxu0 %v15550_v10 }
 0xa74   :  { %13722 = vmatpush3.bf16.msra.mxu0 %v15550_v10  ;;  %v13657_v33 = vpop.f32.mrb[76].mxu0 }
 0xa75   :  { %13727 = vmatprep.subr.bf16.mxu0 %v15551_v31  ;;  %v8970_v13 = vpop.f32.mrb[77].mxu0 }
 0xa76   :  { %v13658_v15 = vpop.f32.mrb[78].mxu0 }
 0xa77   :  { %v9170_v49 = vpack.c.bf16 %v13658_v15, %v13657_v33  ;;  %v8973_v41 = vpop.f32.mrb[79].mxu0 }
 0xa78   :  { %v9169_v51 = vpack.c.bf16 %v8973_v41, %v8970_v13 }
 0xa7b   :  { %13724 = vmatmul.mubr.msk.bf16.vlgmr.msra.gmra.mrb[124].mxu0 %vm8421_vm3, %v9166_v59 }
 0xa7c   :  { %13728 = vmatpush3.bf16.msra.mxu0 %v15551_v31  ;;  %13731 = vmatprep.mubr.msk.bf16.mxu0 %vm8421_vm3, %v9167_v58  ;;  %v13661_v24 = vpop.f32.mrb[80].mxu0 }
 0xa7d   :  { %13729 = vmatprep.subr.bf16.mxu0 %v15552_v26  ;;  %v8986_v16 = vpop.f32.mrb[81].mxu0 }
 0xa7e   :  { %v13662_v54 = vpop.f32.mrb[82].mxu0 }
 0xa7f   :  { %v9172_v43 = vpack.c.bf16 %v13662_v54, %v13661_v24  ;;  %v8989_v56 = vpop.f32.mrb[83].mxu0  ;;  %v15564_v54 = vld [vmem:[%s19209_s9 + $0x98] sm:$0xff]  }
 0xa80   :  { %13730 = vmatpush3.bf16.msra.mxu0 %v15552_v26  ;;  %v9171_v5 = vpack.c.bf16 %v8989_v56, %v8986_v16  ;;  %v15565_v56 = vld [vmem:[%s19209_s9 + $0xa0] sm:$0xff]  }
 0xa81   :  { %13735 = vmatprep.subr.bf16.mxu0 %v15553_v25 }
 0xa84   :  { %v13665_v40 = vpop.f32.mrb[84].mxu0 }
 0xa85   :  { %v9002_v20 = vpop.f32.mrb[85].mxu0 }
 0xa86   :  { %v13666_v22 = vpop.f32.mrb[86].mxu0 }
 0xa87   :  { %13732 = vmatmul.mubr.msk.bf16.vlgmr.msra.gmra.mrb[124].mxu0 %vm8421_vm3, %v9168_v37  ;;  %v9174_v47 = vpack.c.bf16 %v13666_v22, %v13665_v40  ;;  %v9005_v17 = vpop.f32.mrb[87].mxu0 }
 0xa88   :  { %13736 = vmatpush3.bf16.msra.mxu0 %v15553_v25  ;;  %13739 = vmatprep.mubr.msk.bf16.mxu0 %vm8421_vm3, %v9169_v51  ;;  %v9173_v12 = vpack.c.bf16 %v9005_v17, %v9002_v20  ;;  %v15566_v17 = vld [vmem:[%s19209_s9 + $0xa8] sm:$0xff]  }
 0xa89   :  { %13737 = vmatprep.subr.bf16.mxu0 %v15554_v14 }
 0xa8c   :  { %13738 = vmatpush3.bf16.msra.mxu0 %v15554_v14  ;;  %v13669_v34 = vpop.f32.mrb[88].mxu0 }
 0xa8d   :  { %13743 = vmatprep.subr.bf16.mxu0 %v15555_v50  ;;  %v9018_v57 = vpop.f32.mrb[89].mxu0 }
 0xa8e   :  { %v13670_v9 = vpop.f32.mrb[90].mxu0 }
 0xa8f   :  { %v9176_v1 = vpack.c.bf16 %v13670_v9, %v13669_v34  ;;  %v9021_v62 = vpop.f32.mrb[91].mxu0 }
 0xa90   :  { %v9175_v53 = vpack.c.bf16 %v9021_v62, %v9018_v57  ;;  %v15568_v62 = vld [vmem:[%s19209_s9 + $0xb8] sm:$0xff]  }
 0xa93   :  { %13740 = vmatmul.mubr.msk.bf16.vlgmr.msra.gmra.mrb[124].mxu0 %vm8421_vm3, %v9170_v49  ;;  %v15563_v49 = vld [vmem:[%s19209_s9 + $0x90] sm:$0xff]  }
 0xa94   :  { %13744 = vmatpush3.bf16.msra.mxu0 %v15555_v50  ;;  %13747 = vmatprep.mubr.msk.bf16.mxu0 %vm8421_vm3, %v9171_v5  ;;  %v18731_v61 = vpop.f32.mrb[92].mxu0 }
 0xa95   :  { %13745 = vmatprep.subr.bf16.mxu0 %v15556_v29  ;;  %v9034_v8 = vpop.f32.mrb[93].mxu0 }
 0xa96   :  { %v13674_v6 = vpop.f32.mrb[94].mxu0 }
 0xa97   :  { %v9178_v3 = vpack.c.bf16 %v13674_v6, %v18731_v61  ;;  %v9037_v19 = vpop.f32.mrb[95].mxu0  ;;  %v15571_v61 = vld [vmem:[%s19209_s9 + $0xd0] sm:$0xff]   ;;  %v15574_v6 = vld [vmem:[%s19209_s9 + $0xe8] sm:$0xff]  }
 0xa98   :  { %13746 = vmatpush3.bf16.msra.mxu0 %v15556_v29  ;;  %v9177_v30 = vpack.c.bf16 %v9037_v19, %v9034_v8  ;;  %v15570_v29 = vld [vmem:[%s19209_s9 + $0xc8] sm:$0xff]   ;;  %v15573_v8 = vld [vmem:[%s19209_s9 + $0xe0] sm:$0xff]   ;;  %v15576_v19 = vld [vmem:[%s19209_s9 + $0xf8] sm:$0xff]  }
 0xa99   :  { %13751 = vmatprep.subr.bf16.mxu0 %v15557_v46 }
 0xa9c   :  { %v18737_v21 = vpop.f32.mrb[96].mxu0 }
 0xa9d   :  { %v9050_v45 = vpop.f32.mrb[97].mxu0 }
 0xa9e   :  { %v18742_v4 = vpop.f32.mrb[98].mxu0 }
 0xa9f   :  { %13748 = vmatmul.mubr.msk.bf16.vlgmr.msra.gmra.mrb[124].mxu0 %vm8421_vm3, %v9172_v43  ;;  %v9180_v7 = vpack.c.bf16 %v18742_v4, %v18737_v21  ;;  %v9053_v28 = vpop.f32.mrb[99].mxu0  ;;  %v12697_v21 = vld [vmem:[%s19214_s10] ss:$0 sm:$0xff] }
 0xaa0   :  { %13752 = vmatpush3.bf16.msra.mxu0 %v15557_v46  ;;  %13755 = vmatprep.mubr.msk.bf16.mxu0 %vm8421_vm3, %v9173_v12  ;;  %v9179_v44 = vpack.c.bf16 %v9053_v28, %v9050_v45  ;;  %v15572_v46 = vld [vmem:[%s19209_s9 + $0xd8] sm:$0xff]  }
 0xaa1   :  { %13753 = vmatprep.subr.bf16.mxu0 %v15558_v18 }
 0xaa4   :  { %13754 = vmatpush3.bf16.msra.mxu0 %v15558_v18  ;;  %v18751_v55 = vpop.f32.mrb[100].mxu0 }
 0xaa5   :  { %13759 = vmatprep.subr.bf16.mxu0 %v15559_v60  ;;  %v9066_v35 = vpop.f32.mrb[101].mxu0 }
 0xaa6   :  { %v18753_v0 = vpop.f32.mrb[102].mxu0 }
 0xaa7   :  { %v9182_v36 = vpack.c.bf16 %v18753_v0, %v18751_v55  ;;  %v9069_v42 = vpop.f32.mrb[103].mxu0 }
 0xaa8   :  { %v9181_v52 = vpack.c.bf16 %v9069_v42, %v9066_v35 }
 0xaab   :  { %13756 = vmatmul.mubr.msk.bf16.vlgmr.msra.gmra.mrb[124].mxu0 %vm8421_vm3, %v9174_v47 }
 0xaac   :  { %13760 = vmatpush3.bf16.msra.mxu0 %v15559_v60  ;;  %13763 = vmatprep.mubr.msk.bf16.mxu0 %vm8421_vm3, %v9175_v53  ;;  %v18762_v59 = vpop.f32.mrb[104].mxu0  ;;  %v15569_v53 = vld [vmem:[%s19209_s9 + $0xc0] sm:$0xff]  }
 0xaad   :  { %13761 = vmatprep.subr.bf16.mxu0 %v15560_v63  ;;  %v9082_v39 = vpop.f32.mrb[105].mxu0 }
 0xaae   :  { %v18767_v32 = vpop.f32.mrb[106].mxu0 }
 0xaaf   :  { %v9184_v10 = vpack.c.bf16 %v18767_v32, %v18762_v59  ;;  %v9085_v27 = vpop.f32.mrb[107].mxu0 }
 0xab0   :  { %13762 = vmatpush3.bf16.msra.mxu0 %v15560_v63  ;;  %v9183_v2 = vpack.c.bf16 %v9085_v27, %v9082_v39 }
 0xab1   :  { %13767 = vmatprep.subr.bf16.mxu0 %v15561_v11 }
 0xab4   :  { %v18771_v37 = vpop.f32.mrb[108].mxu0 }
 0xab5   :  { %v9098_v58 = vpop.f32.mrb[109].mxu0 }
 0xab6   :  { %v18776_v31 = vpop.f32.mrb[110].mxu0 }
 0xab7   :  { %13764 = vmatmul.mubr.msk.bf16.vlgmr.msra.gmra.mrb[124].mxu0 %vm8421_vm3, %v9176_v1  ;;  %v9186_v33 = vpack.c.bf16 %v18776_v31, %v18771_v37  ;;  %v9101_v13 = vpop.f32.mrb[111].mxu0  ;;  %v15567_v1 = vld [vmem:[%s19209_s9 + $0xb0] sm:$0xff]  }
 0xab8   :  { %13768 = vmatpush3.bf16.msra.mxu0 %v15561_v11  ;;  %13771 = vmatprep.mubr.msk.bf16.mxu0 %vm8421_vm3, %v9177_v30  ;;  %v9185_v15 = vpack.c.bf16 %v9101_v13, %v9098_v58  ;;  %v15577_v30 = vld [vmem:[%s19212_s13] sm:$0xff]  }
 0xab9   :  { %13769 = vmatprep.subr.bf16.mxu0 %v15562_v48 }
 0xabc   :  { %13770 = vmatpush3.bf16.msra.mxu0 %v15562_v48  ;;  %v13693_v41 = vpop.f32.mrb[112].mxu0 }
 0xabd   :  { %13775 = vmatprep.subr.bf16.mxu0 %v15563_v49  ;;  %v9114_v51 = vpop.f32.mrb[113].mxu0 }
 0xabe   :  { %v13694_v26 = vpop.f32.mrb[114].mxu0 }
 0xabf   :  { %v9188_v24 = vpack.c.bf16 %v13694_v26, %v13693_v41  ;;  %v9117_v25 = vpop.f32.mrb[115].mxu0 }
 0xac0   :  { %v9187_v16 = vpack.c.bf16 %v9117_v25, %v9114_v51 }
 0xac3   :  { %13772 = vmatmul.mubr.msk.bf16.vlgmr.msra.gmra.mrb[124].mxu0 %vm8421_vm3, %v9178_v3  ;;  %v15575_v3 = vld [vmem:[%s19209_s9 + $0xf0] sm:$0xff]  }
 0xac4   :  { %13776 = vmatpush3.bf16.msra.mxu0 %v15563_v49  ;;  %13779 = vmatprep.mubr.msk.bf16.mxu0 %vm8421_vm3, %v9179_v44  ;;  %v13697_v43 = vpop.f32.mrb[116].mxu0 }
 0xac5   :  { %13777 = vmatprep.subr.bf16.mxu0 %v15564_v54  ;;  %v9130_v5 = vpop.f32.mrb[117].mxu0 }
 0xac6   :  { %v13698_v40 = vpop.f32.mrb[118].mxu0 }
 0xac7   :  { %v9190_v14 = vpack.c.bf16 %v13698_v40, %v13697_v43  ;;  %v9133_v20 = vpop.f32.mrb[119].mxu0 }
 0xac8   :  { %13778 = vmatpush3.bf16.msra.mxu0 %v15564_v54  ;;  %v9189_v22 = vpack.c.bf16 %v9133_v20, %v9130_v5 }
 0xac9   :  { %13783 = vmatprep.subr.bf16.mxu0 %v15565_v56 }
 0xacc   :  { %v13701_v47 = vpop.f32.mrb[120].mxu0 }
 0xacd   :  { %v9146_v12 = vpop.f32.mrb[121].mxu0 }
 0xace   :  { %v13702_v50 = vpop.f32.mrb[122].mxu0 }
 0xacf   :  { %13780 = vmatmul.mubr.msk.bf16.vlgmr.msra.gmra.mrb[124].mxu0 %vm8421_vm3, %v9180_v7  ;;  %v9192_v34 = vpack.c.bf16 %v13702_v50, %v13701_v47  ;;  %v9149_v57 = vpop.f32.mrb[123].mxu0 }
 0xad0   :  { %13784 = vmatpush3.bf16.msra.mxu0 %v15565_v56  ;;  %13787 = vmatprep.mubr.msk.bf16.mxu0 %vm8421_vm3, %v9181_v52  ;;  %v9191_v9 = vpack.c.bf16 %v9149_v57, %v9146_v12  ;;  %v10411_v12 = vld [vmem:[%s19215_s11] sm:$0x1] }
 0xad1   :  { %13785 = vmatprep.subr.bf16.mxu0 %v15566_v17 }
 0xad4   :  { %13786 = vmatpush3.bf16.msra.mxu0 %v15566_v17 }
 0xad5   :  { %13791 = vmatprep.subr.bf16.mxu0 %v15567_v1 }
 0xadb   :  { %13788 = vmatmul.mubr.msk.bf16.vlgmr.msra.gmra.mrb[124].mxu0 %vm8421_vm3, %v9182_v36 }
 0xadc   :  { %13792 = vmatpush3.bf16.msra.mxu0 %v15567_v1  ;;  %13795 = vmatprep.mubr.msk.bf16.mxu0 %vm8421_vm3, %v9183_v2 }
 0xadd   :  { %13793 = vmatprep.subr.bf16.mxu0 %v15568_v62 }
 0xae0   :  { %13794 = vmatpush3.bf16.msra.mxu0 %v15568_v62 }
 0xae1   :  { %13799 = vmatprep.subr.bf16.mxu0 %v15569_v53 }
 0xae7   :  { %13796 = vmatmul.mubr.msk.bf16.vlgmr.msra.gmra.mrb[124].mxu0 %vm8421_vm3, %v9184_v10 }
 0xae8   :  { %13800 = vmatpush3.bf16.msra.mxu0 %v15569_v53  ;;  %13803 = vmatprep.mubr.msk.bf16.mxu0 %vm8421_vm3, %v9185_v15 }
 0xae9   :  { %13801 = vmatprep.subr.bf16.mxu0 %v15570_v29 }
 0xaec   :  { %13802 = vmatpush3.bf16.msra.mxu0 %v15570_v29 }
 0xaed   :  { %13807 = vmatprep.subr.bf16.mxu0 %v15571_v61 }
 0xaf3   :  { %13804 = vmatmul.mubr.msk.bf16.vlgmr.msra.gmra.mrb[124].mxu0 %vm8421_vm3, %v9186_v33 }
 0xaf4   :  { %13808 = vmatpush3.bf16.msra.mxu0 %v15571_v61  ;;  %13811 = vmatprep.mubr.msk.bf16.mxu0 %vm8421_vm3, %v9187_v16 }
 0xaf5   :  { %13809 = vmatprep.subr.bf16.mxu0 %v15572_v46 }
 0xaf8   :  { %13810 = vmatpush3.bf16.msra.mxu0 %v15572_v46 }
 0xaf9   :  { %13815 = vmatprep.subr.bf16.mxu0 %v15573_v8 }
 0xaff   :  { %13812 = vmatmul.mubr.msk.bf16.vlgmr.msra.gmra.mrb[124].mxu0 %vm8421_vm3, %v9188_v24 }
 0xb00   :  { %13816 = vmatpush3.bf16.msra.mxu0 %v15573_v8  ;;  %13819 = vmatprep.mubr.msk.bf16.mxu0 %vm8421_vm3, %v9189_v22 }
 0xb01   :  { %13817 = vmatprep.subr.bf16.mxu0 %v15574_v6 }
 0xb04   :  { %13818 = vmatpush3.bf16.msra.mxu0 %v15574_v6 }
 0xb05   :  { %13823 = vmatprep.subr.bf16.mxu0 %v15575_v3 }
 0xb0b   :  { %13820 = vmatmul.mubr.msk.bf16.vlgmr.msra.gmra.mrb[124].mxu0 %vm8421_vm3, %v9190_v14 }
 0xb0c   :  { %13824 = vmatpush3.bf16.msra.mxu0 %v15575_v3  ;;  %13827 = vmatprep.mubr.msk.bf16.mxu0 %vm8421_vm3, %v9191_v9  ;;  %v12698_v9 = vld [vmem:[%s19216_s12] ss:$0 sm:$0xff] }
 0xb0d   :  { %13825 = vmatprep.subr.bf16.mxu0 %v15576_v19 }
 0xb10   :  { %13826 = vmatpush3.bf16.msra.mxu0 %v15576_v19 }
 0xb17   :  { %13828 = vmatmul.mubr.msk.bf16.vlgmr.msra.gmra.mrb[124].mxu0 %vm8421_vm3, %v9192_v34 }
 0xb18   :  { %13835 = vmatprep.mubr.msk.bf16.mxu0 %vm8421_vm3, %v15577_v30 }
 0xbea   :  { %v13829_v18 = vpop.f32.mrb[124].mxu0 }
 0xbeb   :  { %v10381_v45 = vpop.f32.mrb[125].mxu0  ;;  %v10409_v44 = vadd.f32 %v13829_v18, %v12697_v21 }
 0xbec   :  { %v10407_v4 = vadd.f32 %v12697_v21, %v10381_v45  ;;  %v13830_v7 = vpop.f32.mrb[126].mxu0 }
 0xbed   :  { %v10384_v28 = vpop.f32.mrb[127].mxu0  ;;  %v10410_v35 = vadd.f32 %v13830_v7, %v12697_v21  ;;  %v10417_v42 = vsel %vm10413_vm4, %v10409_v44, 0.0 }
 0xbee   :  { %v10408_v60 = vadd.f32 %v12697_v21, %v10384_v28  ;;  %v10414_v55 = vsel %vm10413_vm4, %v10407_v4, 0.0  ;;  %v15578_v28 = vld [vmem:[%s19212_s13 + $0x8] sm:$0xff]  }
 0xbef   :  { %v10419_v63 = vsel %vm10413_vm4, %v10410_v35, 0.0 }
 0xbf0   :  { %v10415_v0 = vsel %vm10413_vm4, %v10408_v60, 0.0 }
 0xbf1   :  { %v10416_v36 = vadd.f32 %v10415_v0, %v10414_v55  ;;  %v15580_v55 = vld [vmem:[%s19213_s14 + $0x28] sm:$0xff]   ;;  %v15582_v0 = vld [vmem:[%s19213_s14 + $0x38] sm:$0xff]  }
 0xbf3   :  { %v10418_v52 = vadd.f32 %v10417_v42, %v10416_v36 }
 0xbf5   :  { %v10420_v59 = vadd.f32 %v10419_v63, %v10418_v52 }
 0xbf7   :  { %v10421_v11 = vrot.slane %v10420_v59, 4 }
 0xbf9   :  { %v10422_v39 = vadd.f32 %v10421_v11, %v10420_v59 }
 0xbfb   :  { %v10423_v32 = vrot.slane %v10422_v39, 2 }
 0xbfd   :  { %v10424_v10 = vadd.f32 %v10423_v32, %v10422_v39  ;;  %v15583_v39 = vld [vmem:[%s19213_s14] sm:$0xff]  }
 0xbff   :  { %v10425_v27 = vrot.slane %v10424_v10, 1 }
 0xc01   :  { %v10426_v2 = vadd.f32 %v10425_v27, %v10424_v10  ;;  %v15584_v10 = vld [vmem:[%s19213_s14 + $0x8] sm:$0xff]   ;;  %v15585_v27 = vld [vmem:[%s19213_s14 + $0x10] sm:$0xff]  }
 0xc03   :  { %v10428_v37 = vmul.f32 0.03125, %v10426_v2  ;;  %v15586_v2 = vld [vmem:[%s19213_s14 + $0x18] sm:$0xff]  }
 0xc05   :  { %v10429_v48 = vsub.f32 %v10407_v4, %v10428_v37  ;;  %v10430_v58 = vsub.f32 %v10408_v60, %v10428_v37  ;;  %v10431_v31 = vsub.f32 %v10409_v44, %v10428_v37  ;;  %v10432_v33 = vsub.f32 %v10410_v35, %v10428_v37  ;;  %v15579_v44 = vld [vmem:[%s19213_s14 + $0x20] sm:$0xff]   ;;  %v15581_v35 = vld [vmem:[%s19213_s14 + $0x30] sm:$0xff]  }
 0xc06   :  { %v15653_v60 = vmov 0.0   ;;  %v15587_v37 = vld [vmem:[%s19213_s14 + $0x40] sm:$0xff]  }
 0xc07   :  { %v10433_v13 = vmul.f32 %v10429_v48, %v10429_v48  ;;  %v10434_v15 = vmul.f32 %v10430_v58, %v10430_v58  ;;  %v10435_v49 = vmul.f32 %v10431_v31, %v10431_v31  ;;  %v10436_v41 = vmul.f32 %v10432_v33, %v10432_v33 }
 0xc09   :  { %v10437_v51 = vsel %vm10413_vm4, %v10433_v13, 0.0  ;;  %v10438_v26 = vsel %vm10413_vm4, %v10434_v15, 0.0  ;;  %v10440_v25 = vsel %vm10413_vm4, %v10435_v49, 0.0  ;;  %v10442_v54 = vsel %vm10413_vm4, %v10436_v41, 0.0  ;;  %v15592_v15 = vld [vmem:[%s19213_s14 + $0x68] sm:$0xff]   ;;  %v15593_v49 = vld [vmem:[%s19213_s14 + $0x70] sm:$0xff]  }
 0xc0a   :  { %v10439_v24 = vadd.f32 %v10438_v26, %v10437_v51  ;;  %v15594_v41 = vld [vmem:[%s19213_s14 + $0x78] sm:$0xff]   ;;  %v15595_v51 = vld [vmem:[%s19213_s14 + $0x80] sm:$0xff]  }
 0xc0c   :  { %v10441_v16 = vadd.f32 %v10440_v25, %v10439_v24  ;;  %v15596_v24 = vld [vmem:[%s19213_s14 + $0x88] sm:$0xff]   ;;  %v15597_v25 = vld [vmem:[%s19213_s14 + $0x90] sm:$0xff]  }
 0xc0e   :  { %v10443_v43 = vadd.f32 %v10442_v54, %v10441_v16  ;;  %v15598_v16 = vld [vmem:[%s19213_s14 + $0x98] sm:$0xff]   ;;  %v15599_v54 = vld [vmem:[%s19213_s14 + $0xa0] sm:$0xff]  }
 0xc10   :  { %v10444_v56 = vrot.slane %v10443_v43, 4 }
 0xc12   :  { %v10445_v5 = vadd.f32 %v10444_v56, %v10443_v43  ;;  %v15600_v56 = vld [vmem:[%s19213_s14 + $0xa8] sm:$0xff]  }
 0xc14   :  { %v10446_v40 = vrot.slane %v10445_v5, 2 }
 0xc16   :  { %v10447_v14 = vadd.f32 %v10446_v40, %v10445_v5  ;;  %v15601_v5 = vld [vmem:[%s19213_s14 + $0xb0] sm:$0xff]   ;;  %v15602_v40 = vld [vmem:[%s19213_s14 + $0xb8] sm:$0xff]  }
 0xc18   :  { %v10448_v20 = vrot.slane %v10447_v14, 1 }
 0xc1a   :  { %v10449_v22 = vadd.f32 %v10448_v20, %v10447_v14  ;;  %v15603_v14 = vld [vmem:[%s19213_s14 + $0xc0] sm:$0xff]  }
 0xc1c   :  { %v10450_v47 = vmul.f32 0.03125, %v10449_v22  ;;  %v15604_v22 = vld [vmem:[%s19213_s14 + $0xc8] sm:$0xff]  }
 0xc1e   :  { %v10451_v17 = vadd.f32 1e-05, %v10450_v47  ;;  %v15605_v47 = vld [vmem:[%s19213_s14 + $0xd0] sm:$0xff]  }
 0xc20   :  { %15645 = vrsqrt.f32 %v10451_v17  ;;  %v15606_v17 = vld [vmem:[%s19213_s14 + $0xd8] sm:$0xff]  }
 0xc2a   :  { %v15646_v50 = vpop.eup %15645 }
 0xc2b   :  { %v10453_v34 = vmul.f32 %v15646_v50, %v10411_v12  ;;  %v15607_v12 = vld [vmem:[%s19213_s14 + $0xe0] sm:$0xff]  }
 0xc2d   :  { %v10457_v57 = vrot.slane %v10453_v34, %v8536_v23  ;;  %v15608_v34 = vld [vmem:[%s19213_s14 + $0xe8] sm:$0xff]  }
 0xc2f   :  { %v10459_v1 = vmul.f32 %v10457_v57, %v10430_v58  ;;  %v10458_v62 = vmul.f32 %v10457_v57, %v10429_v48  ;;  %v10460_v53 = vmul.f32 %v10457_v57, %v10431_v31  ;;  %v10461_v29 = vmul.f32 %v10457_v57, %v10432_v33  ;;  %v15588_v48 = vld [vmem:[%s19213_s14 + $0x48] sm:$0xff]   ;;  %v15589_v58 = vld [vmem:[%s19213_s14 + $0x50] sm:$0xff]   ;;  %v15590_v31 = vld [vmem:[%s19213_s14 + $0x58] sm:$0xff]  }
 0xc30   :  { %v15591_v33 = vld [vmem:[%s19213_s14 + $0x60] sm:$0xff]   ;;  %v15609_v57 = vld [vmem:[%s19213_s14 + $0xf0] sm:$0xff]  }
 0xc31   :  { %v10469_v61 = vadd.f32 %v12698_v9, %v10459_v1  ;;  %v10468_v46 = vadd.f32 %v12698_v9, %v10458_v62  ;;  %v10470_v8 = vadd.f32 %v12698_v9, %v10460_v53  ;;  %v10471_v6 = vadd.f32 %v12698_v9, %v10461_v29  ;;  %v15610_v9 = vld [vmem:[%s19213_s14 + $0xf8] sm:$0xff]   ;;  %v15611_v1 = vld [vmem:[%s19213_s14 + $0x100] sm:$0xff]   ;;  %v15612_v53 = vld [vmem:[%s19213_s14 + $0x108] sm:$0xff]  }
 0xc32   :  { %v15613_v29 = vld [vmem:[%s19213_s14 + $0x110] sm:$0xff]  }
 0xc33   :  { %v10472_v3 = vmul.f32 0.2, %v10468_v46  ;;  %v10473_v19 = vmul.f32 0.2, %v10469_v61  ;;  %v10474_v30 = vmul.f32 0.2, %v10470_v8 }
 0xc34   :  { %v10475_v21 = vmul.f32 0.2, %v10471_v6 }
 0xc35   :  { %v10476_v18 = vmax.f32 %v10468_v46, %v10472_v3  ;;  %v10477_v45 = vmax.f32 %v10469_v61, %v10473_v19  ;;  %v10478_v38 = vmax.f32 %v10470_v8, %v10474_v30  ;;  %v15614_v61 = vld [vmem:[%s19213_s14 + $0x118] sm:$0xff]   ;;  %v15615_v46 = vld [vmem:[%s19213_s14 + $0x120] sm:$0xff]   ;;  %v15616_v8 = vld [vmem:[%s19213_s14 + $0x128] sm:$0xff]  }
 0xc36   :  { %v10479_v23 = vmax.f32 %v10471_v6, %v10475_v21  ;;  %v15617_v6 = vld [vmem:[%s19213_s14 + $0x130] sm:$0xff]   ;;  %v15618_v3 = vld [vmem:[%s19213_s14 + $0x138] sm:$0xff]   ;;  %v15619_v19 = vld [vmem:[%s19213_s14 + $0x140] sm:$0xff]  }
 0xc37   :  { %v10480_v4 = vpack.c.bf16 %v10477_v45, %v10476_v18  ;;  %v15620_v21 = vld [vmem:[%s19213_s14 + $0x148] sm:$0xff]   ;;  %v15621_v18 = vld [vmem:[%s19213_s14 + $0x150] sm:$0xff]   ;;  %v15622_v45 = vld [vmem:[%s19213_s14 + $0x158] sm:$0xff]  }
 0xc38   :  { %v10481_v7 = vpack.c.bf16 %v10479_v23, %v10478_v38  ;;  %v15623_v38 = vld [vmem:[%s19213_s14 + $0x160] sm:$0xff]  }
 0xc39   :  { %13831 = vmatprep.subr.bf16.mxu0 %v10480_v4 }
 0xc3a   :  { %13832 = vmatpush3.bf16.msra.mxu0 %v10480_v4  ;;  %v15624_v4 = vld [vmem:[%s19213_s14 + $0x168] sm:$0xff]  }
 0xc3b   :  { %13833 = vmatprep.subr.bf16.mxu0 %v10481_v7 }
 0xc3e   :  { %13834 = vmatpush3.bf16.msra.mxu0 %v10481_v7  ;;  %v15625_v7 = vld [vmem:[%s19213_s14 + $0x170] sm:$0xff]  }
 0xc3f   :  { %13839 = vmatprep.subr.bf16.mxu0 %v15653_v60 }
 0xc41   :  { %13836 = vmatmul.mubr.msk.bf16.vlgmr.msra.gmra.mrb[128].mxu0 %vm8421_vm3, %v15578_v28  ;;  %v15626_v28 = vld [vmem:[%s19213_s14 + $0x178] sm:$0xff]  }
 0xc42   :  { %13840 = vmatpush3.bf16.msra.mxu0 %v15579_v44  ;;  %13847 = vmatprep.mubr.msk.bf16.mxu0 %vm15654_vm5, %v15653_v60  ;;  %v15627_v44 = vld [vmem:[%s19213_s14 + $0x180] sm:$0xff]  }
 0xc43   :  { %13841 = vmatprep.subr.bf16.mxu0 %v15653_v60 }
 0xc46   :  { %13842 = vmatpush3.bf16.msra.mxu0 %v15580_v55 }
 0xc47   :  { %13843 = vmatprep.subr.bf16.mxu0 %v15653_v60 }
 0xc4a   :  { %13844 = vmatpush3.bf16.msra.mxu0 %v15581_v35  ;;  %v15628_v35 = vld [vmem:[%s19213_s14 + $0x188] sm:$0xff]  }
 0xc4b   :  { %13845 = vmatprep.subr.bf16.mxu0 %v15653_v60 }
 0xc4e   :  { %13846 = vmatpush3.bf16.msra.mxu0 %v15582_v0  ;;  %v15629_v0 = vld [vmem:[%s19213_s14 + $0x190] sm:$0xff]  }
 0xc4f   :  { %13851 = vmatprep.subr.bf16.mxu0 %v15653_v60 }
 0xd14   :  { %v13837_v36 = vpop.f32.mrb[128].mxu0 }
 0xd15   :  { %v10536_v42 = vpop.f32.mrb[129].mxu0 }
 0xd16   :  { %v13838_v52 = vpop.f32.mrb[130].mxu0 }
 0xd17   :  { %v18891_v63 = vpack.c.bf16 %v13838_v52, %v13837_v36  ;;  %v10539_v59 = vpop.f32.mrb[131].mxu0  ;;  %v15630_v36 = vld [vmem:[%s19213_s14 + $0x198] sm:$0xff]  }
 0xd18   :  { %v18893_v11 = vpack.c.bf16 %v10539_v59, %v10536_v42  ;;  %v15631_v42 = vld [vmem:[%s19213_s14 + $0x1a0] sm:$0xff]   ;;  %v15632_v59 = vld [vmem:[%s19213_s14 + $0x1a8] sm:$0xff]  }
 0xd19   :  { %v11261_v30 = vrot.slane %v18891_v63, 1  ;;  %v11339_v23 = vrot.slane %v18891_v63, 2  ;;  %v11417_v55 = vrot.slane %v18891_v63, 3  ;;  %v11495_v52 = vrot.slane %v18891_v63, 4 }
 0xd1a   :  { %v10571_v32 = vrot.slane %v18893_v11, 1  ;;  %v10715_v13 = vrot.slane %v18893_v11, 2  ;;  %v10793_v26 = vrot.slane %v18893_v11, 3  ;;  %v10871_v43 = vrot.slane %v18893_v11, 4 }
 0xd1b   :  { %v10949_v20 = vrot.slane %v18893_v11, 5  ;;  %v11027_v50 = vrot.slane %v18893_v11, 6  ;;  %v11105_v62 = vrot.slane %v18893_v11, 7 }
 0xd1c   :  { %13848 = vmatmul.mubr.msk.bf16.vlgmr.msra.gmra.mrb[132].mxu0 %vm10413_vm4, %v10571_v32  ;;  %v15635_v32 = vld [vmem:[%s19213_s14 + $0x1c0] sm:$0xff]  }
 0xd1d   :  { %13852 = vmatpush3.bf16.msra.mxu0 %v15583_v39  ;;  %13859 = vmatprep.mubr.msk.bf16.mxu0 %vm15654_vm5, %v15653_v60  ;;  %v15634_v39 = vld [vmem:[%s19213_s14 + $0x1b8] sm:$0xff]  }
 0xd1e   :  { %13853 = vmatprep.subr.bf16.mxu0 %v15653_v60 }
 0xd21   :  { %13854 = vmatpush3.bf16.msra.mxu0 %v15584_v10  ;;  %v11573_v10 = vrot.slane %v18891_v63, 5 }
 0xd22   :  { %13855 = vmatprep.subr.bf16.mxu0 %v15653_v60 }
 0xd25   :  { %13856 = vmatpush3.bf16.msra.mxu0 %v15585_v27  ;;  %v15636_v27 = vld [vmem:[%s19213_s14 + $0x1c8] sm:$0xff]  }
 0xd26   :  { %13857 = vmatprep.subr.bf16.mxu0 %v15653_v60 }
 0xd29   :  { %13858 = vmatpush3.bf16.msra.mxu0 %v15586_v2 }
 0xd2a   :  { %13863 = vmatprep.subr.bf16.mxu0 %v15653_v60 }
 0xd2c   :  { %13860 = vmatmul.mubr.msk.bf16.vlgmr.msra.gmra.mrb[136].mxu0 %vm10413_vm4, %v18893_v11  ;;  %v15633_v11 = vld [vmem:[%s19213_s14 + $0x1b0] sm:$0xff]  }
 0xd2d   :  { %13864 = vmatpush3.bf16.msra.mxu0 %v15587_v37  ;;  %13871 = vmatprep.mubr.msk.bf16.mxu0 %vm15654_vm5, %v15653_v60 }
 0xd2e   :  { %13865 = vmatprep.subr.bf16.mxu0 %v15653_v60 }
 0xd31   :  { %13866 = vmatpush3.bf16.msra.mxu0 %v15588_v48 }
 0xd32   :  { %13867 = vmatprep.subr.bf16.mxu0 %v15653_v60 }
 0xd35   :  { %13868 = vmatpush3.bf16.msra.mxu0 %v15589_v58  ;;  %v15637_v58 = vld [vmem:[%s19213_s14 + $0x1d0] sm:$0xff]  }
 0xd36   :  { %13869 = vmatprep.subr.bf16.mxu0 %v15653_v60 }
 0xd39   :  { %13870 = vmatpush3.bf16.msra.mxu0 %v15590_v31 }
 0xd3a   :  { %13875 = vmatprep.subr.bf16.mxu0 %v15653_v60 }
 0xd3c   :  { %13872 = vmatmul.mubr.msk.bf16.vlgmr.msra.gmra.mrb[140].mxu0 %vm10413_vm4, %v10715_v13  ;;  %v15639_v13 = vld [vmem:[%s19213_s14 + $0x1e0] sm:$0xff]  }
 0xd3d   :  { %13876 = vmatpush3.bf16.msra.mxu0 %v15591_v33  ;;  %13883 = vmatprep.mubr.msk.bf16.mxu0 %vm15654_vm5, %v15653_v60  ;;  %v15638_v33 = vld [vmem:[%s19213_s14 + $0x1d8] sm:$0xff]  }
 0xd3e   :  { %13877 = vmatprep.subr.bf16.mxu0 %v15653_v60 }
 0xd41   :  { %13878 = vmatpush3.bf16.msra.mxu0 %v15592_v15  ;;  %v11651_v15 = vrot.slane %v18891_v63, 6 }
 0xd42   :  { %13879 = vmatprep.subr.bf16.mxu0 %v15653_v60 }
 0xd45   :  { %13880 = vmatpush3.bf16.msra.mxu0 %v15593_v49  ;;  %v15640_v49 = vld [vmem:[%s19213_s14 + $0x1e8] sm:$0xff]  }
 0xd46   :  { %13881 = vmatprep.subr.bf16.mxu0 %v15653_v60 }
 0xd49   :  { %13882 = vmatpush3.bf16.msra.mxu0 %v15594_v41 }
 0xd4a   :  { %13887 = vmatprep.subr.bf16.mxu0 %v15653_v60 }
 0xd4c   :  { %13884 = vmatmul.mubr.msk.bf16.vlgmr.msra.gmra.mrb[144].mxu0 %vm10413_vm4, %v10793_v26 }
 0xd4d   :  { %13888 = vmatpush3.bf16.msra.mxu0 %v15595_v51  ;;  %13895 = vmatprep.mubr.msk.bf16.mxu0 %vm15654_vm5, %v15653_v60 }
 0xd4e   :  { %13889 = vmatprep.subr.bf16.mxu0 %v15653_v60 }
 0xd51   :  { %13890 = vmatpush3.bf16.msra.mxu0 %v15596_v24 }
 0xd52   :  { %13891 = vmatprep.subr.bf16.mxu0 %v15653_v60 }
 0xd55   :  { %13892 = vmatpush3.bf16.msra.mxu0 %v15597_v25  ;;  %v15641_v25 = vld [vmem:[%s19213_s14 + $0x1f0] sm:$0xff]  }
 0xd56   :  { %13893 = vmatprep.subr.bf16.mxu0 %v15653_v60 }
 0xd59   :  { %13894 = vmatpush3.bf16.msra.mxu0 %v15598_v16 }
 0xd5a   :  { %13899 = vmatprep.subr.bf16.mxu0 %v15653_v60 }
 0xd5c   :  { %13896 = vmatmul.mubr.msk.bf16.vlgmr.msra.gmra.mrb[148].mxu0 %vm10413_vm4, %v10871_v43  ;;  %v11729_v43 = vrot.slane %v18891_v63, 7 }
 0xd5d   :  { %13900 = vmatpush3.bf16.msra.mxu0 %v15599_v54  ;;  %13907 = vmatprep.mubr.msk.bf16.mxu0 %vm15654_vm5, %v15653_v60  ;;  %v15642_v54 = vld [vmem:[%s19213_s14 + $0x1f8] sm:$0xff]  }
 0xd5e   :  { %13901 = vmatprep.subr.bf16.mxu0 %v15653_v60 }
 0xd61   :  { %13902 = vmatpush3.bf16.msra.mxu0 %v15600_v56 }
 0xd62   :  { %13903 = vmatprep.subr.bf16.mxu0 %v15653_v60 }
 0xd65   :  { %13904 = vmatpush3.bf16.msra.mxu0 %v15601_v5 }
 0xd66   :  { %13905 = vmatprep.subr.bf16.mxu0 %v15653_v60 }
 0xd69   :  { %13906 = vmatpush3.bf16.msra.mxu0 %v15602_v40 }
 0xd6a   :  { %13911 = vmatprep.subr.bf16.mxu0 %v15653_v60 }
 0xd6c   :  { %13908 = vmatmul.mubr.msk.bf16.vlgmr.msra.gmra.mrb[152].mxu0 %vm10413_vm4, %v10949_v20 }
 0xd6d   :  { %13912 = vmatpush3.bf16.msra.mxu0 %v15603_v14  ;;  %13919 = vmatprep.mubr.msk.bf16.mxu0 %vm15654_vm5, %v15653_v60 }
 0xd6e   :  { %13913 = vmatprep.subr.bf16.mxu0 %v15653_v60 }
 0xd71   :  { %13914 = vmatpush3.bf16.msra.mxu0 %v15604_v22 }
 0xd72   :  { %13915 = vmatprep.subr.bf16.mxu0 %v15653_v60 }
 0xd75   :  { %13916 = vmatpush3.bf16.msra.mxu0 %v15605_v47 }
 0xd76   :  { %13917 = vmatprep.subr.bf16.mxu0 %v15653_v60 }
 0xd79   :  { %13918 = vmatpush3.bf16.msra.mxu0 %v15606_v17 }
 0xd7a   :  { %13923 = vmatprep.subr.bf16.mxu0 %v15653_v60 }
 0xd7c   :  { %13920 = vmatmul.mubr.msk.bf16.vlgmr.msra.gmra.mrb[156].mxu0 %vm10413_vm4, %v11027_v50 }
 0xd7d   :  { %13924 = vmatpush3.bf16.msra.mxu0 %v15607_v12  ;;  %13931 = vmatprep.mubr.msk.bf16.mxu0 %vm15654_vm5, %v15653_v60 }
 0xd7e   :  { %13925 = vmatprep.subr.bf16.mxu0 %v15653_v60 }
 0xd81   :  { %13926 = vmatpush3.bf16.msra.mxu0 %v15608_v34 }
 0xd82   :  { %13927 = vmatprep.subr.bf16.mxu0 %v15653_v60 }
 0xd85   :  { %13928 = vmatpush3.bf16.msra.mxu0 %v15609_v57 }
 0xd86   :  { %13929 = vmatprep.subr.bf16.mxu0 %v15653_v60 }
 0xd89   :  { %13930 = vmatpush3.bf16.msra.mxu0 %v15610_v9 }
 0xd8a   :  { %13935 = vmatprep.subr.bf16.mxu0 %v15653_v60 }
 0xd8c   :  { %13932 = vmatmul.mubr.msk.bf16.vlgmr.msra.gmra.mrb[160].mxu0 %vm10413_vm4, %v11105_v62 }
 0xd8d   :  { %13936 = vmatpush3.bf16.msra.mxu0 %v15611_v1  ;;  %13943 = vmatprep.mubr.msk.bf16.mxu0 %vm15654_vm5, %v15653_v60 }
 0xd8e   :  { %13937 = vmatprep.subr.bf16.mxu0 %v15653_v60 }
 0xd91   :  { %13938 = vmatpush3.bf16.msra.mxu0 %v15612_v53 }
 0xd92   :  { %13939 = vmatprep.subr.bf16.mxu0 %v15653_v60 }
 0xd95   :  { %13940 = vmatpush3.bf16.msra.mxu0 %v15613_v29 }
 0xd96   :  { %13941 = vmatprep.subr.bf16.mxu0 %v15653_v60 }
 0xd99   :  { %13942 = vmatpush3.bf16.msra.mxu0 %v15614_v61 }
 0xd9a   :  { %13947 = vmatprep.subr.bf16.mxu0 %v15653_v60 }
 0xd9c   :  { %13944 = vmatmul.mubr.msk.bf16.vlgmr.msra.gmra.mrb[164].mxu0 %vm10413_vm4, %v18891_v63 }
 0xd9d   :  { %13948 = vmatpush3.bf16.msra.mxu0 %v15615_v46  ;;  %13955 = vmatprep.mubr.msk.bf16.mxu0 %vm15654_vm5, %v15653_v60 }
 0xd9e   :  { %13949 = vmatprep.subr.bf16.mxu0 %v15653_v60 }
 0xda1   :  { %13950 = vmatpush3.bf16.msra.mxu0 %v15616_v8 }
 0xda2   :  { %13951 = vmatprep.subr.bf16.mxu0 %v15653_v60 }
 0xda5   :  { %13952 = vmatpush3.bf16.msra.mxu0 %v15617_v6 }
 0xda6   :  { %13953 = vmatprep.subr.bf16.mxu0 %v15653_v60 }
 0xda9   :  { %13954 = vmatpush3.bf16.msra.mxu0 %v15618_v3 }
 0xdaa   :  { %13959 = vmatprep.subr.bf16.mxu0 %v15653_v60 }
 0xdac   :  { %13956 = vmatmul.mubr.msk.bf16.vlgmr.msra.gmra.mrb[168].mxu0 %vm10413_vm4, %v11261_v30  ;;  %v21_v30 = vstv %s19217_s15 }
 0xdad   :  { %13960 = vmatpush3.bf16.msra.mxu0 %v15619_v19  ;;  %13967 = vmatprep.mubr.msk.bf16.mxu0 %vm15654_vm5, %v15653_v60  ;;  %22 = vst [vmem:[#allocation2] sm:$0x1] %v21_v30 }
 0xdae   :  { %13961 = vmatprep.subr.bf16.mxu0 %v15653_v60 }
 0xdb1   :  { %13962 = vmatpush3.bf16.msra.mxu0 %v15620_v21 }
 0xdb2   :  { %13963 = vmatprep.subr.bf16.mxu0 %v15653_v60 }
 0xdb5   :  { %13964 = vmatpush3.bf16.msra.mxu0 %v15621_v18 }
 0xdb6   :  { %13965 = vmatprep.subr.bf16.mxu0 %v15653_v60 }
 0xdb9   :  { %13966 = vmatpush3.bf16.msra.mxu0 %v15622_v45 }
 0xdba   :  { %13971 = vmatprep.subr.bf16.mxu0 %v15653_v60 }
 0xdbc   :  { %13968 = vmatmul.mubr.msk.bf16.vlgmr.msra.gmra.mrb[172].mxu0 %vm10413_vm4, %v11339_v23 }
 0xdbd   :  { %13972 = vmatpush3.bf16.msra.mxu0 %v15623_v38  ;;  %13979 = vmatprep.mubr.msk.bf16.mxu0 %vm15654_vm5, %v15653_v60 }
 0xdbe   :  { %13973 = vmatprep.subr.bf16.mxu0 %v15653_v60 }
 0xdc1   :  { %13974 = vmatpush3.bf16.msra.mxu0 %v15624_v4 }
 0xdc2   :  { %13975 = vmatprep.subr.bf16.mxu0 %v15653_v60 }
 0xdc5   :  { %13976 = vmatpush3.bf16.msra.mxu0 %v15625_v7 }
 0xdc6   :  { %13977 = vmatprep.subr.bf16.mxu0 %v15653_v60 }
 0xdc9   :  { %13978 = vmatpush3.bf16.msra.mxu0 %v15626_v28 }
 0xdca   :  { %13983 = vmatprep.subr.bf16.mxu0 %v15653_v60 }
 0xdcc   :  { %13980 = vmatmul.mubr.msk.bf16.vlgmr.msra.gmra.mrb[176].mxu0 %vm10413_vm4, %v11417_v55 }
 0xdcd   :  { %13984 = vmatpush3.bf16.msra.mxu0 %v15627_v44  ;;  %13991 = vmatprep.mubr.msk.bf16.mxu0 %vm15654_vm5, %v15653_v60 }
 0xdce   :  { %13985 = vmatprep.subr.bf16.mxu0 %v15653_v60 }
 0xdd1   :  { %13986 = vmatpush3.bf16.msra.mxu0 %v15628_v35 }
 0xdd2   :  { %13987 = vmatprep.subr.bf16.mxu0 %v15653_v60 }
 0xdd5   :  { %13988 = vmatpush3.bf16.msra.mxu0 %v15629_v0 }
 0xdd6   :  { %13989 = vmatprep.subr.bf16.mxu0 %v15653_v60 }
 0xdd9   :  { %13990 = vmatpush3.bf16.msra.mxu0 %v15630_v36 }
 0xdda   :  { %13995 = vmatprep.subr.bf16.mxu0 %v15653_v60 }
 0xddc   :  { %13992 = vmatmul.mubr.msk.bf16.vlgmr.msra.gmra.mrb[180].mxu0 %vm10413_vm4, %v11495_v52 }
 0xddd   :  { %13996 = vmatpush3.bf16.msra.mxu0 %v15631_v42  ;;  %14003 = vmatprep.mubr.msk.bf16.mxu0 %vm15654_vm5, %v15653_v60 }
 0xdde   :  { %13997 = vmatprep.subr.bf16.mxu0 %v15653_v60 }
 0xde1   :  { %13998 = vmatpush3.bf16.msra.mxu0 %v15632_v59 }
 0xde2   :  { %13999 = vmatprep.subr.bf16.mxu0 %v15653_v60 }
 0xde5   :  { %14000 = vmatpush3.bf16.msra.mxu0 %v15633_v11 }
 0xde6   :  { %14001 = vmatprep.subr.bf16.mxu0 %v15653_v60 }
 0xde9   :  { %14002 = vmatpush3.bf16.msra.mxu0 %v15634_v39 }
 0xdea   :  { %14007 = vmatprep.subr.bf16.mxu0 %v15653_v60 }
 0xdec   :  { %14004 = vmatmul.mubr.msk.bf16.vlgmr.msra.gmra.mrb[184].mxu0 %vm10413_vm4, %v11573_v10 }
 0xded   :  { %14008 = vmatpush3.bf16.msra.mxu0 %v15635_v32  ;;  %14015 = vmatprep.mubr.msk.bf16.mxu0 %vm15654_vm5, %v15653_v60 }
 0xdee   :  { %14009 = vmatprep.subr.bf16.mxu0 %v15653_v60 }
 0xdef   :  { %v10633_v2 = vpop.f32.mrb[132].mxu0 }
 0xdf0   :  { %v13849_v37 = vpop.f32.mrb[133].mxu0 }
 0xdf1   :  { %14010 = vmatpush3.bf16.msra.mxu0 %v15636_v27  ;;  %v10636_v48 = vpop.f32.mrb[134].mxu0 }
 0xdf2   :  { %v13850_v31 = vpop.f32.mrb[135].mxu0  ;;  %14011 = vmatprep.subr.bf16.mxu0 %v15653_v60 }
 0xdf5   :  { %14012 = vmatpush3.bf16.msra.mxu0 %v15637_v58 }
 0xdf6   :  { %14013 = vmatprep.subr.bf16.mxu0 %v15653_v60 }
 0xdf9   :  { %14014 = vmatpush3.bf16.msra.mxu0 %v15638_v33 }
 0xdfa   :  { %14019 = vmatprep.subr.bf16.mxu0 %v15653_v60 }
 0xdfc   :  { %14016 = vmatmul.mubr.msk.bf16.vlgmr.msra.gmra.mrb[188].mxu0 %vm10413_vm4, %v11651_v15 }
 0xdfd   :  { %14020 = vmatpush3.bf16.msra.mxu0 %v15639_v13  ;;  %14027 = vmatprep.mubr.msk.bf16.mxu0 %vm15654_vm5, %v15653_v60 }
 0xdfe   :  { %14021 = vmatprep.subr.bf16.mxu0 %v15653_v60 }
 0xdff   :  { %v10700_v41 = vpop.f32.mrb[136].mxu0 }
 0xe00   :  { %v10701_v51 = vadd.f32 %v10700_v41, %v10633_v2  ;;  %v13861_v26 = vpop.f32.mrb[137].mxu0 }
 0xe01   :  { %v10703_v24 = vpop.f32.mrb[138].mxu0  ;;  %14022 = vmatpush3.bf16.msra.mxu0 %v15640_v49 }
 0xe02   :  { %v13862_v16 = vpop.f32.mrb[139].mxu0  ;;  %14023 = vmatprep.subr.bf16.mxu0 %v15653_v60 }
 0xe05   :  { %14024 = vmatpush3.bf16.msra.mxu0 %v15641_v25 }
 0xe06   :  { %14025 = vmatprep.subr.bf16.mxu0 %v15653_v60 }
 0xe09   :  { %14026 = vmatpush3.bf16.msra.mxu0 %v15642_v54 }
 0xe0c   :  { %14028 = vmatmul.mubr.msk.bf16.vlgmr.msra.gmra.mrb[192].mxu0 %vm10413_vm4, %v11729_v43 }
 0xe0f   :  { %v10777_v56 = vpop.f32.mrb[140].mxu0 }
 0xe10   :  { %v10783_v5 = vadd.f32 %v10777_v56, %v10701_v51  ;;  %v13873_v40 = vpop.f32.mrb[141].mxu0 }
 0xe11   :  { %v10780_v14 = vpop.f32.mrb[142].mxu0 }
 0xe12   :  { %v13874_v20 = vpop.f32.mrb[143].mxu0  ;;  %v12903_v14 = vld [vmem:[#allocation2] ss:$0 sm:$0xff] }
 0xe1f   :  { %v10855_v22 = vpop.f32.mrb[144].mxu0 }
 0xe20   :  { %v10861_v47 = vadd.f32 %v10855_v22, %v10783_v5  ;;  %v13885_v17 = vpop.f32.mrb[145].mxu0 }
 0xe21   :  { %v10858_v12 = vpop.f32.mrb[146].mxu0 }
 0xe22   :  { %v13886_v50 = vpop.f32.mrb[147].mxu0 }
 0xe2f   :  { %v10933_v34 = vpop.f32.mrb[148].mxu0 }
 0xe30   :  { %v10939_v57 = vadd.f32 %v10933_v34, %v10861_v47  ;;  %v13897_v9 = vpop.f32.mrb[149].mxu0 }
 0xe31   :  { %v10936_v1 = vpop.f32.mrb[150].mxu0 }
 0xe32   :  { %v13898_v60 = vpop.f32.mrb[151].mxu0 }
 0xe3f   :  { %v11011_v62 = vpop.f32.mrb[152].mxu0 }
 0xe40   :  { %v11017_v53 = vadd.f32 %v11011_v62, %v10939_v57  ;;  %v13909_v63 = vpop.f32.mrb[153].mxu0 }
 0xe41   :  { %v11014_v29 = vpop.f32.mrb[154].mxu0 }
 0xe42   :  { %v13910_v61 = vpop.f32.mrb[155].mxu0 }
 0xe4f   :  { %v11089_v46 = vpop.f32.mrb[156].mxu0 }
 0xe50   :  { %v11095_v8 = vadd.f32 %v11089_v46, %v11017_v53  ;;  %v13921_v6 = vpop.f32.mrb[157].mxu0 }
 0xe51   :  { %v11092_v3 = vpop.f32.mrb[158].mxu0 }
 0xe52   :  { %v13922_v19 = vpop.f32.mrb[159].mxu0 }
 0xe5f   :  { %v11167_v21 = vpop.f32.mrb[160].mxu0 }
 0xe60   :  { %v11173_v18 = vadd.f32 %v11167_v21, %v11095_v8  ;;  %v13933_v45 = vpop.f32.mrb[161].mxu0 }
 0xe61   :  { %v11170_v38 = vpop.f32.mrb[162].mxu0 }
 0xe62   :  { %v13934_v23 = vpop.f32.mrb[163].mxu0 }
 0xe6f   :  { %v11244_v4 = vpop.f32.mrb[164].mxu0 }
 0xe70   :  { %v11250_v7 = vadd.f32 %v11244_v4, %v11173_v18  ;;  %v13945_v28 = vpop.f32.mrb[165].mxu0 }
 0xe71   :  { %v11247_v44 = vpop.f32.mrb[166].mxu0 }
 0xe72   :  { %v13946_v55 = vpop.f32.mrb[167].mxu0 }
 0xe7f   :  { %v11323_v35 = vpop.f32.mrb[168].mxu0 }
 0xe80   :  { %v11329_v0 = vadd.f32 %v11323_v35, %v11250_v7  ;;  %v13957_v36 = vpop.f32.mrb[169].mxu0 }
 0xe81   :  { %v11326_v42 = vpop.f32.mrb[170].mxu0 }
 0xe82   :  { %v13958_v52 = vpop.f32.mrb[171].mxu0 }
 0xe8f   :  { %v11401_v59 = vpop.f32.mrb[172].mxu0 }
 0xe90   :  { %v11407_v11 = vadd.f32 %v11401_v59, %v11329_v0  ;;  %v13969_v39 = vpop.f32.mrb[173].mxu0 }
 0xe91   :  { %v11404_v32 = vpop.f32.mrb[174].mxu0 }
 0xe92   :  { %v13970_v10 = vpop.f32.mrb[175].mxu0 }
 0xe9f   :  { %v11479_v27 = vpop.f32.mrb[176].mxu0 }
 0xea0   :  { %v11485_v2 = vadd.f32 %v11479_v27, %v11407_v11  ;;  %v13981_v37 = vpop.f32.mrb[177].mxu0 }
 0xea1   :  { %v11482_v48 = vpop.f32.mrb[178].mxu0 }
 0xea2   :  { %v13982_v58 = vpop.f32.mrb[179].mxu0 }
 0xeaf   :  { %v11557_v31 = vpop.f32.mrb[180].mxu0 }
 0xeb0   :  { %v11563_v33 = vadd.f32 %v11557_v31, %v11485_v2  ;;  %v13993_v13 = vpop.f32.mrb[181].mxu0 }
 0xeb1   :  { %v11560_v15 = vpop.f32.mrb[182].mxu0 }
 0xeb2   :  { %v13994_v49 = vpop.f32.mrb[183].mxu0 }
 0xebf   :  { %v11635_v41 = vpop.f32.mrb[184].mxu0 }
 0xec0   :  { %v11641_v51 = vadd.f32 %v11635_v41, %v11563_v33  ;;  %v14005_v26 = vpop.f32.mrb[185].mxu0 }
 0xec1   :  { %v11638_v24 = vpop.f32.mrb[186].mxu0 }
 0xec2   :  { %v14006_v25 = vpop.f32.mrb[187].mxu0 }
 0xecf   :  { %v11713_v16 = vpop.f32.mrb[188].mxu0 }
 0xed0   :  { %v11719_v54 = vadd.f32 %v11713_v16, %v11641_v51  ;;  %v14017_v43 = vpop.f32.mrb[189].mxu0 }
 0xed1   :  { %v11716_v56 = vpop.f32.mrb[190].mxu0 }
 0xed2   :  { %v14018_v5 = vpop.f32.mrb[191].mxu0 }
 0xedf   :  { %v11791_v40 = vpop.f32.mrb[192].mxu0 }
 0xee0   :  { %v11797_v20 = vadd.f32 %v11791_v40, %v11719_v54  ;;  %v14029_v22 = vpop.f32.mrb[193].mxu0 }
 0xee1   :  { %v11794_v47 = vpop.f32.mrb[194].mxu0 }
 0xee2   :  { %v11805_v17 = vadd.f32 %v12903_v14, %v11797_v20  ;;  %v14030_v12 = vpop.f32.mrb[195].mxu0 }
 0xee4   :  { %v11806_v50 = vsub.f32 0.0, %v11805_v17 }
 0xee6   :  { %v11807_v34 = vmul.f32 1.442695, %v11806_v50 }
 0xee8   :  { %15647 = vpow2.f32 %v11807_v34 }
 0xef2   :  { %v15648_v57 = vpop.eup %15647 }
 0xef3   :  { %v11809_v9 = vadd.f32 1.0, %v15648_v57 }
 0xef5   :  { %15649 = vrcp.f32 %v11809_v9 }
 0xeff   :  { %v15650_v1 = vpop.eup %15649 }
 0xf00   :  { %11813 = vst.msk [vmem:[%s19218_s16] sm:$0x3] %vm11812_vm6, %v15650_v1 }

</bundles_post_ra>
